<compile_context>
chip_gen: v6e
topology: v6e:2x2x1
jax: 0.10.0
libtpu: 0.0.40
codegen_flags: <defaults>
</compile_context>

<pallas_src>
import functools

import jax
import jax.numpy as jnp
from jax import lax
from jax.experimental import pallas as pl
from jax.experimental.pallas import tpu as pltpu

_K = 3        # ker_size
_PAD = 1      # padd_size
_EPS = 1e-5   # BatchNorm eps
# (Cin, Cout, followed_by_bn_lrelu) for head, 3 body blocks, tail.
_LAYER_CFG = [(4, 32, True), (32, 16, True), (16, 8, True), (8, 8, True), (8, 8, False)]


# ----------------------------------------------------------------------------- kernel
def _fused_net_kernel(yy_ref, xx_ref, x_ref,
                      w0_ref, g0_ref, be0_ref,
                      w1_ref, g1_ref, be1_ref,
                      w2_ref, g2_ref, be2_ref,
                      w3_ref, g3_ref, be3_ref,
                      w4_ref, b4_ref,
                      o_ref,
                      *, H, W, NHW):
    """Whole WDiscriminatorMulti forward in one kernel invocation.

    Everything lives in a lane-dense (C, N*H*W) layout (pixels on lanes, channels on
    sublanes).  A 3x3 'same' conv is 9 per-tap matmuls on circularly-shifted,
    border-masked activations, so no padded scratch buffers are needed.
    """
    yy = yy_ref[...]                      # (1, NHW) int32: row index of every pixel
    xx = xx_ref[...]                      # (1, NHW) int32: col index of every pixel

    # Border-validity masks for the 8 off-centre taps; shared by every layer.
    masks = {}
    for kh in range(_K):
        for kw in range(_K):
            dy, dx = kh - _PAD, kw - _PAD
            if dy == 0 and dx == 0:
                continue
            ok_y = jnp.logical_and(yy + dy >= 0, yy + dy < H)
            ok_x = jnp.logical_and(xx + dx >= 0, xx + dx < W)
            masks[(dy, dx)] = jnp.logical_and(ok_y, ok_x)      # (1, NHW) bool

    def conv(act, cout, w_ref):
        """3x3 'same' conv: 9 shifted-tap bf16 matmuls, f32 accumulator (cout, NHW)."""
        acc = jnp.zeros((cout, NHW), jnp.float32)
        for kh in range(_K):
            for kw in range(_K):
                dy, dx = kh - _PAD, kw - _PAD
                s = (dy * W + dx) % NHW
                if s == 0:
                    tap = act
                else:
                    # Circular lane shift: tap[:, i] = act[:, (i + dy*W + dx) % NHW].
                    # Wrapped / out-of-image positions are zeroed by the border mask.
                    tap = jnp.concatenate([act[:, s:], act[:, :s]], axis=1)
                    tap = jnp.where(masks[(dy, dx)], tap, 0.0)
                acc = acc + jnp.dot(w_ref[kh * _K + kw],        # (cout, cin) bf16
                                    tap.astype(jnp.bfloat16),
                                    preferred_element_type=jnp.float32)
        return acc

    act = x_ref[...].astype(jnp.float32)                        # (4, NHW)
    inv_n = jnp.float32(1.0 / NHW)
    bn_layers = ((w0_ref, g0_ref, be0_ref),
                 (w1_ref, g1_ref, be1_ref),
                 (w2_ref, g2_ref, be2_ref),
                 (w3_ref, g3_ref, be3_ref))
    for li, (w_ref, g_ref, be_ref) in enumerate(bn_layers):
        _, cout, _ = _LAYER_CFG[li]
        acc = conv(act, cout, w_ref)                            # (cout, NHW) f32
        # Training-mode BatchNorm, fused single pass (conv bias omitted: batch
        # statistics cancel a per-channel additive bias exactly).
        s1 = jnp.sum(acc, axis=1, keepdims=True)                # (cout, 1)
        s2 = jnp.sum(acc * acc, axis=1, keepdims=True)
        mean = s1 * inv_n
        var = jnp.maximum(s2 * inv_n - mean * mean, 0.0)        # biased variance
        scale = g_ref[...] * lax.rsqrt(var + _EPS)
        shift = be_ref[...] - mean * scale
        y = acc * scale + shift
        act = jnp.where(y >= 0, y, 0.2 * y)                     # LeakyReLU(0.2)

    # Tail: plain conv + bias (no BN / activation), lane-dense output store.
    _, cout, _ = _LAYER_CFG[4]
    o_ref[...] = conv(act, cout, w4_ref) + b4_ref[...]


def _full_spec(shape):
    # Whole-array block (block == full array dims satisfies the (8,128) rule).
    return pl.BlockSpec(shape, lambda *_: (0,) * len(shape))


def wdiscriminator_multi_pallas(x_nchw, params):
    """Forward pass; input/output are NCHW to match the PyTorch module."""
    N, C0, H, W = x_nchw.shape
    NHW = N * H * W

    # NCHW -> lane-dense (C, N*H*W): channels on sublanes, pixels on lanes (bf16 operand).
    x = jnp.transpose(x_nchw, (1, 0, 2, 3)).reshape(C0, NHW).astype(jnp.bfloat16)

    # Pixel row/col indices (int32) for the in-kernel conv border masks
    # (computed here so the kernel never needs vector integer div/mod).
    pix = jnp.arange(NHW, dtype=jnp.int32)
    yy = ((pix // W) % H).reshape(1, NHW)
    xx = (pix % W).reshape(1, NHW)

    flat_inputs = [yy, xx, x]
    flops = 0
    transcendentals = 0
    for li, (w, b, gamma, beta, has_bn) in enumerate(params):
        cin, cout, _ = _LAYER_CFG[li]
        # HWIO -> (9, cout, cin): tap-major, each tap a ready-made matmul LHS (bf16).
        flat_inputs.append(
            jnp.transpose(w, (0, 1, 3, 2)).reshape(_K * _K, cout, cin).astype(jnp.bfloat16))
        if has_bn:
            flat_inputs.append(gamma.reshape(cout, 1).astype(jnp.float32))
            flat_inputs.append(beta.reshape(cout, 1).astype(jnp.float32))
            transcendentals += cout                              # rsqrt per channel
        else:
            flat_inputs.append(b.reshape(cout, 1).astype(jnp.float32))
        flops += 2 * NHW * _K * _K * cin * cout

    out_c = _LAYER_CFG[-1][1]
    bytes_accessed = sum(int(a.size) * a.dtype.itemsize for a in flat_inputs) \
        + NHW * out_c * 4

    # Generous bound on live activation values (may spill to compiler-managed VMEM).
    act_bytes = 6 * NHW * max(c for _, c, _ in _LAYER_CFG) * 4
    vmem_limit = int(min(64 * 2**20, max(16 * 2**20, 2 * (bytes_accessed + act_bytes))))

    # TODO(synk): for real SinGAN resolutions add a spatial grid over N*H with two-pass
    # BatchNorm statistics so the working set fits v7x's 64 MiB VMEM and the grid axis
    # can be marked "parallel" for its two TensorCores; toy sizes run fully fused.
    kernel = functools.partial(_fused_net_kernel, H=H, W=W, NHW=NHW)
    out = pl.pallas_call(
        kernel,
        out_shape=jax.ShapeDtypeStruct((out_c, NHW), jnp.float32),
        in_specs=[_full_spec(a.shape) for a in flat_inputs],
        out_specs=_full_spec((out_c, NHW)),
        compiler_params=pltpu.CompilerParams(vmem_limit_bytes=vmem_limit),
        cost_estimate=pl.CostEstimate(flops=flops, transcendentals=transcendentals,
                                      bytes_accessed=bytes_accessed),
    )(*flat_inputs)

    # Lane-dense (out_c, N*H*W) -> NCHW (cheap wrapper-side relayout).
    return jnp.transpose(out.reshape(out_c, N, H, W), (1, 0, 2, 3))


# ------------------------------------------------------------------- params + reference
def init_params(key):
    params = []
    for (cin, cout, has_bn) in _LAYER_CFG:
        key, k1, k2, k3, k4 = jax.random.split(key, 5)
        w = 0.05 * jax.random.normal(k1, (3, 3, cin, cout), jnp.float32)   # HWIO
        b = 0.01 * jax.random.normal(k2, (cout,), jnp.float32)
        if has_bn:
            gamma = 1.0 + 0.1 * jax.random.normal(k3, (cout,), jnp.float32)
            beta = 0.1 * jax.random.normal(k4, (cout,), jnp.float32)
        else:  # tail: plain conv, BN params unused (identity placeholders)
            gamma = jnp.ones((cout,), jnp.float32)
            beta = jnp.zeros((cout,), jnp.float32)
        params.append((w, b, gamma, beta, has_bn))
    return params


def wdiscriminator_multi_ref(x_nchw, params):
    """Pure-JAX reference (f32 lax.conv, bias included everywhere, like PyTorch)."""
    x = jnp.transpose(x_nchw, (0, 2, 3, 1)).astype(jnp.float32)
    for (w, b, gamma, beta, has_bn) in params:
        y = lax.conv_general_dilated(x, w, window_strides=(1, 1), padding="SAME",
                                     dimension_numbers=("NHWC", "HWIO", "NHWC"))
        y = y + b.reshape(1, 1, 1, -1)
        if has_bn:
            mean = jnp.mean(y, axis=(0, 1, 2), keepdims=True)
            var = jnp.mean(jnp.square(y - mean), axis=(0, 1, 2), keepdims=True)
            y = (y - mean) * (gamma.reshape(1, 1, 1, -1) * lax.rsqrt(var + _EPS)) \
                + beta.reshape(1, 1, 1, -1)
            y = jnp.where(y >= 0, y, 0.2 * y)
        x = y
    return jnp.transpose(x, (0, 3, 1, 2))


# ----------------------------------------------------------------------------- driver
if __name__ == "__main__":
    key = jax.random.PRNGKey(0)
    key, kx = jax.random.split(key)
    x = jax.random.normal(kx, (2, 4, 16, 16), jnp.float32)             # NCHW input
    params = init_params(key)

    out = wdiscriminator_multi_pallas(x, params)
    out = jax.block_until_ready(out)
    assert out.shape == (2, 8, 16, 16), out.shape                      # num_transforms+1 = 8

    ref = jax.block_until_ready(wdiscriminator_multi_ref(x, params))
    max_err = float(jnp.max(jnp.abs(out - ref)))
    scale = float(jnp.max(jnp.abs(ref))) + 1.0
    # bf16 matmul operands (f32 accumulate) vs. the pure-f32 reference: allow a slightly
    # looser bound than exact-f32; real bugs produce O(1) errors and would still trip this.
    assert max_err < 2e-2 * scale, f"mismatch vs reference: {max_err}"

    print("KERNEL_OK")
</pallas_src>

<mosaic_0001>
module attributes {stable_mosaic.version = 11 : i64} {
  func.func @_fused_net_kernel(%arg0: memref<1x512xi32, #tpu.memory_space<vmem>>, %arg1: memref<1x512xi32, #tpu.memory_space<vmem>>, %arg2: memref<4x512xbf16, #tpu.memory_space<vmem>>, %arg3: memref<9x32x4xbf16, #tpu.memory_space<vmem>>, %arg4: memref<32x1xf32, #tpu.memory_space<vmem>>, %arg5: memref<32x1xf32, #tpu.memory_space<vmem>>, %arg6: memref<9x16x32xbf16, #tpu.memory_space<vmem>>, %arg7: memref<16x1xf32, #tpu.memory_space<vmem>>, %arg8: memref<16x1xf32, #tpu.memory_space<vmem>>, %arg9: memref<9x8x16xbf16, #tpu.memory_space<vmem>>, %arg10: memref<8x1xf32, #tpu.memory_space<vmem>>, %arg11: memref<8x1xf32, #tpu.memory_space<vmem>>, %arg12: memref<9x8x8xbf16, #tpu.memory_space<vmem>>, %arg13: memref<8x1xf32, #tpu.memory_space<vmem>>, %arg14: memref<8x1xf32, #tpu.memory_space<vmem>>, %arg15: memref<9x8x8xbf16, #tpu.memory_space<vmem>>, %arg16: memref<8x1xf32, #tpu.memory_space<vmem>>, %arg17: memref<8x512xf32, #tpu.memory_space<vmem>>) attributes {dimension_semantics = [], scalar_prefetch = 0 : i64, scratch_operands = 0 : i64, tpu.core_type = #tpu.core_type<tc>} {
    %c0 = arith.constant 0 : index
    %c0_0 = arith.constant 0 : index
    %0 = vector.load %arg0[%c0, %c0_0] : memref<1x512xi32, #tpu.memory_space<vmem>>, vector<1x512xi32>
    %c0_1 = arith.constant 0 : index
    %c0_2 = arith.constant 0 : index
    %1 = vector.load %arg1[%c0_1, %c0_2] : memref<1x512xi32, #tpu.memory_space<vmem>>, vector<1x512xi32>
    %c-1_i32 = arith.constant -1 : i32
    %2 = vector.broadcast %c-1_i32 : i32 to vector<1x512xi32>
    %3 = arith.addi %0, %2 : vector<1x512xi32>
    %c0_i32 = arith.constant 0 : i32
    %4 = vector.broadcast %c0_i32 : i32 to vector<1x512xi32>
    %5 = arith.cmpi sge, %3, %4 : vector<1x512xi32>
    %c-1_i32_3 = arith.constant -1 : i32
    %6 = vector.broadcast %c-1_i32_3 : i32 to vector<1x512xi32>
    %7 = arith.addi %0, %6 : vector<1x512xi32>
    %c16_i32 = arith.constant 16 : i32
    %8 = vector.broadcast %c16_i32 : i32 to vector<1x512xi32>
    %9 = arith.cmpi slt, %7, %8 : vector<1x512xi32>
    %10 = arith.andi %5, %9 : vector<1x512xi1>
    %c-1_i32_4 = arith.constant -1 : i32
    %11 = vector.broadcast %c-1_i32_4 : i32 to vector<1x512xi32>
    %12 = arith.addi %1, %11 : vector<1x512xi32>
    %c0_i32_5 = arith.constant 0 : i32
    %13 = vector.broadcast %c0_i32_5 : i32 to vector<1x512xi32>
    %14 = arith.cmpi sge, %12, %13 : vector<1x512xi32>
    %c-1_i32_6 = arith.constant -1 : i32
    %15 = vector.broadcast %c-1_i32_6 : i32 to vector<1x512xi32>
    %16 = arith.addi %1, %15 : vector<1x512xi32>
    %c16_i32_7 = arith.constant 16 : i32
    %17 = vector.broadcast %c16_i32_7 : i32 to vector<1x512xi32>
    %18 = arith.cmpi slt, %16, %17 : vector<1x512xi32>
    %19 = arith.andi %14, %18 : vector<1x512xi1>
    %20 = arith.andi %10, %19 : vector<1x512xi1>
    %c-1_i32_8 = arith.constant -1 : i32
    %21 = vector.broadcast %c-1_i32_8 : i32 to vector<1x512xi32>
    %22 = arith.addi %0, %21 : vector<1x512xi32>
    %c0_i32_9 = arith.constant 0 : i32
    %23 = vector.broadcast %c0_i32_9 : i32 to vector<1x512xi32>
    %24 = arith.cmpi sge, %22, %23 : vector<1x512xi32>
    %c-1_i32_10 = arith.constant -1 : i32
    %25 = vector.broadcast %c-1_i32_10 : i32 to vector<1x512xi32>
    %26 = arith.addi %0, %25 : vector<1x512xi32>
    %c16_i32_11 = arith.constant 16 : i32
    %27 = vector.broadcast %c16_i32_11 : i32 to vector<1x512xi32>
    %28 = arith.cmpi slt, %26, %27 : vector<1x512xi32>
    %29 = arith.andi %24, %28 : vector<1x512xi1>
    %c0_i32_12 = arith.constant 0 : i32
    %30 = vector.broadcast %c0_i32_12 : i32 to vector<1x512xi32>
    %31 = arith.addi %1, %30 : vector<1x512xi32>
    %c0_i32_13 = arith.constant 0 : i32
    %32 = vector.broadcast %c0_i32_13 : i32 to vector<1x512xi32>
    %33 = arith.cmpi sge, %31, %32 : vector<1x512xi32>
    %c0_i32_14 = arith.constant 0 : i32
    %34 = vector.broadcast %c0_i32_14 : i32 to vector<1x512xi32>
    %35 = arith.addi %1, %34 : vector<1x512xi32>
    %c16_i32_15 = arith.constant 16 : i32
    %36 = vector.broadcast %c16_i32_15 : i32 to vector<1x512xi32>
    %37 = arith.cmpi slt, %35, %36 : vector<1x512xi32>
    %38 = arith.andi %33, %37 : vector<1x512xi1>
    %39 = arith.andi %29, %38 : vector<1x512xi1>
    %c-1_i32_16 = arith.constant -1 : i32
    %40 = vector.broadcast %c-1_i32_16 : i32 to vector<1x512xi32>
    %41 = arith.addi %0, %40 : vector<1x512xi32>
    %c0_i32_17 = arith.constant 0 : i32
    %42 = vector.broadcast %c0_i32_17 : i32 to vector<1x512xi32>
    %43 = arith.cmpi sge, %41, %42 : vector<1x512xi32>
    %c-1_i32_18 = arith.constant -1 : i32
    %44 = vector.broadcast %c-1_i32_18 : i32 to vector<1x512xi32>
    %45 = arith.addi %0, %44 : vector<1x512xi32>
    %c16_i32_19 = arith.constant 16 : i32
    %46 = vector.broadcast %c16_i32_19 : i32 to vector<1x512xi32>
    %47 = arith.cmpi slt, %45, %46 : vector<1x512xi32>
    %48 = arith.andi %43, %47 : vector<1x512xi1>
    %c1_i32 = arith.constant 1 : i32
    %49 = vector.broadcast %c1_i32 : i32 to vector<1x512xi32>
    %50 = arith.addi %1, %49 : vector<1x512xi32>
    %c0_i32_20 = arith.constant 0 : i32
    %51 = vector.broadcast %c0_i32_20 : i32 to vector<1x512xi32>
    %52 = arith.cmpi sge, %50, %51 : vector<1x512xi32>
    %c1_i32_21 = arith.constant 1 : i32
    %53 = vector.broadcast %c1_i32_21 : i32 to vector<1x512xi32>
    %54 = arith.addi %1, %53 : vector<1x512xi32>
    %c16_i32_22 = arith.constant 16 : i32
    %55 = vector.broadcast %c16_i32_22 : i32 to vector<1x512xi32>
    %56 = arith.cmpi slt, %54, %55 : vector<1x512xi32>
    %57 = arith.andi %52, %56 : vector<1x512xi1>
    %58 = arith.andi %48, %57 : vector<1x512xi1>
    %c0_i32_23 = arith.constant 0 : i32
    %59 = vector.broadcast %c0_i32_23 : i32 to vector<1x512xi32>
    %60 = arith.addi %0, %59 : vector<1x512xi32>
    %c0_i32_24 = arith.constant 0 : i32
    %61 = vector.broadcast %c0_i32_24 : i32 to vector<1x512xi32>
    %62 = arith.cmpi sge, %60, %61 : vector<1x512xi32>
    %c0_i32_25 = arith.constant 0 : i32
    %63 = vector.broadcast %c0_i32_25 : i32 to vector<1x512xi32>
    %64 = arith.addi %0, %63 : vector<1x512xi32>
    %c16_i32_26 = arith.constant 16 : i32
    %65 = vector.broadcast %c16_i32_26 : i32 to vector<1x512xi32>
    %66 = arith.cmpi slt, %64, %65 : vector<1x512xi32>
    %67 = arith.andi %62, %66 : vector<1x512xi1>
    %c-1_i32_27 = arith.constant -1 : i32
    %68 = vector.broadcast %c-1_i32_27 : i32 to vector<1x512xi32>
    %69 = arith.addi %1, %68 : vector<1x512xi32>
    %c0_i32_28 = arith.constant 0 : i32
    %70 = vector.broadcast %c0_i32_28 : i32 to vector<1x512xi32>
    %71 = arith.cmpi sge, %69, %70 : vector<1x512xi32>
    %c-1_i32_29 = arith.constant -1 : i32
    %72 = vector.broadcast %c-1_i32_29 : i32 to vector<1x512xi32>
    %73 = arith.addi %1, %72 : vector<1x512xi32>
    %c16_i32_30 = arith.constant 16 : i32
    %74 = vector.broadcast %c16_i32_30 : i32 to vector<1x512xi32>
    %75 = arith.cmpi slt, %73, %74 : vector<1x512xi32>
    %76 = arith.andi %71, %75 : vector<1x512xi1>
    %77 = arith.andi %67, %76 : vector<1x512xi1>
    %c0_i32_31 = arith.constant 0 : i32
    %78 = vector.broadcast %c0_i32_31 : i32 to vector<1x512xi32>
    %79 = arith.addi %0, %78 : vector<1x512xi32>
    %c0_i32_32 = arith.constant 0 : i32
    %80 = vector.broadcast %c0_i32_32 : i32 to vector<1x512xi32>
    %81 = arith.cmpi sge, %79, %80 : vector<1x512xi32>
    %c0_i32_33 = arith.constant 0 : i32
    %82 = vector.broadcast %c0_i32_33 : i32 to vector<1x512xi32>
    %83 = arith.addi %0, %82 : vector<1x512xi32>
    %c16_i32_34 = arith.constant 16 : i32
    %84 = vector.broadcast %c16_i32_34 : i32 to vector<1x512xi32>
    %85 = arith.cmpi slt, %83, %84 : vector<1x512xi32>
    %86 = arith.andi %81, %85 : vector<1x512xi1>
    %c1_i32_35 = arith.constant 1 : i32
    %87 = vector.broadcast %c1_i32_35 : i32 to vector<1x512xi32>
    %88 = arith.addi %1, %87 : vector<1x512xi32>
    %c0_i32_36 = arith.constant 0 : i32
    %89 = vector.broadcast %c0_i32_36 : i32 to vector<1x512xi32>
    %90 = arith.cmpi sge, %88, %89 : vector<1x512xi32>
    %c1_i32_37 = arith.constant 1 : i32
    %91 = vector.broadcast %c1_i32_37 : i32 to vector<1x512xi32>
    %92 = arith.addi %1, %91 : vector<1x512xi32>
    %c16_i32_38 = arith.constant 16 : i32
    %93 = vector.broadcast %c16_i32_38 : i32 to vector<1x512xi32>
    %94 = arith.cmpi slt, %92, %93 : vector<1x512xi32>
    %95 = arith.andi %90, %94 : vector<1x512xi1>
    %96 = arith.andi %86, %95 : vector<1x512xi1>
    %c1_i32_39 = arith.constant 1 : i32
    %97 = vector.broadcast %c1_i32_39 : i32 to vector<1x512xi32>
    %98 = arith.addi %0, %97 : vector<1x512xi32>
    %c0_i32_40 = arith.constant 0 : i32
    %99 = vector.broadcast %c0_i32_40 : i32 to vector<1x512xi32>
    %100 = arith.cmpi sge, %98, %99 : vector<1x512xi32>
    %c1_i32_41 = arith.constant 1 : i32
    %101 = vector.broadcast %c1_i32_41 : i32 to vector<1x512xi32>
    %102 = arith.addi %0, %101 : vector<1x512xi32>
    %c16_i32_42 = arith.constant 16 : i32
    %103 = vector.broadcast %c16_i32_42 : i32 to vector<1x512xi32>
    %104 = arith.cmpi slt, %102, %103 : vector<1x512xi32>
    %105 = arith.andi %100, %104 : vector<1x512xi1>
    %c-1_i32_43 = arith.constant -1 : i32
    %106 = vector.broadcast %c-1_i32_43 : i32 to vector<1x512xi32>
    %107 = arith.addi %1, %106 : vector<1x512xi32>
    %c0_i32_44 = arith.constant 0 : i32
    %108 = vector.broadcast %c0_i32_44 : i32 to vector<1x512xi32>
    %109 = arith.cmpi sge, %107, %108 : vector<1x512xi32>
    %c-1_i32_45 = arith.constant -1 : i32
    %110 = vector.broadcast %c-1_i32_45 : i32 to vector<1x512xi32>
    %111 = arith.addi %1, %110 : vector<1x512xi32>
    %c16_i32_46 = arith.constant 16 : i32
    %112 = vector.broadcast %c16_i32_46 : i32 to vector<1x512xi32>
    %113 = arith.cmpi slt, %111, %112 : vector<1x512xi32>
    %114 = arith.andi %109, %113 : vector<1x512xi1>
    %115 = arith.andi %105, %114 : vector<1x512xi1>
    %c1_i32_47 = arith.constant 1 : i32
    %116 = vector.broadcast %c1_i32_47 : i32 to vector<1x512xi32>
    %117 = arith.addi %0, %116 : vector<1x512xi32>
    %c0_i32_48 = arith.constant 0 : i32
    %118 = vector.broadcast %c0_i32_48 : i32 to vector<1x512xi32>
    %119 = arith.cmpi sge, %117, %118 : vector<1x512xi32>
    %c1_i32_49 = arith.constant 1 : i32
    %120 = vector.broadcast %c1_i32_49 : i32 to vector<1x512xi32>
    %121 = arith.addi %0, %120 : vector<1x512xi32>
    %c16_i32_50 = arith.constant 16 : i32
    %122 = vector.broadcast %c16_i32_50 : i32 to vector<1x512xi32>
    %123 = arith.cmpi slt, %121, %122 : vector<1x512xi32>
    %124 = arith.andi %119, %123 : vector<1x512xi1>
    %c0_i32_51 = arith.constant 0 : i32
    %125 = vector.broadcast %c0_i32_51 : i32 to vector<1x512xi32>
    %126 = arith.addi %1, %125 : vector<1x512xi32>
    %c0_i32_52 = arith.constant 0 : i32
    %127 = vector.broadcast %c0_i32_52 : i32 to vector<1x512xi32>
    %128 = arith.cmpi sge, %126, %127 : vector<1x512xi32>
    %c0_i32_53 = arith.constant 0 : i32
    %129 = vector.broadcast %c0_i32_53 : i32 to vector<1x512xi32>
    %130 = arith.addi %1, %129 : vector<1x512xi32>
    %c16_i32_54 = arith.constant 16 : i32
    %131 = vector.broadcast %c16_i32_54 : i32 to vector<1x512xi32>
    %132 = arith.cmpi slt, %130, %131 : vector<1x512xi32>
    %133 = arith.andi %128, %132 : vector<1x512xi1>
    %134 = arith.andi %124, %133 : vector<1x512xi1>
    %c1_i32_55 = arith.constant 1 : i32
    %135 = vector.broadcast %c1_i32_55 : i32 to vector<1x512xi32>
    %136 = arith.addi %0, %135 : vector<1x512xi32>
    %c0_i32_56 = arith.constant 0 : i32
    %137 = vector.broadcast %c0_i32_56 : i32 to vector<1x512xi32>
    %138 = arith.cmpi sge, %136, %137 : vector<1x512xi32>
    %c1_i32_57 = arith.constant 1 : i32
    %139 = vector.broadcast %c1_i32_57 : i32 to vector<1x512xi32>
    %140 = arith.addi %0, %139 : vector<1x512xi32>
    %c16_i32_58 = arith.constant 16 : i32
    %141 = vector.broadcast %c16_i32_58 : i32 to vector<1x512xi32>
    %142 = arith.cmpi slt, %140, %141 : vector<1x512xi32>
    %143 = arith.andi %138, %142 : vector<1x512xi1>
    %c1_i32_59 = arith.constant 1 : i32
    %144 = vector.broadcast %c1_i32_59 : i32 to vector<1x512xi32>
    %145 = arith.addi %1, %144 : vector<1x512xi32>
    %c0_i32_60 = arith.constant 0 : i32
    %146 = vector.broadcast %c0_i32_60 : i32 to vector<1x512xi32>
    %147 = arith.cmpi sge, %145, %146 : vector<1x512xi32>
    %c1_i32_61 = arith.constant 1 : i32
    %148 = vector.broadcast %c1_i32_61 : i32 to vector<1x512xi32>
    %149 = arith.addi %1, %148 : vector<1x512xi32>
    %c16_i32_62 = arith.constant 16 : i32
    %150 = vector.broadcast %c16_i32_62 : i32 to vector<1x512xi32>
    %151 = arith.cmpi slt, %149, %150 : vector<1x512xi32>
    %152 = arith.andi %147, %151 : vector<1x512xi1>
    %153 = arith.andi %143, %152 : vector<1x512xi1>
    %c0_63 = arith.constant 0 : index
    %c0_64 = arith.constant 0 : index
    %154 = vector.load %arg2[%c0_63, %c0_64] : memref<4x512xbf16, #tpu.memory_space<vmem>>, vector<4x512xbf16>
    %155 = arith.extf %154 : vector<4x512xbf16> to vector<4x512xf32>
    %cst = arith.constant 0.000000e+00 : f32
    %156 = vector.broadcast %cst : f32 to vector<32x512xf32>
    %157 = vector.extract_strided_slice %155 {offsets = [0, 495], sizes = [4, 17], strides = [1, 1]} : vector<4x512xf32> to vector<4x17xf32>
    %158 = vector.extract_strided_slice %155 {offsets = [0, 0], sizes = [4, 495], strides = [1, 1]} : vector<4x512xf32> to vector<4x495xf32>
    %159 = tpu.concatenate %157, %158 in 1 : vector<4x17xf32>, vector<4x495xf32> -> vector<4x512xf32>
    %cst_65 = arith.constant 0.000000e+00 : f32
    %160 = vector.shape_cast %20 : vector<1x512xi1> to vector<1x512xi1>
    %161 = vector.broadcast %160 : vector<1x512xi1> to vector<4x512xi1>
    %162 = vector.broadcast %cst_65 : f32 to vector<4x512xf32>
    %163 = arith.select %161, %159, %162 : vector<4x512xi1>, vector<4x512xf32>
    %c0_66 = arith.constant 0 : index
    %c0_67 = arith.constant 0 : index
    %c0_68 = arith.constant 0 : index
    %164 = vector.load %arg3[%c0_66, %c0_67, %c0_68] : memref<9x32x4xbf16, #tpu.memory_space<vmem>>, vector<1x32x4xbf16>
    %165 = vector.shape_cast %164 : vector<1x32x4xbf16> to vector<32x4xbf16>
    %166 = arith.truncf %163 : vector<4x512xf32> to vector<4x512xbf16>
    %cst_69 = arith.constant dense<0.000000e+00> : vector<32x512xf32>
    %167 = tpu.matmul %165, %166, %cst_69 {dimension_numbers = #tpu.dot_dimension_numbers<[1], [0], [0], [1], [0, 0, 1, 1], [], []>} : vector<32x4xbf16>, vector<4x512xbf16>, vector<32x512xf32> -> vector<32x512xf32>
    %168 = arith.addf %156, %167 : vector<32x512xf32>
    %169 = vector.extract_strided_slice %155 {offsets = [0, 496], sizes = [4, 16], strides = [1, 1]} : vector<4x512xf32> to vector<4x16xf32>
    %170 = vector.extract_strided_slice %155 {offsets = [0, 0], sizes = [4, 496], strides = [1, 1]} : vector<4x512xf32> to vector<4x496xf32>
    %171 = tpu.concatenate %169, %170 in 1 : vector<4x16xf32>, vector<4x496xf32> -> vector<4x512xf32>
    %cst_70 = arith.constant 0.000000e+00 : f32
    %172 = vector.shape_cast %39 : vector<1x512xi1> to vector<1x512xi1>
    %173 = vector.broadcast %172 : vector<1x512xi1> to vector<4x512xi1>
    %174 = vector.broadcast %cst_70 : f32 to vector<4x512xf32>
    %175 = arith.select %173, %171, %174 : vector<4x512xi1>, vector<4x512xf32>
    %c1 = arith.constant 1 : index
    %c0_71 = arith.constant 0 : index
    %c0_72 = arith.constant 0 : index
    %176 = vector.load %arg3[%c1, %c0_71, %c0_72] : memref<9x32x4xbf16, #tpu.memory_space<vmem>>, vector<1x32x4xbf16>
    %177 = vector.shape_cast %176 : vector<1x32x4xbf16> to vector<32x4xbf16>
    %178 = arith.truncf %175 : vector<4x512xf32> to vector<4x512xbf16>
    %cst_73 = arith.constant dense<0.000000e+00> : vector<32x512xf32>
    %179 = tpu.matmul %177, %178, %cst_73 {dimension_numbers = #tpu.dot_dimension_numbers<[1], [0], [0], [1], [0, 0, 1, 1], [], []>} : vector<32x4xbf16>, vector<4x512xbf16>, vector<32x512xf32> -> vector<32x512xf32>
    %180 = arith.addf %168, %179 : vector<32x512xf32>
    %181 = vector.extract_strided_slice %155 {offsets = [0, 497], sizes = [4, 15], strides = [1, 1]} : vector<4x512xf32> to vector<4x15xf32>
    %182 = vector.extract_strided_slice %155 {offsets = [0, 0], sizes = [4, 497], strides = [1, 1]} : vector<4x512xf32> to vector<4x497xf32>
    %183 = tpu.concatenate %181, %182 in 1 : vector<4x15xf32>, vector<4x497xf32> -> vector<4x512xf32>
    %cst_74 = arith.constant 0.000000e+00 : f32
    %184 = vector.shape_cast %58 : vector<1x512xi1> to vector<1x512xi1>
    %185 = vector.broadcast %184 : vector<1x512xi1> to vector<4x512xi1>
    %186 = vector.broadcast %cst_74 : f32 to vector<4x512xf32>
    %187 = arith.select %185, %183, %186 : vector<4x512xi1>, vector<4x512xf32>
    %c2 = arith.constant 2 : index
    %c0_75 = arith.constant 0 : index
    %c0_76 = arith.constant 0 : index
    %188 = vector.load %arg3[%c2, %c0_75, %c0_76] : memref<9x32x4xbf16, #tpu.memory_space<vmem>>, vector<1x32x4xbf16>
    %189 = vector.shape_cast %188 : vector<1x32x4xbf16> to vector<32x4xbf16>
    %190 = arith.truncf %187 : vector<4x512xf32> to vector<4x512xbf16>
    %cst_77 = arith.constant dense<0.000000e+00> : vector<32x512xf32>
    %191 = tpu.matmul %189, %190, %cst_77 {dimension_numbers = #tpu.dot_dimension_numbers<[1], [0], [0], [1], [0, 0, 1, 1], [], []>} : vector<32x4xbf16>, vector<4x512xbf16>, vector<32x512xf32> -> vector<32x512xf32>
    %192 = arith.addf %180, %191 : vector<32x512xf32>
    %193 = vector.extract_strided_slice %155 {offsets = [0, 511], sizes = [4, 1], strides = [1, 1]} : vector<4x512xf32> to vector<4x1xf32>
    %194 = vector.extract_strided_slice %155 {offsets = [0, 0], sizes = [4, 511], strides = [1, 1]} : vector<4x512xf32> to vector<4x511xf32>
    %195 = tpu.concatenate %193, %194 in 1 : vector<4x1xf32>, vector<4x511xf32> -> vector<4x512xf32>
    %cst_78 = arith.constant 0.000000e+00 : f32
    %196 = vector.shape_cast %77 : vector<1x512xi1> to vector<1x512xi1>
    %197 = vector.broadcast %196 : vector<1x512xi1> to vector<4x512xi1>
    %198 = vector.broadcast %cst_78 : f32 to vector<4x512xf32>
    %199 = arith.select %197, %195, %198 : vector<4x512xi1>, vector<4x512xf32>
    %c3 = arith.constant 3 : index
    %c0_79 = arith.constant 0 : index
    %c0_80 = arith.constant 0 : index
    %200 = vector.load %arg3[%c3, %c0_79, %c0_80] : memref<9x32x4xbf16, #tpu.memory_space<vmem>>, vector<1x32x4xbf16>
    %201 = vector.shape_cast %200 : vector<1x32x4xbf16> to vector<32x4xbf16>
    %202 = arith.truncf %199 : vector<4x512xf32> to vector<4x512xbf16>
    %cst_81 = arith.constant dense<0.000000e+00> : vector<32x512xf32>
    %203 = tpu.matmul %201, %202, %cst_81 {dimension_numbers = #tpu.dot_dimension_numbers<[1], [0], [0], [1], [0, 0, 1, 1], [], []>} : vector<32x4xbf16>, vector<4x512xbf16>, vector<32x512xf32> -> vector<32x512xf32>
    %204 = arith.addf %192, %203 : vector<32x512xf32>
    %c4 = arith.constant 4 : index
    %c0_82 = arith.constant 0 : index
    %c0_83 = arith.constant 0 : index
    %205 = vector.load %arg3[%c4, %c0_82, %c0_83] : memref<9x32x4xbf16, #tpu.memory_space<vmem>>, vector<1x32x4xbf16>
    %206 = vector.shape_cast %205 : vector<1x32x4xbf16> to vector<32x4xbf16>
    %207 = arith.truncf %155 : vector<4x512xf32> to vector<4x512xbf16>
    %cst_84 = arith.constant dense<0.000000e+00> : vector<32x512xf32>
    %208 = tpu.matmul %206, %207, %cst_84 {dimension_numbers = #tpu.dot_dimension_numbers<[1], [0], [0], [1], [0, 0, 1, 1], [], []>} : vector<32x4xbf16>, vector<4x512xbf16>, vector<32x512xf32> -> vector<32x512xf32>
    %209 = arith.addf %204, %208 : vector<32x512xf32>
    %210 = vector.extract_strided_slice %155 {offsets = [0, 1], sizes = [4, 511], strides = [1, 1]} : vector<4x512xf32> to vector<4x511xf32>
    %211 = vector.extract_strided_slice %155 {offsets = [0, 0], sizes = [4, 1], strides = [1, 1]} : vector<4x512xf32> to vector<4x1xf32>
    %212 = tpu.concatenate %210, %211 in 1 : vector<4x511xf32>, vector<4x1xf32> -> vector<4x512xf32>
    %cst_85 = arith.constant 0.000000e+00 : f32
    %213 = vector.shape_cast %96 : vector<1x512xi1> to vector<1x512xi1>
    %214 = vector.broadcast %213 : vector<1x512xi1> to vector<4x512xi1>
    %215 = vector.broadcast %cst_85 : f32 to vector<4x512xf32>
    %216 = arith.select %214, %212, %215 : vector<4x512xi1>, vector<4x512xf32>
    %c5 = arith.constant 5 : index
    %c0_86 = arith.constant 0 : index
    %c0_87 = arith.constant 0 : index
    %217 = vector.load %arg3[%c5, %c0_86, %c0_87] : memref<9x32x4xbf16, #tpu.memory_space<vmem>>, vector<1x32x4xbf16>
    %218 = vector.shape_cast %217 : vector<1x32x4xbf16> to vector<32x4xbf16>
    %219 = arith.truncf %216 : vector<4x512xf32> to vector<4x512xbf16>
    %cst_88 = arith.constant dense<0.000000e+00> : vector<32x512xf32>
    %220 = tpu.matmul %218, %219, %cst_88 {dimension_numbers = #tpu.dot_dimension_numbers<[1], [0], [0], [1], [0, 0, 1, 1], [], []>} : vector<32x4xbf16>, vector<4x512xbf16>, vector<32x512xf32> -> vector<32x512xf32>
    %221 = arith.addf %209, %220 : vector<32x512xf32>
    %222 = vector.extract_strided_slice %155 {offsets = [0, 15], sizes = [4, 497], strides = [1, 1]} : vector<4x512xf32> to vector<4x497xf32>
    %223 = vector.extract_strided_slice %155 {offsets = [0, 0], sizes = [4, 15], strides = [1, 1]} : vector<4x512xf32> to vector<4x15xf32>
    %224 = tpu.concatenate %222, %223 in 1 : vector<4x497xf32>, vector<4x15xf32> -> vector<4x512xf32>
    %cst_89 = arith.constant 0.000000e+00 : f32
    %225 = vector.shape_cast %115 : vector<1x512xi1> to vector<1x512xi1>
    %226 = vector.broadcast %225 : vector<1x512xi1> to vector<4x512xi1>
    %227 = vector.broadcast %cst_89 : f32 to vector<4x512xf32>
    %228 = arith.select %226, %224, %227 : vector<4x512xi1>, vector<4x512xf32>
    %c6 = arith.constant 6 : index
    %c0_90 = arith.constant 0 : index
    %c0_91 = arith.constant 0 : index
    %229 = vector.load %arg3[%c6, %c0_90, %c0_91] : memref<9x32x4xbf16, #tpu.memory_space<vmem>>, vector<1x32x4xbf16>
    %230 = vector.shape_cast %229 : vector<1x32x4xbf16> to vector<32x4xbf16>
    %231 = arith.truncf %228 : vector<4x512xf32> to vector<4x512xbf16>
    %cst_92 = arith.constant dense<0.000000e+00> : vector<32x512xf32>
    %232 = tpu.matmul %230, %231, %cst_92 {dimension_numbers = #tpu.dot_dimension_numbers<[1], [0], [0], [1], [0, 0, 1, 1], [], []>} : vector<32x4xbf16>, vector<4x512xbf16>, vector<32x512xf32> -> vector<32x512xf32>
    %233 = arith.addf %221, %232 : vector<32x512xf32>
    %234 = vector.extract_strided_slice %155 {offsets = [0, 16], sizes = [4, 496], strides = [1, 1]} : vector<4x512xf32> to vector<4x496xf32>
    %235 = vector.extract_strided_slice %155 {offsets = [0, 0], sizes = [4, 16], strides = [1, 1]} : vector<4x512xf32> to vector<4x16xf32>
    %236 = tpu.concatenate %234, %235 in 1 : vector<4x496xf32>, vector<4x16xf32> -> vector<4x512xf32>
    %cst_93 = arith.constant 0.000000e+00 : f32
    %237 = vector.shape_cast %134 : vector<1x512xi1> to vector<1x512xi1>
    %238 = vector.broadcast %237 : vector<1x512xi1> to vector<4x512xi1>
    %239 = vector.broadcast %cst_93 : f32 to vector<4x512xf32>
    %240 = arith.select %238, %236, %239 : vector<4x512xi1>, vector<4x512xf32>
    %c7 = arith.constant 7 : index
    %c0_94 = arith.constant 0 : index
    %c0_95 = arith.constant 0 : index
    %241 = vector.load %arg3[%c7, %c0_94, %c0_95] : memref<9x32x4xbf16, #tpu.memory_space<vmem>>, vector<1x32x4xbf16>
    %242 = vector.shape_cast %241 : vector<1x32x4xbf16> to vector<32x4xbf16>
    %243 = arith.truncf %240 : vector<4x512xf32> to vector<4x512xbf16>
    %cst_96 = arith.constant dense<0.000000e+00> : vector<32x512xf32>
    %244 = tpu.matmul %242, %243, %cst_96 {dimension_numbers = #tpu.dot_dimension_numbers<[1], [0], [0], [1], [0, 0, 1, 1], [], []>} : vector<32x4xbf16>, vector<4x512xbf16>, vector<32x512xf32> -> vector<32x512xf32>
    %245 = arith.addf %233, %244 : vector<32x512xf32>
    %246 = vector.extract_strided_slice %155 {offsets = [0, 17], sizes = [4, 495], strides = [1, 1]} : vector<4x512xf32> to vector<4x495xf32>
    %247 = vector.extract_strided_slice %155 {offsets = [0, 0], sizes = [4, 17], strides = [1, 1]} : vector<4x512xf32> to vector<4x17xf32>
    %248 = tpu.concatenate %246, %247 in 1 : vector<4x495xf32>, vector<4x17xf32> -> vector<4x512xf32>
    %cst_97 = arith.constant 0.000000e+00 : f32
    %249 = vector.shape_cast %153 : vector<1x512xi1> to vector<1x512xi1>
    %250 = vector.broadcast %249 : vector<1x512xi1> to vector<4x512xi1>
    %251 = vector.broadcast %cst_97 : f32 to vector<4x512xf32>
    %252 = arith.select %250, %248, %251 : vector<4x512xi1>, vector<4x512xf32>
    %c8 = arith.constant 8 : index
    %c0_98 = arith.constant 0 : index
    %c0_99 = arith.constant 0 : index
    %253 = vector.load %arg3[%c8, %c0_98, %c0_99] : memref<9x32x4xbf16, #tpu.memory_space<vmem>>, vector<1x32x4xbf16>
    %254 = vector.shape_cast %253 : vector<1x32x4xbf16> to vector<32x4xbf16>
    %255 = arith.truncf %252 : vector<4x512xf32> to vector<4x512xbf16>
    %cst_100 = arith.constant dense<0.000000e+00> : vector<32x512xf32>
    %256 = tpu.matmul %254, %255, %cst_100 {dimension_numbers = #tpu.dot_dimension_numbers<[1], [0], [0], [1], [0, 0, 1, 1], [], []>} : vector<32x4xbf16>, vector<4x512xbf16>, vector<32x512xf32> -> vector<32x512xf32>
    %257 = arith.addf %245, %256 : vector<32x512xf32>
    %cst_101 = arith.constant dense<0.000000e+00> : vector<32xf32>
    %258 = vector.multi_reduction <add>, %257, %cst_101 [1] : vector<32x512xf32> to vector<32xf32>
    %259 = vector.shape_cast %258 : vector<32xf32> to vector<32x1xf32>
    %260 = arith.mulf %257, %257 : vector<32x512xf32>
    %cst_102 = arith.constant dense<0.000000e+00> : vector<32xf32>
    %261 = vector.multi_reduction <add>, %260, %cst_102 [1] : vector<32x512xf32> to vector<32xf32>
    %262 = vector.shape_cast %261 : vector<32xf32> to vector<32x1xf32>
    %cst_103 = arith.constant 0.001953125 : f32
    %263 = vector.broadcast %cst_103 : f32 to vector<32x1xf32>
    %264 = arith.mulf %259, %263 : vector<32x1xf32>
    %cst_104 = arith.constant 0.001953125 : f32
    %265 = vector.broadcast %cst_104 : f32 to vector<32x1xf32>
    %266 = arith.mulf %262, %265 : vector<32x1xf32>
    %267 = arith.mulf %264, %264 : vector<32x1xf32>
    %268 = arith.subf %266, %267 : vector<32x1xf32>
    %cst_105 = arith.constant 0.000000e+00 : f32
    %269 = vector.broadcast %cst_105 : f32 to vector<32x1xf32>
    %270 = arith.maximumf %268, %269 : vector<32x1xf32>
    %c0_106 = arith.constant 0 : index
    %c0_107 = arith.constant 0 : index
    %271 = vector.load %arg4[%c0_106, %c0_107] : memref<32x1xf32, #tpu.memory_space<vmem>>, vector<32x1xf32>
    %cst_108 = arith.constant 9.99999974E-6 : f32
    %272 = vector.broadcast %cst_108 : f32 to vector<32x1xf32>
    %273 = arith.addf %270, %272 : vector<32x1xf32>
    %274 = math.rsqrt %273 : vector<32x1xf32>
    %275 = arith.mulf %271, %274 : vector<32x1xf32>
    %c0_109 = arith.constant 0 : index
    %c0_110 = arith.constant 0 : index
    %276 = vector.load %arg5[%c0_109, %c0_110] : memref<32x1xf32, #tpu.memory_space<vmem>>, vector<32x1xf32>
    %277 = arith.mulf %264, %275 : vector<32x1xf32>
    %278 = arith.subf %276, %277 : vector<32x1xf32>
    %279 = vector.broadcast %275 : vector<32x1xf32> to vector<32x512xf32>
    %280 = arith.mulf %257, %279 : vector<32x512xf32>
    %281 = vector.broadcast %278 : vector<32x1xf32> to vector<32x512xf32>
    %282 = arith.addf %280, %281 : vector<32x512xf32>
    %cst_111 = arith.constant 0.000000e+00 : f32
    %283 = vector.broadcast %cst_111 : f32 to vector<32x512xf32>
    %284 = arith.cmpf oge, %282, %283 : vector<32x512xf32>
    %cst_112 = arith.constant 2.000000e-01 : f32
    %285 = vector.broadcast %cst_112 : f32 to vector<32x512xf32>
    %286 = arith.mulf %285, %282 : vector<32x512xf32>
    %287 = arith.select %284, %282, %286 : vector<32x512xi1>, vector<32x512xf32>
    %cst_113 = arith.constant 0.000000e+00 : f32
    %288 = vector.broadcast %cst_113 : f32 to vector<16x512xf32>
    %289 = vector.extract_strided_slice %287 {offsets = [0, 495], sizes = [32, 17], strides = [1, 1]} : vector<32x512xf32> to vector<32x17xf32>
    %290 = vector.extract_strided_slice %287 {offsets = [0, 0], sizes = [32, 495], strides = [1, 1]} : vector<32x512xf32> to vector<32x495xf32>
    %291 = tpu.concatenate %289, %290 in 1 : vector<32x17xf32>, vector<32x495xf32> -> vector<32x512xf32>
    %cst_114 = arith.constant 0.000000e+00 : f32
    %292 = vector.shape_cast %20 : vector<1x512xi1> to vector<1x512xi1>
    %293 = vector.broadcast %292 : vector<1x512xi1> to vector<32x512xi1>
    %294 = vector.broadcast %cst_114 : f32 to vector<32x512xf32>
    %295 = arith.select %293, %291, %294 : vector<32x512xi1>, vector<32x512xf32>
    %c0_115 = arith.constant 0 : index
    %c0_116 = arith.constant 0 : index
    %c0_117 = arith.constant 0 : index
    %296 = vector.load %arg6[%c0_115, %c0_116, %c0_117] : memref<9x16x32xbf16, #tpu.memory_space<vmem>>, vector<1x16x32xbf16>
    %297 = vector.shape_cast %296 : vector<1x16x32xbf16> to vector<16x32xbf16>
    %298 = arith.truncf %295 : vector<32x512xf32> to vector<32x512xbf16>
    %cst_118 = arith.constant dense<0.000000e+00> : vector<16x512xf32>
    %299 = tpu.matmul %297, %298, %cst_118 {dimension_numbers = #tpu.dot_dimension_numbers<[1], [0], [0], [1], [0, 0, 1, 1], [], []>} : vector<16x32xbf16>, vector<32x512xbf16>, vector<16x512xf32> -> vector<16x512xf32>
    %300 = arith.addf %288, %299 : vector<16x512xf32>
    %301 = vector.extract_strided_slice %287 {offsets = [0, 496], sizes = [32, 16], strides = [1, 1]} : vector<32x512xf32> to vector<32x16xf32>
    %302 = vector.extract_strided_slice %287 {offsets = [0, 0], sizes = [32, 496], strides = [1, 1]} : vector<32x512xf32> to vector<32x496xf32>
    %303 = tpu.concatenate %301, %302 in 1 : vector<32x16xf32>, vector<32x496xf32> -> vector<32x512xf32>
    %cst_119 = arith.constant 0.000000e+00 : f32
    %304 = vector.shape_cast %39 : vector<1x512xi1> to vector<1x512xi1>
    %305 = vector.broadcast %304 : vector<1x512xi1> to vector<32x512xi1>
    %306 = vector.broadcast %cst_119 : f32 to vector<32x512xf32>
    %307 = arith.select %305, %303, %306 : vector<32x512xi1>, vector<32x512xf32>
    %c1_120 = arith.constant 1 : index
    %c0_121 = arith.constant 0 : index
    %c0_122 = arith.constant 0 : index
    %308 = vector.load %arg6[%c1_120, %c0_121, %c0_122] : memref<9x16x32xbf16, #tpu.memory_space<vmem>>, vector<1x16x32xbf16>
    %309 = vector.shape_cast %308 : vector<1x16x32xbf16> to vector<16x32xbf16>
    %310 = arith.truncf %307 : vector<32x512xf32> to vector<32x512xbf16>
    %cst_123 = arith.constant dense<0.000000e+00> : vector<16x512xf32>
    %311 = tpu.matmul %309, %310, %cst_123 {dimension_numbers = #tpu.dot_dimension_numbers<[1], [0], [0], [1], [0, 0, 1, 1], [], []>} : vector<16x32xbf16>, vector<32x512xbf16>, vector<16x512xf32> -> vector<16x512xf32>
    %312 = arith.addf %300, %311 : vector<16x512xf32>
    %313 = vector.extract_strided_slice %287 {offsets = [0, 497], sizes = [32, 15], strides = [1, 1]} : vector<32x512xf32> to vector<32x15xf32>
    %314 = vector.extract_strided_slice %287 {offsets = [0, 0], sizes = [32, 497], strides = [1, 1]} : vector<32x512xf32> to vector<32x497xf32>
    %315 = tpu.concatenate %313, %314 in 1 : vector<32x15xf32>, vector<32x497xf32> -> vector<32x512xf32>
    %cst_124 = arith.constant 0.000000e+00 : f32
    %316 = vector.shape_cast %58 : vector<1x512xi1> to vector<1x512xi1>
    %317 = vector.broadcast %316 : vector<1x512xi1> to vector<32x512xi1>
    %318 = vector.broadcast %cst_124 : f32 to vector<32x512xf32>
    %319 = arith.select %317, %315, %318 : vector<32x512xi1>, vector<32x512xf32>
    %c2_125 = arith.constant 2 : index
    %c0_126 = arith.constant 0 : index
    %c0_127 = arith.constant 0 : index
    %320 = vector.load %arg6[%c2_125, %c0_126, %c0_127] : memref<9x16x32xbf16, #tpu.memory_space<vmem>>, vector<1x16x32xbf16>
    %321 = vector.shape_cast %320 : vector<1x16x32xbf16> to vector<16x32xbf16>
    %322 = arith.truncf %319 : vector<32x512xf32> to vector<32x512xbf16>
    %cst_128 = arith.constant dense<0.000000e+00> : vector<16x512xf32>
    %323 = tpu.matmul %321, %322, %cst_128 {dimension_numbers = #tpu.dot_dimension_numbers<[1], [0], [0], [1], [0, 0, 1, 1], [], []>} : vector<16x32xbf16>, vector<32x512xbf16>, vector<16x512xf32> -> vector<16x512xf32>
    %324 = arith.addf %312, %323 : vector<16x512xf32>
    %325 = vector.extract_strided_slice %287 {offsets = [0, 511], sizes = [32, 1], strides = [1, 1]} : vector<32x512xf32> to vector<32x1xf32>
    %326 = vector.extract_strided_slice %287 {offsets = [0, 0], sizes = [32, 511], strides = [1, 1]} : vector<32x512xf32> to vector<32x511xf32>
    %327 = tpu.concatenate %325, %326 in 1 : vector<32x1xf32>, vector<32x511xf32> -> vector<32x512xf32>
    %cst_129 = arith.constant 0.000000e+00 : f32
    %328 = vector.shape_cast %77 : vector<1x512xi1> to vector<1x512xi1>
    %329 = vector.broadcast %328 : vector<1x512xi1> to vector<32x512xi1>
    %330 = vector.broadcast %cst_129 : f32 to vector<32x512xf32>
    %331 = arith.select %329, %327, %330 : vector<32x512xi1>, vector<32x512xf32>
    %c3_130 = arith.constant 3 : index
    %c0_131 = arith.constant 0 : index
    %c0_132 = arith.constant 0 : index
    %332 = vector.load %arg6[%c3_130, %c0_131, %c0_132] : memref<9x16x32xbf16, #tpu.memory_space<vmem>>, vector<1x16x32xbf16>
    %333 = vector.shape_cast %332 : vector<1x16x32xbf16> to vector<16x32xbf16>
    %334 = arith.truncf %331 : vector<32x512xf32> to vector<32x512xbf16>
    %cst_133 = arith.constant dense<0.000000e+00> : vector<16x512xf32>
    %335 = tpu.matmul %333, %334, %cst_133 {dimension_numbers = #tpu.dot_dimension_numbers<[1], [0], [0], [1], [0, 0, 1, 1], [], []>} : vector<16x32xbf16>, vector<32x512xbf16>, vector<16x512xf32> -> vector<16x512xf32>
    %336 = arith.addf %324, %335 : vector<16x512xf32>
    %c4_134 = arith.constant 4 : index
    %c0_135 = arith.constant 0 : index
    %c0_136 = arith.constant 0 : index
    %337 = vector.load %arg6[%c4_134, %c0_135, %c0_136] : memref<9x16x32xbf16, #tpu.memory_space<vmem>>, vector<1x16x32xbf16>
    %338 = vector.shape_cast %337 : vector<1x16x32xbf16> to vector<16x32xbf16>
    %339 = arith.truncf %287 : vector<32x512xf32> to vector<32x512xbf16>
    %cst_137 = arith.constant dense<0.000000e+00> : vector<16x512xf32>
    %340 = tpu.matmul %338, %339, %cst_137 {dimension_numbers = #tpu.dot_dimension_numbers<[1], [0], [0], [1], [0, 0, 1, 1], [], []>} : vector<16x32xbf16>, vector<32x512xbf16>, vector<16x512xf32> -> vector<16x512xf32>
    %341 = arith.addf %336, %340 : vector<16x512xf32>
    %342 = vector.extract_strided_slice %287 {offsets = [0, 1], sizes = [32, 511], strides = [1, 1]} : vector<32x512xf32> to vector<32x511xf32>
    %343 = vector.extract_strided_slice %287 {offsets = [0, 0], sizes = [32, 1], strides = [1, 1]} : vector<32x512xf32> to vector<32x1xf32>
    %344 = tpu.concatenate %342, %343 in 1 : vector<32x511xf32>, vector<32x1xf32> -> vector<32x512xf32>
    %cst_138 = arith.constant 0.000000e+00 : f32
    %345 = vector.shape_cast %96 : vector<1x512xi1> to vector<1x512xi1>
    %346 = vector.broadcast %345 : vector<1x512xi1> to vector<32x512xi1>
    %347 = vector.broadcast %cst_138 : f32 to vector<32x512xf32>
    %348 = arith.select %346, %344, %347 : vector<32x512xi1>, vector<32x512xf32>
    %c5_139 = arith.constant 5 : index
    %c0_140 = arith.constant 0 : index
    %c0_141 = arith.constant 0 : index
    %349 = vector.load %arg6[%c5_139, %c0_140, %c0_141] : memref<9x16x32xbf16, #tpu.memory_space<vmem>>, vector<1x16x32xbf16>
    %350 = vector.shape_cast %349 : vector<1x16x32xbf16> to vector<16x32xbf16>
    %351 = arith.truncf %348 : vector<32x512xf32> to vector<32x512xbf16>
    %cst_142 = arith.constant dense<0.000000e+00> : vector<16x512xf32>
    %352 = tpu.matmul %350, %351, %cst_142 {dimension_numbers = #tpu.dot_dimension_numbers<[1], [0], [0], [1], [0, 0, 1, 1], [], []>} : vector<16x32xbf16>, vector<32x512xbf16>, vector<16x512xf32> -> vector<16x512xf32>
    %353 = arith.addf %341, %352 : vector<16x512xf32>
    %354 = vector.extract_strided_slice %287 {offsets = [0, 15], sizes = [32, 497], strides = [1, 1]} : vector<32x512xf32> to vector<32x497xf32>
    %355 = vector.extract_strided_slice %287 {offsets = [0, 0], sizes = [32, 15], strides = [1, 1]} : vector<32x512xf32> to vector<32x15xf32>
    %356 = tpu.concatenate %354, %355 in 1 : vector<32x497xf32>, vector<32x15xf32> -> vector<32x512xf32>
    %cst_143 = arith.constant 0.000000e+00 : f32
    %357 = vector.shape_cast %115 : vector<1x512xi1> to vector<1x512xi1>
    %358 = vector.broadcast %357 : vector<1x512xi1> to vector<32x512xi1>
    %359 = vector.broadcast %cst_143 : f32 to vector<32x512xf32>
    %360 = arith.select %358, %356, %359 : vector<32x512xi1>, vector<32x512xf32>
    %c6_144 = arith.constant 6 : index
    %c0_145 = arith.constant 0 : index
    %c0_146 = arith.constant 0 : index
    %361 = vector.load %arg6[%c6_144, %c0_145, %c0_146] : memref<9x16x32xbf16, #tpu.memory_space<vmem>>, vector<1x16x32xbf16>
    %362 = vector.shape_cast %361 : vector<1x16x32xbf16> to vector<16x32xbf16>
    %363 = arith.truncf %360 : vector<32x512xf32> to vector<32x512xbf16>
    %cst_147 = arith.constant dense<0.000000e+00> : vector<16x512xf32>
    %364 = tpu.matmul %362, %363, %cst_147 {dimension_numbers = #tpu.dot_dimension_numbers<[1], [0], [0], [1], [0, 0, 1, 1], [], []>} : vector<16x32xbf16>, vector<32x512xbf16>, vector<16x512xf32> -> vector<16x512xf32>
    %365 = arith.addf %353, %364 : vector<16x512xf32>
    %366 = vector.extract_strided_slice %287 {offsets = [0, 16], sizes = [32, 496], strides = [1, 1]} : vector<32x512xf32> to vector<32x496xf32>
    %367 = vector.extract_strided_slice %287 {offsets = [0, 0], sizes = [32, 16], strides = [1, 1]} : vector<32x512xf32> to vector<32x16xf32>
    %368 = tpu.concatenate %366, %367 in 1 : vector<32x496xf32>, vector<32x16xf32> -> vector<32x512xf32>
    %cst_148 = arith.constant 0.000000e+00 : f32
    %369 = vector.shape_cast %134 : vector<1x512xi1> to vector<1x512xi1>
    %370 = vector.broadcast %369 : vector<1x512xi1> to vector<32x512xi1>
    %371 = vector.broadcast %cst_148 : f32 to vector<32x512xf32>
    %372 = arith.select %370, %368, %371 : vector<32x512xi1>, vector<32x512xf32>
    %c7_149 = arith.constant 7 : index
    %c0_150 = arith.constant 0 : index
    %c0_151 = arith.constant 0 : index
    %373 = vector.load %arg6[%c7_149, %c0_150, %c0_151] : memref<9x16x32xbf16, #tpu.memory_space<vmem>>, vector<1x16x32xbf16>
    %374 = vector.shape_cast %373 : vector<1x16x32xbf16> to vector<16x32xbf16>
    %375 = arith.truncf %372 : vector<32x512xf32> to vector<32x512xbf16>
    %cst_152 = arith.constant dense<0.000000e+00> : vector<16x512xf32>
    %376 = tpu.matmul %374, %375, %cst_152 {dimension_numbers = #tpu.dot_dimension_numbers<[1], [0], [0], [1], [0, 0, 1, 1], [], []>} : vector<16x32xbf16>, vector<32x512xbf16>, vector<16x512xf32> -> vector<16x512xf32>
    %377 = arith.addf %365, %376 : vector<16x512xf32>
    %378 = vector.extract_strided_slice %287 {offsets = [0, 17], sizes = [32, 495], strides = [1, 1]} : vector<32x512xf32> to vector<32x495xf32>
    %379 = vector.extract_strided_slice %287 {offsets = [0, 0], sizes = [32, 17], strides = [1, 1]} : vector<32x512xf32> to vector<32x17xf32>
    %380 = tpu.concatenate %378, %379 in 1 : vector<32x495xf32>, vector<32x17xf32> -> vector<32x512xf32>
    %cst_153 = arith.constant 0.000000e+00 : f32
    %381 = vector.shape_cast %153 : vector<1x512xi1> to vector<1x512xi1>
    %382 = vector.broadcast %381 : vector<1x512xi1> to vector<32x512xi1>
    %383 = vector.broadcast %cst_153 : f32 to vector<32x512xf32>
    %384 = arith.select %382, %380, %383 : vector<32x512xi1>, vector<32x512xf32>
    %c8_154 = arith.constant 8 : index
    %c0_155 = arith.constant 0 : index
    %c0_156 = arith.constant 0 : index
    %385 = vector.load %arg6[%c8_154, %c0_155, %c0_156] : memref<9x16x32xbf16, #tpu.memory_space<vmem>>, vector<1x16x32xbf16>
    %386 = vector.shape_cast %385 : vector<1x16x32xbf16> to vector<16x32xbf16>
    %387 = arith.truncf %384 : vector<32x512xf32> to vector<32x512xbf16>
    %cst_157 = arith.constant dense<0.000000e+00> : vector<16x512xf32>
    %388 = tpu.matmul %386, %387, %cst_157 {dimension_numbers = #tpu.dot_dimension_numbers<[1], [0], [0], [1], [0, 0, 1, 1], [], []>} : vector<16x32xbf16>, vector<32x512xbf16>, vector<16x512xf32> -> vector<16x512xf32>
    %389 = arith.addf %377, %388 : vector<16x512xf32>
    %cst_158 = arith.constant dense<0.000000e+00> : vector<16xf32>
    %390 = vector.multi_reduction <add>, %389, %cst_158 [1] : vector<16x512xf32> to vector<16xf32>
    %391 = vector.shape_cast %390 : vector<16xf32> to vector<16x1xf32>
    %392 = arith.mulf %389, %389 : vector<16x512xf32>
    %cst_159 = arith.constant dense<0.000000e+00> : vector<16xf32>
    %393 = vector.multi_reduction <add>, %392, %cst_159 [1] : vector<16x512xf32> to vector<16xf32>
    %394 = vector.shape_cast %393 : vector<16xf32> to vector<16x1xf32>
    %cst_160 = arith.constant 0.001953125 : f32
    %395 = vector.broadcast %cst_160 : f32 to vector<16x1xf32>
    %396 = arith.mulf %391, %395 : vector<16x1xf32>
    %cst_161 = arith.constant 0.001953125 : f32
    %397 = vector.broadcast %cst_161 : f32 to vector<16x1xf32>
    %398 = arith.mulf %394, %397 : vector<16x1xf32>
    %399 = arith.mulf %396, %396 : vector<16x1xf32>
    %400 = arith.subf %398, %399 : vector<16x1xf32>
    %cst_162 = arith.constant 0.000000e+00 : f32
    %401 = vector.broadcast %cst_162 : f32 to vector<16x1xf32>
    %402 = arith.maximumf %400, %401 : vector<16x1xf32>
    %c0_163 = arith.constant 0 : index
    %c0_164 = arith.constant 0 : index
    %403 = vector.load %arg7[%c0_163, %c0_164] : memref<16x1xf32, #tpu.memory_space<vmem>>, vector<16x1xf32>
    %cst_165 = arith.constant 9.99999974E-6 : f32
    %404 = vector.broadcast %cst_165 : f32 to vector<16x1xf32>
    %405 = arith.addf %402, %404 : vector<16x1xf32>
    %406 = math.rsqrt %405 : vector<16x1xf32>
    %407 = arith.mulf %403, %406 : vector<16x1xf32>
    %c0_166 = arith.constant 0 : index
    %c0_167 = arith.constant 0 : index
    %408 = vector.load %arg8[%c0_166, %c0_167] : memref<16x1xf32, #tpu.memory_space<vmem>>, vector<16x1xf32>
    %409 = arith.mulf %396, %407 : vector<16x1xf32>
    %410 = arith.subf %408, %409 : vector<16x1xf32>
    %411 = vector.broadcast %407 : vector<16x1xf32> to vector<16x512xf32>
    %412 = arith.mulf %389, %411 : vector<16x512xf32>
    %413 = vector.broadcast %410 : vector<16x1xf32> to vector<16x512xf32>
    %414 = arith.addf %412, %413 : vector<16x512xf32>
    %cst_168 = arith.constant 0.000000e+00 : f32
    %415 = vector.broadcast %cst_168 : f32 to vector<16x512xf32>
    %416 = arith.cmpf oge, %414, %415 : vector<16x512xf32>
    %cst_169 = arith.constant 2.000000e-01 : f32
    %417 = vector.broadcast %cst_169 : f32 to vector<16x512xf32>
    %418 = arith.mulf %417, %414 : vector<16x512xf32>
    %419 = arith.select %416, %414, %418 : vector<16x512xi1>, vector<16x512xf32>
    %cst_170 = arith.constant 0.000000e+00 : f32
    %420 = vector.broadcast %cst_170 : f32 to vector<8x512xf32>
    %421 = vector.extract_strided_slice %419 {offsets = [0, 495], sizes = [16, 17], strides = [1, 1]} : vector<16x512xf32> to vector<16x17xf32>
    %422 = vector.extract_strided_slice %419 {offsets = [0, 0], sizes = [16, 495], strides = [1, 1]} : vector<16x512xf32> to vector<16x495xf32>
    %423 = tpu.concatenate %421, %422 in 1 : vector<16x17xf32>, vector<16x495xf32> -> vector<16x512xf32>
    %cst_171 = arith.constant 0.000000e+00 : f32
    %424 = vector.shape_cast %20 : vector<1x512xi1> to vector<1x512xi1>
    %425 = vector.broadcast %424 : vector<1x512xi1> to vector<16x512xi1>
    %426 = vector.broadcast %cst_171 : f32 to vector<16x512xf32>
    %427 = arith.select %425, %423, %426 : vector<16x512xi1>, vector<16x512xf32>
    %c0_172 = arith.constant 0 : index
    %c0_173 = arith.constant 0 : index
    %c0_174 = arith.constant 0 : index
    %428 = vector.load %arg9[%c0_172, %c0_173, %c0_174] : memref<9x8x16xbf16, #tpu.memory_space<vmem>>, vector<1x8x16xbf16>
    %429 = vector.shape_cast %428 : vector<1x8x16xbf16> to vector<8x16xbf16>
    %430 = arith.truncf %427 : vector<16x512xf32> to vector<16x512xbf16>
    %cst_175 = arith.constant dense<0.000000e+00> : vector<8x512xf32>
    %431 = tpu.matmul %429, %430, %cst_175 {dimension_numbers = #tpu.dot_dimension_numbers<[1], [0], [0], [1], [0, 0, 1, 1], [], []>} : vector<8x16xbf16>, vector<16x512xbf16>, vector<8x512xf32> -> vector<8x512xf32>
    %432 = arith.addf %420, %431 : vector<8x512xf32>
    %433 = vector.extract_strided_slice %419 {offsets = [0, 496], sizes = [16, 16], strides = [1, 1]} : vector<16x512xf32> to vector<16x16xf32>
    %434 = vector.extract_strided_slice %419 {offsets = [0, 0], sizes = [16, 496], strides = [1, 1]} : vector<16x512xf32> to vector<16x496xf32>
    %435 = tpu.concatenate %433, %434 in 1 : vector<16x16xf32>, vector<16x496xf32> -> vector<16x512xf32>
    %cst_176 = arith.constant 0.000000e+00 : f32
    %436 = vector.shape_cast %39 : vector<1x512xi1> to vector<1x512xi1>
    %437 = vector.broadcast %436 : vector<1x512xi1> to vector<16x512xi1>
    %438 = vector.broadcast %cst_176 : f32 to vector<16x512xf32>
    %439 = arith.select %437, %435, %438 : vector<16x512xi1>, vector<16x512xf32>
    %c1_177 = arith.constant 1 : index
    %c0_178 = arith.constant 0 : index
    %c0_179 = arith.constant 0 : index
    %440 = vector.load %arg9[%c1_177, %c0_178, %c0_179] : memref<9x8x16xbf16, #tpu.memory_space<vmem>>, vector<1x8x16xbf16>
    %441 = vector.shape_cast %440 : vector<1x8x16xbf16> to vector<8x16xbf16>
    %442 = arith.truncf %439 : vector<16x512xf32> to vector<16x512xbf16>
    %cst_180 = arith.constant dense<0.000000e+00> : vector<8x512xf32>
    %443 = tpu.matmul %441, %442, %cst_180 {dimension_numbers = #tpu.dot_dimension_numbers<[1], [0], [0], [1], [0, 0, 1, 1], [], []>} : vector<8x16xbf16>, vector<16x512xbf16>, vector<8x512xf32> -> vector<8x512xf32>
    %444 = arith.addf %432, %443 : vector<8x512xf32>
    %445 = vector.extract_strided_slice %419 {offsets = [0, 497], sizes = [16, 15], strides = [1, 1]} : vector<16x512xf32> to vector<16x15xf32>
    %446 = vector.extract_strided_slice %419 {offsets = [0, 0], sizes = [16, 497], strides = [1, 1]} : vector<16x512xf32> to vector<16x497xf32>
    %447 = tpu.concatenate %445, %446 in 1 : vector<16x15xf32>, vector<16x497xf32> -> vector<16x512xf32>
    %cst_181 = arith.constant 0.000000e+00 : f32
    %448 = vector.shape_cast %58 : vector<1x512xi1> to vector<1x512xi1>
    %449 = vector.broadcast %448 : vector<1x512xi1> to vector<16x512xi1>
    %450 = vector.broadcast %cst_181 : f32 to vector<16x512xf32>
    %451 = arith.select %449, %447, %450 : vector<16x512xi1>, vector<16x512xf32>
    %c2_182 = arith.constant 2 : index
    %c0_183 = arith.constant 0 : index
    %c0_184 = arith.constant 0 : index
    %452 = vector.load %arg9[%c2_182, %c0_183, %c0_184] : memref<9x8x16xbf16, #tpu.memory_space<vmem>>, vector<1x8x16xbf16>
    %453 = vector.shape_cast %452 : vector<1x8x16xbf16> to vector<8x16xbf16>
    %454 = arith.truncf %451 : vector<16x512xf32> to vector<16x512xbf16>
    %cst_185 = arith.constant dense<0.000000e+00> : vector<8x512xf32>
    %455 = tpu.matmul %453, %454, %cst_185 {dimension_numbers = #tpu.dot_dimension_numbers<[1], [0], [0], [1], [0, 0, 1, 1], [], []>} : vector<8x16xbf16>, vector<16x512xbf16>, vector<8x512xf32> -> vector<8x512xf32>
    %456 = arith.addf %444, %455 : vector<8x512xf32>
    %457 = vector.extract_strided_slice %419 {offsets = [0, 511], sizes = [16, 1], strides = [1, 1]} : vector<16x512xf32> to vector<16x1xf32>
    %458 = vector.extract_strided_slice %419 {offsets = [0, 0], sizes = [16, 511], strides = [1, 1]} : vector<16x512xf32> to vector<16x511xf32>
    %459 = tpu.concatenate %457, %458 in 1 : vector<16x1xf32>, vector<16x511xf32> -> vector<16x512xf32>
    %cst_186 = arith.constant 0.000000e+00 : f32
    %460 = vector.shape_cast %77 : vector<1x512xi1> to vector<1x512xi1>
    %461 = vector.broadcast %460 : vector<1x512xi1> to vector<16x512xi1>
    %462 = vector.broadcast %cst_186 : f32 to vector<16x512xf32>
    %463 = arith.select %461, %459, %462 : vector<16x512xi1>, vector<16x512xf32>
    %c3_187 = arith.constant 3 : index
    %c0_188 = arith.constant 0 : index
    %c0_189 = arith.constant 0 : index
    %464 = vector.load %arg9[%c3_187, %c0_188, %c0_189] : memref<9x8x16xbf16, #tpu.memory_space<vmem>>, vector<1x8x16xbf16>
    %465 = vector.shape_cast %464 : vector<1x8x16xbf16> to vector<8x16xbf16>
    %466 = arith.truncf %463 : vector<16x512xf32> to vector<16x512xbf16>
    %cst_190 = arith.constant dense<0.000000e+00> : vector<8x512xf32>
    %467 = tpu.matmul %465, %466, %cst_190 {dimension_numbers = #tpu.dot_dimension_numbers<[1], [0], [0], [1], [0, 0, 1, 1], [], []>} : vector<8x16xbf16>, vector<16x512xbf16>, vector<8x512xf32> -> vector<8x512xf32>
    %468 = arith.addf %456, %467 : vector<8x512xf32>
    %c4_191 = arith.constant 4 : index
    %c0_192 = arith.constant 0 : index
    %c0_193 = arith.constant 0 : index
    %469 = vector.load %arg9[%c4_191, %c0_192, %c0_193] : memref<9x8x16xbf16, #tpu.memory_space<vmem>>, vector<1x8x16xbf16>
    %470 = vector.shape_cast %469 : vector<1x8x16xbf16> to vector<8x16xbf16>
    %471 = arith.truncf %419 : vector<16x512xf32> to vector<16x512xbf16>
    %cst_194 = arith.constant dense<0.000000e+00> : vector<8x512xf32>
    %472 = tpu.matmul %470, %471, %cst_194 {dimension_numbers = #tpu.dot_dimension_numbers<[1], [0], [0], [1], [0, 0, 1, 1], [], []>} : vector<8x16xbf16>, vector<16x512xbf16>, vector<8x512xf32> -> vector<8x512xf32>
    %473 = arith.addf %468, %472 : vector<8x512xf32>
    %474 = vector.extract_strided_slice %419 {offsets = [0, 1], sizes = [16, 511], strides = [1, 1]} : vector<16x512xf32> to vector<16x511xf32>
    %475 = vector.extract_strided_slice %419 {offsets = [0, 0], sizes = [16, 1], strides = [1, 1]} : vector<16x512xf32> to vector<16x1xf32>
    %476 = tpu.concatenate %474, %475 in 1 : vector<16x511xf32>, vector<16x1xf32> -> vector<16x512xf32>
    %cst_195 = arith.constant 0.000000e+00 : f32
    %477 = vector.shape_cast %96 : vector<1x512xi1> to vector<1x512xi1>
    %478 = vector.broadcast %477 : vector<1x512xi1> to vector<16x512xi1>
    %479 = vector.broadcast %cst_195 : f32 to vector<16x512xf32>
    %480 = arith.select %478, %476, %479 : vector<16x512xi1>, vector<16x512xf32>
    %c5_196 = arith.constant 5 : index
    %c0_197 = arith.constant 0 : index
    %c0_198 = arith.constant 0 : index
    %481 = vector.load %arg9[%c5_196, %c0_197, %c0_198] : memref<9x8x16xbf16, #tpu.memory_space<vmem>>, vector<1x8x16xbf16>
    %482 = vector.shape_cast %481 : vector<1x8x16xbf16> to vector<8x16xbf16>
    %483 = arith.truncf %480 : vector<16x512xf32> to vector<16x512xbf16>
    %cst_199 = arith.constant dense<0.000000e+00> : vector<8x512xf32>
    %484 = tpu.matmul %482, %483, %cst_199 {dimension_numbers = #tpu.dot_dimension_numbers<[1], [0], [0], [1], [0, 0, 1, 1], [], []>} : vector<8x16xbf16>, vector<16x512xbf16>, vector<8x512xf32> -> vector<8x512xf32>
    %485 = arith.addf %473, %484 : vector<8x512xf32>
    %486 = vector.extract_strided_slice %419 {offsets = [0, 15], sizes = [16, 497], strides = [1, 1]} : vector<16x512xf32> to vector<16x497xf32>
    %487 = vector.extract_strided_slice %419 {offsets = [0, 0], sizes = [16, 15], strides = [1, 1]} : vector<16x512xf32> to vector<16x15xf32>
    %488 = tpu.concatenate %486, %487 in 1 : vector<16x497xf32>, vector<16x15xf32> -> vector<16x512xf32>
    %cst_200 = arith.constant 0.000000e+00 : f32
    %489 = vector.shape_cast %115 : vector<1x512xi1> to vector<1x512xi1>
    %490 = vector.broadcast %489 : vector<1x512xi1> to vector<16x512xi1>
    %491 = vector.broadcast %cst_200 : f32 to vector<16x512xf32>
    %492 = arith.select %490, %488, %491 : vector<16x512xi1>, vector<16x512xf32>
    %c6_201 = arith.constant 6 : index
    %c0_202 = arith.constant 0 : index
    %c0_203 = arith.constant 0 : index
    %493 = vector.load %arg9[%c6_201, %c0_202, %c0_203] : memref<9x8x16xbf16, #tpu.memory_space<vmem>>, vector<1x8x16xbf16>
    %494 = vector.shape_cast %493 : vector<1x8x16xbf16> to vector<8x16xbf16>
    %495 = arith.truncf %492 : vector<16x512xf32> to vector<16x512xbf16>
    %cst_204 = arith.constant dense<0.000000e+00> : vector<8x512xf32>
    %496 = tpu.matmul %494, %495, %cst_204 {dimension_numbers = #tpu.dot_dimension_numbers<[1], [0], [0], [1], [0, 0, 1, 1], [], []>} : vector<8x16xbf16>, vector<16x512xbf16>, vector<8x512xf32> -> vector<8x512xf32>
    %497 = arith.addf %485, %496 : vector<8x512xf32>
    %498 = vector.extract_strided_slice %419 {offsets = [0, 16], sizes = [16, 496], strides = [1, 1]} : vector<16x512xf32> to vector<16x496xf32>
    %499 = vector.extract_strided_slice %419 {offsets = [0, 0], sizes = [16, 16], strides = [1, 1]} : vector<16x512xf32> to vector<16x16xf32>
    %500 = tpu.concatenate %498, %499 in 1 : vector<16x496xf32>, vector<16x16xf32> -> vector<16x512xf32>
    %cst_205 = arith.constant 0.000000e+00 : f32
    %501 = vector.shape_cast %134 : vector<1x512xi1> to vector<1x512xi1>
    %502 = vector.broadcast %501 : vector<1x512xi1> to vector<16x512xi1>
    %503 = vector.broadcast %cst_205 : f32 to vector<16x512xf32>
    %504 = arith.select %502, %500, %503 : vector<16x512xi1>, vector<16x512xf32>
    %c7_206 = arith.constant 7 : index
    %c0_207 = arith.constant 0 : index
    %c0_208 = arith.constant 0 : index
    %505 = vector.load %arg9[%c7_206, %c0_207, %c0_208] : memref<9x8x16xbf16, #tpu.memory_space<vmem>>, vector<1x8x16xbf16>
    %506 = vector.shape_cast %505 : vector<1x8x16xbf16> to vector<8x16xbf16>
    %507 = arith.truncf %504 : vector<16x512xf32> to vector<16x512xbf16>
    %cst_209 = arith.constant dense<0.000000e+00> : vector<8x512xf32>
    %508 = tpu.matmul %506, %507, %cst_209 {dimension_numbers = #tpu.dot_dimension_numbers<[1], [0], [0], [1], [0, 0, 1, 1], [], []>} : vector<8x16xbf16>, vector<16x512xbf16>, vector<8x512xf32> -> vector<8x512xf32>
    %509 = arith.addf %497, %508 : vector<8x512xf32>
    %510 = vector.extract_strided_slice %419 {offsets = [0, 17], sizes = [16, 495], strides = [1, 1]} : vector<16x512xf32> to vector<16x495xf32>
    %511 = vector.extract_strided_slice %419 {offsets = [0, 0], sizes = [16, 17], strides = [1, 1]} : vector<16x512xf32> to vector<16x17xf32>
    %512 = tpu.concatenate %510, %511 in 1 : vector<16x495xf32>, vector<16x17xf32> -> vector<16x512xf32>
    %cst_210 = arith.constant 0.000000e+00 : f32
    %513 = vector.shape_cast %153 : vector<1x512xi1> to vector<1x512xi1>
    %514 = vector.broadcast %513 : vector<1x512xi1> to vector<16x512xi1>
    %515 = vector.broadcast %cst_210 : f32 to vector<16x512xf32>
    %516 = arith.select %514, %512, %515 : vector<16x512xi1>, vector<16x512xf32>
    %c8_211 = arith.constant 8 : index
    %c0_212 = arith.constant 0 : index
    %c0_213 = arith.constant 0 : index
    %517 = vector.load %arg9[%c8_211, %c0_212, %c0_213] : memref<9x8x16xbf16, #tpu.memory_space<vmem>>, vector<1x8x16xbf16>
    %518 = vector.shape_cast %517 : vector<1x8x16xbf16> to vector<8x16xbf16>
    %519 = arith.truncf %516 : vector<16x512xf32> to vector<16x512xbf16>
    %cst_214 = arith.constant dense<0.000000e+00> : vector<8x512xf32>
    %520 = tpu.matmul %518, %519, %cst_214 {dimension_numbers = #tpu.dot_dimension_numbers<[1], [0], [0], [1], [0, 0, 1, 1], [], []>} : vector<8x16xbf16>, vector<16x512xbf16>, vector<8x512xf32> -> vector<8x512xf32>
    %521 = arith.addf %509, %520 : vector<8x512xf32>
    %cst_215 = arith.constant dense<0.000000e+00> : vector<8xf32>
    %522 = vector.multi_reduction <add>, %521, %cst_215 [1] : vector<8x512xf32> to vector<8xf32>
    %523 = vector.shape_cast %522 : vector<8xf32> to vector<8x1xf32>
    %524 = arith.mulf %521, %521 : vector<8x512xf32>
    %cst_216 = arith.constant dense<0.000000e+00> : vector<8xf32>
    %525 = vector.multi_reduction <add>, %524, %cst_216 [1] : vector<8x512xf32> to vector<8xf32>
    %526 = vector.shape_cast %525 : vector<8xf32> to vector<8x1xf32>
    %cst_217 = arith.constant 0.001953125 : f32
    %527 = vector.broadcast %cst_217 : f32 to vector<8x1xf32>
    %528 = arith.mulf %523, %527 : vector<8x1xf32>
    %cst_218 = arith.constant 0.001953125 : f32
    %529 = vector.broadcast %cst_218 : f32 to vector<8x1xf32>
    %530 = arith.mulf %526, %529 : vector<8x1xf32>
    %531 = arith.mulf %528, %528 : vector<8x1xf32>
    %532 = arith.subf %530, %531 : vector<8x1xf32>
    %cst_219 = arith.constant 0.000000e+00 : f32
    %533 = vector.broadcast %cst_219 : f32 to vector<8x1xf32>
    %534 = arith.maximumf %532, %533 : vector<8x1xf32>
    %c0_220 = arith.constant 0 : index
    %c0_221 = arith.constant 0 : index
    %535 = vector.load %arg10[%c0_220, %c0_221] : memref<8x1xf32, #tpu.memory_space<vmem>>, vector<8x1xf32>
    %cst_222 = arith.constant 9.99999974E-6 : f32
    %536 = vector.broadcast %cst_222 : f32 to vector<8x1xf32>
    %537 = arith.addf %534, %536 : vector<8x1xf32>
    %538 = math.rsqrt %537 : vector<8x1xf32>
    %539 = arith.mulf %535, %538 : vector<8x1xf32>
    %c0_223 = arith.constant 0 : index
    %c0_224 = arith.constant 0 : index
    %540 = vector.load %arg11[%c0_223, %c0_224] : memref<8x1xf32, #tpu.memory_space<vmem>>, vector<8x1xf32>
    %541 = arith.mulf %528, %539 : vector<8x1xf32>
    %542 = arith.subf %540, %541 : vector<8x1xf32>
    %543 = vector.broadcast %539 : vector<8x1xf32> to vector<8x512xf32>
    %544 = arith.mulf %521, %543 : vector<8x512xf32>
    %545 = vector.broadcast %542 : vector<8x1xf32> to vector<8x512xf32>
    %546 = arith.addf %544, %545 : vector<8x512xf32>
    %cst_225 = arith.constant 0.000000e+00 : f32
    %547 = vector.broadcast %cst_225 : f32 to vector<8x512xf32>
    %548 = arith.cmpf oge, %546, %547 : vector<8x512xf32>
    %cst_226 = arith.constant 2.000000e-01 : f32
    %549 = vector.broadcast %cst_226 : f32 to vector<8x512xf32>
    %550 = arith.mulf %549, %546 : vector<8x512xf32>
    %551 = arith.select %548, %546, %550 : vector<8x512xi1>, vector<8x512xf32>
    %cst_227 = arith.constant 0.000000e+00 : f32
    %552 = vector.broadcast %cst_227 : f32 to vector<8x512xf32>
    %553 = vector.extract_strided_slice %551 {offsets = [0, 495], sizes = [8, 17], strides = [1, 1]} : vector<8x512xf32> to vector<8x17xf32>
    %554 = vector.extract_strided_slice %551 {offsets = [0, 0], sizes = [8, 495], strides = [1, 1]} : vector<8x512xf32> to vector<8x495xf32>
    %555 = tpu.concatenate %553, %554 in 1 : vector<8x17xf32>, vector<8x495xf32> -> vector<8x512xf32>
    %cst_228 = arith.constant 0.000000e+00 : f32
    %556 = vector.shape_cast %20 : vector<1x512xi1> to vector<1x512xi1>
    %557 = vector.broadcast %556 : vector<1x512xi1> to vector<8x512xi1>
    %558 = vector.broadcast %cst_228 : f32 to vector<8x512xf32>
    %559 = arith.select %557, %555, %558 : vector<8x512xi1>, vector<8x512xf32>
    %c0_229 = arith.constant 0 : index
    %c0_230 = arith.constant 0 : index
    %c0_231 = arith.constant 0 : index
    %560 = vector.load %arg12[%c0_229, %c0_230, %c0_231] : memref<9x8x8xbf16, #tpu.memory_space<vmem>>, vector<1x8x8xbf16>
    %561 = vector.shape_cast %560 : vector<1x8x8xbf16> to vector<8x8xbf16>
    %562 = arith.truncf %559 : vector<8x512xf32> to vector<8x512xbf16>
    %cst_232 = arith.constant dense<0.000000e+00> : vector<8x512xf32>
    %563 = tpu.matmul %561, %562, %cst_232 {dimension_numbers = #tpu.dot_dimension_numbers<[1], [0], [0], [1], [0, 0, 1, 1], [], []>} : vector<8x8xbf16>, vector<8x512xbf16>, vector<8x512xf32> -> vector<8x512xf32>
    %564 = arith.addf %552, %563 : vector<8x512xf32>
    %565 = vector.extract_strided_slice %551 {offsets = [0, 496], sizes = [8, 16], strides = [1, 1]} : vector<8x512xf32> to vector<8x16xf32>
    %566 = vector.extract_strided_slice %551 {offsets = [0, 0], sizes = [8, 496], strides = [1, 1]} : vector<8x512xf32> to vector<8x496xf32>
    %567 = tpu.concatenate %565, %566 in 1 : vector<8x16xf32>, vector<8x496xf32> -> vector<8x512xf32>
    %cst_233 = arith.constant 0.000000e+00 : f32
    %568 = vector.shape_cast %39 : vector<1x512xi1> to vector<1x512xi1>
    %569 = vector.broadcast %568 : vector<1x512xi1> to vector<8x512xi1>
    %570 = vector.broadcast %cst_233 : f32 to vector<8x512xf32>
    %571 = arith.select %569, %567, %570 : vector<8x512xi1>, vector<8x512xf32>
    %c1_234 = arith.constant 1 : index
    %c0_235 = arith.constant 0 : index
    %c0_236 = arith.constant 0 : index
    %572 = vector.load %arg12[%c1_234, %c0_235, %c0_236] : memref<9x8x8xbf16, #tpu.memory_space<vmem>>, vector<1x8x8xbf16>
    %573 = vector.shape_cast %572 : vector<1x8x8xbf16> to vector<8x8xbf16>
    %574 = arith.truncf %571 : vector<8x512xf32> to vector<8x512xbf16>
    %cst_237 = arith.constant dense<0.000000e+00> : vector<8x512xf32>
    %575 = tpu.matmul %573, %574, %cst_237 {dimension_numbers = #tpu.dot_dimension_numbers<[1], [0], [0], [1], [0, 0, 1, 1], [], []>} : vector<8x8xbf16>, vector<8x512xbf16>, vector<8x512xf32> -> vector<8x512xf32>
    %576 = arith.addf %564, %575 : vector<8x512xf32>
    %577 = vector.extract_strided_slice %551 {offsets = [0, 497], sizes = [8, 15], strides = [1, 1]} : vector<8x512xf32> to vector<8x15xf32>
    %578 = vector.extract_strided_slice %551 {offsets = [0, 0], sizes = [8, 497], strides = [1, 1]} : vector<8x512xf32> to vector<8x497xf32>
    %579 = tpu.concatenate %577, %578 in 1 : vector<8x15xf32>, vector<8x497xf32> -> vector<8x512xf32>
    %cst_238 = arith.constant 0.000000e+00 : f32
    %580 = vector.shape_cast %58 : vector<1x512xi1> to vector<1x512xi1>
    %581 = vector.broadcast %580 : vector<1x512xi1> to vector<8x512xi1>
    %582 = vector.broadcast %cst_238 : f32 to vector<8x512xf32>
    %583 = arith.select %581, %579, %582 : vector<8x512xi1>, vector<8x512xf32>
    %c2_239 = arith.constant 2 : index
    %c0_240 = arith.constant 0 : index
    %c0_241 = arith.constant 0 : index
    %584 = vector.load %arg12[%c2_239, %c0_240, %c0_241] : memref<9x8x8xbf16, #tpu.memory_space<vmem>>, vector<1x8x8xbf16>
    %585 = vector.shape_cast %584 : vector<1x8x8xbf16> to vector<8x8xbf16>
    %586 = arith.truncf %583 : vector<8x512xf32> to vector<8x512xbf16>
    %cst_242 = arith.constant dense<0.000000e+00> : vector<8x512xf32>
    %587 = tpu.matmul %585, %586, %cst_242 {dimension_numbers = #tpu.dot_dimension_numbers<[1], [0], [0], [1], [0, 0, 1, 1], [], []>} : vector<8x8xbf16>, vector<8x512xbf16>, vector<8x512xf32> -> vector<8x512xf32>
    %588 = arith.addf %576, %587 : vector<8x512xf32>
    %589 = vector.extract_strided_slice %551 {offsets = [0, 511], sizes = [8, 1], strides = [1, 1]} : vector<8x512xf32> to vector<8x1xf32>
    %590 = vector.extract_strided_slice %551 {offsets = [0, 0], sizes = [8, 511], strides = [1, 1]} : vector<8x512xf32> to vector<8x511xf32>
    %591 = tpu.concatenate %589, %590 in 1 : vector<8x1xf32>, vector<8x511xf32> -> vector<8x512xf32>
    %cst_243 = arith.constant 0.000000e+00 : f32
    %592 = vector.shape_cast %77 : vector<1x512xi1> to vector<1x512xi1>
    %593 = vector.broadcast %592 : vector<1x512xi1> to vector<8x512xi1>
    %594 = vector.broadcast %cst_243 : f32 to vector<8x512xf32>
    %595 = arith.select %593, %591, %594 : vector<8x512xi1>, vector<8x512xf32>
    %c3_244 = arith.constant 3 : index
    %c0_245 = arith.constant 0 : index
    %c0_246 = arith.constant 0 : index
    %596 = vector.load %arg12[%c3_244, %c0_245, %c0_246] : memref<9x8x8xbf16, #tpu.memory_space<vmem>>, vector<1x8x8xbf16>
    %597 = vector.shape_cast %596 : vector<1x8x8xbf16> to vector<8x8xbf16>
    %598 = arith.truncf %595 : vector<8x512xf32> to vector<8x512xbf16>
    %cst_247 = arith.constant dense<0.000000e+00> : vector<8x512xf32>
    %599 = tpu.matmul %597, %598, %cst_247 {dimension_numbers = #tpu.dot_dimension_numbers<[1], [0], [0], [1], [0, 0, 1, 1], [], []>} : vector<8x8xbf16>, vector<8x512xbf16>, vector<8x512xf32> -> vector<8x512xf32>
    %600 = arith.addf %588, %599 : vector<8x512xf32>
    %c4_248 = arith.constant 4 : index
    %c0_249 = arith.constant 0 : index
    %c0_250 = arith.constant 0 : index
    %601 = vector.load %arg12[%c4_248, %c0_249, %c0_250] : memref<9x8x8xbf16, #tpu.memory_space<vmem>>, vector<1x8x8xbf16>
    %602 = vector.shape_cast %601 : vector<1x8x8xbf16> to vector<8x8xbf16>
    %603 = arith.truncf %551 : vector<8x512xf32> to vector<8x512xbf16>
    %cst_251 = arith.constant dense<0.000000e+00> : vector<8x512xf32>
    %604 = tpu.matmul %602, %603, %cst_251 {dimension_numbers = #tpu.dot_dimension_numbers<[1], [0], [0], [1], [0, 0, 1, 1], [], []>} : vector<8x8xbf16>, vector<8x512xbf16>, vector<8x512xf32> -> vector<8x512xf32>
    %605 = arith.addf %600, %604 : vector<8x512xf32>
    %606 = vector.extract_strided_slice %551 {offsets = [0, 1], sizes = [8, 511], strides = [1, 1]} : vector<8x512xf32> to vector<8x511xf32>
    %607 = vector.extract_strided_slice %551 {offsets = [0, 0], sizes = [8, 1], strides = [1, 1]} : vector<8x512xf32> to vector<8x1xf32>
    %608 = tpu.concatenate %606, %607 in 1 : vector<8x511xf32>, vector<8x1xf32> -> vector<8x512xf32>
    %cst_252 = arith.constant 0.000000e+00 : f32
    %609 = vector.shape_cast %96 : vector<1x512xi1> to vector<1x512xi1>
    %610 = vector.broadcast %609 : vector<1x512xi1> to vector<8x512xi1>
    %611 = vector.broadcast %cst_252 : f32 to vector<8x512xf32>
    %612 = arith.select %610, %608, %611 : vector<8x512xi1>, vector<8x512xf32>
    %c5_253 = arith.constant 5 : index
    %c0_254 = arith.constant 0 : index
    %c0_255 = arith.constant 0 : index
    %613 = vector.load %arg12[%c5_253, %c0_254, %c0_255] : memref<9x8x8xbf16, #tpu.memory_space<vmem>>, vector<1x8x8xbf16>
    %614 = vector.shape_cast %613 : vector<1x8x8xbf16> to vector<8x8xbf16>
    %615 = arith.truncf %612 : vector<8x512xf32> to vector<8x512xbf16>
    %cst_256 = arith.constant dense<0.000000e+00> : vector<8x512xf32>
    %616 = tpu.matmul %614, %615, %cst_256 {dimension_numbers = #tpu.dot_dimension_numbers<[1], [0], [0], [1], [0, 0, 1, 1], [], []>} : vector<8x8xbf16>, vector<8x512xbf16>, vector<8x512xf32> -> vector<8x512xf32>
    %617 = arith.addf %605, %616 : vector<8x512xf32>
    %618 = vector.extract_strided_slice %551 {offsets = [0, 15], sizes = [8, 497], strides = [1, 1]} : vector<8x512xf32> to vector<8x497xf32>
    %619 = vector.extract_strided_slice %551 {offsets = [0, 0], sizes = [8, 15], strides = [1, 1]} : vector<8x512xf32> to vector<8x15xf32>
    %620 = tpu.concatenate %618, %619 in 1 : vector<8x497xf32>, vector<8x15xf32> -> vector<8x512xf32>
    %cst_257 = arith.constant 0.000000e+00 : f32
    %621 = vector.shape_cast %115 : vector<1x512xi1> to vector<1x512xi1>
    %622 = vector.broadcast %621 : vector<1x512xi1> to vector<8x512xi1>
    %623 = vector.broadcast %cst_257 : f32 to vector<8x512xf32>
    %624 = arith.select %622, %620, %623 : vector<8x512xi1>, vector<8x512xf32>
    %c6_258 = arith.constant 6 : index
    %c0_259 = arith.constant 0 : index
    %c0_260 = arith.constant 0 : index
    %625 = vector.load %arg12[%c6_258, %c0_259, %c0_260] : memref<9x8x8xbf16, #tpu.memory_space<vmem>>, vector<1x8x8xbf16>
    %626 = vector.shape_cast %625 : vector<1x8x8xbf16> to vector<8x8xbf16>
    %627 = arith.truncf %624 : vector<8x512xf32> to vector<8x512xbf16>
    %cst_261 = arith.constant dense<0.000000e+00> : vector<8x512xf32>
    %628 = tpu.matmul %626, %627, %cst_261 {dimension_numbers = #tpu.dot_dimension_numbers<[1], [0], [0], [1], [0, 0, 1, 1], [], []>} : vector<8x8xbf16>, vector<8x512xbf16>, vector<8x512xf32> -> vector<8x512xf32>
    %629 = arith.addf %617, %628 : vector<8x512xf32>
    %630 = vector.extract_strided_slice %551 {offsets = [0, 16], sizes = [8, 496], strides = [1, 1]} : vector<8x512xf32> to vector<8x496xf32>
    %631 = vector.extract_strided_slice %551 {offsets = [0, 0], sizes = [8, 16], strides = [1, 1]} : vector<8x512xf32> to vector<8x16xf32>
    %632 = tpu.concatenate %630, %631 in 1 : vector<8x496xf32>, vector<8x16xf32> -> vector<8x512xf32>
    %cst_262 = arith.constant 0.000000e+00 : f32
    %633 = vector.shape_cast %134 : vector<1x512xi1> to vector<1x512xi1>
    %634 = vector.broadcast %633 : vector<1x512xi1> to vector<8x512xi1>
    %635 = vector.broadcast %cst_262 : f32 to vector<8x512xf32>
    %636 = arith.select %634, %632, %635 : vector<8x512xi1>, vector<8x512xf32>
    %c7_263 = arith.constant 7 : index
    %c0_264 = arith.constant 0 : index
    %c0_265 = arith.constant 0 : index
    %637 = vector.load %arg12[%c7_263, %c0_264, %c0_265] : memref<9x8x8xbf16, #tpu.memory_space<vmem>>, vector<1x8x8xbf16>
    %638 = vector.shape_cast %637 : vector<1x8x8xbf16> to vector<8x8xbf16>
    %639 = arith.truncf %636 : vector<8x512xf32> to vector<8x512xbf16>
    %cst_266 = arith.constant dense<0.000000e+00> : vector<8x512xf32>
    %640 = tpu.matmul %638, %639, %cst_266 {dimension_numbers = #tpu.dot_dimension_numbers<[1], [0], [0], [1], [0, 0, 1, 1], [], []>} : vector<8x8xbf16>, vector<8x512xbf16>, vector<8x512xf32> -> vector<8x512xf32>
    %641 = arith.addf %629, %640 : vector<8x512xf32>
    %642 = vector.extract_strided_slice %551 {offsets = [0, 17], sizes = [8, 495], strides = [1, 1]} : vector<8x512xf32> to vector<8x495xf32>
    %643 = vector.extract_strided_slice %551 {offsets = [0, 0], sizes = [8, 17], strides = [1, 1]} : vector<8x512xf32> to vector<8x17xf32>
    %644 = tpu.concatenate %642, %643 in 1 : vector<8x495xf32>, vector<8x17xf32> -> vector<8x512xf32>
    %cst_267 = arith.constant 0.000000e+00 : f32
    %645 = vector.shape_cast %153 : vector<1x512xi1> to vector<1x512xi1>
    %646 = vector.broadcast %645 : vector<1x512xi1> to vector<8x512xi1>
    %647 = vector.broadcast %cst_267 : f32 to vector<8x512xf32>
    %648 = arith.select %646, %644, %647 : vector<8x512xi1>, vector<8x512xf32>
    %c8_268 = arith.constant 8 : index
    %c0_269 = arith.constant 0 : index
    %c0_270 = arith.constant 0 : index
    %649 = vector.load %arg12[%c8_268, %c0_269, %c0_270] : memref<9x8x8xbf16, #tpu.memory_space<vmem>>, vector<1x8x8xbf16>
    %650 = vector.shape_cast %649 : vector<1x8x8xbf16> to vector<8x8xbf16>
    %651 = arith.truncf %648 : vector<8x512xf32> to vector<8x512xbf16>
    %cst_271 = arith.constant dense<0.000000e+00> : vector<8x512xf32>
    %652 = tpu.matmul %650, %651, %cst_271 {dimension_numbers = #tpu.dot_dimension_numbers<[1], [0], [0], [1], [0, 0, 1, 1], [], []>} : vector<8x8xbf16>, vector<8x512xbf16>, vector<8x512xf32> -> vector<8x512xf32>
    %653 = arith.addf %641, %652 : vector<8x512xf32>
    %cst_272 = arith.constant dense<0.000000e+00> : vector<8xf32>
    %654 = vector.multi_reduction <add>, %653, %cst_272 [1] : vector<8x512xf32> to vector<8xf32>
    %655 = vector.shape_cast %654 : vector<8xf32> to vector<8x1xf32>
    %656 = arith.mulf %653, %653 : vector<8x512xf32>
    %cst_273 = arith.constant dense<0.000000e+00> : vector<8xf32>
    %657 = vector.multi_reduction <add>, %656, %cst_273 [1] : vector<8x512xf32> to vector<8xf32>
    %658 = vector.shape_cast %657 : vector<8xf32> to vector<8x1xf32>
    %cst_274 = arith.constant 0.001953125 : f32
    %659 = vector.broadcast %cst_274 : f32 to vector<8x1xf32>
    %660 = arith.mulf %655, %659 : vector<8x1xf32>
    %cst_275 = arith.constant 0.001953125 : f32
    %661 = vector.broadcast %cst_275 : f32 to vector<8x1xf32>
    %662 = arith.mulf %658, %661 : vector<8x1xf32>
    %663 = arith.mulf %660, %660 : vector<8x1xf32>
    %664 = arith.subf %662, %663 : vector<8x1xf32>
    %cst_276 = arith.constant 0.000000e+00 : f32
    %665 = vector.broadcast %cst_276 : f32 to vector<8x1xf32>
    %666 = arith.maximumf %664, %665 : vector<8x1xf32>
    %c0_277 = arith.constant 0 : index
    %c0_278 = arith.constant 0 : index
    %667 = vector.load %arg13[%c0_277, %c0_278] : memref<8x1xf32, #tpu.memory_space<vmem>>, vector<8x1xf32>
    %cst_279 = arith.constant 9.99999974E-6 : f32
    %668 = vector.broadcast %cst_279 : f32 to vector<8x1xf32>
    %669 = arith.addf %666, %668 : vector<8x1xf32>
    %670 = math.rsqrt %669 : vector<8x1xf32>
    %671 = arith.mulf %667, %670 : vector<8x1xf32>
    %c0_280 = arith.constant 0 : index
    %c0_281 = arith.constant 0 : index
    %672 = vector.load %arg14[%c0_280, %c0_281] : memref<8x1xf32, #tpu.memory_space<vmem>>, vector<8x1xf32>
    %673 = arith.mulf %660, %671 : vector<8x1xf32>
    %674 = arith.subf %672, %673 : vector<8x1xf32>
    %675 = vector.broadcast %671 : vector<8x1xf32> to vector<8x512xf32>
    %676 = arith.mulf %653, %675 : vector<8x512xf32>
    %677 = vector.broadcast %674 : vector<8x1xf32> to vector<8x512xf32>
    %678 = arith.addf %676, %677 : vector<8x512xf32>
    %cst_282 = arith.constant 0.000000e+00 : f32
    %679 = vector.broadcast %cst_282 : f32 to vector<8x512xf32>
    %680 = arith.cmpf oge, %678, %679 : vector<8x512xf32>
    %cst_283 = arith.constant 2.000000e-01 : f32
    %681 = vector.broadcast %cst_283 : f32 to vector<8x512xf32>
    %682 = arith.mulf %681, %678 : vector<8x512xf32>
    %683 = arith.select %680, %678, %682 : vector<8x512xi1>, vector<8x512xf32>
    %cst_284 = arith.constant 0.000000e+00 : f32
    %684 = vector.broadcast %cst_284 : f32 to vector<8x512xf32>
    %685 = vector.extract_strided_slice %683 {offsets = [0, 495], sizes = [8, 17], strides = [1, 1]} : vector<8x512xf32> to vector<8x17xf32>
    %686 = vector.extract_strided_slice %683 {offsets = [0, 0], sizes = [8, 495], strides = [1, 1]} : vector<8x512xf32> to vector<8x495xf32>
    %687 = tpu.concatenate %685, %686 in 1 : vector<8x17xf32>, vector<8x495xf32> -> vector<8x512xf32>
    %cst_285 = arith.constant 0.000000e+00 : f32
    %688 = vector.shape_cast %20 : vector<1x512xi1> to vector<1x512xi1>
    %689 = vector.broadcast %688 : vector<1x512xi1> to vector<8x512xi1>
    %690 = vector.broadcast %cst_285 : f32 to vector<8x512xf32>
    %691 = arith.select %689, %687, %690 : vector<8x512xi1>, vector<8x512xf32>
    %c0_286 = arith.constant 0 : index
    %c0_287 = arith.constant 0 : index
    %c0_288 = arith.constant 0 : index
    %692 = vector.load %arg15[%c0_286, %c0_287, %c0_288] : memref<9x8x8xbf16, #tpu.memory_space<vmem>>, vector<1x8x8xbf16>
    %693 = vector.shape_cast %692 : vector<1x8x8xbf16> to vector<8x8xbf16>
    %694 = arith.truncf %691 : vector<8x512xf32> to vector<8x512xbf16>
    %cst_289 = arith.constant dense<0.000000e+00> : vector<8x512xf32>
    %695 = tpu.matmul %693, %694, %cst_289 {dimension_numbers = #tpu.dot_dimension_numbers<[1], [0], [0], [1], [0, 0, 1, 1], [], []>} : vector<8x8xbf16>, vector<8x512xbf16>, vector<8x512xf32> -> vector<8x512xf32>
    %696 = arith.addf %684, %695 : vector<8x512xf32>
    %697 = vector.extract_strided_slice %683 {offsets = [0, 496], sizes = [8, 16], strides = [1, 1]} : vector<8x512xf32> to vector<8x16xf32>
    %698 = vector.extract_strided_slice %683 {offsets = [0, 0], sizes = [8, 496], strides = [1, 1]} : vector<8x512xf32> to vector<8x496xf32>
    %699 = tpu.concatenate %697, %698 in 1 : vector<8x16xf32>, vector<8x496xf32> -> vector<8x512xf32>
    %cst_290 = arith.constant 0.000000e+00 : f32
    %700 = vector.shape_cast %39 : vector<1x512xi1> to vector<1x512xi1>
    %701 = vector.broadcast %700 : vector<1x512xi1> to vector<8x512xi1>
    %702 = vector.broadcast %cst_290 : f32 to vector<8x512xf32>
    %703 = arith.select %701, %699, %702 : vector<8x512xi1>, vector<8x512xf32>
    %c1_291 = arith.constant 1 : index
    %c0_292 = arith.constant 0 : index
    %c0_293 = arith.constant 0 : index
    %704 = vector.load %arg15[%c1_291, %c0_292, %c0_293] : memref<9x8x8xbf16, #tpu.memory_space<vmem>>, vector<1x8x8xbf16>
    %705 = vector.shape_cast %704 : vector<1x8x8xbf16> to vector<8x8xbf16>
    %706 = arith.truncf %703 : vector<8x512xf32> to vector<8x512xbf16>
    %cst_294 = arith.constant dense<0.000000e+00> : vector<8x512xf32>
    %707 = tpu.matmul %705, %706, %cst_294 {dimension_numbers = #tpu.dot_dimension_numbers<[1], [0], [0], [1], [0, 0, 1, 1], [], []>} : vector<8x8xbf16>, vector<8x512xbf16>, vector<8x512xf32> -> vector<8x512xf32>
    %708 = arith.addf %696, %707 : vector<8x512xf32>
    %709 = vector.extract_strided_slice %683 {offsets = [0, 497], sizes = [8, 15], strides = [1, 1]} : vector<8x512xf32> to vector<8x15xf32>
    %710 = vector.extract_strided_slice %683 {offsets = [0, 0], sizes = [8, 497], strides = [1, 1]} : vector<8x512xf32> to vector<8x497xf32>
    %711 = tpu.concatenate %709, %710 in 1 : vector<8x15xf32>, vector<8x497xf32> -> vector<8x512xf32>
    %cst_295 = arith.constant 0.000000e+00 : f32
    %712 = vector.shape_cast %58 : vector<1x512xi1> to vector<1x512xi1>
    %713 = vector.broadcast %712 : vector<1x512xi1> to vector<8x512xi1>
    %714 = vector.broadcast %cst_295 : f32 to vector<8x512xf32>
    %715 = arith.select %713, %711, %714 : vector<8x512xi1>, vector<8x512xf32>
    %c2_296 = arith.constant 2 : index
    %c0_297 = arith.constant 0 : index
    %c0_298 = arith.constant 0 : index
    %716 = vector.load %arg15[%c2_296, %c0_297, %c0_298] : memref<9x8x8xbf16, #tpu.memory_space<vmem>>, vector<1x8x8xbf16>
    %717 = vector.shape_cast %716 : vector<1x8x8xbf16> to vector<8x8xbf16>
    %718 = arith.truncf %715 : vector<8x512xf32> to vector<8x512xbf16>
    %cst_299 = arith.constant dense<0.000000e+00> : vector<8x512xf32>
    %719 = tpu.matmul %717, %718, %cst_299 {dimension_numbers = #tpu.dot_dimension_numbers<[1], [0], [0], [1], [0, 0, 1, 1], [], []>} : vector<8x8xbf16>, vector<8x512xbf16>, vector<8x512xf32> -> vector<8x512xf32>
    %720 = arith.addf %708, %719 : vector<8x512xf32>
    %721 = vector.extract_strided_slice %683 {offsets = [0, 511], sizes = [8, 1], strides = [1, 1]} : vector<8x512xf32> to vector<8x1xf32>
    %722 = vector.extract_strided_slice %683 {offsets = [0, 0], sizes = [8, 511], strides = [1, 1]} : vector<8x512xf32> to vector<8x511xf32>
    %723 = tpu.concatenate %721, %722 in 1 : vector<8x1xf32>, vector<8x511xf32> -> vector<8x512xf32>
    %cst_300 = arith.constant 0.000000e+00 : f32
    %724 = vector.shape_cast %77 : vector<1x512xi1> to vector<1x512xi1>
    %725 = vector.broadcast %724 : vector<1x512xi1> to vector<8x512xi1>
    %726 = vector.broadcast %cst_300 : f32 to vector<8x512xf32>
    %727 = arith.select %725, %723, %726 : vector<8x512xi1>, vector<8x512xf32>
    %c3_301 = arith.constant 3 : index
    %c0_302 = arith.constant 0 : index
    %c0_303 = arith.constant 0 : index
    %728 = vector.load %arg15[%c3_301, %c0_302, %c0_303] : memref<9x8x8xbf16, #tpu.memory_space<vmem>>, vector<1x8x8xbf16>
    %729 = vector.shape_cast %728 : vector<1x8x8xbf16> to vector<8x8xbf16>
    %730 = arith.truncf %727 : vector<8x512xf32> to vector<8x512xbf16>
    %cst_304 = arith.constant dense<0.000000e+00> : vector<8x512xf32>
    %731 = tpu.matmul %729, %730, %cst_304 {dimension_numbers = #tpu.dot_dimension_numbers<[1], [0], [0], [1], [0, 0, 1, 1], [], []>} : vector<8x8xbf16>, vector<8x512xbf16>, vector<8x512xf32> -> vector<8x512xf32>
    %732 = arith.addf %720, %731 : vector<8x512xf32>
    %c4_305 = arith.constant 4 : index
    %c0_306 = arith.constant 0 : index
    %c0_307 = arith.constant 0 : index
    %733 = vector.load %arg15[%c4_305, %c0_306, %c0_307] : memref<9x8x8xbf16, #tpu.memory_space<vmem>>, vector<1x8x8xbf16>
    %734 = vector.shape_cast %733 : vector<1x8x8xbf16> to vector<8x8xbf16>
    %735 = arith.truncf %683 : vector<8x512xf32> to vector<8x512xbf16>
    %cst_308 = arith.constant dense<0.000000e+00> : vector<8x512xf32>
    %736 = tpu.matmul %734, %735, %cst_308 {dimension_numbers = #tpu.dot_dimension_numbers<[1], [0], [0], [1], [0, 0, 1, 1], [], []>} : vector<8x8xbf16>, vector<8x512xbf16>, vector<8x512xf32> -> vector<8x512xf32>
    %737 = arith.addf %732, %736 : vector<8x512xf32>
    %738 = vector.extract_strided_slice %683 {offsets = [0, 1], sizes = [8, 511], strides = [1, 1]} : vector<8x512xf32> to vector<8x511xf32>
    %739 = vector.extract_strided_slice %683 {offsets = [0, 0], sizes = [8, 1], strides = [1, 1]} : vector<8x512xf32> to vector<8x1xf32>
    %740 = tpu.concatenate %738, %739 in 1 : vector<8x511xf32>, vector<8x1xf32> -> vector<8x512xf32>
    %cst_309 = arith.constant 0.000000e+00 : f32
    %741 = vector.shape_cast %96 : vector<1x512xi1> to vector<1x512xi1>
    %742 = vector.broadcast %741 : vector<1x512xi1> to vector<8x512xi1>
    %743 = vector.broadcast %cst_309 : f32 to vector<8x512xf32>
    %744 = arith.select %742, %740, %743 : vector<8x512xi1>, vector<8x512xf32>
    %c5_310 = arith.constant 5 : index
    %c0_311 = arith.constant 0 : index
    %c0_312 = arith.constant 0 : index
    %745 = vector.load %arg15[%c5_310, %c0_311, %c0_312] : memref<9x8x8xbf16, #tpu.memory_space<vmem>>, vector<1x8x8xbf16>
    %746 = vector.shape_cast %745 : vector<1x8x8xbf16> to vector<8x8xbf16>
    %747 = arith.truncf %744 : vector<8x512xf32> to vector<8x512xbf16>
    %cst_313 = arith.constant dense<0.000000e+00> : vector<8x512xf32>
    %748 = tpu.matmul %746, %747, %cst_313 {dimension_numbers = #tpu.dot_dimension_numbers<[1], [0], [0], [1], [0, 0, 1, 1], [], []>} : vector<8x8xbf16>, vector<8x512xbf16>, vector<8x512xf32> -> vector<8x512xf32>
    %749 = arith.addf %737, %748 : vector<8x512xf32>
    %750 = vector.extract_strided_slice %683 {offsets = [0, 15], sizes = [8, 497], strides = [1, 1]} : vector<8x512xf32> to vector<8x497xf32>
    %751 = vector.extract_strided_slice %683 {offsets = [0, 0], sizes = [8, 15], strides = [1, 1]} : vector<8x512xf32> to vector<8x15xf32>
    %752 = tpu.concatenate %750, %751 in 1 : vector<8x497xf32>, vector<8x15xf32> -> vector<8x512xf32>
    %cst_314 = arith.constant 0.000000e+00 : f32
    %753 = vector.shape_cast %115 : vector<1x512xi1> to vector<1x512xi1>
    %754 = vector.broadcast %753 : vector<1x512xi1> to vector<8x512xi1>
    %755 = vector.broadcast %cst_314 : f32 to vector<8x512xf32>
    %756 = arith.select %754, %752, %755 : vector<8x512xi1>, vector<8x512xf32>
    %c6_315 = arith.constant 6 : index
    %c0_316 = arith.constant 0 : index
    %c0_317 = arith.constant 0 : index
    %757 = vector.load %arg15[%c6_315, %c0_316, %c0_317] : memref<9x8x8xbf16, #tpu.memory_space<vmem>>, vector<1x8x8xbf16>
    %758 = vector.shape_cast %757 : vector<1x8x8xbf16> to vector<8x8xbf16>
    %759 = arith.truncf %756 : vector<8x512xf32> to vector<8x512xbf16>
    %cst_318 = arith.constant dense<0.000000e+00> : vector<8x512xf32>
    %760 = tpu.matmul %758, %759, %cst_318 {dimension_numbers = #tpu.dot_dimension_numbers<[1], [0], [0], [1], [0, 0, 1, 1], [], []>} : vector<8x8xbf16>, vector<8x512xbf16>, vector<8x512xf32> -> vector<8x512xf32>
    %761 = arith.addf %749, %760 : vector<8x512xf32>
    %762 = vector.extract_strided_slice %683 {offsets = [0, 16], sizes = [8, 496], strides = [1, 1]} : vector<8x512xf32> to vector<8x496xf32>
    %763 = vector.extract_strided_slice %683 {offsets = [0, 0], sizes = [8, 16], strides = [1, 1]} : vector<8x512xf32> to vector<8x16xf32>
    %764 = tpu.concatenate %762, %763 in 1 : vector<8x496xf32>, vector<8x16xf32> -> vector<8x512xf32>
    %cst_319 = arith.constant 0.000000e+00 : f32
    %765 = vector.shape_cast %134 : vector<1x512xi1> to vector<1x512xi1>
    %766 = vector.broadcast %765 : vector<1x512xi1> to vector<8x512xi1>
    %767 = vector.broadcast %cst_319 : f32 to vector<8x512xf32>
    %768 = arith.select %766, %764, %767 : vector<8x512xi1>, vector<8x512xf32>
    %c7_320 = arith.constant 7 : index
    %c0_321 = arith.constant 0 : index
    %c0_322 = arith.constant 0 : index
    %769 = vector.load %arg15[%c7_320, %c0_321, %c0_322] : memref<9x8x8xbf16, #tpu.memory_space<vmem>>, vector<1x8x8xbf16>
    %770 = vector.shape_cast %769 : vector<1x8x8xbf16> to vector<8x8xbf16>
    %771 = arith.truncf %768 : vector<8x512xf32> to vector<8x512xbf16>
    %cst_323 = arith.constant dense<0.000000e+00> : vector<8x512xf32>
    %772 = tpu.matmul %770, %771, %cst_323 {dimension_numbers = #tpu.dot_dimension_numbers<[1], [0], [0], [1], [0, 0, 1, 1], [], []>} : vector<8x8xbf16>, vector<8x512xbf16>, vector<8x512xf32> -> vector<8x512xf32>
    %773 = arith.addf %761, %772 : vector<8x512xf32>
    %774 = vector.extract_strided_slice %683 {offsets = [0, 17], sizes = [8, 495], strides = [1, 1]} : vector<8x512xf32> to vector<8x495xf32>
    %775 = vector.extract_strided_slice %683 {offsets = [0, 0], sizes = [8, 17], strides = [1, 1]} : vector<8x512xf32> to vector<8x17xf32>
    %776 = tpu.concatenate %774, %775 in 1 : vector<8x495xf32>, vector<8x17xf32> -> vector<8x512xf32>
    %cst_324 = arith.constant 0.000000e+00 : f32
    %777 = vector.shape_cast %153 : vector<1x512xi1> to vector<1x512xi1>
    %778 = vector.broadcast %777 : vector<1x512xi1> to vector<8x512xi1>
    %779 = vector.broadcast %cst_324 : f32 to vector<8x512xf32>
    %780 = arith.select %778, %776, %779 : vector<8x512xi1>, vector<8x512xf32>
    %c8_325 = arith.constant 8 : index
    %c0_326 = arith.constant 0 : index
    %c0_327 = arith.constant 0 : index
    %781 = vector.load %arg15[%c8_325, %c0_326, %c0_327] : memref<9x8x8xbf16, #tpu.memory_space<vmem>>, vector<1x8x8xbf16>
    %782 = vector.shape_cast %781 : vector<1x8x8xbf16> to vector<8x8xbf16>
    %783 = arith.truncf %780 : vector<8x512xf32> to vector<8x512xbf16>
    %cst_328 = arith.constant dense<0.000000e+00> : vector<8x512xf32>
    %784 = tpu.matmul %782, %783, %cst_328 {dimension_numbers = #tpu.dot_dimension_numbers<[1], [0], [0], [1], [0, 0, 1, 1], [], []>} : vector<8x8xbf16>, vector<8x512xbf16>, vector<8x512xf32> -> vector<8x512xf32>
    %785 = arith.addf %773, %784 : vector<8x512xf32>
    %c0_329 = arith.constant 0 : index
    %c0_330 = arith.constant 0 : index
    %786 = vector.load %arg16[%c0_329, %c0_330] : memref<8x1xf32, #tpu.memory_space<vmem>>, vector<8x1xf32>
    %787 = vector.broadcast %786 : vector<8x1xf32> to vector<8x512xf32>
    %788 = arith.addf %785, %787 : vector<8x512xf32>
    %c0_331 = arith.constant 0 : index
    %c0_332 = arith.constant 0 : index
    %789 = vector.load %arg17[%c0_331, %c0_332] : memref<8x512xf32, #tpu.memory_space<vmem>>, vector<8x512xf32>
    tpu.vector_store %arg17[%c0_331, %c0_332], %788 {strides = array<i32>} : memref<8x512xf32, #tpu.memory_space<vmem>>, vector<8x512xf32>,
    return
  }
}

</mosaic_0001>

<bundles_post_ra>
// kernel: tpu_custom_call.1
= control target key start
LH: loop header
LB: loop body
LE: loop exit
PB: predicated region body
PF: predicated region fallthrough
CT: control target
= control target key end

     0   :  { %s11814_s0 = inlined_call_operand.vmem [shape: s32[1,512], index: 0, kind: input, shape index: {}]   ;;  %s11815_s1 = inlined_call_operand.vmem [shape: s32[1,512], index: 1, kind: input, shape index: {}]   ;;  %s11816_s2 = inlined_call_operand.vmem [shape: bf16[4,512], index: 2, kind: input, shape index: {}]   ;;  %s11817_s3 = inlined_call_operand.vmem [shape: bf16[9,32,4], index: 3, kind: input, shape index: {}]   ;;  %s11818_s4 = inlined_call_operand.vmem [shape: f32[32,1], index: 4, kind: input, shape index: {}]   ;;  %s11819_s5 = inlined_call_operand.vmem [shape: f32[32,1], index: 5, kind: input, shape index: {}]   ;;  %s11820_s6 = inlined_call_operand.vmem [shape: bf16[9,16,32], index: 6, kind: input, shape index: {}]   ;;  %s11821_s7 = inlined_call_operand.vmem [shape: f32[16,1], index: 7, kind: input, shape index: {}]   ;;  %s11822_s8 = inlined_call_operand.vmem [shape: f32[16,1], index: 8, kind: input, shape index: {}]   ;;  %s11823_s9 = inlined_call_operand.vmem [shape: bf16[9,8,16], index: 9, kind: input, shape index: {}]   ;;  %s11824_s10 = inlined_call_operand.vmem [shape: f32[8,1], index: 10, kind: input, shape index: {}]   ;;  %s11825_s11 = inlined_call_operand.vmem [shape: f32[8,1], index: 11, kind: input, shape index: {}]   ;;  %s11826_s12 = inlined_call_operand.vmem [shape: bf16[9,8,8], index: 12, kind: input, shape index: {}]   ;;  %s11827_s13 = inlined_call_operand.vmem [shape: f32[8,1], index: 13, kind: input, shape index: {}]   ;;  %s11828_s14 = inlined_call_operand.vmem [shape: f32[8,1], index: 14, kind: input, shape index: {}]   ;;  %s11829_s15 = inlined_call_operand.vmem [shape: bf16[9,8,8], index: 15, kind: input, shape index: {}]   ;;  %s11830_s16 = inlined_call_operand.vmem [shape: f32[8,1], index: 16, kind: input, shape index: {}]   ;;  %s11831_s17 = inlined_call_operand.hbm [shape: f32[8,512], index: 17, kind: output, shape index: {}]  }
   0x1   :  { %12043 = sst [smem:[#allocation74_spill]] %s11814_s0 }
   0x2   :  { %12044 = sst [smem:[#allocation75_spill]] %s11815_s1 }
   0x3   :  { %v8836_v0 = vld [vmem:[%s11816_s2] sm:$0xff]  ;;  %s12045_s28 = sld [smem:[#allocation74_spill]]  ;;  %s8732_s2 = smov 16   ;;  %v11884_v7 = vmov 0  }
   0x4   :  { %v91_v2 = vunpack.c.l.bf16 %v8836_v0  ;;  %v92_v3 = vunpack.c.h.bf16 %v8836_v0  ;;  %s12046_s30 = sld [smem:[#allocation75_spill]]  ;;  %262 = vmatprep.mubr.bf16.mxu0 %v11884_v7  ;;  %315 = vmatprep.mubr.bf16.mxu1 %v11884_v7  ;;  %s8734_s18 = smov 17  }
   0x5   :  { %8064 = vset.pattern.permute.xlu1 %v11884_v7  ;;  %8065 = vset.pattern.permute.xlu0 %v11884_v7  ;;  %s8735_s19 = smov 15   ;;  %s8736_s1 = smov 1  }
   0x6   :  { %v94_v6 = vcombine.high %v92_v3, %v92_v3  ;;  %155 = vrot.lane.b32.xlu1 %v92_v3, %s8732_s2  ;;  %v99_v11 = vcombine.high %v91_v2, %v91_v2  ;;  %s8737_s20 = smov 127   ;;  %s8738_s21 = smov 113  }
   0x8   :  { %v8024_v8 = vpack.i.bf16 %v91_v2, %v94_v6  ;;  %v8044_v12 = vpack.i.bf16 %v99_v11, %v91_v2 }
   0x9   :  { %v8841_v1 = vld [vmem:[%s12045_s28] sm:$0xf] }
   0xa   :  { %v8848_v4 = vld [vmem:[%s12046_s30] sm:$0xf]  ;;  %v83_v5 = vadd.s32 1, %v8841_v1  ;;  %8025 = vrot.lane.b32.xlu0 %v8024_v8, %s8732_s2  ;;  %8030 = vrot.lane.b32.xlu1 %v8024_v8, %s8734_s18 }
   0xb   :  { %vm69_vm0 = vcmp.ge.s32.totalorder %v8848_v4, 0  ;;  %vm70_vm1 = vcmp.lt.s32.totalorder %v8848_v4, 16 }
   0xc   :  { %vm84_vm2 = vcmp.ge.s32.totalorder %v83_v5, 0  ;;  %vm85_vm3 = vcmp.lt.s32.totalorder %v83_v5, 16  ;;  %vm8857_vm4 = vmand %vm69_vm0, %vm70_vm1 }
   0xd   :  { %vm8862_vm5 = vmand %vm84_vm2, %vm85_vm3 }
   0xe   :  { %153 = vrot.lane.b32.xlu0 %v99_v11, %s8732_s2  ;;  %104 = vrot.lane.b32.xlu1 %v92_v3, %s8734_s18 }
  0x12   :  { %102 = vrot.lane.b32.xlu0 %v99_v11, %s8734_s18  ;;  %475 = vrot.lane.b32.xlu1 %v99_v11, %s8735_s19 }
  0x16   :  { %8035 = vrot.lane.b32.xlu0 %v8024_v8, %s8735_s19  ;;  %8040 = vrot.lane.b32.xlu1 %v8024_v8, %s8736_s1 }
  0x1a   :  { %477 = vrot.lane.b32.xlu0 %v92_v3, %s8735_s19  ;;  %679 = vrot.lane.b32.xlu1 %v92_v3, %s8736_s1 }
  0x1e   :  { %677 = vrot.lane.b32.xlu0 %v99_v11, %s8736_s1  ;;  %1051 = vrot.lane.b32.xlu1 %v92_v3, %s8737_s20 }
  0x22   :  { %8045 = vrot.lane.b32.xlu0 %v8044_v12, %s8737_s20  ;;  %8050 = vrot.lane.b32.xlu1 %v8044_v12, %s8738_s21 }
  0x23   :  { %22 = vsyncpa [#allocation3], 0  ;;  %s8739_s22 = smov 112   ;;  %s8740_s23 = smov 111   ;;  %v60_v13 = vadd.s32 4294967295, %v8841_v1  ;;  %v64_v14 = vadd.s32 4294967295, %v8848_v4  ;;  %v116_v15 = vlaneseq }
  0x24   :  { %v73_v20 = vadd.s32 1, %v8848_v4  ;;  %vm11832_vm2 = vcmask 130048   ;;  %v12057_v34 = vmov 0  ;;  %v12060_v36 = vmov 0  ;;  %v8666_v16 = vld [vmem:[%s11817_s3 + $0x10] sm:$0xff]   ;;  %v8678_v33 = vld [vmem:[%s11817_s3 + $0x58] sm:$0xff]  }
  0x25   :  { %vm61_vm7 = vcmp.ge.s32.totalorder %v60_v13, 0  ;;  %vm62_vm8 = vcmp.lt.s32.totalorder %v60_v13, 16  ;;  %vm65_vm9 = vcmp.ge.s32.totalorder %v64_v14, 0  ;;  %vm66_vm10 = vcmp.lt.s32.totalorder %v64_v14, 16 }
  0x26   :  { %1053 = vrot.lane.b32.xlu0 %v94_v6, %s8737_s20  ;;  %1255 = vrot.lane.b32.xlu1 %v94_v6, %s8738_s21  ;;  %vm8895_vm11 = vmand %vm61_vm7, %vm62_vm8  ;;  %v8899_v17 = vshrl.u32 %v116_v15, 7  ;;  %vm74_vm15 = vcmp.ge.s32.totalorder %v73_v20, 0  ;;  %vm75_vm0 = vcmp.lt.s32.totalorder %v73_v20, 16  ;;  %vm11833_vm8 = vcmask 138240  }
  0x27   :  { %vm8901_vm12 = vmand %vm65_vm9, %vm66_vm10  ;;  %v12063_v37 = vmov 0  ;;  %v12066_v38 = vmov 0  ;;  %v12069_v40 = vmov 0  ;;  %v12072_v45 = vmov 0 }
  0x28   :  { %vm72_vm13 = vmand %vm8895_vm11, %vm8857_vm4  ;;  %v8914_v19 = vsub.s32 3, %v8899_v17  ;;  %v8919_v22 = vsub.s32 1, %v8899_v17  ;;  %v8922_v23 = vsub.s32 0, %v8899_v17  ;;  %v8925_v24 = vsub.s32 2, %v8899_v17 }
  0x29   :  { %vm68_vm14 = vmand %vm8895_vm11, %vm8901_vm12  ;;  %v166_v21 = vsel %vm72_vm13, 1, %v11884_v7  ;;  %vm78_vm6 = vcmp.ge.s32.totalorder %v8841_v1, 0  ;;  %vm79_vm7 = vcmp.lt.s32.totalorder %v8841_v1, 16  ;;  %v12075_v2 = vmov 0 }
  0x2a   :  { %1253 = vrot.lane.b32.xlu0 %v92_v3, %s8738_s21  ;;  %1455 = vrot.lane.b32.xlu1 %v92_v3, %s8739_s22  ;;  %v115_v25 = vsel %vm68_vm14, 1, %v11884_v7  ;;  %v182_v26 = vrot.slane %v166_v21, %v8914_v19  ;;  %v174_v28 = vrot.slane %v166_v21, %v8919_v22  ;;  %v170_v29 = vrot.slane %v166_v21, %v8922_v23  ;;  %vm8934_vm1 = vmand %vm74_vm15, %vm75_vm0 }
  0x2b   :  { %v178_v30 = vrot.slane %v166_v21, %v8925_v24  ;;  %v119_v31 = vrot.slane %v115_v25, %v8922_v23  ;;  %v131_v32 = vrot.slane %v115_v25, %v8914_v19  ;;  %vm77_vm15 = vmand %vm8895_vm11, %vm8934_vm1  ;;  %v123_v46 = vrot.slane %v115_v25, %v8919_v22 }
  0x2c   :  { %vm8938_vm3 = vcmp.eq.s32.totalorder %v182_v26, 1  ;;  %vm8942_vm9 = vcmp.eq.s32.totalorder %v174_v28, 1  ;;  %vm8946_vm10 = vcmp.eq.s32.totalorder %v170_v29, 1  ;;  %v127_v47 = vrot.slane %v115_v25, %v8925_v24 }
  0x2d   :  { %v12058_v34 = vsel %vm8938_vm3, 4294967295, %v12057_v34  ;;  %v12061_v36 = vsel %vm8942_vm9, 4294967295, %v12060_v36  ;;  %v12064_v37 = vsel %vm8946_vm10, 4294967295, %v12063_v37  ;;  %vm8950_vm13 = vcmp.eq.s32.totalorder %v178_v30, 1 }
  0x2e   :  { %8055 = vrot.lane.b32.xlu0 %v8044_v12, %s8739_s22  ;;  %8060 = vrot.lane.b32.xlu1 %v8044_v12, %s8740_s23  ;;  %12059 = vst [vmem:[#allocation5_spill] sm:$0xff] %v12058_v34  ;;  %12062 = vst [vmem:[#allocation6_spill] sm:$0xff] %v12061_v36  ;;  %v12067_v38 = vsel %vm8950_vm13, 4294967295, %v12066_v38  ;;  %vm8954_vm14 = vcmp.eq.s32.totalorder %v119_v31, 1  ;;  %vm8962_vm0 = vcmp.eq.s32.totalorder %v131_v32, 1  ;;  %v488_v56 = vsel %vm77_vm15, 1, %v11884_v7 }
  0x2f   :  { %12065 = vst [vmem:[#allocation7_spill] sm:$0xff] %v12064_v37  ;;  %12068 = vst [vmem:[#allocation8_spill] sm:$0xff] %v12067_v38  ;;  %v12070_v40 = vsel %vm8954_vm14, 4294967295, %v12069_v40  ;;  %v12073_v45 = vsel %vm8962_vm0, 4294967295, %v12072_v45  ;;  %vm8987_vm11 = vcmp.eq.s32.totalorder %v123_v46, 1  ;;  %v12081_v8 = vmov 0 }
  0x30   :  { %12071 = vst [vmem:[#allocation9_spill] sm:$0xff] %v12070_v40  ;;  %12074 = vst [vmem:[#allocation10_spill] sm:$0xff] %v12073_v45  ;;  %v12076_v2 = vsel %vm8987_vm11, 4294967295, %v12075_v2  ;;  %v496_v1 = vrot.slane %v488_v56, %v8919_v22  ;;  %v504_v30 = vrot.slane %v488_v56, %v8914_v19  ;;  %v12090_v32 = vmov 0 }
  0x31   :  { %12077 = vst [vmem:[#allocation11_spill] sm:$0xff] %v12076_v2  ;;  %vm8995_vm15 = vmand %vm78_vm6, %vm79_vm7 }
  0x32   :  { %1457 = vrot.lane.b32.xlu0 %v94_v6, %s8739_s22  ;;  %1659 = vrot.lane.b32.xlu1 %v94_v6, %s8740_s23 }
  0x36   :  { %1657 = vrot.lane.b32.xlu0 %v92_v3, %s8740_s23  ;;  %v8671_v3 = vld [vmem:[%s11817_s3 + $0x28] sm:$0xff]  }
  0x78   :  { %v156_v27 = vpop.permute.xlu1 %155 }
  0x7c   :  { %v8026_v35 = vpop.permute.xlu0 %8025  ;;  %v8031_v39 = vpop.permute.xlu1 %8030 }
  0x7d   :  { %v8028_v41 = vunpack.i.h.bf16 %v8026_v35  ;;  %v8027_v42 = vunpack.i.l.bf16 %v8026_v35  ;;  %v8033_v43 = vunpack.i.h.bf16 %v8031_v39  ;;  %v8032_v44 = vunpack.i.l.bf16 %v8031_v39 }
  0x7e   :  { %v500_v35 = vrot.slane %v488_v56, %v8925_v24  ;;  %v492_v39 = vrot.slane %v488_v56, %v8922_v23 }
  0x7f   :  { %v160_v48 = vsel %vm11832_vm2, %v156_v27, %v8027_v42  ;;  %v165_v49 = vsel %vm11832_vm2, %v8027_v42, %v8028_v41  ;;  %v114_v50 = vsel %vm11833_vm8, %v8032_v44, %v8033_v43 }
  0x80   :  { %v154_v51 = vpop.permute.xlu0 %153  ;;  %v190_v52 = vsel %vm8938_vm3, %v160_v48, 0.0  ;;  %v187_v53 = vsel %vm8946_vm10, %v165_v49, 0.0  ;;  %v105_v54 = vpop.permute.xlu1 %104  ;;  %v136_v55 = vsel %vm8954_vm14, %v114_v50, 0.0  ;;  %v12097_v49 = vmov 0 }
  0x81   :  { %v159_v57 = vsel %vm11832_vm2, %v154_v51, %v156_v27  ;;  %v199_v58 = vpack.c.bf16 %v190_v52, %v190_v52  ;;  %v158_v59 = vsel %vm11832_vm2, %v8028_v41, %v154_v51  ;;  %v196_v60 = vpack.c.bf16 %v187_v53, %v187_v53 }
  0x82   :  { %v188_v61 = vsel %vm8942_vm9, %v158_v59, 0.0  ;;  %v189_v62 = vsel %vm8950_vm13, %v159_v57, 0.0  ;;  %v109_v63 = vsel %vm11833_vm8, %v105_v54, %v8032_v44  ;;  %vm12080_vm2 = vcmask 1041408   ;;  %vm81_vm13 = vmand %vm8995_vm15, %vm8901_vm12 }
  0x83   :  { %7473 = vmatprep.subr.msk.bf16.mxu1 %vm12080_vm2, %v199_v58  ;;  %v197_v4 = vpack.c.bf16 %v188_v61, %v188_v61  ;;  %v198_v5 = vpack.c.bf16 %v189_v62, %v189_v62  ;;  %v139_v6 = vsel %vm8962_vm0, %v109_v63, 0.0  ;;  %vm9002_vm8 = vcmp.eq.s32.totalorder %v127_v47, 1  ;;  %vm12084_vm6 = vmmov %vm12080_vm2 }
  0x84   :  { %v12082_v8 = vsel %vm9002_vm8, 4294967295, %v12081_v8  ;;  %v147_v11 = vpack.c.bf16 %v139_v6, %v139_v6  ;;  %v103_v12 = vpop.permute.xlu0 %102  ;;  %v144_v13 = vpack.c.bf16 %v136_v55, %v136_v55  ;;  %vm12085_vm7 = vmmov %vm12080_vm2  ;;  %v476_v25 = vpop.permute.xlu1 %475  ;;  %v9032_v41 = vsel %vm81_vm13, 1, %v11884_v7  ;;  %v8667_v55 = vld [vmem:[%s11817_s3 + $0x18] sm:$0xff]  }
  0x85   :  { %12083 = vst [vmem:[#allocation12_spill] sm:$0xff] %v12082_v8  ;;  %7470 = vmatprep.subr.msk.bf16.mxu0 %vm12084_vm6, %v197_v4  ;;  %v219_v14 = vsel %vm12085_vm7, %v196_v60, 0  ;;  %vm12086_vm14 = vmmov %vm12080_vm2  ;;  %vm12087_vm2 = vcmask 138240   ;;  %vm11842_vm6 = vcmask 31744   ;;  %vm12096_vm13 = vcmask 121856  }
  0x86   :  { %v225_v15 = vsel %vm12086_vm14, %v198_v5, 0  ;;  %v107_v20 = vsel %vm12087_vm2, %v8033_v43, %v103_v12  ;;  %vm12088_vm0 = vmmov %vm12087_vm2  ;;  %245 = vmatpush1.bf16.msra.mxu0 %v219_v14  ;;  %v12100_v52 = vmov 0  ;;  %v12103_v53 = vmov 0 }
  0x87   :  { %v108_v21 = vsel %vm12088_vm0, %v103_v12, %v105_v54  ;;  %298 = vmatpush1.bf16.msra.mxu1 %v225_v15  ;;  %v137_v26 = vsel %vm8987_vm11, %v107_v20, 0.0  ;;  %vm12089_vm14 = vmmov %vm12085_vm7  ;;  %vm9025_vm7 = vcmp.eq.s32.totalorder %v496_v1, 1  ;;  %v706_v54 = vrot.slane %v9032_v41, %v8914_v19 }
  0x88   :  { %v138_v27 = vsel %vm9002_vm8, %v108_v21, 0.0  ;;  %v145_v28 = vpack.c.bf16 %v137_v26, %v137_v26  ;;  %7481 = vmatprep.subr.msk.bf16.mxu1 %vm12089_vm14, %v147_v11  ;;  %v8036_v31 = vpop.permute.xlu0 %8035  ;;  %v12091_v32 = vsel %vm9025_vm7, 4294967295, %v12090_v32  ;;  %vm12093_vm2 = vmmov %vm12089_vm14  ;;  %v9038_v47 = vpop.permute.xlu1 %8040  ;;  %vm9044_vm8 = vcmp.eq.s32.totalorder %v504_v30, 1  ;;  %v8668_v21 = vld [vmem:[%s11817_s3] sm:$0xff]  }
  0x89   :  { %v146_v29 = vpack.c.bf16 %v138_v27, %v138_v27  ;;  %12092 = vst [vmem:[#allocation13_spill] sm:$0xff] %v12091_v32  ;;  %7471 = vmatmul.mubr.msk.bf16.vlgmr.msra.gmra.mxu0 %vm11842_vm6, %v8666_v16  ;;  %v353_v42 = vsel %vm12093_vm2, %v144_v13, 0  ;;  %vm12094_vm14 = vmmov %vm12093_vm2  ;;  %v8038_v44 = vunpack.i.h.bf16 %v8036_v31  ;;  %v8037_v46 = vunpack.i.l.bf16 %v8036_v31 }
  0x8a   :  { %7474 = vmatmul.mubr.msk.bf16.vlgmr.msra.gmra.mxu1 %vm11842_vm6, %v8666_v16  ;;  %272 = vmatprep.mubr.bf16.mxu0 %v11884_v7  ;;  %vm12095_vm0 = vmmov %vm12093_vm2  ;;  %v12098_v49 = vsel %vm9044_vm8, 4294967295, %v12097_v49  ;;  %vm9050_vm2 = vcmp.eq.s32.totalorder %v500_v35, 1  ;;  %v8043_v58 = vunpack.i.h.bf16 %v9038_v47  ;;  %v698_v59 = vrot.slane %v9032_v41, %v8919_v22 }
  0x8b   :  { %v359_v43 = vsel %vm12094_vm14, %v146_v29, 0  ;;  %325 = vmatprep.mubr.bf16.mxu1 %v11884_v7  ;;  %7478 = vmatprep.subr.msk.bf16.mxu0 %vm12095_vm0, %v145_v28  ;;  %v480_v48 = vsel %vm12096_vm13, %v8038_v44, %v476_v25  ;;  %12099 = vst [vmem:[#allocation14_spill] sm:$0xff] %v12098_v49  ;;  %v12101_v52 = vsel %vm9050_vm2, 4294967295, %v12100_v52  ;;  %vm9054_vm14 = vcmp.eq.s32.totalorder %v492_v39, 1  ;;  %vm12106_vm0 = vmmov %vm12096_vm13 }
  0x8c   :  { %432 = vmatpush1.bf16.msra.mxu1 %v359_v43  ;;  %379 = vmatpush1.bf16.msra.mxu0 %v353_v42  ;;  %v510_v50 = vsel %vm9025_vm7, %v480_v48, 0.0  ;;  %v478_v51 = vpop.permute.xlu0 %477  ;;  %12102 = vst [vmem:[#allocation15_spill] sm:$0xff] %v12101_v52  ;;  %v12104_v53 = vsel %vm9054_vm14, 4294967295, %v12103_v53  ;;  %vm12107_vm13 = vmmov %vm12106_vm0  ;;  %v8042_v63 = vunpack.i.l.bf16 %v9038_v47  ;;  %vm12109_vm7 = vcmask 1041408   ;;  %v680_v5 = vpop.permute.xlu1 %679 }
  0x8d   :  { %12105 = vst [vmem:[#allocation16_spill] sm:$0xff] %v12104_v53  ;;  %v519_v56 = vpack.c.bf16 %v510_v50, %v510_v50  ;;  %v482_v57 = vsel %vm12106_vm0, %v478_v51, %v8037_v46  ;;  %v481_v60 = vsel %vm12107_vm13, %v476_v25, %v478_v51  ;;  %vm12108_vm6 = vmmov %vm12106_vm0  ;;  %vm11849_vm11 = vcmask 7168  }
  0x8e   :  { %v512_v61 = vsel %vm9044_vm8, %v482_v57, 0.0  ;;  %v487_v62 = vsel %vm12108_vm6, %v8037_v46, %v8038_v44  ;;  %vm12110_vm0 = vcmask 31744   ;;  %v511_v11 = vsel %vm9050_vm2, %v481_v60, 0.0  ;;  %v8669_v44 = vld [vmem:[%s11817_s3 + $0x8] sm:$0xff]  }
  0x8f   :  { %v521_v4 = vpack.c.bf16 %v512_v61, %v512_v61  ;;  %7490 = vmatprep.subr.msk.bf16.mxu0 %vm12109_vm7, %v519_v56  ;;  %vm12111_vm3 = vmmov %vm12110_vm0  ;;  %v509_v12 = vsel %vm9054_vm14, %v487_v62, 0.0  ;;  %v684_v13 = vsel %vm11849_vm11, %v680_v5, %v8042_v63  ;;  %vm9082_vm6 = vcmp.eq.s32.totalorder %v706_v54, 1 }
  0x90   :  { %v678_v6 = vpop.permute.xlu0 %677  ;;  %v12112_v1 = vmov 0  ;;  %vm9087_vm7 = vcmp.eq.s32.totalorder %v698_v59, 1  ;;  %v12115_v15 = vmov 0  ;;  %v520_v16 = vpack.c.bf16 %v511_v11, %v511_v11  ;;  %v8670_v59 = vld [vmem:[%s11817_s3 + $0x20] sm:$0xff]  }
  0x91   :  { %7472 = vmatmul.mubr.msk.bf16.gmra.mxu0 %vm12110_vm0, %v8667_v55  ;;  %v12113_v1 = vsel %vm9082_vm6, 4294967295, %v12112_v1  ;;  %v682_v14 = vsel %vm11849_vm11, %v8043_v58, %v678_v6  ;;  %v12116_v15 = vsel %vm9087_vm7, 4294967295, %v12115_v15  ;;  %v518_v20 = vpack.c.bf16 %v509_v12, %v509_v12 }
  0x92   :  { %7475 = vmatmul.mubr.msk.bf16.gmra.mxu1 %vm12111_vm3, %v8667_v55  ;;  %396 = vmatprep.mubr.bf16.mxu0 %v11884_v7  ;;  %12114 = vst [vmem:[#allocation17_spill] sm:$0xff] %v12113_v1  ;;  %12117 = vst [vmem:[#allocation18_spill] sm:$0xff] %v12116_v15  ;;  %vm12118_vm3 = vcmask 1041408   ;;  %v714_v25 = vsel %vm9082_vm6, %v684_v13, 0.0  ;;  %v712_v26 = vsel %vm9087_vm7, %v682_v14, 0.0  ;;  %v702_v39 = vrot.slane %v9032_v41, %v8925_v24  ;;  %v1052_v13 = vpop.permute.xlu1 %1051 }
  0x93   :  { %449 = vmatprep.mubr.bf16.mxu1 %v11884_v7  ;;  %7493 = vmatprep.subr.msk.bf16.mxu1 %vm12118_vm3, %v521_v4  ;;  %v8741_v27 = vmov 1983009808   ;;  %vm12119_vm13 = vmmov %vm12118_vm3  ;;  %v723_v31 = vpack.c.bf16 %v714_v25, %v714_v25  ;;  %v721_v35 = vpack.c.bf16 %v712_v26, %v712_v26  ;;  %v694_v42 = vrot.slane %v9032_v41, %v8922_v23  ;;  %v8672_v26 = vld [vmem:[%s11817_s3 + $0x30] sm:$0xff]  }
  0x94   :  { %v892_v28 = vunpack.c.l.s4 %v8741_v27  ;;  %v539_v29 = vsel %vm12119_vm13, %v518_v20, 0  ;;  %vm12120_vm0 = vmmov %vm12118_vm3  ;;  %vm12121_vm3 = vcmask 31744   ;;  %v12125_v47 = vmov 0 }
  0x95   :  { %v545_v30 = vsel %vm12120_vm0, %v520_v16, 0  ;;  %vm12122_vm11 = vmmov %vm12121_vm3  ;;  %vm9120_vm7 = vcmp.eq.s32.totalorder %v694_v42, 1  ;;  %v12129_v41 = vmov 0  ;;  %v890_v51 = vcombine.high %v8836_v0, %v8836_v0 }
  0x96   :  { %vm12123_vm13 = vmmov %vm12120_vm0  ;;  %v893_v43 = vunpack.c.0.s8 %v892_v28  ;;  %v12130_v41 = vsel %vm9120_vm7, 4294967295, %v12129_v41  ;;  %v12140_v20 = vmov 0  ;;  %v12143_v25 = vmov 0 }
  0x97   :  { %12131 = vst [vmem:[#allocation20_spill] sm:$0xff] %v12130_v41 }
  0x98   :  { %v896_v50 = vsub.s32 %v893_v43, %v8899_v17  ;;  %v8051_v43 = vpop.permute.xlu1 %8050 }
  0x99   :  { %7479 = vmatmul.mubr.msk.bf16.vlgmr.msra.gmra.mxu0 %vm12121_vm3, %v8668_v21  ;;  %vm9115_vm3 = vcmp.eq.s32.totalorder %v702_v39, 1 }
  0x9a   :  { %7482 = vmatmul.mubr.msk.bf16.vlgmr.msra.gmra.mxu1 %vm12122_vm11, %v8668_v21  ;;  %406 = vmatprep.mubr.bf16.mxu0 %v11884_v7  ;;  %vm12124_vm11 = vcmask 7168   ;;  %v12126_v47 = vsel %vm9115_vm3, 4294967295, %v12125_v47  ;;  %v897_v17 = vrot.slane %v8836_v0, %v896_v50  ;;  %v8046_v0 = vpop.permute.xlu0 %8045 }
  0x9b   :  { %459 = vmatprep.mubr.bf16.mxu1 %v11884_v7  ;;  %565 = vmatpush1.bf16.msra.mxu0 %v539_v29  ;;  %v683_v46 = vsel %vm12124_vm11, %v678_v6, %v680_v5  ;;  %12127 = vst [vmem:[#allocation19_spill] sm:$0xff] %v12126_v47  ;;  %vm12128_vm6 = vmmov %vm12124_vm11  ;;  %v8048_v5 = vunpack.i.h.bf16 %v8046_v0  ;;  %v8047_v6 = vunpack.i.l.bf16 %v8046_v0  ;;  %v12164_v0 = vmov 0 }
  0x9c   :  { %618 = vmatpush1.bf16.msra.mxu1 %v545_v30  ;;  %7502 = vmatprep.subr.msk.bf16.mxu0 %vm12123_vm13, %v721_v35  ;;  %v689_v48 = vsel %vm12128_vm6, %v8042_v63, %v8043_v58  ;;  %vm12132_vm13 = vcmask 31744   ;;  %v713_v54 = vsel %vm9115_vm3, %v683_v46, 0.0  ;;  %v904_v58 = vrot.slane %v890_v51, %v896_v50 }
  0x9d   :  { %7505 = vmatprep.subr.msk.bf16.mxu1 %vm12120_vm0, %v723_v31  ;;  %vm12133_vm0 = vmmov %vm12132_vm13  ;;  %v711_v55 = vsel %vm9120_vm7, %v689_v48, 0.0  ;;  %v722_v56 = vpack.c.bf16 %v713_v54, %v713_v54  ;;  %vm12134_vm6 = vcmask 1041408   ;;  %v905_v62 = vcombine.high %v897_v17, %v897_v17 }
  0x9e   :  { %v720_v57 = vpack.c.bf16 %v711_v55, %v711_v55  ;;  %vm12135_vm11 = vmmov %vm12134_vm6  ;;  %v906_v63 = vcombine.high %v904_v58, %v904_v58  ;;  %v1054_v14 = vpop.permute.xlu0 %1053  ;;  %v12151_v46 = vmov 0  ;;  %v12154_v48 = vmov 0 }
  0x9f   :  { %v747_v61 = vsel %vm12135_vm11, %v722_v56, 0  ;;  %vm12136_vm3 = vmmov %vm12133_vm0  ;;  %v8053_v56 = vunpack.i.h.bf16 %v8051_v43 }
  0xa0   :  { %v741_v60 = vsel %vm12134_vm6, %v720_v57, 0  ;;  %vm12137_vm11 = vmmov %vm12134_vm6  ;;  %v8052_v57 = vunpack.i.l.bf16 %v8051_v43 }
  0xa1   :  { %7480 = vmatmul.mubr.msk.bf16.gmra.mxu0 %vm12132_vm13, %v8669_v44  ;;  %vm82_vm13 = vmand %vm8995_vm15, %vm8934_vm1  ;;  %vm11856_vm15 = vcmask 1039360  }
  0xa2   :  { %7483 = vmatmul.mubr.msk.bf16.gmra.mxu1 %vm12133_vm0, %v8669_v44  ;;  %582 = vmatprep.mubr.bf16.mxu0 %v11884_v7  ;;  %v1065_v4 = vsel %vm82_vm13, 1, %v11884_v7  ;;  %vm12139_vm13 = vmmov %vm12133_vm0  ;;  %v1057_v16 = vsel %vm11856_vm15, %v8048_v5, %v1052_v13  ;;  %v1064_v21 = vsel %vm11856_vm15, %v1054_v14, %v8047_v6  ;;  %vm12148_vm15 = vcmask 31744   ;;  %v8673_v44 = vld [vmem:[%s11817_s3 + $0x38] sm:$0xff]  }
  0xa3   :  { %635 = vmatprep.mubr.bf16.mxu1 %v11884_v7  ;;  %v1073_v11 = vrot.slane %v1065_v4, %v8919_v22  ;;  %v1081_v12 = vrot.slane %v1065_v4, %v8914_v19  ;;  %vm12149_vm7 = vmmov %vm12148_vm15  ;;  %v1077_v39 = vrot.slane %v1065_v4, %v8925_v24  ;;  %v1069_v42 = vrot.slane %v1065_v4, %v8922_v23 }
  0xa9   :  { %7491 = vmatmul.mubr.msk.bf16.vlgmr.msra.gmra.mxu0 %vm12133_vm0, %v8670_v59 }
  0xaa   :  { %7494 = vmatmul.mubr.msk.bf16.vlgmr.msra.gmra.mxu1 %vm12136_vm3, %v8670_v59  ;;  %592 = vmatprep.mubr.bf16.mxu0 %v11884_v7  ;;  %vm12138_vm3 = vmmov %vm12133_vm0  ;;  %vm9162_vm0 = vcmp.eq.s32.totalorder %v1073_v11, 1 }
  0xab   :  { %645 = vmatprep.mubr.bf16.mxu1 %v11884_v7  ;;  %767 = vmatpush1.bf16.msra.mxu0 %v741_v60  ;;  %v12141_v20 = vsel %vm9162_vm0, 4294967295, %v12140_v20  ;;  %v1087_v27 = vsel %vm9162_vm0, %v1057_v16, 0.0 }
  0xac   :  { %820 = vmatpush1.bf16.msra.mxu1 %v747_v61  ;;  %7514 = vmatprep.subr.msk.bf16.mxu0 %vm12134_vm6, %v905_v62  ;;  %12142 = vst [vmem:[#allocation21_spill] sm:$0xff] %v12141_v20  ;;  %vm9167_vm6 = vcmp.eq.s32.totalorder %v1081_v12, 1  ;;  %v1096_v31 = vpack.c.bf16 %v1087_v27, %v1087_v27  ;;  %v12161_v62 = vmov 0 }
  0xad   :  { %7517 = vmatprep.subr.msk.bf16.mxu1 %vm12137_vm11, %v906_v63  ;;  %v12144_v25 = vsel %vm9167_vm6, 4294967295, %v12143_v25  ;;  %v1089_v28 = vsel %vm9167_vm6, %v1064_v21, 0.0  ;;  %vm87_vm11 = vmand %vm8862_vm5, %vm8901_vm12 }
  0xae   :  { %12145 = vst [vmem:[#allocation22_spill] sm:$0xff] %v12144_v25  ;;  %v1098_v35 = vpack.c.bf16 %v1089_v28, %v1089_v28  ;;  %v1267_v18 = vsel %vm87_vm11, 1, %v11884_v7  ;;  %vm12157_vm11 = vcmask 1039360  }
  0xaf   :  { %v1283_v50 = vrot.slane %v1267_v18, %v8914_v19  ;;  %v1275_v51 = vrot.slane %v1267_v18, %v8919_v22  ;;  %v1058_v54 = vsel %vm12157_vm11, %v1052_v13, %v1054_v14  ;;  %v1279_v21 = vrot.slane %v1267_v18, %v8925_v24 }
  0xb1   :  { %7492 = vmatmul.mubr.msk.bf16.gmra.mxu0 %vm12138_vm3, %v8671_v3  ;;  %vm12146_vm3 = vcmask 1041408  }
  0xb2   :  { %7495 = vmatmul.mubr.msk.bf16.gmra.mxu1 %vm12139_vm13, %v8671_v3  ;;  %784 = vmatprep.mubr.bf16.mxu0 %v11884_v7  ;;  %v914_v29 = vsel %vm12146_vm3, %v897_v17, 0  ;;  %vm12147_vm13 = vmmov %vm12146_vm3  ;;  %v1256_v17 = vpop.permute.xlu1 %1255 }
  0xb3   :  { %837 = vmatprep.mubr.bf16.mxu1 %v11884_v7  ;;  %v920_v30 = vsel %vm12147_vm13, %v904_v58, 0  ;;  %vm12150_vm12 = vmmov %vm12146_vm3  ;;  %v1254_v58 = vpop.permute.xlu0 %1253 }
  0xb4   :  { %vm12158_vm13 = vmmov %vm12157_vm11  ;;  %vm9217_vm11 = vcmp.eq.s32.totalorder %v1283_v50, 1 }
  0xb5   :  { %v1056_v55 = vsel %vm12158_vm13, %v8047_v6, %v8048_v5  ;;  %v12162_v62 = vsel %vm9217_vm11, 4294967295, %v12161_v62  ;;  %vm9222_vm13 = vcmp.eq.s32.totalorder %v1275_v51, 1  ;;  %v8675_v5 = vld [vmem:[%s11817_s3 + $0x40] sm:$0xff]  }
  0xb6   :  { %12163 = vst [vmem:[#allocation25_spill] sm:$0xff] %v12162_v62  ;;  %v12165_v0 = vsel %vm9222_vm13, 4294967295, %v12164_v0 }
  0xb7   :  { %12166 = vst [vmem:[#allocation26_spill] sm:$0xff] %v12165_v0  ;;  %v8056_v27 = vpop.permute.xlu0 %8055 }
  0xb8   :  { %v8058_v43 = vunpack.i.h.bf16 %v8056_v27 }
  0xb9   :  { %7503 = vmatmul.mubr.msk.bf16.vlgmr.msra.gmra.mxu0 %vm12148_vm15, %v8672_v26  ;;  %vm9200_vm15 = vcmp.eq.s32.totalorder %v1069_v42, 1 }
  0xba   :  { %7506 = vmatmul.mubr.msk.bf16.vlgmr.msra.gmra.mxu1 %vm12149_vm7, %v8672_v26  ;;  %794 = vmatprep.mubr.bf16.mxu0 %v11884_v7  ;;  %vm9196_vm7 = vcmp.eq.s32.totalorder %v1077_v39, 1  ;;  %v12155_v48 = vsel %vm9200_vm15, 4294967295, %v12154_v48  ;;  %v1086_v60 = vsel %vm9200_vm15, %v1056_v55, 0.0  ;;  %v1271_v26 = vrot.slane %v1267_v18, %v8922_v23 }
  0xbb   :  { %847 = vmatprep.mubr.bf16.mxu1 %v11884_v7  ;;  %940 = vmatpush1.bf16.msra.mxu0 %v914_v29  ;;  %v12152_v46 = vsel %vm9196_vm7, 4294967295, %v12151_v46  ;;  %12156 = vst [vmem:[#allocation24_spill] sm:$0xff] %v12155_v48  ;;  %v1088_v59 = vsel %vm9196_vm7, %v1058_v54, 0.0  ;;  %v1095_v3 = vpack.c.bf16 %v1086_v60, %v1086_v60  ;;  %v8676_v29 = vld [vmem:[%s11817_s3 + $0x48] sm:$0xff]   ;;  %v8057_v18 = vunpack.i.l.bf16 %v8056_v27  ;;  %v1458_v50 = vpop.permute.xlu0 %1457  ;;  %v8677_v60 = vld [vmem:[%s11817_s3 + $0x50] sm:$0xff]  }
  0xbc   :  { %993 = vmatpush1.bf16.msra.mxu1 %v920_v30  ;;  %7526 = vmatprep.subr.msk.bf16.mxu0 %vm12150_vm12, %v1096_v31  ;;  %12153 = vst [vmem:[#allocation23_spill] sm:$0xff] %v12152_v46  ;;  %vm11861_vm12 = vcmask 924672   ;;  %v1097_v4 = vpack.c.bf16 %v1088_v59, %v1088_v59  ;;  %v12174_v30 = vmov 0  ;;  %v12177_v31 = vmov 0 }
  0xbd   :  { %7529 = vmatprep.subr.msk.bf16.mxu1 %vm12146_vm3, %v1098_v35  ;;  %vm12159_vm3 = vcmask 31744   ;;  %v1266_v61 = vsel %vm11861_vm12, %v1256_v17, %v8052_v57  ;;  %v1259_v63 = vsel %vm11861_vm12, %v8053_v56, %v1254_v58  ;;  %vm12169_vm12 = vcmask 31744  }
  0xbe   :  { %vm12160_vm6 = vmmov %vm12159_vm3  ;;  %v1291_v6 = vsel %vm9217_vm11, %v1266_v61, 0.0  ;;  %v1289_v11 = vsel %vm9222_vm13, %v1259_v63, 0.0  ;;  %vm9256_vm11 = vcmp.eq.s32.totalorder %v1271_v26, 1 }
  0xbf   :  { %v1300_v14 = vpack.c.bf16 %v1291_v6, %v1291_v6  ;;  %v1298_v16 = vpack.c.bf16 %v1289_v11, %v1289_v11  ;;  %vm12170_vm7 = vmmov %vm12169_vm12  ;;  %v12178_v31 = vsel %vm9256_vm11, 4294967295, %v12177_v31 }
  0xc0   :  { %12179 = vst [vmem:[#allocation28_spill] sm:$0xff] %v12178_v31 }
  0xc1   :  { %7504 = vmatmul.mubr.msk.bf16.gmra.mxu0 %vm12159_vm3, %v8673_v44 }
  0xc2   :  { %7507 = vmatmul.mubr.msk.bf16.gmra.mxu1 %vm12160_vm6, %v8673_v44  ;;  %957 = vmatprep.mubr.bf16.mxu0 %v11884_v7  ;;  %vm12167_vm6 = vcmask 1041408   ;;  %v1456_v44 = vpop.permute.xlu1 %1455 }
  0xc3   :  { %1010 = vmatprep.mubr.bf16.mxu1 %v11884_v7  ;;  %v1116_v12 = vsel %vm12167_vm6, %v1095_v3, 0  ;;  %vm12168_vm3 = vmmov %vm12167_vm6 }
  0xc4   :  { %v1122_v13 = vsel %vm12168_vm3, %v1097_v4, 0  ;;  %vm12171_vm6 = vmand %vm8862_vm5, %vm8857_vm4  ;;  %vm12180_vm4 = vcmask 924672  }
  0xc5   :  { %v1469_v28 = vsel %vm12171_vm6, 1, %v11884_v7  ;;  %v1260_v39 = vsel %vm12180_vm4, %v1254_v58, %v1256_v17  ;;  %vm12181_vm6 = vmmov %vm12180_vm4  ;;  %v12187_v17 = vmov 0 }
  0xc6   :  { %v1477_v9 = vrot.slane %v1469_v28, %v8919_v22  ;;  %v1485_v35 = vrot.slane %v1469_v28, %v8914_v19  ;;  %v1258_v42 = vsel %vm12181_vm6, %v8052_v57, %v8053_v56  ;;  %v12184_v56 = vmov 0 }
  0xc7   :  { %v1288_v54 = vsel %vm9256_vm11, %v1258_v42, 0.0  ;;  %v1481_v11 = vrot.slane %v1469_v28, %v8925_v24 }
  0xc8   :  { %vm9273_vm4 = vcmp.eq.s32.totalorder %v1477_v9, 1  ;;  %vm9278_vm6 = vcmp.eq.s32.totalorder %v1485_v35, 1  ;;  %v1297_v59 = vpack.c.bf16 %v1288_v54, %v1288_v54  ;;  %v8679_v54 = vld [vmem:[%s11817_s3 + $0x60] sm:$0xff]  }
  0xc9   :  { %7515 = vmatmul.mubr.msk.bf16.vlgmr.msra.gmra.mxu0 %vm12169_vm12, %v8675_v5  ;;  %vm12172_vm12 = vmmov %vm12168_vm3  ;;  %v12185_v56 = vsel %vm9273_vm4, 4294967295, %v12184_v56  ;;  %v12188_v17 = vsel %vm9278_vm6, 4294967295, %v12187_v17 }
  0xca   :  { %7518 = vmatmul.mubr.msk.bf16.vlgmr.msra.gmra.mxu1 %vm12170_vm7, %v8675_v5  ;;  %967 = vmatprep.mubr.bf16.mxu0 %v11884_v7  ;;  %vm12173_vm7 = vmmov %vm12168_vm3  ;;  %vm9252_vm3 = vcmp.eq.s32.totalorder %v1279_v21, 1  ;;  %12186 = vst [vmem:[#allocation29_spill] sm:$0xff] %v12185_v56 }
  0xcb   :  { %1020 = vmatprep.mubr.bf16.mxu1 %v11884_v7  ;;  %1142 = vmatpush1.bf16.msra.mxu0 %v1116_v12  ;;  %v12175_v30 = vsel %vm9252_vm3, 4294967295, %v12174_v30  ;;  %v1290_v51 = vsel %vm9252_vm3, %v1260_v39, 0.0  ;;  %12189 = vst [vmem:[#allocation30_spill] sm:$0xff] %v12188_v17  ;;  %vm12192_vm3 = vcmask 31744   ;;  %v1473_v12 = vrot.slane %v1469_v28, %v8922_v23  ;;  %v1658_v39 = vpop.permute.xlu0 %1657 }
  0xcc   :  { %1195 = vmatpush1.bf16.msra.mxu1 %v1122_v13  ;;  %7538 = vmatprep.subr.msk.bf16.mxu0 %vm12172_vm12, %v1298_v16  ;;  %12176 = vst [vmem:[#allocation27_spill] sm:$0xff] %v12175_v30  ;;  %vm11868_vm12 = vcmask 916480   ;;  %v1299_v58 = vpack.c.bf16 %v1290_v51, %v1290_v51  ;;  %vm12193_vm11 = vmmov %vm12192_vm3  ;;  %v8061_v13 = vpop.permute.xlu1 %8060  ;;  %v12199_v16 = vmov 0 }
  0xcd   :  { %7541 = vmatprep.subr.msk.bf16.mxu1 %vm12173_vm7, %v1300_v14  ;;  %vm12182_vm7 = vcmask 31744   ;;  %v1461_v55 = vsel %vm11868_vm12, %v8058_v43, %v1456_v44  ;;  %v1468_v57 = vsel %vm11868_vm12, %v1458_v50, %v8057_v18  ;;  %v12196_v14 = vmov 0 }
  0xce   :  { %vm12183_vm13 = vmmov %vm12182_vm7  ;;  %v1491_v61 = vsel %vm9273_vm4, %v1461_v55, 0.0  ;;  %v1493_v63 = vsel %vm9278_vm6, %v1468_v57, 0.0  ;;  %v8062_v9 = vunpack.i.l.bf16 %v8061_v13  ;;  %vm12226_vm6 = vcmask 31744  }
  0xcf   :  { %v1500_v5 = vpack.c.bf16 %v1491_v61, %v1491_v61  ;;  %v1502_v6 = vpack.c.bf16 %v1493_v63, %v1493_v63 }
  0xd0   :  { %v1660_v35 = vpop.permute.xlu1 %1659 }
  0xd1   :  { %7516 = vmatmul.mubr.msk.bf16.gmra.mxu0 %vm12182_vm7, %v8676_v29  ;;  %vm12190_vm7 = vcmask 1041408  }
  0xd2   :  { %7519 = vmatmul.mubr.msk.bf16.gmra.mxu1 %vm12183_vm13, %v8676_v29  ;;  %1159 = vmatprep.mubr.bf16.mxu0 %v11884_v7  ;;  %vm89_vm13 = vmand %vm8862_vm5, %vm8934_vm1  ;;  %v1318_v4 = vsel %vm12190_vm7, %v1297_v59, 0  ;;  %v8063_v29 = vunpack.i.h.bf16 %v8061_v13 }
  0xd3   :  { %1212 = vmatprep.mubr.bf16.mxu1 %v11884_v7  ;;  %vm12191_vm12 = vmmov %vm12190_vm7  ;;  %v1671_v10 = vsel %vm89_vm13, 1, %v11884_v7 }
  0xd4   :  { %v1324_v3 = vsel %vm12191_vm12, %v1299_v58, 0  ;;  %vm12194_vm5 = vmmov %vm12190_vm7  ;;  %v1687_v21 = vrot.slane %v1671_v10, %v8914_v19  ;;  %v1679_v26 = vrot.slane %v1671_v10, %v8919_v22  ;;  %vm12202_vm12 = vcmask 916480  }
  0xd5   :  { %vm12195_vm1 = vmmov %vm12194_vm5  ;;  %v1462_v27 = vsel %vm12202_vm12, %v1456_v44, %v1458_v50  ;;  %vm11873_vm7 = vcmask 908288   ;;  %v12209_v44 = vmov 0  ;;  %v1683_v63 = vrot.slane %v1671_v10, %v8925_v24 }
  0xd6   :  { %vm12203_vm13 = vmmov %vm12202_vm12  ;;  %v1670_v22 = vsel %vm11873_vm7, %v1660_v35, %v8062_v9  ;;  %vm9328_vm12 = vcmp.eq.s32.totalorder %v1687_v21, 1 }
  0xd7   :  { %v1460_v28 = vsel %vm12203_vm13, %v8057_v18, %v8058_v43  ;;  %v12206_v43 = vmov 0  ;;  %v1663_v18 = vsel %vm11873_vm7, %v8063_v29, %v1658_v39  ;;  %vm9333_vm13 = vcmp.eq.s32.totalorder %v1679_v26, 1 }
  0xd8   :  { %v12207_v43 = vsel %vm9328_vm12, 4294967295, %v12206_v43  ;;  %v12210_v44 = vsel %vm9333_vm13, 4294967295, %v12209_v44  ;;  %v1695_v55 = vsel %vm9328_vm12, %v1670_v22, 0.0  ;;  %v1693_v57 = vsel %vm9333_vm13, %v1663_v18, 0.0 }
  0xd9   :  { %7527 = vmatmul.mubr.msk.bf16.vlgmr.msra.gmra.mxu0 %vm12192_vm3, %v8677_v60  ;;  %vm9311_vm3 = vcmp.eq.s32.totalorder %v1473_v12, 1  ;;  %12208 = vst [vmem:[#allocation33_spill] sm:$0xff] %v12207_v43  ;;  %12211 = vst [vmem:[#allocation34_spill] sm:$0xff] %v12210_v44  ;;  %v1702_v61 = vpack.c.bf16 %v1693_v57, %v1693_v57  ;;  %vm12214_vm7 = vcmask 31744  }
  0xda   :  { %7530 = vmatmul.mubr.msk.bf16.vlgmr.msra.gmra.mxu1 %vm12193_vm11, %v8677_v60  ;;  %1169 = vmatprep.mubr.bf16.mxu0 %v11884_v7  ;;  %vm9307_vm11 = vcmp.eq.s32.totalorder %v1481_v11, 1  ;;  %v12200_v16 = vsel %vm9311_vm3, 4294967295, %v12199_v16  ;;  %v1490_v19 = vsel %vm9311_vm3, %v1460_v28, 0.0  ;;  %v1704_v60 = vpack.c.bf16 %v1695_v55, %v1695_v55  ;;  %v8683_v28 = vld [vmem:[%s11817_s3 + $0x80] sm:$0xff]  }
  0xdb   :  { %1222 = vmatprep.mubr.bf16.mxu1 %v11884_v7  ;;  %1344 = vmatpush1.bf16.msra.mxu0 %v1318_v4  ;;  %v12197_v14 = vsel %vm9307_vm11, 4294967295, %v12196_v14  ;;  %12201 = vst [vmem:[#allocation32_spill] sm:$0xff] %v12200_v16  ;;  %v1492_v42 = vsel %vm9307_vm11, %v1462_v27, 0.0  ;;  %v1499_v51 = vpack.c.bf16 %v1490_v19, %v1490_v19  ;;  %vm12215_vm11 = vmmov %vm12214_vm7  ;;  %v1675_v4 = vrot.slane %v1671_v10, %v8922_v23  ;;  %v8682_v27 = vld [vmem:[%s11817_s3 + $0x78] sm:$0xff]  }
  0xdc   :  { %1397 = vmatpush1.bf16.msra.mxu1 %v1324_v3  ;;  %7550 = vmatprep.subr.msk.bf16.mxu0 %vm12194_vm5, %v1500_v5  ;;  %12198 = vst [vmem:[#allocation31_spill] sm:$0xff] %v12197_v14  ;;  %vm12204_vm5 = vcmask 31744   ;;  %v1501_v50 = vpack.c.bf16 %v1492_v42, %v1492_v42  ;;  %v8680_v3 = vld [vmem:[%s11817_s3 + $0x68] sm:$0xff]   ;;  %v12223_v23 = vmov 0 }
  0xdd   :  { %7553 = vmatprep.subr.msk.bf16.mxu1 %vm12195_vm1, %v1502_v6  ;;  %vm12205_vm1 = vmmov %vm12204_vm5  ;;  %v12219_v6 = vmov 0  ;;  %vm9363_vm13 = vcmp.eq.s32.totalorder %v1675_v4, 1 }
  0xde   :  { %v12224_v23 = vsel %vm9363_vm13, 4294967295, %v12223_v23 }
  0xdf   :  { %12225 = vst [vmem:[#allocation36_spill] sm:$0xff] %v12224_v23 }
  0xe1   :  { %7528 = vmatmul.mubr.msk.bf16.gmra.mxu0 %vm12204_vm5, %v8678_v33  ;;  %vm12212_vm5 = vcmask 1041408  }
  0xe2   :  { %7531 = vmatmul.mubr.msk.bf16.gmra.mxu1 %vm12205_vm1, %v8678_v33  ;;  %1361 = vmatprep.mubr.bf16.mxu0 %v11884_v7  ;;  %v1520_v58 = vsel %vm12212_vm5, %v1499_v51, 0  ;;  %vm12213_vm1 = vmmov %vm12212_vm5  ;;  %v8681_v33 = vld [vmem:[%s11817_s3 + $0x70] sm:$0xff]  }
  0xe3   :  { %1414 = vmatprep.mubr.bf16.mxu1 %v11884_v7  ;;  %v1526_v59 = vsel %vm12213_vm1, %v1501_v50, 0  ;;  %vm12216_vm12 = vmmov %vm12213_vm1 }
  0xe4   :  { %vm12217_vm5 = vmmov %vm12213_vm1 }
  0xe9   :  { %7539 = vmatmul.mubr.msk.bf16.vlgmr.msra.gmra.mxu0 %vm12214_vm7, %v8679_v54  ;;  %vm12218_vm7 = vcmask 908288  }
  0xea   :  { %7542 = vmatmul.mubr.msk.bf16.vlgmr.msra.gmra.mxu1 %vm12215_vm11, %v8679_v54  ;;  %1371 = vmatprep.mubr.bf16.mxu0 %v11884_v7  ;;  %v1664_v5 = vsel %vm12218_vm7, %v1658_v39, %v1660_v35  ;;  %vm9358_vm11 = vcmp.eq.s32.totalorder %v1683_v63, 1  ;;  %vm12222_vm1 = vmmov %vm12218_vm7 }
  0xeb   :  { %1424 = vmatprep.mubr.bf16.mxu1 %v11884_v7  ;;  %1546 = vmatpush1.bf16.msra.mxu0 %v1520_v58  ;;  %v12220_v6 = vsel %vm9358_vm11, 4294967295, %v12219_v6  ;;  %v1662_v24 = vsel %vm12222_vm1, %v8062_v9, %v8063_v29  ;;  %v1694_v11 = vsel %vm9358_vm11, %v1664_v5, 0.0  ;;  %v8684_v29 = vld [vmem:[%s11817_s3 + $0x88] sm:$0xff]  }
  0xec   :  { %1599 = vmatpush1.bf16.msra.mxu1 %v1526_v59  ;;  %7562 = vmatprep.subr.msk.bf16.mxu0 %vm12216_vm12, %v1702_v61  ;;  %12221 = vst [vmem:[#allocation35_spill] sm:$0xff] %v12220_v6  ;;  %vm12227_vm12 = vmmov %vm12226_vm6  ;;  %v1692_v12 = vsel %vm9363_vm13, %v1662_v24, 0.0  ;;  %v1703_v13 = vpack.c.bf16 %v1694_v11, %v1694_v11 }
  0xed   :  { %7565 = vmatprep.subr.msk.bf16.mxu1 %vm12217_vm5, %v1704_v60  ;;  %v1701_v10 = vpack.c.bf16 %v1692_v12, %v1692_v12  ;;  %vm12229_vm7 = vmmov %vm12227_vm12 }
  0xee   :  { %vm12230_vm1 = vmmov %vm12229_vm7 }
  0xef   :  { %v1722_v21 = vsel %vm12217_vm5, %v1701_v10, 0  ;;  %vm12232_vm11 = vmmov %vm12230_vm1 }
  0xf1   :  { %7540 = vmatmul.mubr.msk.bf16.gmra.mxu0 %vm12226_vm6, %v8680_v3  ;;  %vm12228_vm6 = vmmov %vm12217_vm5 }
  0xf2   :  { %7543 = vmatmul.mubr.msk.bf16.gmra.mxu1 %vm12227_vm12, %v8680_v3  ;;  %1563 = vmatprep.mubr.bf16.mxu0 %v11884_v7  ;;  %v1728_v26 = vsel %vm12228_vm6, %v1703_v13, 0  ;;  %vm12231_vm12 = vmmov %vm12230_vm1 }
  0xf3   :  { %1616 = vmatprep.mubr.bf16.mxu1 %v11884_v7  ;;  %vm12233_vm5 = vmmov %vm12230_vm1 }
  0xf4   :  { %vm12234_vm6 = vmmov %vm12230_vm1 }
  0xf9   :  { %7551 = vmatmul.mubr.msk.bf16.vlgmr.msra.gmra.mxu0 %vm12229_vm7, %v8681_v33  ;;  %vm12236_vm7 = vmmov %vm12230_vm1 }
  0xfa   :  { %7554 = vmatmul.mubr.msk.bf16.vlgmr.msra.gmra.mxu1 %vm12230_vm1, %v8681_v33  ;;  %1573 = vmatprep.mubr.bf16.mxu0 %v11884_v7 }
  0xfb   :  { %1626 = vmatprep.mubr.bf16.mxu1 %v11884_v7  ;;  %1748 = vmatpush1.bf16.msra.mxu0 %v1722_v21 }
  0xfc   :  { %1801 = vmatpush1.bf16.msra.mxu1 %v1728_v26 }
 0x101   :  { %7552 = vmatmul.mubr.msk.bf16.gmra.mxu0 %vm12231_vm12, %v8682_v27 }
 0x102   :  { %7555 = vmatmul.mubr.msk.bf16.gmra.mxu1 %vm12232_vm11, %v8682_v27  ;;  %1765 = vmatprep.mubr.bf16.mxu0 %v11884_v7  ;;  %vm12235_vm11 = vmmov %vm12230_vm1 }
 0x103   :  { %1818 = vmatprep.mubr.bf16.mxu1 %v11884_v7 }
 0x109   :  { %7563 = vmatmul.mubr.msk.bf16.vlgmr.msra.gmra.mxu0 %vm12233_vm5, %v8683_v28 }
 0x10a   :  { %7566 = vmatmul.mubr.msk.bf16.vlgmr.msra.gmra.mxu1 %vm12234_vm6, %v8683_v28  ;;  %1775 = vmatprep.mubr.bf16.mxu0 %v11884_v7 }
 0x10b   :  { %1828 = vmatprep.mubr.bf16.mxu1 %v11884_v7 }
 0x111   :  { %7564 = vmatmul.mubr.msk.bf16.gmra.mxu0 %vm12235_vm11, %v8684_v29 }
 0x112   :  { %7567 = vmatmul.mubr.msk.bf16.gmra.mxu1 %vm12236_vm7, %v8684_v29  ;;  %2325 = vmatprep.mubr.bf16.mxu0 %v11884_v7 }
 0x113   :  { %2368 = vmatprep.mubr.bf16.mxu1 %v11884_v7 }
 0x149   :  { %v264_v9 = vpop.f32.mrf.mxu0 }
 0x14a   :  { %v317_v35 = vpop.f32.mrf.mxu1 }
 0x14b   :  { %v266_v39 = vpop.f32.mrf.mxu0 }
 0x14c   :  { %v319_v42 = vpop.f32.mrf.mxu1 }
 0x14d   :  { %v268_v19 = vpop.f32.mrf.mxu0 }
 0x14e   :  { %v321_v22 = vpop.f32.mrf.mxu1 }
 0x14f   :  { %v9405_v18 = vpop.f32.mrf.mxu0 }
 0x150   :  { %v9407_v50 = vpop.f32.mrf.mxu1 }
 0x151   :  { %v274_v51 = vpop.f32.mrf.mxu0 }
 0x152   :  { %v327_v54 = vpop.f32.mrf.mxu1 }
 0x153   :  { %v276_v55 = vpop.f32.mrf.mxu0 }
 0x154   :  { %v329_v57 = vpop.f32.mrf.mxu1 }
 0x155   :  { %v278_v58 = vpop.f32.mrf.mxu0 }
 0x156   :  { %v331_v59 = vpop.f32.mrf.mxu1 }
 0x157   :  { %v9409_v60 = vpop.f32.mrf.mxu0 }
 0x158   :  { %v9411_v61 = vpop.f32.mrf.mxu1 }
 0x159   :  { %v398_v63 = vpop.f32.mrf.mxu0 }
 0x15a   :  { %v451_v4 = vpop.f32.mrf.mxu1  ;;  %v399_v3 = vadd.f32 %v398_v63, %v264_v9 }
 0x15b   :  { %v452_v5 = vadd.f32 %v451_v4, %v317_v35  ;;  %v400_v24 = vpop.f32.mrf.mxu0 }
 0x15c   :  { %v453_v11 = vpop.f32.mrf.mxu1  ;;  %v401_v12 = vadd.f32 %v400_v24, %v266_v39 }
 0x15d   :  { %v454_v13 = vadd.f32 %v453_v11, %v319_v42  ;;  %v402_v10 = vpop.f32.mrf.mxu0 }
 0x15e   :  { %v455_v33 = vpop.f32.mrf.mxu1  ;;  %v403_v21 = vadd.f32 %v402_v10, %v268_v19 }
 0x15f   :  { %v456_v26 = vadd.f32 %v455_v33, %v321_v22  ;;  %v9413_v27 = vpop.f32.mrf.mxu0 }
 0x160   :  { %v9415_v28 = vpop.f32.mrf.mxu1 }
 0x161   :  { %v408_v29 = vpop.f32.mrf.mxu0 }
 0x162   :  { %v461_v7 = vpop.f32.mrf.mxu1  ;;  %v409_v6 = vadd.f32 %v408_v29, %v274_v51 }
 0x163   :  { %v462_v43 = vadd.f32 %v461_v7, %v327_v54  ;;  %v410_v23 = vpop.f32.mrf.mxu0 }
 0x164   :  { %v463_v44 = vpop.f32.mrf.mxu1  ;;  %v411_v9 = vadd.f32 %v410_v23, %v276_v55 }
 0x165   :  { %v464_v35 = vadd.f32 %v463_v44, %v329_v57  ;;  %v412_v63 = vpop.f32.mrf.mxu0 }
 0x166   :  { %v465_v4 = vpop.f32.mrf.mxu1  ;;  %v413_v39 = vadd.f32 %v412_v63, %v278_v58 }
 0x167   :  { %v466_v42 = vadd.f32 %v465_v4, %v331_v59  ;;  %v9417_v24 = vpop.f32.mrf.mxu0 }
 0x168   :  { %v9419_v19 = vpop.f32.mrf.mxu1 }
 0x169   :  { %v584_v22 = vpop.f32.mrf.mxu0 }
 0x16a   :  { %v637_v11 = vpop.f32.mrf.mxu1  ;;  %v656_v10 = vadd.f32 %v584_v22, %v399_v3 }
 0x16b   :  { %v658_v33 = vadd.f32 %v637_v11, %v452_v5  ;;  %v586_v14 = vpop.f32.mrf.mxu0 }
 0x16c   :  { %v639_v17 = vpop.f32.mrf.mxu1  ;;  %v657_v51 = vadd.f32 %v586_v14, %v401_v12 }
 0x16d   :  { %v659_v7 = vadd.f32 %v639_v17, %v454_v13  ;;  %v588_v54 = vpop.f32.mrf.mxu0 }
 0x16e   :  { %v641_v29 = vpop.f32.mrf.mxu1  ;;  %v660_v23 = vadd.f32 %v588_v54, %v403_v21 }
 0x16f   :  { %v662_v44 = vadd.f32 %v641_v29, %v456_v26  ;;  %v9421_v55 = vpop.f32.mrf.mxu0 }
 0x170   :  { %v9423_v57 = vpop.f32.mrf.mxu1 }
 0x171   :  { %v594_v58 = vpop.f32.mrf.mxu0 }
 0x172   :  { %v647_v59 = vpop.f32.mrf.mxu1  ;;  %v664_v63 = vadd.f32 %v594_v58, %v409_v6 }
 0x173   :  { %v666_v4 = vadd.f32 %v647_v59, %v462_v43  ;;  %v596_v16 = vpop.f32.mrf.mxu0 }
 0x174   :  { %v649_v56 = vpop.f32.mrf.mxu1  ;;  %v665_v3 = vadd.f32 %v596_v16, %v411_v9 }
 0x175   :  { %v667_v5 = vadd.f32 %v649_v56, %v464_v35  ;;  %v598_v22 = vpop.f32.mrf.mxu0 }
 0x176   :  { %v651_v11 = vpop.f32.mrf.mxu1  ;;  %v668_v14 = vadd.f32 %v598_v22, %v413_v39 }
 0x177   :  { %v670_v17 = vadd.f32 %v651_v11, %v466_v42  ;;  %v9425_v12 = vpop.f32.mrf.mxu0 }
 0x178   :  { %v9427_v13 = vpop.f32.mrf.mxu1 }
 0x179   :  { %v786_v21 = vpop.f32.mrf.mxu0 }
 0x17a   :  { %v839_v26 = vpop.f32.mrf.mxu1  ;;  %v858_v54 = vadd.f32 %v786_v21, %v656_v10 }
 0x17b   :  { %v860_v29 = vadd.f32 %v839_v26, %v658_v33  ;;  %v788_v30 = vpop.f32.mrf.mxu0 }
 0x17c   :  { %v841_v62 = vpop.f32.mrf.mxu1  ;;  %v859_v6 = vadd.f32 %v788_v30, %v657_v51 }
 0x17d   :  { %v861_v43 = vadd.f32 %v841_v62, %v659_v7  ;;  %v790_v58 = vpop.f32.mrf.mxu0 }
 0x17e   :  { %v843_v59 = vpop.f32.mrf.mxu1  ;;  %v862_v16 = vadd.f32 %v790_v58, %v660_v23 }
 0x17f   :  { %v864_v56 = vadd.f32 %v843_v59, %v662_v44  ;;  %v9429_v9 = vpop.f32.mrf.mxu0 }
 0x180   :  { %v9431_v35 = vpop.f32.mrf.mxu1 }
 0x181   :  { %v796_v39 = vpop.f32.mrf.mxu0 }
 0x182   :  { %v849_v42 = vpop.f32.mrf.mxu1  ;;  %v9433_v22 = vadd.f32 %v796_v39, %v664_v63 }
 0x183   :  { %v9435_v11 = vadd.f32 %v849_v42, %v666_v4  ;;  %v798_v10 = vpop.f32.mrf.mxu0 }
 0x184   :  { %v851_v33 = vpop.f32.mrf.mxu1  ;;  %v9437_v21 = vadd.f32 %v798_v10, %v665_v3 }
 0x185   :  { %v9439_v30 = vadd.f32 %v851_v33, %v667_v5  ;;  %v800_v62 = vpop.f32.mrf.mxu0 }
 0x186   :  { %v853_v51 = vpop.f32.mrf.mxu1  ;;  %v9441_v7 = vadd.f32 %v800_v62, %v668_v14 }
 0x187   :  { %v9443_v23 = vadd.f32 %v853_v51, %v670_v17  ;;  %v9445_v44 = vpop.f32.mrf.mxu0 }
 0x188   :  { %v9447_v26 = vpop.f32.mrf.mxu1 }
 0x189   :  { %v959_v63 = vpop.f32.mrf.mxu0 }
 0x18a   :  { %v1012_v58 = vpop.f32.mrf.mxu1  ;;  %v9449_v4 = vadd.f32 %v959_v63, %v858_v54 }
 0x18b   :  { %v9451_v59 = vadd.f32 %v1012_v58, %v860_v29  ;;  %v961_v3 = vpop.f32.mrf.mxu0 }
 0x18c   :  { %v1014_v39 = vpop.f32.mrf.mxu1  ;;  %v9453_v5 = vadd.f32 %v961_v3, %v859_v6 }
 0x18d   :  { %v9455_v42 = vadd.f32 %v1014_v39, %v861_v43  ;;  %v963_v14 = vpop.f32.mrf.mxu0 }
 0x18e   :  { %v1016_v10 = vpop.f32.mrf.mxu1  ;;  %v9457_v17 = vadd.f32 %v963_v14, %v862_v16 }
 0x18f   :  { %v9459_v33 = vadd.f32 %v1016_v10, %v864_v56  ;;  %v9461_v62 = vpop.f32.mrf.mxu0 }
 0x190   :  { %v9463_v51 = vpop.f32.mrf.mxu1 }
 0x191   :  { %v9465_v54 = vpop.f32.mrf.mxu0 }
 0x192   :  { %v9467_v29 = vpop.f32.mrf.mxu1 }
 0x193   :  { %v9469_v63 = vpop.f32.mrf.mxu0 }
 0x194   :  { %v9471_v6 = vpop.f32.mrf.mxu1 }
 0x195   :  { %v9473_v43 = vpop.f32.mrf.mxu0 }
 0x196   :  { %v9475_v58 = vpop.f32.mrf.mxu1 }
 0x197   :  { %v9477_v16 = vpop.f32.mrf.mxu0 }
 0x198   :  { %v9479_v56 = vpop.f32.mrf.mxu1 }
 0x199   :  { %v9481_v3 = vpop.f32.mrf.mxu0 }
 0x19a   :  { %v9483_v39 = vpop.f32.mrf.mxu1 }
 0x19b   :  { %v9485_v14 = vpop.f32.mrf.mxu0 }
 0x19c   :  { %v9487_v10 = vpop.f32.mrf.mxu1 }
 0x19d   :  { %v9489_v31 = vpop.f32.mrf.mxu0 }
 0x19e   :  { %v9491_v0 = vpop.f32.mrf.mxu1 }
 0x19f   :  { %v9493_v46 = vpop.f32.mrf.mxu0 }
 0x1a0   :  { %v9495_v25 = vpop.f32.mrf.mxu1 }
 0x1a1   :  { %v9497_v48 = vpop.f32.mrf.mxu0 }
 0x1a2   :  { %v9499_v20 = vpop.f32.mrf.mxu1 }
 0x1a3   :  { %v9501_v47 = vpop.f32.mrf.mxu0 }
 0x1a4   :  { %v9503_v1 = vpop.f32.mrf.mxu1 }
 0x1a5   :  { %v9505_v41 = vpop.f32.mrf.mxu0 }
 0x1a6   :  { %v9507_v15 = vpop.f32.mrf.mxu1 }
 0x1a7   :  { %v9509_v52 = vpop.f32.mrf.mxu0 }
 0x1a8   :  { %v9511_v49 = vpop.f32.mrf.mxu1 }
 0x1a9   :  { %12237 = vst [vmem:[#allocation37_spill] sm:$0xff] %v9511_v49  ;;  %v9513_v53 = vpop.f32.mrf.mxu0 }
 0x1aa   :  { %12238 = vst [vmem:[#allocation38_spill] sm:$0xff] %v9513_v53  ;;  %v9515_v32 = vpop.f32.mrf.mxu1 }
 0x1ab   :  { %12239 = vst [vmem:[#allocation39_spill] sm:$0xff] %v9515_v32  ;;  %v9517_v8 = vpop.f32.mrf.mxu0 }
 0x1ac   :  { %12240 = vst [vmem:[#allocation40_spill] sm:$0xff] %v9517_v8  ;;  %v9519_v45 = vpop.f32.mrf.mxu1 }
 0x1ad   :  { %12241 = vst [vmem:[#allocation41_spill] sm:$0xff] %v9519_v45  ;;  %v9521_v40 = vpop.f32.mrf.mxu0 }
 0x1ae   :  { %12242 = vst [vmem:[#allocation42_spill] sm:$0xff] %v9521_v40  ;;  %v9523_v2 = vpop.f32.mrf.mxu1 }
 0x1af   :  { %12243 = vst [vmem:[#allocation43_spill] sm:$0xff] %v9523_v2  ;;  %v9525_v38 = vpop.f32.mrf.mxu0 }
 0x1b0   :  { %12244 = vst [vmem:[#allocation44_spill] sm:$0xff] %v9525_v38  ;;  %v9527_v34 = vpop.f32.mrf.mxu1 }
 0x1b1   :  { %12245 = vst [vmem:[#allocation45_spill] sm:$0xff] %v9527_v34  ;;  %v9529_v37 = vpop.f32.mrf.mxu0 }
 0x1b2   :  { %12246 = vst [vmem:[#allocation46_spill] sm:$0xff] %v9529_v37  ;;  %v9531_v36 = vpop.f32.mrf.mxu1 }
 0x1b3   :  { %12247 = vst [vmem:[#allocation47_spill] sm:$0xff] %v9531_v36  ;;  %v9533_v49 = vpop.f32.mrf.mxu0 }
 0x1b4   :  { %12248 = vst [vmem:[#allocation48_spill] sm:$0xff] %v9533_v49  ;;  %v9535_v53 = vpop.f32.mrf.mxu1 }
 0x1b5   :  { %12249 = vst [vmem:[#allocation49_spill] sm:$0xff] %v9535_v53  ;;  %v9537_v32 = vpop.f32.mrf.mxu0 }
 0x1b6   :  { %12250 = vst [vmem:[#allocation50_spill] sm:$0xff] %v9537_v32  ;;  %v9539_v8 = vpop.f32.mrf.mxu1 }
 0x1b7   :  { %12251 = vst [vmem:[#allocation51_spill] sm:$0xff] %v9539_v8  ;;  %v9541_v45 = vpop.f32.mrf.mxu0 }
 0x1b8   :  { %12252 = vst [vmem:[#allocation52_spill] sm:$0xff] %v9541_v45  ;;  %v9543_v40 = vpop.f32.mrf.mxu1 }
 0x1b9   :  { %v9545_v2 = vpop.f32.mrf.mxu0 }
 0x1ba   :  { %12253 = vst [vmem:[#allocation53_spill] sm:$0xff] %v9545_v2  ;;  %v9547_v38 = vpop.f32.mrf.mxu1  ;;  %v405_v2 = vadd.f32 %v9413_v27, %v9405_v18 }
 0x1bb   :  { %12254 = vst [vmem:[#allocation54_spill] sm:$0xff] %v9547_v38  ;;  %v9549_v34 = vpop.f32.mrf.mxu0 }
 0x1bc   :  { %12255 = vst [vmem:[#allocation55_spill] sm:$0xff] %v9549_v34  ;;  %v9551_v37 = vpop.f32.mrf.mxu1  ;;  %v458_v34 = vadd.f32 %v9415_v28, %v9407_v50 }
 0x1bd   :  { %12256 = vst [vmem:[#allocation56_spill] sm:$0xff] %v9551_v37  ;;  %v9553_v36 = vpop.f32.mrf.mxu0  ;;  %v415_v37 = vadd.f32 %v9417_v24, %v9409_v60 }
 0x1be   :  { %12257 = vst [vmem:[#allocation57_spill] sm:$0xff] %v9553_v36  ;;  %v9555_v49 = vpop.f32.mrf.mxu1 }
 0x1bf   :  { %12258 = vst [vmem:[#allocation58_spill] sm:$0xff] %v9555_v49  ;;  %v9557_v53 = vpop.f32.mrf.mxu0  ;;  %v468_v49 = vadd.f32 %v9419_v19, %v9411_v61  ;;  %v669_v38 = vadd.f32 %v9425_v12, %v415_v37 }
 0x1c0   :  { %12259 = vst [vmem:[#allocation59_spill] sm:$0xff] %v9557_v53  ;;  %v9559_v32 = vpop.f32.mrf.mxu1 }
 0x1c1   :  { %12260 = vst [vmem:[#allocation60_spill] sm:$0xff] %v9559_v32  ;;  %v9561_v8 = vpop.f32.mrf.mxu0  ;;  %v661_v32 = vadd.f32 %v9421_v55, %v405_v2  ;;  %v671_v18 = vadd.f32 %v9427_v13, %v468_v49  ;;  %v871_v28 = vadd.f32 %v9445_v44, %v669_v38  ;;  %v1039_v49 = vadd.f32 %v9465_v54, %v9433_v22 }
 0x1c2   :  { %v9563_v45 = vpop.f32.mrf.mxu1  ;;  %v1042_v38 = vadd.f32 %v9471_v6, %v9439_v30  ;;  %v1043_v55 = vadd.f32 %v9473_v43, %v9441_v7  ;;  %v1233_v22 = vadd.f32 %v9481_v3, %v9449_v4  ;;  %v1236_v30 = vadd.f32 %v9487_v10, %v9455_v42 }
 0x1c3   :  { %12261 = vst [vmem:[#allocation61_spill] sm:$0xff] %v9563_v45  ;;  %v9573_v36 = vpop.f32.mrf.mxu0  ;;  %v663_v45 = vadd.f32 %v9423_v57, %v458_v34  ;;  %v863_v60 = vadd.f32 %v9429_v9, %v661_v32  ;;  %v873_v24 = vadd.f32 %v9447_v26, %v671_v18  ;;  %v1041_v32 = vadd.f32 %v9467_v29, %v9435_v11  ;;  %v12271_v18 = vld [vmem:[#allocation45_spill] sm:$0xff] }
 0x1c4   :  { %v9575_v53 = vpop.f32.mrf.mxu1  ;;  %v1045_v57 = vadd.f32 %v9475_v58, %v9443_v23  ;;  %v1044_v9 = vadd.f32 %v9477_v16, %v871_v28  ;;  %v1235_v11 = vadd.f32 %v9483_v39, %v9451_v59  ;;  %v1237_v7 = vadd.f32 %v9489_v31, %v9457_v17  ;;  %v12268_v16 = vld [vmem:[#allocation46_spill] sm:$0xff]  ;;  %v12269_v39 = vld [vmem:[#allocation43_spill] sm:$0xff] }
 0x1c5   :  { %v9581_v27 = vpop.f32.mrf.mxu0  ;;  %v865_v61 = vadd.f32 %v9431_v35, %v663_v45  ;;  %v1036_v34 = vadd.f32 %v9461_v62, %v863_v60  ;;  %v1040_v45 = vadd.f32 %v9469_v63, %v9437_v21  ;;  %v1046_v35 = vadd.f32 %v9479_v56, %v873_v24  ;;  %v12273_v24 = vld [vmem:[#allocation47_spill] sm:$0xff] }
 0x1c6   :  { %v9583_v50 = vpop.f32.mrf.mxu1  ;;  %v1234_v21 = vadd.f32 %v9485_v14, %v9453_v5  ;;  %v1239_v23 = vadd.f32 %v9491_v0, %v9459_v33  ;;  %v1241_v59 = vadd.f32 %v9497_v48, %v1039_v49  ;;  %v1243_v5 = vadd.f32 %v9499_v20, %v1041_v32  ;;  %v12264_v48 = vld [vmem:[#allocation39_spill] sm:$0xff]  ;;  %v12265_v20 = vld [vmem:[#allocation40_spill] sm:$0xff]  ;;  %v12275_v32 = vld [vmem:[#allocation50_spill] sm:$0xff] }
 0x1c7   :  { %v9589_v19 = vpop.f32.mrf.mxu0  ;;  %v1038_v37 = vadd.f32 %v9463_v51, %v865_v61  ;;  %v1238_v4 = vadd.f32 %v9493_v46, %v1036_v34  ;;  %v1242_v51 = vadd.f32 %v9501_v47, %v1040_v45  ;;  %v1244_v42 = vadd.f32 %v9503_v1, %v1042_v38  ;;  %v12262_v46 = vld [vmem:[#allocation37_spill] sm:$0xff]  ;;  %v12267_v1 = vld [vmem:[#allocation42_spill] sm:$0xff]  ;;  %v12270_v14 = vld [vmem:[#allocation44_spill] sm:$0xff] }
 0x1c8   :  { %v9591_v2 = vpop.f32.mrf.mxu1  ;;  %v1245_v31 = vadd.f32 %v9505_v41, %v1043_v55  ;;  %v1247_v17 = vadd.f32 %v9507_v15, %v1045_v57  ;;  %v1246_v54 = vadd.f32 %v9509_v52, %v1044_v9  ;;  %v1248_v29 = vadd.f32 %v12262_v46, %v1046_v35  ;;  %v12266_v47 = vld [vmem:[#allocation41_spill] sm:$0xff]  ;;  %v12272_v61 = vld [vmem:[#allocation48_spill] sm:$0xff]  ;;  %v12276_v9 = vld [vmem:[#allocation51_spill] sm:$0xff] }
 0x1c9   :  { %v9607_v12 = vpop.f32.mrf.mxu0  ;;  %v1240_v62 = vadd.f32 %v9495_v25, %v1038_v37  ;;  %v12263_v25 = vld [vmem:[#allocation38_spill] sm:$0xff]  ;;  %v1437_v6 = vadd.f32 %v12264_v48, %v1235_v11  ;;  %v1436_v43 = vadd.f32 %v12265_v20, %v1234_v21  ;;  %v9643_v58 = vadd.f32 %v12266_v47, %v1236_v30  ;;  %v12274_v37 = vld [vmem:[#allocation49_spill] sm:$0xff] }
 0x1ca   :  { %v9609_v13 = vpop.f32.mrf.mxu1  ;;  %v1435_v63 = vadd.f32 %v12263_v25, %v1233_v22  ;;  %v1439_v41 = vadd.f32 %v12267_v1, %v1237_v7  ;;  %v1443_v15 = vadd.f32 %v12268_v16, %v1241_v59  ;;  %v1441_v52 = vadd.f32 %v12269_v39, %v1239_v23  ;;  %v12277_v22 = vld [vmem:[#allocation52_spill] sm:$0xff]  ;;  %v12278_v7 = vld [vmem:[#allocation53_spill] sm:$0xff]  ;;  %v12283_v48 = vld [vmem:[#allocation58_spill] sm:$0xff] }
 0x1cb   :  { %v1769_v44 = vpop.f32.mrf.mxu0  ;;  %v1440_v10 = vadd.f32 %v12270_v14, %v1238_v4  ;;  %v9652_v60 = vadd.f32 %v12271_v18, %v1240_v62  ;;  %v1444_v28 = vadd.f32 %v12272_v61, %v1242_v51  ;;  %v1445_v34 = vadd.f32 %v12273_v24, %v1243_v5  ;;  %v12279_v4 = vld [vmem:[#allocation54_spill] sm:$0xff]  ;;  %v12280_v59 = vld [vmem:[#allocation61_spill] sm:$0xff] }
 0x1cc   :  { %v9625_v26 = vpop.f32.mrf.mxu1  ;;  %v1446_v49 = vadd.f32 %v12274_v37, %v1244_v42  ;;  %v1447_v45 = vadd.f32 %v12275_v32, %v1245_v31  ;;  %v1645_v38 = vadd.f32 %v9561_v8, %v1443_v15  ;;  %v1449_v35 = vadd.f32 %v12276_v9, %v1247_v17  ;;  %v12281_v31 = vld [vmem:[#allocation55_spill] sm:$0xff]  ;;  %v12282_v25 = vld [vmem:[#allocation57_spill] sm:$0xff] }
 0x1cd   :  { %v1771_v0 = vpop.f32.mrf.mxu0  ;;  %v1448_v11 = vadd.f32 %v12277_v22, %v1246_v54  ;;  %v1450_v21 = vadd.f32 %v9543_v40, %v1248_v29  ;;  %v1646_v30 = vadd.f32 %v9573_v36, %v1444_v28  ;;  %v1637_v23 = vadd.f32 %v12278_v7, %v1435_v63  ;;  %v12284_v40 = vld [vmem:[#allocation59_spill] sm:$0xff] }
 0x1ce   :  { %v9635_v33 = vpop.f32.mrf.mxu1  ;;  %v1639_v62 = vadd.f32 %v12279_v4, %v1437_v6  ;;  %v1647_v5 = vadd.f32 %v12280_v59, %v1445_v34  ;;  %v1638_v46 = vadd.f32 %v12281_v31, %v1436_v43  ;;  %v1641_v17 = vadd.f32 %v12282_v25, %v1439_v41 }
 0x1cf   :  { %v1773_v56 = vpop.f32.mrf.mxu0  ;;  %v1643_v54 = vadd.f32 %v12283_v48, %v1441_v52  ;;  %v1642_v36 = vadd.f32 %v12284_v40, %v1440_v10  ;;  %v1648_v29 = vadd.f32 %v9575_v53, %v1446_v49  ;;  %v1649_v63 = vadd.f32 %v9581_v27, %v1447_v45 }
 0x1d0   :  { %v9647_v3 = vpop.f32.mrf.mxu1  ;;  %v1650_v16 = vadd.f32 %v9589_v19, %v1448_v11  ;;  %v9679_v15 = vadd.f32 %v1769_v44, %v1638_v46  ;;  %v1651_v39 = vadd.f32 %v9583_v50, %v1449_v35  ;;  %v1652_v53 = vadd.f32 %v9591_v2, %v1450_v21  ;;  %v12285_v35 = vld [vmem:[#allocation56_spill] sm:$0xff] }
 0x1d1   :  { %v1777_v55 = vpop.f32.mrf.mxu0  ;;  %v9687_v52 = vadd.f32 %v1773_v56, %v1642_v36  ;;  %v9692_v19 = vadd.f32 %v9607_v12, %v1637_v23  ;;  %v9694_v44 = vadd.f32 %v1771_v0, %v1641_v17  ;;  %v1640_v22 = vadd.f32 %v12285_v35, %v9643_v58 }
 0x1d2   :  { %v1830_v57 = vpop.f32.mrf.mxu1  ;;  %v9666_v51 = vadd.f32 %v1777_v55, %v1645_v38  ;;  %v1876_v12 = vmul.f32 %v9679_v15, %v9679_v15  ;;  %v9721_v55 = vadd.f32 %v9609_v13, %v1639_v62  ;;  %v9729_v11 = vadd.f32 %v9635_v33, %v1643_v54  ;;  %v12286_v13 = vld [vmem:[#allocation60_spill] sm:$0xff] }
 0x1d3   :  { %v1779_v42 = vpop.f32.mrf.mxu0  ;;  %v9676_v6 = vadd.f32 %v1830_v57, %v1647_v5  ;;  %v1855_v24 = vadd.f32 %v9679_v15, %v9692_v19  ;;  %v1860_v45 = vadd.f32 %v9687_v52, %v9694_v44  ;;  %v1875_v38 = vmul.f32 %v9692_v19, %v9692_v19 }
 0x1d4   :  { %v1832_v8 = vpop.f32.mrf.mxu1  ;;  %v9671_v20 = vadd.f32 %v1779_v42, %v1646_v30  ;;  %v1883_v27 = vmul.f32 %v9666_v51, %v9666_v51  ;;  %v1644_v7 = vadd.f32 %v12286_v13, %v9652_v60  ;;  %v1880_v58 = vmul.f32 %v9687_v52, %v9687_v52 }
 0x1d5   :  { %v1781_v47 = vpop.f32.mrf.mxu0  ;;  %v1885_v50 = vmul.f32 %v9676_v6, %v9676_v6  ;;  %v9702_v61 = vadd.f32 %v1832_v8, %v1648_v29  ;;  %v1856_v4 = vadd.f32 %v1855_v24, %v9721_v55  ;;  %v1891_v62 = vadd.f32 %v1876_v12, %v1875_v38 }
 0x1d6   :  { %v1834_v1 = vpop.f32.mrf.mxu1  ;;  %v1865_v43 = vadd.f32 %v9671_v20, %v9666_v51  ;;  %v1884_v41 = vmul.f32 %v9671_v20, %v9671_v20  ;;  %v9696_v10 = vadd.f32 %v1781_v47, %v1649_v63  ;;  %v1861_v59 = vadd.f32 %v1860_v45, %v9729_v11 }
 0x1d7   :  { %v1783_v14 = vpop.f32.mrf.mxu0  ;;  %v9709_v0 = vadd.f32 %v1834_v1, %v1651_v39  ;;  %v1886_v30 = vmul.f32 %v9702_v61, %v9702_v61  ;;  %v1877_v42 = vmul.f32 %v9721_v55, %v9721_v55  ;;  %v9745_v8 = vadd.f32 %v9625_v26, %v1640_v22 }
 0x1d8   :  { %v9698_v18 = vadd.f32 %v1783_v14, %v1650_v16  ;;  %v1836_v2 = vpop.f32.mrf.mxu1  ;;  %v1866_v56 = vadd.f32 %v1865_v43, %v9676_v6  ;;  %v1901_v28 = vadd.f32 %v1884_v41, %v1883_v27  ;;  %v1887_v21 = vmul.f32 %v9696_v10, %v9696_v10 }
 0x1d9   :  { %v9723_v57 = vadd.f32 %v1836_v2, %v1652_v53  ;;  %v1879_v60 = vmul.f32 %v9694_v44, %v9694_v44  ;;  %v9750_v31 = vadd.f32 %v9647_v3, %v1644_v7  ;;  %v1889_v46 = vmul.f32 %v9709_v0, %v9709_v0 }
 0x1da   :  { %v1870_v34 = vadd.f32 %v9698_v18, %v9696_v10  ;;  %v1888_v37 = vmul.f32 %v9698_v18, %v9698_v18  ;;  %v1867_v49 = vadd.f32 %v1866_v56, %v9702_v61  ;;  %v1902_v32 = vadd.f32 %v1901_v28, %v1885_v50 }
 0x1db   :  { %v1857_v25 = vadd.f32 %v1856_v4, %v9745_v8  ;;  %v1892_v17 = vadd.f32 %v1891_v62, %v1877_v42  ;;  %v1862_v48 = vadd.f32 %v1861_v59, %v9750_v31  ;;  %v1896_v40 = vadd.f32 %v1880_v58, %v1879_v60  ;;  %v1933_v42 = vld [vmem:[%s11818_s4 + $0x10] sm:$0xff] }
 0x1dc   :  { %v1871_v9 = vadd.f32 %v1870_v34, %v9709_v0  ;;  %1868 = vadd.xlane.f32.xlu0 %v1867_v49  ;;  %v1903_v33 = vadd.f32 %v1902_v32, %v1886_v30  ;;  %v1906_v5 = vadd.f32 %v1888_v37, %v1887_v21  ;;  %v1878_v26 = vmul.f32 %v9745_v8, %v9745_v8 }
 0x1dd   :  { %v1881_v36 = vmul.f32 %v9729_v11, %v9729_v11  ;;  %v1890_v3 = vmul.f32 %v9723_v57, %v9723_v57  ;;  %v1882_v1 = vmul.f32 %v9750_v31, %v9750_v31 }
 0x1de   :  { %v1872_v23 = vadd.f32 %v1871_v9, %v9723_v57  ;;  %v1907_v54 = vadd.f32 %v1906_v5, %v1889_v46  ;;  %v1893_v29 = vadd.f32 %v1892_v17, %v1878_v26  ;;  %v1934_v17 = vld [vmem:[%s11818_s4 + $0x18] sm:$0xff] }
 0x1df   :  { %v1897_v47 = vadd.f32 %v1896_v40, %v1881_v36  ;;  %v1932_v36 = vld [vmem:[%s11818_s4 + $0x8] sm:$0xff] }
 0x1e0   :  { %1873 = vadd.xlane.f32.xlu1 %v1872_v23  ;;  %1904 = vadd.xlane.f32.xlu0 %v1903_v33  ;;  %v1908_v63 = vadd.f32 %v1907_v54, %v1890_v3 }
 0x1e1   :  { %v1898_v16 = vadd.f32 %v1897_v47, %v1882_v1  ;;  %v1947_v47 = vld [vmem:[%s11819_s5] sm:$0xff] }
 0x1e4   :  { %1858 = vadd.xlane.f32.xlu1 %v1857_v25  ;;  %1863 = vadd.xlane.f32.xlu0 %v1862_v48  ;;  %v1931_v25 = vld [vmem:[%s11818_s4] sm:$0xff] }
 0x1e8   :  { %1894 = vadd.xlane.f32.xlu1 %v1893_v29  ;;  %1909 = vadd.xlane.f32.xlu0 %v1908_v63 }
 0x1ec   :  { %1899 = vadd.xlane.f32.xlu0 %v1898_v16 }
 0x265   :  { %v1869_v43 = vpop.xlane.xlu0 %1868 }
 0x266   :  { %v1913_v41 = vmul.f32 0.001953125, %v1869_v43  ;;  %v1949_v43 = vld [vmem:[%s11819_s5 + $0x10] sm:$0xff] }
 0x268   :  { %v1921_v27 = vmul.f32 %v1913_v41, %v1913_v41 }
 0x269   :  { %v1874_v39 = vpop.xlane.xlu1 %1873  ;;  %v1905_v53 = vpop.xlane.xlu0 %1904 }
 0x26a   :  { %v1917_v14 = vmul.f32 0.001953125, %v1905_v53  ;;  %v1914_v24 = vmul.f32 0.001953125, %v1874_v39 }
 0x26c   :  { %v1925_v50 = vsub.f32 %v1917_v14, %v1921_v27  ;;  %v1922_v38 = vmul.f32 %v1914_v24, %v1914_v24  ;;  %v1950_v27 = vld [vmem:[%s11819_s5 + $0x18] sm:$0xff] }
 0x26d   :  { %v1859_v2 = vpop.xlane.xlu1 %1858  ;;  %v1864_v56 = vpop.xlane.xlu0 %1863 }
 0x26e   :  { %v1911_v28 = vmul.f32 0.001953125, %v1859_v2  ;;  %v1929_v12 = vmax.f32 %v1925_v50, 0.0  ;;  %v1912_v9 = vmul.f32 0.001953125, %v1864_v56  ;;  %v1948_v2 = vld [vmem:[%s11819_s5 + $0x8] sm:$0xff] }
 0x270   :  { %v1937_v34 = vadd.f32 1e-05, %v1929_v12  ;;  %v1919_v49 = vmul.f32 %v1911_v28, %v1911_v28  ;;  %v1920_v7 = vmul.f32 %v1912_v9, %v1912_v9 }
 0x271   :  { %v1895_v37 = vpop.xlane.xlu1 %1894  ;;  %v1910_v32 = vpop.xlane.xlu0 %1909 }
 0x272   :  { %v1915_v45 = vmul.f32 0.001953125, %v1895_v37  ;;  %8694 = vrsqrt.f32 %v1937_v34  ;;  %v1918_v35 = vmul.f32 0.001953125, %v1910_v32 }
 0x274   :  { %v1923_v22 = vsub.f32 %v1915_v45, %v1919_v49  ;;  %v1926_v21 = vsub.f32 %v1918_v35, %v1922_v38 }
 0x275   :  { %v1900_v13 = vpop.xlane.xlu0 %1899 }
 0x276   :  { %v1927_v30 = vmax.f32 %v1923_v22, 0.0  ;;  %v1930_v23 = vmax.f32 %v1926_v21, 0.0  ;;  %v1916_v4 = vmul.f32 0.001953125, %v1900_v13 }
 0x278   :  { %v1935_v62 = vadd.f32 1e-05, %v1927_v30  ;;  %v1938_v58 = vadd.f32 1e-05, %v1930_v23  ;;  %v1924_v33 = vsub.f32 %v1916_v4, %v1920_v7 }
 0x27a   :  { %8696 = vrsqrt.f32 %v1935_v62  ;;  %v1928_v59 = vmax.f32 %v1924_v33, 0.0 }
 0x27b   :  { %8698 = vrsqrt.f32 %v1938_v58 }
 0x27c   :  { %v1936_v5 = vadd.f32 1e-05, %v1928_v59 }
 0x27e   :  { %8700 = vrsqrt.f32 %v1936_v5 }
 0x27f   :  { %v8695_v60 = vpop.eup %8694 }
 0x280   :  { %v1945_v46 = vmul.f32 %v8695_v60, %v1933_v42 }
 0x282   :  { %1971 = vperm.xlu1 %8064, %v1945_v46   ;;  %v1953_v16 = vmul.f32 %v1945_v46, %v1913_v41 }
 0x284   :  { %v1957_v39 = vsub.f32 %v1949_v43, %v1953_v16 }
 0x287   :  { %v8697_v48 = vpop.eup %8696 }
 0x288   :  { %v8699_v54 = vpop.eup %8698  ;;  %v1943_v40 = vmul.f32 %v8697_v48, %v1931_v25 }
 0x289   :  { %v1946_v26 = vmul.f32 %v8699_v54, %v1934_v17 }
 0x28a   :  { %1961 = vperm.xlu1 %8064, %v1943_v40   ;;  %v1951_v63 = vmul.f32 %v1943_v40, %v1911_v28 }
 0x28b   :  { %1976 = vperm.xlu0 %8065, %v1946_v26   ;;  %v8701_v3 = vpop.eup %8700  ;;  %v1954_v53 = vmul.f32 %v1946_v26, %v1914_v24 }
 0x28c   :  { %v1944_v29 = vmul.f32 %v8701_v3, %v1932_v36  ;;  %v1955_v1 = vsub.f32 %v1947_v47, %v1951_v63 }
 0x28d   :  { %v1958_v14 = vsub.f32 %v1950_v27, %v1954_v53 }
 0x28e   :  { %1966 = vperm.xlu1 %8064, %v1944_v29   ;;  %v1952_v50 = vmul.f32 %v1944_v29, %v1912_v9 }
 0x290   :  { %v1956_v41 = vsub.f32 %v1948_v2, %v1952_v50 }
 0x292   :  { %1997 = vperm.xlu1 %8064, %v1955_v1  }
 0x296   :  { %2007 = vperm.xlu1 %8064, %v1957_v39  }
 0x29a   :  { %2012 = vperm.xlu1 %8064, %v1958_v14  }
 0x29e   :  { %2002 = vperm.xlu1 %8064, %v1956_v41  }
 0x2fd   :  { %v1972_v56 = vpop.permute.xlu1 %1971 }
 0x2fe   :  { %v1988_v62 = vmul.f32 %v1972_v56, %v9671_v20  ;;  %v1989_v58 = vmul.f32 %v1972_v56, %v9676_v6  ;;  %v1990_v33 = vmul.f32 %v1972_v56, %v9702_v61 }
 0x305   :  { %v1962_v28 = vpop.permute.xlu1 %1961 }
 0x306   :  { %v1979_v34 = vmul.f32 %v1962_v28, %v9692_v19  ;;  %v1980_v24 = vmul.f32 %v1962_v28, %v9679_v15  ;;  %v1981_v19 = vmul.f32 %v1962_v28, %v9721_v55  ;;  %v1987_v15 = vmul.f32 %v1972_v56, %v9666_v51  ;;  %v1977_v13 = vpop.permute.xlu0 %1976 }
 0x307   :  { %v1982_v7 = vmul.f32 %v1962_v28, %v9745_v8  ;;  %v1991_v51 = vmul.f32 %v1977_v13, %v9696_v10  ;;  %v1992_v8 = vmul.f32 %v1977_v13, %v9698_v18  ;;  %v1994_v63 = vmul.f32 %v1977_v13, %v9723_v57 }
 0x309   :  { %v1967_v12 = vpop.permute.xlu1 %1966 }
 0x30a   :  { %v1983_v23 = vmul.f32 %v1967_v12, %v9694_v44  ;;  %v1984_v59 = vmul.f32 %v1967_v12, %v9687_v52  ;;  %v1986_v55 = vmul.f32 %v1967_v12, %v9750_v31  ;;  %v1993_v44 = vmul.f32 %v1977_v13, %v9709_v0 }
 0x30b   :  { %v1985_v20 = vmul.f32 %v1967_v12, %v9729_v11 }
 0x30d   :  { %v1998_v37 = vpop.permute.xlu1 %1997 }
 0x30e   :  { %v2015_v49 = vadd.f32 %v1998_v37, %v1979_v34  ;;  %v2016_v32 = vadd.f32 %v1998_v37, %v1980_v24  ;;  %v2017_v4 = vadd.f32 %v1998_v37, %v1981_v19  ;;  %v2018_v42 = vadd.f32 %v1998_v37, %v1982_v7 }
 0x310   :  { %vm2031_vm1 = vcmp.ge.f32.partialorder %v2015_v49, 0.0  ;;  %vm2032_vm12 = vcmp.ge.f32.partialorder %v2016_v32, 0.0  ;;  %v2047_v45 = vmul.f32 0.2, %v2015_v49  ;;  %v2048_v38 = vmul.f32 0.2, %v2016_v32 }
 0x311   :  { %v2008_v9 = vpop.permute.xlu1 %2007  ;;  %v2049_v25 = vmul.f32 0.2, %v2017_v4  ;;  %vm2033_vm6 = vcmp.ge.f32.partialorder %v2017_v4, 0.0  ;;  %v2050_v31 = vmul.f32 0.2, %v2018_v42 }
 0x312   :  { %v9790_v35 = vsel %vm2031_vm1, %v2015_v49, %v2047_v45  ;;  %v9792_v22 = vsel %vm2032_vm12, %v2016_v32, %v2048_v38  ;;  %v2023_v10 = vadd.f32 %v2008_v9, %v1987_v15  ;;  %vm2034_vm1 = vcmp.ge.f32.partialorder %v2018_v42, 0.0 }
 0x313   :  { %12287 = vst [vmem:[#allocation37_spill] sm:$0xff] %v9790_v35  ;;  %12288 = vst [vmem:[#allocation38_spill] sm:$0xff] %v9792_v22  ;;  %v8066_v21 = vpack.i.bf16 %v9792_v22, %v9790_v35  ;;  %v2024_v11 = vadd.f32 %v2008_v9, %v1988_v62  ;;  %v2025_v54 = vadd.f32 %v2008_v9, %v1989_v58 }
 0x314   :  { %v2026_v26 = vadd.f32 %v2008_v9, %v1990_v33  ;;  %v9826_v1 = vsel %vm2033_vm6, %v2017_v4, %v2049_v25  ;;  %v9828_v16 = vsel %vm2034_vm1, %v2018_v42, %v2050_v31  ;;  %vm2039_vm12 = vcmp.ge.f32.partialorder %v2023_v10, 0.0 }
 0x315   :  { %v2013_v30 = vpop.permute.xlu1 %2012  ;;  %8067 = vrot.lane.b32.xlu1 %v8066_v21, %s8732_s2  ;;  %12292 = vst [vmem:[#allocation42_spill] sm:$0xff] %v9826_v1  ;;  %12293 = vst [vmem:[#allocation46_spill] sm:$0xff] %v9828_v16  ;;  %v9837_v50 = vpack.i.bf16 %v9826_v1, %v9792_v22  ;;  %v2055_v2 = vmul.f32 0.2, %v2023_v10  ;;  %v2056_v41 = vmul.f32 0.2, %v2024_v11 }
 0x316   :  { %v2027_v36 = vadd.f32 %v2013_v30, %v1991_v51  ;;  %v2028_v3 = vadd.f32 %v2013_v30, %v1992_v8  ;;  %v2029_v47 = vadd.f32 %v2013_v30, %v1993_v44  ;;  %v2030_v39 = vadd.f32 %v2013_v30, %v1994_v63 }
 0x317   :  { %v2057_v28 = vmul.f32 0.2, %v2025_v54  ;;  %v2058_v34 = vmul.f32 0.2, %v2026_v26  ;;  %v9860_v38 = vsel %vm2039_vm12, %v2023_v10, %v2055_v2 }
 0x318   :  { %v2059_v57 = vmul.f32 0.2, %v2027_v36  ;;  %v2060_v27 = vmul.f32 0.2, %v2028_v3  ;;  %vm2043_vm3 = vcmp.ge.f32.partialorder %v2027_v36, 0.0  ;;  %vm2044_vm6 = vcmp.ge.f32.partialorder %v2028_v3, 0.0 }
 0x319   :  { %v2003_v5 = vpop.permute.xlu1 %2002  ;;  %8072 = vrot.lane.b32.xlu1 %v8066_v21, %s8734_s18  ;;  %v2061_v14 = vmul.f32 0.2, %v2029_v47  ;;  %vm2045_vm1 = vcmp.ge.f32.partialorder %v2029_v47, 0.0  ;;  %v2062_v12 = vmul.f32 0.2, %v2030_v39  ;;  %vm2046_vm13 = vcmp.ge.f32.partialorder %v2030_v39, 0.0 }
 0x31a   :  { %v2019_v60 = vadd.f32 %v2003_v5, %v1983_v23  ;;  %v2020_v46 = vadd.f32 %v2003_v5, %v1984_v59  ;;  %v2022_v6 = vadd.f32 %v2003_v5, %v1986_v55  ;;  %v2021_v48 = vadd.f32 %v2003_v5, %v1985_v20 }
 0x31b   :  { %v9845_v24 = vsel %vm2043_vm3, %v2027_v36, %v2059_v57  ;;  %v9847_v37 = vsel %vm2044_vm6, %v2028_v3, %v2060_v27  ;;  %v9849_v49 = vsel %vm2045_vm1, %v2029_v47, %v2061_v14  ;;  %v9872_v19 = vsel %vm2046_vm13, %v2030_v39, %v2062_v12 }
 0x31c   :  { %vm2035_vm5 = vcmp.ge.f32.partialorder %v2019_v60, 0.0  ;;  %vm2036_vm11 = vcmp.ge.f32.partialorder %v2020_v46, 0.0  ;;  %v2051_v52 = vmul.f32 0.2, %v2019_v60  ;;  %v2052_v61 = vmul.f32 0.2, %v2020_v46 }
 0x31d   :  { %vm2038_vm7 = vcmp.ge.f32.partialorder %v2022_v6, 0.0  ;;  %v2054_v17 = vmul.f32 0.2, %v2022_v6  ;;  %8077 = vrot.lane.b32.xlu1 %v8066_v21, %s8735_s19  ;;  %v2053_v43 = vmul.f32 0.2, %v2021_v48  ;;  %12295 = vst [vmem:[#allocation44_spill] sm:$0xff] %v9849_v49  ;;  %v9880_v13 = vpack.i.bf16 %v9849_v49, %v9847_v37 }
 0x31e   :  { %v9811_v18 = vsel %vm2035_vm5, %v2019_v60, %v2051_v52  ;;  %v9813_v0 = vsel %vm2036_vm11, %v2020_v46, %v2052_v61  ;;  %vm2040_vm5 = vcmp.ge.f32.partialorder %v2024_v11, 0.0  ;;  %vm2037_vm11 = vcmp.ge.f32.partialorder %v2021_v48, 0.0 }
 0x31f   :  { %12289 = vst [vmem:[#allocation39_spill] sm:$0xff] %v9811_v18  ;;  %12290 = vst [vmem:[#allocation40_spill] sm:$0xff] %v9813_v0  ;;  %v9818_v40 = vpack.i.bf16 %v9813_v0, %v9811_v18  ;;  %v9820_v29 = vsel %vm2038_vm7, %v2022_v6, %v2054_v17  ;;  %vm2041_vm7 = vcmp.ge.f32.partialorder %v2025_v54, 0.0  ;;  %v9841_v56 = vsel %vm2037_vm11, %v2021_v48, %v2053_v43 }
 0x320   :  { %12291 = vst [vmem:[#allocation41_spill] sm:$0xff] %v9820_v29  ;;  %v9833_v53 = vpack.i.bf16 %v9820_v29, %v9828_v16  ;;  %12294 = vst [vmem:[#allocation43_spill] sm:$0xff] %v9841_v56  ;;  %v8101_v32 = vpack.i.bf16 %v9841_v56, %v9826_v1  ;;  %v9857_v45 = vpack.i.bf16 %v9811_v18, %v9790_v35  ;;  %vm12297_vm3 = vcmp.ge.f32.partialorder %v2026_v26, 0.0 }
 0x321   :  { %8092 = vrot.lane.b32.xlu0 %v9818_v40, %s8732_s2  ;;  %8082 = vrot.lane.b32.xlu1 %v8066_v21, %s8736_s1  ;;  %v9863_v9 = vsel %vm2040_vm5, %v2024_v11, %v2056_v41  ;;  %v9867_v21 = vpack.i.bf16 %v9841_v56, %v9813_v0  ;;  %v9870_v30 = vsel %vm2041_vm7, %v2025_v54, %v2057_v28  ;;  %vm12298_vm13 = vcmask 130048   ;;  %vm10051_vm5 = vmpackc.low %vm8942_vm9, %vm8942_vm9 }
 0x322   :  { %12296 = vst [vmem:[#allocation45_spill] sm:$0xff] %v9870_v30  ;;  %v9876_v15 = vsel %vm12297_vm3, %v2026_v26, %v2058_v34  ;;  %v9884_v7 = vpack.i.bf16 %v9845_v24, %v9860_v38  ;;  %v8166_v42 = vpack.i.bf16 %v9863_v9, %v9860_v38  ;;  %v8191_v60 = vpack.i.bf16 %v9847_v37, %v9845_v24  ;;  %vm12299_vm12 = vmmov %vm12298_vm13 }
 0x323   :  { %v8201_v51 = vpack.i.bf16 %v9849_v49, %v9870_v30  ;;  %v8186_v8 = vpack.i.bf16 %v9870_v30, %v9863_v9  ;;  %v8196_v44 = vpack.i.bf16 %v9872_v19, %v9876_v15  ;;  %vm12304_vm11 = vmmov %vm12299_vm12  ;;  %vm12308_vm3 = vcmask 138240  }
 0x324   :  { %vm12305_vm7 = vmmov %vm12304_vm11  ;;  %v12332_v49 = vmov 0 }
 0x325   :  { %8097 = vrot.lane.b32.xlu0 %v9833_v53, %s8732_s2  ;;  %8087 = vrot.lane.b32.xlu1 %v9837_v50, %s8737_s20  ;;  %vm12306_vm6 = vmmov %vm12305_vm7 }
 0x326   :  { %vm12307_vm1 = vmmov %vm12306_vm6 }
 0x329   :  { %8107 = vrot.lane.b32.xlu0 %v9818_v40, %s8734_s18  ;;  %8102 = vrot.lane.b32.xlu1 %v8101_v32, %s8732_s2 }
 0x32d   :  { %8112 = vrot.lane.b32.xlu0 %v9833_v53, %s8734_s18  ;;  %8117 = vrot.lane.b32.xlu1 %v8101_v32, %s8734_s18 }
 0x331   :  { %8122 = vrot.lane.b32.xlu0 %v9818_v40, %s8735_s19  ;;  %8132 = vrot.lane.b32.xlu1 %v8101_v32, %s8735_s19 }
 0x335   :  { %8127 = vrot.lane.b32.xlu0 %v9833_v53, %s8735_s19  ;;  %8147 = vrot.lane.b32.xlu1 %v8101_v32, %s8736_s1 }
 0x339   :  { %8137 = vrot.lane.b32.xlu0 %v9818_v40, %s8736_s1  ;;  %8162 = vrot.lane.b32.xlu1 %v9833_v53, %s8737_s20 }
 0x33d   :  { %8142 = vrot.lane.b32.xlu0 %v9833_v53, %s8736_s1  ;;  %8167 = vrot.lane.b32.xlu1 %v8166_v42, %s8732_s2 }
 0x341   :  { %8152 = vrot.lane.b32.xlu0 %v9867_v21, %s8737_s20  ;;  %8172 = vrot.lane.b32.xlu1 %v8166_v42, %s8734_s18 }
 0x345   :  { %8157 = vrot.lane.b32.xlu0 %v9857_v45, %s8737_s20  ;;  %8192 = vrot.lane.b32.xlu1 %v8191_v60, %s8732_s2 }
 0x349   :  { %8177 = vrot.lane.b32.xlu0 %v8166_v42, %s8735_s19  ;;  %8202 = vrot.lane.b32.xlu1 %v8201_v51, %s8732_s2 }
 0x34d   :  { %8182 = vrot.lane.b32.xlu0 %v8166_v42, %s8736_s1  ;;  %8222 = vrot.lane.b32.xlu1 %v9837_v50, %s8738_s21 }
 0x351   :  { %8187 = vrot.lane.b32.xlu0 %v8186_v8, %s8737_s20  ;;  %8227 = vrot.lane.b32.xlu1 %v8201_v51, %s8734_s18 }
 0x355   :  { %8197 = vrot.lane.b32.xlu0 %v8196_v44, %s8732_s2  ;;  %8232 = vrot.lane.b32.xlu1 %v8191_v60, %s8735_s19 }
 0x359   :  { %8207 = vrot.lane.b32.xlu0 %v8191_v60, %s8734_s18  ;;  %8247 = vrot.lane.b32.xlu1 %v8201_v51, %s8735_s19 }
 0x35d   :  { %8212 = vrot.lane.b32.xlu0 %v8196_v44, %s8734_s18  ;;  %8252 = vrot.lane.b32.xlu1 %v8191_v60, %s8736_s1 }
 0x361   :  { %8217 = vrot.lane.b32.xlu0 %v8186_v8, %s8738_s21  ;;  %8267 = vrot.lane.b32.xlu1 %v9833_v53, %s8738_s21 }
 0x365   :  { %8237 = vrot.lane.b32.xlu0 %v8196_v44, %s8735_s19  ;;  %8277 = vrot.lane.b32.xlu1 %v9837_v50, %s8739_s22 }
 0x369   :  { %8242 = vrot.lane.b32.xlu0 %v9867_v21, %s8738_s21  ;;  %8287 = vrot.lane.b32.xlu1 %v8201_v51, %s8736_s1 }
 0x36d   :  { %8257 = vrot.lane.b32.xlu0 %v8196_v44, %s8736_s1  ;;  %8292 = vrot.lane.b32.xlu1 %v9880_v13, %s8737_s20 }
 0x371   :  { %8262 = vrot.lane.b32.xlu0 %v9857_v45, %s8738_s21  ;;  %8307 = vrot.lane.b32.xlu1 %v9833_v53, %s8739_s22 }
 0x375   :  { %8272 = vrot.lane.b32.xlu0 %v8186_v8, %s8739_s22  ;;  %8312 = vrot.lane.b32.xlu1 %v8196_v44, %s8737_s20 }
 0x379   :  { %8282 = vrot.lane.b32.xlu0 %v9867_v21, %s8739_s22  ;;  %8317 = vrot.lane.b32.xlu1 %v9880_v13, %s8738_s21 }
 0x37d   :  { %8297 = vrot.lane.b32.xlu0 %v9884_v7, %s8737_s20  ;;  %8332 = vrot.lane.b32.xlu1 %v9837_v50, %s8740_s23 }
 0x381   :  { %8302 = vrot.lane.b32.xlu0 %v9857_v45, %s8739_s22  ;;  %8337 = vrot.lane.b32.xlu1 %v8196_v44, %s8738_s21 }
 0x385   :  { %8322 = vrot.lane.b32.xlu0 %v9884_v7, %s8738_s21  ;;  %8342 = vrot.lane.b32.xlu1 %v9880_v13, %s8739_s22 }
 0x387   :  { %v9980_v46 = vpop.permute.xlu1 %8067 }
 0x388   :  { %v8070_v12 = vunpack.i.h.bf16 %v9980_v46 }
 0x389   :  { %8327 = vrot.lane.b32.xlu0 %v8186_v8, %s8740_s23  ;;  %8357 = vrot.lane.b32.xlu1 %v8196_v44, %s8739_s22 }
 0x38b   :  { %v9984_v20 = vpop.permute.xlu1 %8072 }
 0x38c   :  { %v8075_v62 = vunpack.i.h.bf16 %v9984_v20 }
 0x38d   :  { %8347 = vrot.lane.b32.xlu0 %v9884_v7, %s8739_s22  ;;  %8362 = vrot.lane.b32.xlu1 %v9880_v13, %s8740_s23  ;;  %v12301_v13 = vmov 0 }
 0x38e   :  { %v12302_v13 = vsel %vm10051_vm5, 4294967295, %v12301_v13 }
 0x38f   :  { %v9990_v25 = vpop.permute.xlu1 %8077  ;;  %12303 = vst [vmem:[#allocation48_spill] sm:$0xff] %v12302_v13 }
 0x391   :  { %8352 = vrot.lane.b32.xlu0 %v9867_v21, %s8740_s23  ;;  %8377 = vrot.lane.b32.xlu1 %v8196_v44, %s8740_s23 }
 0x393   :  { %v8093_v6 = vpop.permute.xlu0 %8092  ;;  %v9995_v52 = vpop.permute.xlu1 %8082 }
 0x394   :  { %v8095_v42 = vunpack.i.h.bf16 %v8093_v6  ;;  %v8094_v60 = vunpack.i.l.bf16 %v8093_v6  ;;  %v11958_v6 = vunpack.i.h.bf16 %v9990_v25 }
 0x395   :  { %8367 = vrot.lane.b32.xlu0 %v9884_v7, %s8740_s23  ;;  %8382 = vrot.lane.b32.xlu1 %v9833_v53, %s8740_s23  ;;  %v8069_v7 = vunpack.i.l.bf16 %v9980_v46  ;;  %v8074_v46 = vunpack.i.l.bf16 %v9984_v20 }
 0x396   :  { %v2228_v4 = vsel %vm12305_vm7, %v8094_v60, %v8095_v42  ;;  %vm12312_vm7 = vmmov %vm12307_vm1 }
 0x397   :  { %v8098_v61 = vpop.permute.xlu0 %8097  ;;  %v10001_v31 = vpop.permute.xlu1 %8087 }
 0x398   :  { %v8100_v8 = vunpack.i.h.bf16 %v8098_v61  ;;  %v8099_v44 = vunpack.i.l.bf16 %v8098_v61 }
 0x399   :  { %8372 = vrot.lane.b32.xlu0 %v9857_v45, %s8740_s23 }
 0x39a   :  { %v10078_v20 = vsel %vm12307_vm1, %v8100_v8, %v8094_v60  ;;  %v12314_v60 = vunpack.i.l.bf16 %v9990_v25 }
 0x39b   :  { %v10005_v17 = vpop.permute.xlu0 %8107  ;;  %v8103_v10 = vpop.permute.xlu1 %8102 }
 0x39c   :  { %v8110_v55 = vunpack.i.h.bf16 %v10005_v17  ;;  %v8109_v5 = vunpack.i.l.bf16 %v10005_v17  ;;  %v8105_v33 = vunpack.i.h.bf16 %v8103_v10  ;;  %v8104_v58 = vunpack.i.l.bf16 %v8103_v10 }
 0x39e   :  { %v10081_v23 = vsel %vm12308_vm3, %v8109_v5, %v8110_v55 }
 0x39f   :  { %v10007_v48 = vpop.permute.xlu0 %8112  ;;  %v10009_v11 = vpop.permute.xlu1 %8117 }
 0x3a0   :  { %v8114_v35 = vunpack.i.l.bf16 %v10007_v48 }
 0x3a3   :  { %v10011_v54 = vpop.permute.xlu0 %8122  ;;  %v10013_v40 = vpop.permute.xlu1 %8132 }
 0x3a7   :  { %v10015_v26 = vpop.permute.xlu0 %8127  ;;  %v10017_v36 = vpop.permute.xlu1 %8147 }
 0x3ab   :  { %v10019_v3 = vpop.permute.xlu0 %8137  ;;  %v10021_v63 = vpop.permute.xlu1 %8162 }
 0x3af   :  { %v10023_v47 = vpop.permute.xlu0 %8142  ;;  %v10025_v43 = vpop.permute.xlu1 %8167 }
 0x3b0   :  { %v8170_v27 = vunpack.i.h.bf16 %v10025_v43  ;;  %v11955_v14 = vunpack.i.l.bf16 %v10025_v43 }
 0x3b2   :  { %v2231_v34 = vsel %vm12298_vm13, %v11955_v14, %v8170_v27  ;;  %vm12309_vm13 = vmmov %vm12307_vm1 }
 0x3b3   :  { %v10027_v39 = vpop.permute.xlu0 %8152  ;;  %v10029_v53 = vpop.permute.xlu1 %8172  ;;  %v10086_v14 = vsel %vm12309_vm13, %v8095_v42, %v8105_v33  ;;  %vm12319_vm13 = vmmov %vm12312_vm7 }
 0x3b7   :  { %v10031_v57 = vpop.permute.xlu0 %8157  ;;  %v10035_v50 = vpop.permute.xlu1 %8192 }
 0x3b8   :  { %v8195_v2 = vunpack.i.h.bf16 %v10035_v50  ;;  %v11954_v41 = vunpack.i.l.bf16 %v10035_v50 }
 0x3ba   :  { %v2234_v32 = vsel %vm12299_vm12, %v11954_v41, %v8195_v2  ;;  %vm12310_vm12 = vmmov %vm12307_vm1 }
 0x3bb   :  { %v10039_v28 = vpop.permute.xlu0 %8177  ;;  %v8203_v45 = vpop.permute.xlu1 %8202  ;;  %v7572_v51 = vpack.c.bf16 %v2234_v32, %v2231_v34  ;;  %v10069_v32 = vsel %vm12304_vm11, %v8069_v7, %v8070_v12  ;;  %v2230_v17 = vsel %vm12310_vm12, %v8105_v33, %v8100_v8  ;;  %vm12311_vm11 = vmmov %vm12307_vm1  ;;  %v2227_v34 = vsel %vm12312_vm7, %v8104_v58, %v8099_v44 }
 0x3bc   :  { %v10090_v10 = vsel %vm12311_vm11, %v8070_v12, %v8104_v58  ;;  %vm12315_vm1 = vcmask 121856   ;;  %v8205_v1 = vunpack.i.h.bf16 %v8203_v45  ;;  %v8204_v42 = vunpack.i.l.bf16 %v8203_v45  ;;  %vm12320_vm12 = vmmov %vm12312_vm7 }
 0x3bd   :  { %7573 = vmatprep.subr.msk.bf16.mxu0 %vm10051_vm5, %v7572_v51  ;;  %v10075_v51 = vsel %vm12306_vm6, %v8099_v44, %v8069_v7  ;;  %vm12313_vm6 = vmmov %vm12308_vm3  ;;  %v10101_v21 = vsel %vm12315_vm1, %v12314_v60, %v11958_v6  ;;  %v12316_v33 = vunpack.i.h.bf16 %v9995_v52  ;;  %v12317_v12 = vunpack.i.l.bf16 %v9995_v52 }
 0x3be   :  { %v10094_v7 = vsel %vm12313_vm6, %v8074_v46, %v8075_v62  ;;  %vm12318_vm3 = vcmask 7168   ;;  %v7578_v44 = vpack.c.bf16 %v2228_v4, %v10069_v32  ;;  %v8115_v6 = vunpack.i.h.bf16 %v10007_v48  ;;  %vm10132_vm11 = vmpackc.low %vm8946_vm10, %vm8946_vm10  ;;  %v12330_v4 = vld [vmem:[#allocation5_spill] sm:$0xff] }
 0x3bf   :  { %v10058_v59 = vpop.permute.xlu0 %8182  ;;  %v10066_v61 = vpop.permute.xlu1 %8222  ;;  %v10110_v58 = vsel %vm12318_vm3, %v12317_v12, %v12316_v33  ;;  %v7591_v16 = vpack.c.bf16 %v2230_v17, %v2227_v34  ;;  %v8120_v33 = vunpack.i.h.bf16 %v10009_v11  ;;  %v8119_v12 = vunpack.i.l.bf16 %v10009_v11  ;;  %vm12325_vm6 = vmmov %vm12312_vm7 }
 0x3c0   :  { %v8174_v32 = vunpack.i.l.bf16 %v10029_v53  ;;  %v2232_v60 = vsel %vm12319_vm13, %v8170_v27, %v8204_v42  ;;  %v2235_v45 = vsel %vm12320_vm12, %v8195_v2, %v8205_v1  ;;  %v12322_v48 = vmov 0  ;;  %vm12327_vm1 = vmmov %vm12325_vm6 }
 0x3c1   :  { %v12323_v48 = vsel %vm10132_vm11, 4294967295, %v12322_v48  ;;  %v12326_v34 = vunpack.i.l.bf16 %v10025_v43  ;;  %v12328_v27 = vunpack.i.l.bf16 %v10035_v50  ;;  %vm12329_vm3 = vmmov %vm12327_vm1  ;;  %vm12331_vm13 = vnez %v12330_v4 }
 0x3c2   :  { %12324 = vst [vmem:[#allocation47_spill] sm:$0xff] %v12323_v48  ;;  %vm10147_vm12 = vmpackc.low %vm12331_vm13, %vm12331_vm13  ;;  %vm12335_vm10 = vcmask 138240  }
 0x3c3   :  { %v10083_v41 = vpop.permute.xlu0 %8187  ;;  %v10103_v56 = vpop.permute.xlu1 %8227  ;;  %v12333_v49 = vsel %vm10147_vm12, 4294967295, %v12332_v49  ;;  %v10152_v22 = vsel %vm12335_vm10, %v8114_v35, %v8074_v46 }
 0x3c4   :  { %12334 = vst [vmem:[#allocation49_spill] sm:$0xff] %v12333_v49 }
 0x3c7   :  { %v8198_v18 = vpop.permute.xlu0 %8197  ;;  %v10127_v30 = vpop.permute.xlu1 %8232 }
 0x3c8   :  { %v8200_v29 = vunpack.i.h.bf16 %v8198_v18  ;;  %v8199_v8 = vunpack.i.l.bf16 %v8198_v18 }
 0x3ca   :  { %v2233_v11 = vsel %vm12312_vm7, %v8204_v42, %v8199_v8  ;;  %v2236_v18 = vsel %vm12325_vm6, %v8205_v1, %v8200_v29  ;;  %v2255_v17 = vsel %vm12327_vm1, %v8199_v8, %v12326_v34  ;;  %v2256_v2 = vsel %vm12329_vm3, %v8200_v29, %v12328_v27  ;;  %vm12336_vm7 = vmmov %vm12335_vm10  ;;  %v12337_v34 = vld [vmem:[#allocation8_spill] sm:$0xff] }
 0x3cb   :  { %v10155_v1 = vsel %vm12336_vm7, %v8115_v6, %v8109_v5  ;;  %v7575_v43 = vpack.c.bf16 %v2256_v2, %v2255_v17  ;;  %v8208_v42 = vpop.permute.xlu0 %8207  ;;  %v7585_v8 = vpack.c.bf16 %v2236_v18, %v2233_v11  ;;  %vm12338_vm6 = vnez %v12337_v34  ;;  %vm12342_vm3 = vmmov %vm12336_vm7  ;;  %v10176_v18 = vpop.permute.xlu1 %8247 }
 0x3cc   :  { %vm10160_vm1 = vmpackc.low %vm12338_vm6, %vm12338_vm6  ;;  %v12339_v29 = vmov 0  ;;  %v10165_v50 = vsel %vm12342_vm3, %v8110_v55, %v8120_v33  ;;  %v7588_v27 = vpack.c.bf16 %v2235_v45, %v2232_v60  ;;  %v8210_v4 = vunpack.i.h.bf16 %v8208_v42 }
 0x3cd   :  { %v12340_v29 = vsel %vm10160_vm1, 4294967295, %v12339_v29  ;;  %v8209_v46 = vunpack.i.l.bf16 %v8208_v42  ;;  %vm12343_vm10 = vmmov %vm12342_vm3  ;;  %7576 = vmatpush1.bf16.msk.msra.mxu0 %vm10132_vm11, %v7575_v43  ;;  %7586 = vmatprep.subr.msk.bf16.mxu1 %vm10147_vm12, %v7585_v8  ;;  %v8125_v55 = vunpack.i.h.bf16 %v10011_v54  ;;  %v12346_v60 = vunpack.i.h.bf16 %v10029_v53 }
 0x3ce   :  { %12341 = vst [vmem:[#allocation50_spill] sm:$0xff] %v12340_v29  ;;  %v10168_v0 = vsel %vm12343_vm10, %v8120_v33, %v8115_v6  ;;  %vm12344_vm7 = vmmov %vm12342_vm3  ;;  %7579 = vmatprep.subr.msk.bf16.mxu0 %vm10051_vm5, %v7578_v44  ;;  %7589 = vmatpush1.bf16.msk.msra.mxu1 %vm10160_vm1, %v7588_v27  ;;  %v8135_v45 = vunpack.i.h.bf16 %v10013_v40  ;;  %v8134_v33 = vunpack.i.l.bf16 %v10013_v40  ;;  %v8229_v42 = vunpack.i.l.bf16 %v10103_v56  ;;  %v8685_v40 = vld [vmem:[%s11820_s6 + $0x8] sm:$0xff]  }
 0x3cf   :  { %v10171_v5 = vsel %vm12344_vm7, %v8075_v62, %v8119_v12  ;;  %vm12345_vm13 = vmmov %vm12342_vm3  ;;  %v8213_v17 = vpop.permute.xlu0 %8212  ;;  %7592 = vmatprep.subr.msk.bf16.mxu1 %vm10147_vm12, %v7591_v16  ;;  %v12351_v27 = vmov 0  ;;  %v12355_v43 = vpack.c.bf16 %v10078_v20, %v10075_v51  ;;  %v12362_v51 = vmov 0 }
 0x3d0   :  { %v10174_v11 = vsel %vm12345_vm13, %v8119_v12, %v8114_v35  ;;  %vm12347_vm10 = vmmov %vm12342_vm3  ;;  %v8230_v12 = vunpack.i.h.bf16 %v10103_v56  ;;  %v8215_v8 = vunpack.i.h.bf16 %v8213_v17  ;;  %v8214_v44 = vunpack.i.l.bf16 %v8213_v17  ;;  %v10213_v17 = vpop.permute.xlu1 %8252 }
 0x3d1   :  { %v2137_v62 = vsel %vm12347_vm10, %v8174_v32, %v12346_v60  ;;  %vm12348_vm7 = vmmov %vm12342_vm3  ;;  %v12349_v60 = vld [vmem:[#allocation11_spill] sm:$0xff]  ;;  %7582 = vmatpush1.bf16.msk.msra.mxu0 %vm10132_vm11, %v12355_v43  ;;  %v8180_v20 = vunpack.i.h.bf16 %v10039_v28 }
 0x3d2   :  { %v2140_v35 = vsel %vm12348_vm7, %v8209_v46, %v8210_v4  ;;  %vm12350_vm13 = vnez %v12349_v60  ;;  %vm12354_vm7 = vmmov %vm12342_vm3  ;;  %v2139_v6 = vsel %vm12342_vm3, %v8229_v42, %v8214_v44 }
 0x3d3   :  { %v7599_v2 = vpack.c.bf16 %v2140_v35, %v2137_v62  ;;  %vm10202_vm10 = vmpackc.low %vm12350_vm13, %vm12350_vm13  ;;  %v8235_v62 = vunpack.i.h.bf16 %v10127_v30  ;;  %v8234_v35 = vunpack.i.l.bf16 %v10127_v30  ;;  %v2141_v56 = vsel %vm12354_vm7, %v8210_v4, %v8230_v12  ;;  %v12360_v4 = vld [vmem:[#allocation9_spill] sm:$0xff] }
 0x3d4   :  { %v12352_v27 = vsel %vm10202_vm10, 4294967295, %v12351_v27  ;;  %vm12356_vm13 = vmmov %vm12342_vm3  ;;  %v12359_v30 = vpack.c.bf16 %v10086_v14, %v10090_v10  ;;  %vm12361_vm7 = vnez %v12360_v4  ;;  %v12365_v14 = vld [vmem:[#allocation10_spill] sm:$0xff]  ;;  %v12367_v10 = vmov 0 }
 0x3d5   :  { %12353 = vst [vmem:[#allocation51_spill] sm:$0xff] %v12352_v27  ;;  %v2142_v60 = vsel %vm12356_vm13, %v8230_v12, %v8215_v8  ;;  %vm12357_vm6 = vmmov %vm12342_vm3  ;;  %v8179_v12 = vunpack.i.l.bf16 %v10039_v28  ;;  %7600 = vmatprep.subr.msk.bf16.mxu0 %vm10202_vm10, %v7599_v2  ;;  %v7621_v28 = vpack.c.bf16 %v10165_v50, %v10171_v5  ;;  %vm12371_vm13 = vcmask 261120   ;;  %v10269_v5 = vpop.permute.xlu1 %8267 }
 0x3d6   :  { %v2161_v16 = vsel %vm12357_vm6, %v8214_v44, %v8174_v32  ;;  %vm12358_vm9 = vmmov %vm12342_vm3  ;;  %7595 = vmatpush1.bf16.msk.msra.mxu1 %vm10160_vm1, %v12359_v30  ;;  %v7612_v43 = vpack.c.bf16 %v2142_v60, %v2139_v6  ;;  %7583 = vmatmul.mubr.msk.bf16.vlgmr.msra.gmra.mxu0 %vm12371_vm13, %v8685_v40  ;;  %v12372_v44 = vld [vmem:[#allocation12_spill] sm:$0xff]  ;;  %v7618_v6 = vpack.c.bf16 %v10168_v0, %v10174_v11  ;;  %vm12377_vm1 = vcmask 121856  }
 0x3d7   :  { %v2162_v34 = vsel %vm12358_vm9, %v8215_v8, %v8209_v46  ;;  %vm10232_vm12 = vmpackc.low %vm12361_vm7, %vm12361_vm7  ;;  %v10240_v46 = vpop.permute.xlu0 %8217  ;;  %vm12366_vm9 = vnez %v12365_v14  ;;  %v7608_v8 = vpack.c.bf16 %v10155_v1, %v10152_v22  ;;  %vm12373_vm7 = vnez %v12372_v44 }
 0x3d8   :  { %v12363_v51 = vsel %vm10232_vm12, 4294967295, %v12362_v51  ;;  %v7602_v32 = vpack.c.bf16 %v2162_v34, %v2161_v16  ;;  %vm10245_vm6 = vmpackc.low %vm12366_vm9, %vm12366_vm9  ;;  %v12370_v34 = vunpack.i.h.bf16 %v10029_v53  ;;  %v12374_v16 = vmov 0 }
 0x3d9   :  { %12364 = vst [vmem:[#allocation52_spill] sm:$0xff] %v12363_v51  ;;  %v12368_v10 = vsel %vm10245_vm6, 4294967295, %v12367_v10  ;;  %vm10260_vm9 = vmpackc.low %vm12373_vm7, %vm12373_vm7  ;;  %v2518_v22 = vsel %vm12377_vm1, %v8234_v35, %v8235_v62  ;;  %v8250_v50 = vunpack.i.h.bf16 %v10176_v18  ;;  %v8249_v53 = vunpack.i.l.bf16 %v10176_v18  ;;  %7613 = vmatprep.subr.msk.bf16.mxu1 %vm10245_vm6, %v7612_v43  ;;  %v10325_v44 = vpop.permute.xlu1 %8277 }
 0x3da   :  { %12369 = vst [vmem:[#allocation53_spill] sm:$0xff] %v12368_v10  ;;  %v2138_v2 = vsel %vm12342_vm3, %v12370_v34, %v8229_v42  ;;  %v12375_v16 = vsel %vm10260_vm9, 4294967295, %v12374_v16  ;;  %vm12378_vm3 = vmmov %vm12371_vm13  ;;  %7603 = vmatpush1.bf16.msk.msra.mxu0 %vm10232_vm12, %v7602_v32  ;;  %v12379_v42 = vunpack.i.l.bf16 %v10011_v54  ;;  %v12382_v11 = vunpack.i.h.bf16 %v9990_v25 }
 0x3db   :  { %12376 = vst [vmem:[#allocation54_spill] sm:$0xff] %v12375_v16  ;;  %v7615_v1 = vpack.c.bf16 %v2141_v56, %v2138_v2  ;;  %7596 = vmatmul.mubr.msk.bf16.vlgmr.msra.gmra.mxu1 %vm12378_vm3, %v8685_v40  ;;  %vm12380_vm13 = vmmov %vm12377_vm1  ;;  %v12383_v18 = vpack.c.bf16 %v10081_v23, %v10094_v7  ;;  %v12384_v40 = vunpack.i.l.bf16 %v10015_v26  ;;  %v8140_v34 = vunpack.i.h.bf16 %v10019_v3  ;;  %v8238_v23 = vpop.permute.xlu0 %8237  ;;  %v12389_v7 = vld [vmem:[#allocation13_spill] sm:$0xff] }
 0x3dc   :  { %v2512_v60 = vsel %vm12380_vm13, %v12379_v42, %v8125_v55  ;;  %vm12381_vm7 = vmmov %vm12377_vm1  ;;  %v10283_v56 = vsel %vm12377_vm1, %v12382_v11, %v8134_v33  ;;  %v12391_v2 = vmov 0  ;;  %v8240_v42 = vunpack.i.h.bf16 %v8238_v23 }
 0x3dd   :  { %v10278_v0 = vsel %vm12381_vm7, %v8125_v55, %v8135_v45  ;;  %7606 = vmatprep.subr.msk.bf16.mxu0 %vm10202_vm10, %v12383_v18  ;;  %vm12385_vm3 = vmmov %vm12377_vm1  ;;  %v12386_v55 = vunpack.i.h.bf16 %v10015_v26  ;;  %7616 = vmatpush1.bf16.msk.msra.mxu1 %vm10260_vm9, %v7615_v1  ;;  %v8239_v11 = vunpack.i.l.bf16 %v8238_v23  ;;  %v8686_v1 = vld [vmem:[%s11820_s6] sm:$0xff]   ;;  %v12411_v23 = vunpack.i.l.bf16 %v10011_v54 }
 0x3de   :  { %v10295_v30 = vsel %vm12385_vm3, %v8134_v33, %v12384_v40  ;;  %vm12387_vm7 = vmmov %vm12377_vm1  ;;  %v12394_v33 = vmov 0   ;;  %7619 = vmatprep.subr.msk.bf16.mxu1 %vm10245_vm6, %v7618_v6  ;;  %v2516_v40 = vsel %vm12385_vm3, %v8180_v20, %v8249_v53  ;;  %7609 = vmatpush1.bf16.msk.msra.mxu0 %vm10232_vm12, %v7608_v8  ;;  %v12405_v8 = vmov 0 }
 0x3df   :  { %v10300_v32 = vsel %vm12387_vm7, %v8135_v45, %v12386_v55  ;;  %vm12388_vm13 = vmmov %vm12377_vm1  ;;  %vm12390_vm1 = vnez %v12389_v7  ;;  %2419 = vmatprep.mubr.bf16.mxu0 %v12394_v33  ;;  %2462 = vmatprep.mubr.bf16.mxu1 %v12394_v33  ;;  %v8255_v7 = vunpack.i.h.bf16 %v10213_v17  ;;  %v8254_v45 = vunpack.i.l.bf16 %v10213_v17 }
 0x3e0   :  { %v2515_v43 = vsel %vm12388_vm13, %v8179_v12, %v8180_v20  ;;  %vm10309_vm10 = vmpackc.low %vm12390_vm1, %vm12390_vm1  ;;  %v8185_v6 = vunpack.i.h.bf16 %v10058_v59 }
 0x3e1   :  { %v12392_v2 = vsel %vm10309_vm10, 4294967295, %v12391_v2  ;;  %v7628_v18 = vpack.c.bf16 %v2518_v22, %v2515_v43  ;;  %vm12395_vm7 = vmmov %vm12385_vm3  ;;  %v12397_v22 = vmov 0  ;;  %7622 = vmatpush1.bf16.msk.msra.mxu1 %vm10260_vm9, %v7621_v28  ;;  %v7634_v28 = vpack.c.bf16 %v2512_v60, %v10101_v21 }
 0x3e2   :  { %12393 = vst [vmem:[#allocation61_spill] sm:$0xff] %v12392_v2  ;;  %v2519_v55 = vsel %vm12395_vm7, %v8235_v62, %v8250_v50  ;;  %vm10332_vm13 = vmpackc.low %vm9054_vm14, %vm9054_vm14  ;;  %v8150_v21 = vunpack.i.h.bf16 %v10017_v36 }
 0x3e3   :  { %v12398_v22 = vsel %vm10332_vm13, 4294967295, %v12397_v22  ;;  %vm12400_vm1 = vmmov %vm12385_vm3  ;;  %7629 = vmatprep.subr.msk.bf16.mxu0 %vm10309_vm10, %v7628_v18  ;;  %v7644_v54 = vpack.c.bf16 %v2519_v55, %v2516_v40  ;;  %v8149_v55 = vunpack.i.l.bf16 %v10017_v36 }
 0x3e4   :  { %12399 = vst [vmem:[#allocation55_spill] sm:$0xff] %v12398_v22  ;;  %v2517_v20 = vsel %vm12400_vm1, %v8249_v53, %v8239_v11  ;;  %vm12401_vm3 = vmmov %vm12400_vm1  ;;  %v8184_v53 = vunpack.i.l.bf16 %v10058_v59  ;;  %v12412_v59 = vunpack.i.h.bf16 %v10015_v26 }
 0x3e5   :  { %v2520_v62 = vsel %vm12401_vm3, %v8250_v50, %v8240_v42  ;;  %vm12402_vm7 = vmmov %vm12400_vm1  ;;  %v7650_v50 = vpack.c.bf16 %v10278_v0, %v10283_v56  ;;  %vm12413_vm3 = vcmask 261120   ;;  %v12415_v0 = vmov 0 }
 0x3e6   :  { %v2539_v43 = vsel %vm12402_vm7, %v8239_v11, %v8179_v12  ;;  %vm12403_vm6 = vmmov %vm12400_vm1  ;;  %v10353_v12 = vpop.permute.xlu0 %8242  ;;  %v12409_v11 = vunpack.i.l.bf16 %v10015_v26  ;;  %7610 = vmatmul.mubr.msk.bf16.vlgmr.msra.gmra.mxu0 %vm12413_vm3, %v8686_v1  ;;  %v8144_v56 = vunpack.i.l.bf16 %v10023_v47 }
 0x3e7   :  { %v2540_v17 = vsel %vm12403_vm6, %v8240_v42, %v8234_v35  ;;  %vm10345_vm12 = vmpackc.low %vm9044_vm8, %vm9044_vm8  ;;  %v7641_v35 = vpack.c.bf16 %v2520_v62, %v2517_v20  ;;  %v12408_v42 = vunpack.i.l.bf16 %v9990_v25  ;;  %v8145_v25 = vunpack.i.h.bf16 %v10023_v47  ;;  %v8288_v62 = vpop.permute.xlu1 %8287  ;;  %2608 = vmatprep.mubr.bf16.mxu0 %v12394_v33 }
 0x3e8   :  { %v12406_v8 = vsel %vm10345_vm12, 4294967295, %v12405_v8  ;;  %v7631_v14 = vpack.c.bf16 %v2540_v17, %v2539_v43  ;;  %vm12410_vm6 = vmmov %vm12400_vm1  ;;  %v2538_v43 = vsel %vm12400_vm1, %v12412_v59, %v12411_v23  ;;  %v8290_v60 = vunpack.i.h.bf16 %v8288_v62  ;;  %v8687_v59 = vld [vmem:[%s11820_s6 + $0x10] sm:$0xff]  }
 0x3e9   :  { %12407 = vst [vmem:[#allocation57_spill] sm:$0xff] %v12406_v8  ;;  %v2537_v18 = vsel %vm12410_vm6, %v12409_v11, %v12408_v42  ;;  %vm10372_vm7 = vmpackc.low %vm9050_vm2, %vm9050_vm2  ;;  %vm12418_vm6 = vcmask 7168   ;;  %7642 = vmatprep.subr.msk.bf16.mxu1 %vm10345_vm12, %v7641_v35  ;;  %v8289_v17 = vunpack.i.l.bf16 %v8288_v62  ;;  %v7647_v47 = vpack.c.bf16 %v10300_v32, %v10295_v30 }
 0x3ea   :  { %v12416_v0 = vsel %vm10372_vm7, 4294967295, %v12415_v0  ;;  %v2715_v26 = vsel %vm12418_vm6, %v8254_v45, %v8255_v7  ;;  %7632 = vmatpush1.bf16.msk.msra.mxu0 %vm10332_vm13, %v7631_v14  ;;  %vm12419_vm1 = vmmov %vm12413_vm3  ;;  %v7637_v40 = vpack.c.bf16 %v2538_v43, %v2537_v18  ;;  %v12420_v14 = vunpack.i.l.bf16 %v10019_v3  ;;  %v8258_v42 = vpop.permute.xlu0 %8257 }
 0x3eb   :  { %12417 = vst [vmem:[#allocation58_spill] sm:$0xff] %v12416_v0  ;;  %7623 = vmatmul.mubr.msk.bf16.vlgmr.msra.gmra.mxu1 %vm12419_vm1, %v8686_v1  ;;  %7635 = vmatprep.subr.msk.bf16.mxu0 %vm10309_vm10, %v7634_v28  ;;  %vm12421_vm3 = vmmov %vm12418_vm6  ;;  %v12423_v1 = vld [vmem:[#allocation18_spill] sm:$0xff]  ;;  %v12425_v11 = vmov 0  ;;  %v8260_v30 = vunpack.i.h.bf16 %v8258_v42  ;;  %v8259_v32 = vunpack.i.l.bf16 %v8258_v42  ;;  %v10417_v62 = vpop.permute.xlu1 %8292  ;;  %v8155_v42 = vunpack.i.h.bf16 %v10027_v39 }
 0x3ec   :  { %v2709_v23 = vsel %vm12421_vm3, %v12420_v14, %v8140_v34  ;;  %vm12422_vm6 = vmmov %vm12421_vm3  ;;  %7645 = vmatpush1.bf16.msk.msra.mxu1 %vm10372_vm7, %v7644_v54  ;;  %vm12424_vm1 = vnez %v12423_v1  ;;  %2651 = vmatprep.mubr.bf16.mxu1 %v12394_v33 }
 0x3ed   :  { %v2712_v35 = vsel %vm12422_vm6, %v8184_v53, %v8185_v6  ;;  %vm10399_vm8 = vmpackc.low %vm12424_vm1, %vm12424_vm1  ;;  %7648 = vmatprep.subr.msk.bf16.mxu1 %vm10345_vm12, %v7647_v47  ;;  %v12435_v47 = vmov 0 }
 0x3ee   :  { %v12426_v11 = vsel %vm10399_vm8, 4294967295, %v12425_v11  ;;  %vm12428_vm2 = vmmov %vm12421_vm3  ;;  %v7657_v18 = vpack.c.bf16 %v2715_v26, %v2712_v35  ;;  %7638 = vmatpush1.bf16.msk.msra.mxu0 %vm10332_vm13, %v7637_v40  ;;  %v12433_v26 = vld [vmem:[#allocation20_spill] sm:$0xff]  ;;  %v12441_v35 = vld [vmem:[#allocation17_spill] sm:$0xff]  ;;  %v12443_v40 = vmov 0 }
 0x3ef   :  { %12427 = vst [vmem:[#allocation59_spill] sm:$0xff] %v12426_v11  ;;  %v10405_v36 = vsel %vm12428_vm2, %v8140_v34, %v8150_v21  ;;  %vm12429_vm3 = vmmov %vm12428_vm2  ;;  %vm12434_vm14 = vnez %v12433_v26  ;;  %v8160_v26 = vunpack.i.h.bf16 %v10031_v57 }
 0x3f0   :  { %v2708_v43 = vsel %vm12429_vm3, %v8149_v55, %v8144_v56  ;;  %vm12430_vm6 = vmmov %vm12428_vm2  ;;  %7658 = vmatprep.subr.msk.bf16.mxu0 %vm10399_vm8, %v7657_v18  ;;  %7651 = vmatpush1.bf16.msk.msra.mxu1 %vm10372_vm7, %v7650_v50  ;;  %v12453_v50 = vmov 0 }
 0x3f1   :  { %v2711_v28 = vsel %vm12430_vm6, %v8150_v21, %v8145_v25  ;;  %vm12431_vm1 = vmmov %vm12428_vm2 }
 0x3f2   :  { %v2713_v54 = vsel %vm12431_vm1, %v8185_v6, %v8289_v17  ;;  %vm12432_vm2 = vmmov %vm12431_vm1 }
 0x3f3   :  { %v2716_v34 = vsel %vm12432_vm2, %v8255_v7, %v8290_v60  ;;  %vm10424_vm12 = vmpackc.low %vm12434_vm14, %vm12434_vm14  ;;  %v2737_v7 = vsel %vm12431_vm1, %v8260_v30, %v8254_v45  ;;  %vm12442_vm2 = vnez %v12441_v35  ;;  %v8159_v35 = vunpack.i.l.bf16 %v10031_v57 }
 0x3f4   :  { %v12436_v47 = vsel %vm10424_vm12, 4294967295, %v12435_v47  ;;  %vm12438_vm10 = vmmov %vm12431_vm1  ;;  %v7663_v57 = vpack.c.bf16 %v2709_v23, %v10110_v58  ;;  %v8688_v23 = vld [vmem:[%s11820_s6 + $0x18] sm:$0xff]  }
 0x3f5   :  { %12437 = vst [vmem:[#allocation56_spill] sm:$0xff] %v12436_v47  ;;  %v2714_v14 = vsel %vm12438_vm10, %v8289_v17, %v8259_v32  ;;  %vm12439_vm3 = vmmov %vm12431_vm1  ;;  %v8154_v17 = vunpack.i.l.bf16 %v10027_v39  ;;  %v12451_v39 = vld [vmem:[#allocation19_spill] sm:$0xff] }
 0x3f6   :  { %v2717_v21 = vsel %vm12439_vm3, %v8290_v60, %v8260_v30  ;;  %vm12440_vm6 = vmmov %vm12431_vm1  ;;  %v12446_v60 = vunpack.i.l.bf16 %v9995_v52 }
 0x3f7   :  { %v2736_v6 = vsel %vm12440_vm6, %v8259_v32, %v8184_v53  ;;  %vm10437_vm13 = vmpackc.low %vm12442_vm2, %vm12442_vm2  ;;  %v10445_v53 = vpop.permute.xlu0 %8262  ;;  %v7670_v45 = vpack.c.bf16 %v2717_v21, %v2714_v14  ;;  %v12448_v32 = vunpack.i.l.bf16 %v10019_v3  ;;  %vm12450_vm6 = vcmask 261120   ;;  %v10465_v21 = vpop.permute.xlu1 %8307 }
 0x3f8   :  { %v12444_v40 = vsel %vm10437_vm13, 4294967295, %v12443_v40  ;;  %v7660_v1 = vpack.c.bf16 %v2737_v7, %v2736_v6  ;;  %vm12447_vm10 = vmmov %vm12431_vm1  ;;  %7639 = vmatmul.mubr.msk.bf16.vlgmr.msra.gmra.mxu0 %vm12450_vm6, %v8687_v59  ;;  %v8090_v14 = vunpack.i.h.bf16 %v10001_v31  ;;  %v7673_v3 = vpack.c.bf16 %v2716_v34, %v2713_v54 }
 0x3f9   :  { %12445 = vst [vmem:[#allocation60_spill] sm:$0xff] %v12444_v40  ;;  %v2734_v30 = vsel %vm12447_vm10, %v8144_v56, %v12446_v60  ;;  %vm12449_vm3 = vmmov %vm12431_vm1  ;;  %vm12452_vm1 = vnez %v12451_v39  ;;  %v8089_v56 = vunpack.i.l.bf16 %v10001_v31  ;;  %7671 = vmatprep.subr.msk.bf16.mxu1 %vm10437_vm13, %v7670_v45  ;;  %v8165_v7 = vunpack.i.h.bf16 %v10021_v63  ;;  %2805 = vmatprep.mubr.bf16.mxu0 %v12394_v33  ;;  %v12488_v39 = vld [vmem:[#allocation37_spill] sm:$0xff] }
 0x3fa   :  { %v2735_v18 = vsel %vm12449_vm3, %v8145_v25, %v12448_v32  ;;  %vm10459_vm14 = vmpackc.low %vm12452_vm1, %vm12452_vm1  ;;  %7661 = vmatpush1.bf16.msk.msra.mxu0 %vm10424_vm12, %v7660_v1  ;;  %v12456_v25 = vunpack.i.h.bf16 %v9995_v52  ;;  %v8164_v60 = vunpack.i.l.bf16 %v10021_v63  ;;  %v7676_v31 = vpack.c.bf16 %v2711_v28, %v2708_v43 }
 0x3fb   :  { %v12454_v50 = vsel %vm10459_vm14, 4294967295, %v12453_v50  ;;  %vm12457_vm10 = vmmov %vm12449_vm3  ;;  %v7666_v34 = vpack.c.bf16 %v2735_v18, %v2734_v30  ;;  %7664 = vmatprep.subr.msk.bf16.mxu0 %vm10399_vm8, %v7663_v57  ;;  %v10486_v52 = vpop.permute.xlu0 %8272  ;;  %v8295_v43 = vunpack.i.h.bf16 %v10417_v62  ;;  %v8294_v28 = vunpack.i.l.bf16 %v10417_v62 }
 0x3fc   :  { %12455 = vst [vmem:[#allocation62_spill] sm:$0xff] %v12454_v50  ;;  %v2707_v6 = vsel %vm12457_vm10, %v12456_v25, %v8149_v55  ;;  %vm12458_vm3 = vmmov %vm12450_vm6  ;;  %vm12459_vm6 = vcmask 1039360   ;;  %v12464_v30 = vpack.c.bf16 %v9847_v37, %v9863_v9  ;;  %v8225_v9 = vunpack.i.h.bf16 %v10066_v61 }
 0x3fd   :  { %7652 = vmatmul.mubr.msk.bf16.vlgmr.msra.gmra.mxu1 %vm12458_vm3, %v8687_v59  ;;  %v7679_v54 = vpack.c.bf16 %v10405_v36, %v2707_v6  ;;  %v10480_v1 = vsel %vm12459_vm6, %v8154_v17, %v8155_v42  ;;  %vm12460_vm10 = vmmov %vm12459_vm6  ;;  %v8190_v36 = vunpack.i.h.bf16 %v10083_v41  ;;  %v8189_v59 = vunpack.i.l.bf16 %v10083_v41  ;;  %v12477_v41 = vld [vmem:[#allocation45_spill] sm:$0xff] }
 0x3fe   :  { %7674 = vmatpush1.bf16.msk.msra.mxu1 %vm10459_vm14, %v7673_v3  ;;  %v10489_v58 = vsel %vm12460_vm10, %v8155_v42, %v8165_v7  ;;  %vm12461_vm1 = vmmov %vm12459_vm6  ;;  %v8313_v42 = vpop.permute.xlu1 %8312  ;;  %7667 = vmatpush1.bf16.msk.msra.mxu0 %vm10424_vm12, %v7666_v34  ;;  %v12474_v34 = vld [vmem:[#allocation38_spill] sm:$0xff] }
 0x3ff   :  { %v10492_v63 = vsel %vm12461_vm1, %v8159_v35, %v8089_v56  ;;  %vm12462_vm3 = vmmov %vm12461_vm1  ;;  %7677 = vmatprep.subr.msk.bf16.mxu1 %vm10437_vm13, %v7676_v31  ;;  %2848 = vmatprep.mubr.bf16.mxu1 %v12394_v33  ;;  %v10526_v32 = vpop.permute.xlu0 %8282  ;;  %v8315_v25 = vunpack.i.h.bf16 %v8313_v42 }
 0x400   :  { %v10495_v55 = vsel %vm12462_vm3, %v8160_v26, %v8154_v17  ;;  %v10511_v17 = vsel %vm12461_vm1, %v8089_v56, %v8090_v14  ;;  %vm12463_vm6 = vmmov %vm12461_vm1  ;;  %2898 = vmatprep.subr.bf16.mxu0 %v12464_v30  ;;  %v12484_v30 = vld [vmem:[#allocation46_spill] sm:$0xff] }
 0x401   :  { %v10514_v45 = vsel %vm12463_vm6, %v8090_v14, %v8164_v60  ;;  %vm12465_vm10 = vmmov %vm12461_vm1 }
 0x402   :  { %v10522_v62 = vsel %vm12465_vm10, %v8164_v60, %v8159_v35  ;;  %7680 = vmatpush1.bf16.msk.msra.mxu1 %vm10459_vm14, %v7679_v54  ;;  %vm12466_vm3 = vmmov %vm12461_vm1  ;;  %v12467_v35 = vpack.c.bf16 %v9872_v19, %v9876_v15  ;;  %vm12468_vm1 = vcmask 261120   ;;  %v10543_v6 = vpop.permute.xlu1 %8317  ;;  %v8269_v15 = vunpack.i.l.bf16 %v10269_v5  ;;  %v12473_v54 = vld [vmem:[#allocation40_spill] sm:$0xff] }
 0x403   :  { %v10531_v14 = vsel %vm12466_vm3, %v8165_v7, %v8160_v26  ;;  %7668 = vmatmul.mubr.msk.bf16.vlgmr.msra.gmra.mxu0 %vm12468_vm1, %v8688_v23  ;;  %vm12469_vm6 = vmmov %vm12466_vm3  ;;  %v8314_v26 = vunpack.i.l.bf16 %v8313_v42  ;;  %v12471_v7 = vpack.c.bf16 %v9845_v24, %v9860_v38  ;;  %v12475_v42 = vpack.c.bf16 %v12473_v54, %v12474_v34  ;;  %v8298_v18 = vpop.permute.xlu0 %8297 }
 0x404   :  { %2941 = vmatprep.subr.bf16.mxu1 %v12467_v35  ;;  %v3019_v3 = vsel %vm12469_vm6, %v8189_v59, %v8190_v36  ;;  %vm12470_vm10 = vmmov %vm12466_vm3  ;;  %2918 = vmatprep.mubr.bf16.mxu0 %v12394_v33  ;;  %v8245_v24 = vunpack.i.h.bf16 %v10353_v12  ;;  %v8244_v38 = vunpack.i.l.bf16 %v10353_v12  ;;  %v8265_v35 = vunpack.i.h.bf16 %v10445_v53 }
 0x405   :  { %v3022_v57 = vsel %vm12470_vm10, %v8294_v28, %v8295_v43  ;;  %2899 = vmatpush1.bf16.msra.mxu0 %v12471_v7  ;;  %vm12472_vm3 = vmmov %vm12468_vm1  ;;  %v12476_v7 = vld [vmem:[#allocation44_spill] sm:$0xff]  ;;  %v8264_v54 = vunpack.i.l.bf16 %v10445_v53  ;;  %v8300_v34 = vunpack.i.h.bf16 %v8298_v18  ;;  %v8299_v12 = vunpack.i.l.bf16 %v8298_v18  ;;  %v12487_v18 = vld [vmem:[#allocation39_spill] sm:$0xff] }
 0x406   :  { %7681 = vmatmul.mubr.msk.bf16.vlgmr.msra.gmra.mxu1 %vm12472_vm3, %v8688_v23  ;;  %2900 = vmatprep.subr.bf16.mxu0 %v12475_v42  ;;  %v12478_v37 = vpack.c.bf16 %v12476_v7, %v12477_v41  ;;  %vm10567_vm1 = vmpackc.low %vm9162_vm0, %vm9162_vm0  ;;  %v12480_v23 = vmov 0  ;;  %v12483_v42 = vld [vmem:[#allocation41_spill] sm:$0xff]  ;;  %v7691_v41 = vpack.c.bf16 %v3022_v57, %v3019_v3  ;;  %v3020_v7 = vsel %vm12469_vm6, %v8190_v36, %v8314_v26  ;;  %v10583_v53 = vpop.permute.xlu1 %8332 }
 0x407   :  { %v12481_v23 = vsel %vm10567_vm1, 4294967295, %v12480_v23  ;;  %2961 = vmatprep.mubr.bf16.mxu1 %v12394_v33  ;;  %v12485_v19 = vpack.c.bf16 %v12483_v42, %v12484_v30  ;;  %vm12486_vm10 = vmmov %vm12469_vm6  ;;  %v8320_v56 = vunpack.i.h.bf16 %v10543_v6  ;;  %v8319_v31 = vunpack.i.l.bf16 %v10543_v6  ;;  %v12504_v42 = vld [vmem:[#allocation43_spill] sm:$0xff] }
 0x408   :  { %2942 = vmatpush1.bf16.msra.mxu1 %v12478_v37  ;;  %12482 = vst [vmem:[#allocation40_spill] sm:$0xff] %v12481_v23  ;;  %v8689_v37 = vld [vmem:[%s11820_s6 + $0x20] sm:$0xff]   ;;  %v3023_v60 = vsel %vm12486_vm10, %v8295_v43, %v8315_v25  ;;  %v12489_v20 = vpack.c.bf16 %v12487_v18, %v12488_v39  ;;  %vm10591_vm3 = vmpackc.low %vm9200_vm15, %vm9200_vm15  ;;  %v12491_v3 = vmov 0  ;;  %v3018_v36 = vsel %vm12469_vm6, %v8299_v12, %v8189_v59  ;;  %v12497_v39 = vld [vmem:[#allocation22_spill] sm:$0xff] }
 0x409   :  { %2943 = vmatprep.subr.bf16.mxu1 %v12485_v19  ;;  %v12492_v3 = vsel %vm10591_vm3, 4294967295, %v12491_v3  ;;  %vm12494_vm10 = vmmov %vm12469_vm6  ;;  %vm12498_vm14 = vnez %v12497_v39  ;;  %v12502_v30 = vunpack.i.l.bf16 %v10066_v61  ;;  %vm12503_vm15 = vcmask 924672  }
 0x40a   :  { %2901 = vmatpush1.bf16.msra.mxu0 %v12489_v20  ;;  %12493 = vst [vmem:[#allocation38_spill] sm:$0xff] %v12492_v3  ;;  %v3021_v43 = vsel %vm12494_vm10, %v8300_v34, %v8294_v28  ;;  %vm12495_vm0 = vmmov %vm12469_vm6  ;;  %v12499_v20 = vmov 0  ;;  %v12507_v18 = vunpack.i.h.bf16 %v10240_v46  ;;  %v12508_v19 = vunpack.i.l.bf16 %v10240_v46 }
 0x40b   :  { %v3046_v57 = vsel %vm12495_vm0, %v8314_v26, %v8299_v12  ;;  %vm12496_vm2 = vmmov %vm12495_vm0  ;;  %7692 = vmatprep.subr.msk.bf16.mxu0 %vm10567_vm1, %v7691_v41  ;;  %v10611_v59 = vsel %vm12503_vm15, %v12502_v30, %v8225_v9  ;;  %v7694_v28 = vpack.c.bf16 %v3021_v43, %v3018_v36  ;;  %v12505_v26 = vld [vmem:[#allocation42_spill] sm:$0xff]  ;;  %v7710_v41 = vpack.c.bf16 %v10531_v14, %v10522_v62  ;;  %v12515_v62 = vld [vmem:[#allocation23_spill] sm:$0xff] }
 0x40c   :  { %v3047_v6 = vsel %vm12496_vm2, %v8315_v25, %v8300_v34  ;;  %vm10604_vm13 = vmpackc.low %vm12498_vm14, %vm12498_vm14  ;;  %v12506_v12 = vpack.c.bf16 %v12504_v42, %v12505_v26  ;;  %v10616_v25 = vpop.permute.xlu0 %8302  ;;  %v8270_v30 = vunpack.i.h.bf16 %v10269_v5  ;;  %v12511_v43 = vunpack.i.h.bf16 %v10325_v44 }
 0x40d   :  { %v12500_v20 = vsel %vm10604_vm13, 4294967295, %v12499_v20  ;;  %v7704_v34 = vpack.c.bf16 %v3047_v6, %v3046_v57  ;;  %vm12509_vm0 = vmmov %vm12503_vm15  ;;  %v12512_v42 = vunpack.i.l.bf16 %v10325_v44  ;;  %vm12513_vm2 = vcmask 916480   ;;  %v8338_v6 = vpop.permute.xlu1 %8337 }
 0x40e   :  { %12501 = vst [vmem:[#allocation44_spill] sm:$0xff] %v12500_v20  ;;  %2944 = vmatpush1.bf16.msra.mxu1 %v12506_v12  ;;  %v3216_v39 = vsel %vm12509_vm0, %v12508_v19, %v12507_v18  ;;  %vm12510_vm15 = vmmov %vm12509_vm0  ;;  %vm12514_vm6 = vcmask 261120   ;;  %vm12516_vm10 = vnez %v12515_v62  ;;  %v12517_v14 = vmov 0 }
 0x40f   :  { %v10627_v36 = vsel %vm12510_vm15, %v8225_v9, %v8269_v15  ;;  %v10634_v57 = vsel %vm12513_vm2, %v12512_v42, %v12511_v43  ;;  %7685 = vmatmul.mubr.msk.bf16.vlgmr.msra.gmra.mxu0 %vm12514_vm6, %v8689_v37  ;;  %vm10640_vm14 = vmpackc.low %vm12516_vm10, %vm12516_vm10  ;;  %v10645_v5 = vsel %vm12509_vm0, %v8244_v38, %v8245_v24  ;;  %v7707_v9 = vpack.c.bf16 %v3023_v60, %v3020_v7 }
 0x410   :  { %v12518_v14 = vsel %vm10640_vm14, 4294967295, %v12517_v14  ;;  %vm12520_vm15 = vmmov %vm12509_vm0  ;;  %7695 = vmatpush1.bf16.msk.msra.mxu0 %vm10591_vm3, %v7694_v28  ;;  %7705 = vmatprep.subr.msk.bf16.mxu1 %vm10604_vm13, %v7704_v34  ;;  %v12522_v12 = vunpack.i.l.bf16 %v10066_v61  ;;  %v10661_v43 = vsel %vm12509_vm0, %v8265_v35, %v8244_v38  ;;  %v8275_v28 = vunpack.i.h.bf16 %v10486_v52  ;;  %v12528_v38 = vld [vmem:[#allocation26_spill] sm:$0xff] }
 0x411   :  { %12519 = vst [vmem:[#allocation45_spill] sm:$0xff] %v12518_v14  ;;  %v3219_v19 = vsel %vm12520_vm15, %v8319_v31, %v8320_v56  ;;  %vm12521_vm2 = vmmov %vm12509_vm0  ;;  %vm12525_vm15 = vcmask 261120   ;;  %v8339_v34 = vunpack.i.l.bf16 %v8338_v6  ;;  %v12527_v61 = vpack.c.bf16 %v10480_v1, %v10511_v17  ;;  %3115 = vmatprep.mubr.bf16.mxu0 %v12394_v33  ;;  %v8690_v17 = vld [vmem:[%s11820_s6 + $0x28] sm:$0xff]  }
 0x412   :  { %v10653_v26 = vsel %vm12521_vm2, %v8245_v24, %v8270_v30  ;;  %vm12523_vm6 = vmmov %vm12509_vm0  ;;  %7686 = vmatmul.mubr.msk.bf16.vlgmr.msra.gmra.mxu1 %vm12525_vm15, %v8689_v37  ;;  %v8340_v24 = vunpack.i.h.bf16 %v8338_v6  ;;  %v7720_v1 = vpack.c.bf16 %v3219_v19, %v3216_v39  ;;  %v12535_v39 = vpack.c.bf16 %v10495_v55, %v10492_v63 }
 0x413   :  { %v10658_v18 = vsel %vm12523_vm6, %v8264_v54, %v12522_v12  ;;  %vm12524_vm10 = vmmov %vm12509_vm0  ;;  %7698 = vmatprep.subr.msk.bf16.mxu0 %vm10567_vm1, %v12527_v61  ;;  %7708 = vmatpush1.bf16.msk.msra.mxu1 %vm10640_vm14, %v7707_v9  ;;  %v12533_v12 = vunpack.i.h.bf16 %v10240_v46  ;;  %v12537_v19 = vunpack.i.l.bf16 %v10240_v46  ;;  %v12542_v63 = vmov 0 }
 0x414   :  { %v10664_v60 = vsel %vm12524_vm10, %v8269_v15, %v8264_v54  ;;  %vm12526_vm12 = vmmov %vm12509_vm0  ;;  %v8323_v15 = vpop.permute.xlu0 %8322  ;;  %vm12529_vm10 = vnez %v12528_v38  ;;  %v11994_v54 = vunpack.i.l.bf16 %v10486_v52  ;;  %7711 = vmatprep.subr.msk.bf16.mxu1 %vm10604_vm13, %v7710_v41  ;;  %7701 = vmatpush1.bf16.msk.msra.mxu0 %vm10591_vm3, %v12535_v39 }
 0x415   :  { %v10668_v7 = vsel %vm12526_vm12, %v8270_v30, %v8265_v35  ;;  %vm10681_vm2 = vmpackc.low %vm12529_vm10, %vm12529_vm10  ;;  %v12530_v35 = vmov 0  ;;  %v8325_v37 = vunpack.i.h.bf16 %v8323_v15  ;;  %v8324_v30 = vunpack.i.l.bf16 %v8323_v15  ;;  %v8343_v15 = vpop.permute.xlu1 %8342  ;;  %3158 = vmatprep.mubr.bf16.mxu1 %v12394_v33 }
 0x416   :  { %v12531_v35 = vsel %vm10681_vm2, 4294967295, %v12530_v35  ;;  %vm12534_vm12 = vmmov %vm12509_vm0  ;;  %7721 = vmatprep.subr.msk.bf16.mxu0 %vm10681_vm2, %v7720_v1  ;;  %v8345_v46 = vunpack.i.h.bf16 %v8343_v15  ;;  %v8344_v39 = vunpack.i.l.bf16 %v8343_v15  ;;  %v12549_v1 = vmov 0 }
 0x417   :  { %12532 = vst [vmem:[#allocation41_spill] sm:$0xff] %v12531_v35  ;;  %v3217_v61 = vsel %vm12534_vm12, %v12533_v12, %v8339_v34  ;;  %vm12536_vm6 = vmmov %vm12509_vm0  ;;  %v3215_v9 = vsel %vm12509_vm0, %v8324_v30, %v12537_v19  ;;  %v12540_v12 = vld [vmem:[#allocation28_spill] sm:$0xff]  ;;  %v7729_v15 = vpack.c.bf16 %v10661_v43, %v10658_v18  ;;  %v7739_v18 = vpack.c.bf16 %v10668_v7, %v10664_v60 }
 0x418   :  { %v3220_v41 = vsel %vm12536_vm6, %v8320_v56, %v8340_v24  ;;  %vm12538_vm15 = vmmov %vm12509_vm0  ;;  %vm12541_vm12 = vnez %v12540_v12  ;;  %v12574_v7 = vunpack.i.l.bf16 %v10486_v52 }
 0x419   :  { %v3218_v6 = vsel %vm12538_vm15, %v8325_v37, %v8319_v31  ;;  %vm12539_vm10 = vmmov %vm12509_vm0  ;;  %v12546_v31 = vpack.c.bf16 %v10489_v58, %v10514_v45  ;;  %v7726_v45 = vpack.c.bf16 %v10645_v5, %v10611_v59  ;;  %v8310_v59 = vunpack.i.h.bf16 %v10465_v21 }
 0x41a   :  { %v3243_v42 = vsel %vm12539_vm10, %v8339_v34, %v8324_v30  ;;  %vm10715_vm13 = vmpackc.low %vm12541_vm12, %vm12541_vm12  ;;  %v7723_v56 = vpack.c.bf16 %v3218_v6, %v3215_v9  ;;  %v10725_v34 = vpop.permute.xlu0 %8327  ;;  %v12547_v30 = vld [vmem:[#allocation25_spill] sm:$0xff]  ;;  %v12553_v9 = vld [vmem:[#allocation27_spill] sm:$0xff]  ;;  %v12555_v6 = vmov 0  ;;  %vm12558_vm12 = vcmask 916480  }
 0x41b   :  { %v12543_v63 = vsel %vm10715_vm13, 4294967295, %v12542_v63  ;;  %vm12545_vm3 = vmmov %vm12509_vm0  ;;  %7714 = vmatpush1.bf16.msk.msra.mxu1 %vm10640_vm14, %v12546_v31  ;;  %vm12548_vm10 = vnez %v12547_v30  ;;  %vm12554_vm0 = vnez %v12553_v9  ;;  %v3416_v19 = vsel %vm12558_vm12, %v8344_v39, %v8345_v46  ;;  %v8358_v31 = vpop.permute.xlu1 %8357 }
 0x41c   :  { %12544 = vst [vmem:[#allocation46_spill] sm:$0xff] %v12543_v63  ;;  %v3244_v55 = vsel %vm12545_vm3, %v8340_v24, %v8325_v37  ;;  %vm10730_vm6 = vmpackc.low %vm12548_vm10, %vm12548_vm10  ;;  %v7742_v24 = vpack.c.bf16 %v10653_v26, %v10627_v36  ;;  %v8305_v37 = vunpack.i.h.bf16 %v10616_v25  ;;  %vm12552_vm3 = vcmask 261120  }
 0x41d   :  { %v12550_v1 = vsel %vm10730_vm6, 4294967295, %v12549_v1  ;;  %7702 = vmatmul.mubr.msk.bf16.vlgmr.msra.gmra.mxu0 %vm12552_vm3, %v8690_v17  ;;  %v7733_v58 = vpack.c.bf16 %v3244_v55, %v3243_v42  ;;  %vm10743_vm15 = vmpackc.low %vm12554_vm0, %vm12554_vm0  ;;  %v11995_v36 = vunpack.i.l.bf16 %v10465_v21  ;;  %v7736_v26 = vpack.c.bf16 %v3220_v41, %v3217_v61 }
 0x41e   :  { %12551 = vst [vmem:[#allocation39_spill] sm:$0xff] %v12550_v1  ;;  %v12556_v6 = vsel %vm10743_vm15, 4294967295, %v12555_v6  ;;  %7724 = vmatpush1.bf16.msk.msra.mxu0 %vm10715_vm13, %v7723_v56  ;;  %3312 = vmatprep.mubr.bf16.mxu0 %v12394_v33  ;;  %v8360_v5 = vunpack.i.h.bf16 %v8358_v31  ;;  %v8359_v42 = vunpack.i.l.bf16 %v8358_v31  ;;  %v3413_v43 = vsel %vm12558_vm12, %v11994_v54, %v8275_v28  ;;  %vm12561_vm0 = vmmov %vm12558_vm12  ;;  %v8348_v60 = vpop.permute.xlu0 %8347 }
 0x41f   :  { %12557 = vst [vmem:[#allocation37_spill] sm:$0xff] %v12556_v6  ;;  %7715 = vmatmul.mubr.msk.bf16.vlgmr.msra.gmra.mxu1 %vm12552_vm3, %v8690_v17  ;;  %7734 = vmatprep.subr.msk.bf16.mxu1 %vm10730_vm6, %v7733_v58  ;;  %v12559_v61 = vunpack.i.h.bf16 %v10526_v32  ;;  %v12560_v41 = vunpack.i.l.bf16 %v10526_v32  ;;  %v12562_v17 = vunpack.i.l.bf16 %v10616_v25  ;;  %vm12563_vm3 = vmmov %vm12561_vm0  ;;  %v12565_v58 = vmov 0 }
 0x420   :  { %7727 = vmatprep.subr.msk.bf16.mxu0 %vm10681_vm2, %v7726_v45  ;;  %7737 = vmatpush1.bf16.msk.msra.mxu1 %vm10743_vm15, %v7736_v26  ;;  %vm10782_vm12 = vmpackc.low %vm9273_vm4, %vm9273_vm4  ;;  %v3439_v31 = vsel %vm12561_vm0, %v8310_v59, %v8305_v37  ;;  %v8349_v54 = vunpack.i.l.bf16 %v8348_v60  ;;  %v8691_v45 = vld [vmem:[%s11820_s6 + $0x30] sm:$0xff]   ;;  %v8330_v26 = vunpack.i.h.bf16 %v10725_v34 }
 0x421   :  { %v3410_v55 = vsel %vm12561_vm0, %v12560_v41, %v12559_v61  ;;  %v3438_v56 = vsel %vm12563_vm3, %v11995_v36, %v12562_v17  ;;  %v12566_v58 = vsel %vm10782_vm12, 4294967295, %v12565_v58  ;;  %v7749_v61 = vpack.c.bf16 %v3416_v19, %v3413_v43  ;;  %7740 = vmatprep.subr.msk.bf16.mxu1 %vm10730_vm6, %v7739_v18  ;;  %3355 = vmatprep.mubr.bf16.mxu1 %v12394_v33  ;;  %vm12568_vm3 = vmmov %vm12561_vm0  ;;  %v8363_v43 = vpop.permute.xlu1 %8362  ;;  %v12569_v18 = vld [vmem:[#allocation32_spill] sm:$0xff] }
 0x422   :  { %12567 = vst [vmem:[#allocation43_spill] sm:$0xff] %v12566_v58  ;;  %v8350_v41 = vunpack.i.h.bf16 %v8348_v60  ;;  %v8329_v17 = vunpack.i.l.bf16 %v10725_v34  ;;  %v3414_v36 = vsel %vm12568_vm3, %v8275_v28, %v8359_v42  ;;  %v3417_v19 = vsel %vm12561_vm0, %v8345_v46, %v8360_v5  ;;  %7730 = vmatpush1.bf16.msk.msra.mxu0 %vm10715_vm13, %v7729_v15  ;;  %vm12575_vm6 = vmmov %vm12561_vm0  ;;  %v12578_v15 = vld [vmem:[#allocation30_spill] sm:$0xff] }
 0x423   :  { %vm12570_vm4 = vnez %v12569_v18  ;;  %v12571_v60 = vmov 0  ;;  %v3412_v34 = vsel %vm12575_vm6, %v8349_v54, %v12574_v7  ;;  %vm12576_vm14 = vmmov %vm12561_vm0  ;;  %7750 = vmatprep.subr.msk.bf16.mxu0 %vm10782_vm12, %v7749_v61  ;;  %vm12579_vm13 = vnez %v12578_v15 }
 0x424   :  { %vm10804_vm10 = vmpackc.low %vm12570_vm4, %vm12570_vm4  ;;  %v3415_v9 = vsel %vm12576_vm14, %v8350_v41, %v8344_v39  ;;  %v3441_v46 = vsel %vm12561_vm0, %v8360_v5, %v8350_v41  ;;  %v12580_v18 = vmov 0  ;;  %v8365_v30 = vunpack.i.h.bf16 %v8363_v43  ;;  %7743 = vmatpush1.bf16.msk.msra.mxu1 %vm10743_vm15, %v7742_v24 }
 0x425   :  { %v12572_v60 = vsel %vm10804_vm10, 4294967295, %v12571_v60  ;;  %vm12577_vm3 = vmmov %vm12561_vm0  ;;  %v7752_v12 = vpack.c.bf16 %v3415_v9, %v3412_v34  ;;  %v8364_v7 = vunpack.i.l.bf16 %v8363_v43  ;;  %v12583_v39 = vunpack.i.l.bf16 %v10325_v44  ;;  %v12589_v43 = vld [vmem:[#allocation31_spill] sm:$0xff] }
 0x426   :  { %12573 = vst [vmem:[#allocation42_spill] sm:$0xff] %v12572_v60  ;;  %v3440_v28 = vsel %vm12577_vm3, %v8359_v42, %v8349_v54  ;;  %vm10819_vm4 = vmpackc.low %vm12579_vm13, %vm12579_vm13  ;;  %v10825_v54 = vpop.permute.xlu0 %8352  ;;  %v12584_v5 = vunpack.i.l.bf16 %v10616_v25  ;;  %v12586_v61 = vunpack.i.l.bf16 %v10526_v32  ;;  %vm12588_vm3 = vcmask 261120  }
 0x427   :  { %v12581_v18 = vsel %vm10819_vm4, 4294967295, %v12580_v18  ;;  %v7762_v52 = vpack.c.bf16 %v3441_v46, %v3440_v28  ;;  %vm12585_vm14 = vmmov %vm12561_vm0  ;;  %7731 = vmatmul.mubr.msk.bf16.vlgmr.msra.gmra.mxu0 %vm12588_vm3, %v8691_v45  ;;  %v7755_v9 = vpack.c.bf16 %v3410_v55, %v10634_v57  ;;  %v12591_v24 = vmov 0 }
 0x428   :  { %12582 = vst [vmem:[#allocation63_spill] sm:$0xff] %v12581_v18  ;;  %v3406_v42 = vsel %vm12585_vm14, %v12584_v5, %v12583_v39  ;;  %vm12587_vm6 = vmmov %vm12561_vm0  ;;  %vm12590_vm0 = vnez %v12589_v43  ;;  %v7765_v34 = vpack.c.bf16 %v3417_v19, %v3414_v36  ;;  %vm12594_vm15 = vcmask 908288   ;;  %v8378_v39 = vpop.permute.xlu1 %8377  ;;  %7753 = vmatpush1.bf16.msk.msra.mxu0 %vm10804_vm10, %v7752_v12  ;;  %3509 = vmatprep.mubr.bf16.mxu0 %v12394_v33 }
 0x429   :  { %v3409_v41 = vsel %vm12587_vm6, %v8305_v37, %v12586_v61  ;;  %vm10840_vm13 = vmpackc.low %vm12590_vm0, %vm12590_vm0  ;;  %v3613_v25 = vsel %vm12594_vm15, %v8364_v7, %v8365_v30  ;;  %v8355_v28 = vunpack.i.h.bf16 %v10825_v54  ;;  %v8354_v46 = vunpack.i.l.bf16 %v10825_v54  ;;  %7763 = vmatprep.subr.msk.bf16.mxu1 %vm10819_vm4, %v7762_v52  ;;  %7756 = vmatprep.subr.msk.bf16.mxu0 %vm10782_vm12, %v7755_v9 }
 0x42a   :  { %v12592_v24 = vsel %vm10840_vm13, 4294967295, %v12591_v24  ;;  %v12595_v57 = vunpack.i.h.bf16 %v10526_v32  ;;  %vm12596_vm14 = vmmov %vm12587_vm6  ;;  %v8380_v55 = vunpack.i.h.bf16 %v8378_v39  ;;  %v8379_v5 = vunpack.i.l.bf16 %v8378_v39 }
 0x42b   :  { %12593 = vst [vmem:[#allocation64_spill] sm:$0xff] %v12592_v24  ;;  %vm12597_vm6 = vmmov %vm12588_vm3  ;;  %v7768_v36 = vpack.c.bf16 %v3439_v31, %v3438_v56  ;;  %v12598_v19 = vunpack.i.l.bf16 %v10465_v21  ;;  %v12599_v54 = vunpack.i.h.bf16 %v10325_v44  ;;  %v8335_v52 = vunpack.i.h.bf16 %v10583_v53 }
 0x42c   :  { %v3411_v37 = vsel %vm12596_vm14, %v12595_v57, %v8310_v59  ;;  %7744 = vmatmul.mubr.msk.bf16.vlgmr.msra.gmra.mxu1 %vm12597_vm6, %v8691_v45  ;;  %vm12600_vm15 = vmmov %vm12596_vm14  ;;  %v7758_v61 = vpack.c.bf16 %v3409_v41, %v3406_v42  ;;  %vm12601_vm3 = vcmask 908288   ;;  %v8368_v59 = vpop.permute.xlu0 %8367  ;;  %v12602_v45 = vld [vmem:[#allocation34_spill] sm:$0xff]  ;;  %v12604_v56 = vmov 0  ;;  %v8692_v41 = vld [vmem:[%s11820_s6 + $0x38] sm:$0xff]  }
 0x42d   :  { %v3408_v12 = vsel %vm12600_vm15, %v12599_v54, %v12598_v19  ;;  %v3610_v32 = vsel %vm12601_vm3, %v8329_v17, %v8330_v26  ;;  %7766 = vmatpush1.bf16.msk.msra.mxu1 %vm10840_vm13, %v7765_v34  ;;  %vm12603_vm14 = vnez %v12602_v45  ;;  %v8334_v44 = vunpack.i.l.bf16 %v10583_v53  ;;  %3552 = vmatprep.mubr.bf16.mxu1 %v12394_v33  ;;  %vm12607_vm15 = vmmov %vm12601_vm3  ;;  %v8383_v53 = vpop.permute.xlu1 %8382 }
 0x42e   :  { %vm10869_vm6 = vmpackc.low %vm12603_vm14, %vm12603_vm14  ;;  %v7778_v21 = vpack.c.bf16 %v3613_v25, %v3610_v32  ;;  %v8370_v31 = vunpack.i.h.bf16 %v8368_v59  ;;  %v8369_v42 = vunpack.i.l.bf16 %v8368_v59  ;;  %7769 = vmatprep.subr.msk.bf16.mxu1 %vm10819_vm4, %v7768_v36  ;;  %v7771_v9 = vpack.c.bf16 %v3411_v37, %v3408_v12  ;;  %7759 = vmatpush1.bf16.msk.msra.mxu0 %vm10804_vm10, %v7758_v61  ;;  %v12609_v25 = vld [vmem:[#allocation36_spill] sm:$0xff] }
 0x42f   :  { %v12605_v56 = vsel %vm10869_vm6, 4294967295, %v12604_v56  ;;  %v3607_v34 = vsel %vm12607_vm15, %v8354_v46, %v8355_v28  ;;  %v3611_v39 = vsel %vm12601_vm3, %v8330_v26, %v8379_v5  ;;  %vm12608_vm14 = vmmov %vm12601_vm3  ;;  %vm12610_vm0 = vnez %v12609_v25 }
 0x430   :  { %12606 = vst [vmem:[#allocation65_spill] sm:$0xff] %v12605_v56  ;;  %v3614_v57 = vsel %vm12608_vm14, %v8365_v30, %v8380_v55  ;;  %vm10889_vm4 = vmpackc.low %vm12610_vm0, %vm12610_vm0  ;;  %v12611_v36 = vmov 0  ;;  %7779 = vmatprep.subr.msk.bf16.mxu0 %vm10869_vm6, %v7778_v21  ;;  %v12618_v30 = vld [vmem:[#allocation33_spill] sm:$0xff]  ;;  %v12620_v12 = vmov 0  ;;  %v8385_v59 = vunpack.i.h.bf16 %v8383_v53  ;;  %v12624_v21 = vld [vmem:[#allocation35_spill] sm:$0xff] }
 0x431   :  { %v12612_v36 = vsel %vm10889_vm4, 4294967295, %v12611_v36  ;;  %vm12614_vm12 = vmmov %vm12601_vm3  ;;  %vm12619_vm14 = vnez %v12618_v30  ;;  %7772 = vmatpush1.bf16.msk.msra.mxu1 %vm10840_vm13, %v7771_v9  ;;  %vm12634_vm13 = vcmask 261120  }
 0x432   :  { %12613 = vst [vmem:[#allocation66_spill] sm:$0xff] %v12612_v36  ;;  %v3609_v19 = vsel %vm12614_vm12, %v8369_v42, %v8329_v17  ;;  %vm12615_vm2 = vmmov %vm12601_vm3  ;;  %v8384_v17 = vunpack.i.l.bf16 %v8383_v53  ;;  %vm12623_vm12 = vcmask 261120  }
 0x433   :  { %v3612_v37 = vsel %vm12615_vm2, %v8370_v31, %v8364_v7  ;;  %vm12616_vm15 = vmmov %vm12615_vm2  ;;  %v8373_v7 = vpop.permute.xlu0 %8372  ;;  %7760 = vmatmul.mubr.msk.bf16.vlgmr.msra.gmra.mxu0 %vm12623_vm12, %v8692_v41 }
 0x434   :  { %v3637_v54 = vsel %vm12616_vm15, %v8379_v5, %v8369_v42  ;;  %vm12617_vm3 = vmmov %vm12615_vm2  ;;  %v7781_v61 = vpack.c.bf16 %v3612_v37, %v3609_v19  ;;  %v8375_v5 = vunpack.i.h.bf16 %v8373_v7  ;;  %vm12625_vm15 = vnez %v12624_v21  ;;  %7773 = vmatmul.mubr.msk.bf16.vlgmr.msra.gmra.mxu1 %vm12634_vm13, %v8692_v41  ;;  %3706 = vmatprep.mubr.bf16.mxu0 %v12394_v33 }
 0x435   :  { %v3638_v26 = vsel %vm12617_vm3, %v8380_v55, %v8370_v31  ;;  %vm10902_vm10 = vmpackc.low %vm12619_vm14, %vm12619_vm14  ;;  %v3604_v55 = vsel %vm12615_vm2, %v8334_v44, %v8335_v52  ;;  %v8374_v31 = vunpack.i.l.bf16 %v8373_v7  ;;  %v12626_v42 = vmov 0  ;;  %3749 = vmatprep.mubr.bf16.mxu1 %v12394_v33 }
 0x436   :  { %v12621_v12 = vsel %vm10902_vm10, 4294967295, %v12620_v12  ;;  %v7791_v32 = vpack.c.bf16 %v3638_v26, %v3637_v54  ;;  %vm10913_vm3 = vmpackc.low %vm12625_vm15, %vm12625_vm15  ;;  %v7784_v19 = vpack.c.bf16 %v3607_v34, %v3604_v55  ;;  %v7794_v37 = vpack.c.bf16 %v3614_v57, %v3611_v39  ;;  %7782 = vmatpush1.bf16.msk.msra.mxu0 %vm10889_vm4, %v7781_v61 }
 0x437   :  { %12622 = vst [vmem:[#allocation67_spill] sm:$0xff] %v12621_v12  ;;  %v12627_v42 = vsel %vm10913_vm3, 4294967295, %v12626_v42  ;;  %vm12629_vm0 = vmmov %vm12615_vm2 }
 0x438   :  { %12628 = vst [vmem:[#allocation68_spill] sm:$0xff] %v12627_v42  ;;  %v3608_v53 = vsel %vm12629_vm0, %v8355_v28, %v8385_v59  ;;  %7792 = vmatprep.subr.msk.bf16.mxu1 %vm10902_vm10, %v7791_v32  ;;  %vm12630_vm2 = vmmov %vm12629_vm0  ;;  %7785 = vmatprep.subr.msk.bf16.mxu0 %vm10869_vm6, %v7784_v19 }
 0x439   :  { %v3605_v9 = vsel %vm12630_vm2, %v8335_v52, %v8384_v17  ;;  %vm12631_vm12 = vmmov %vm12629_vm0  ;;  %7795 = vmatpush1.bf16.msk.msra.mxu1 %vm10913_vm3, %v7794_v37 }
 0x43a   :  { %v3603_v54 = vsel %vm12631_vm12, %v8374_v31, %v8334_v44  ;;  %vm12632_vm14 = vmmov %vm12629_vm0  ;;  %v7800_v52 = vpack.c.bf16 %v3608_v53, %v3605_v9 }
 0x43b   :  { %v3606_v26 = vsel %vm12632_vm14, %v8375_v5, %v8354_v46  ;;  %vm12633_vm15 = vmmov %vm12629_vm0  ;;  %v8693_v46 = vld [vmem:[%s11820_s6 + $0x40] sm:$0xff]  }
 0x43c   :  { %v3635_v7 = vsel %vm12633_vm15, %v8384_v17, %v8374_v31  ;;  %vm12635_vm1 = vmmov %vm12629_vm0  ;;  %v7787_v39 = vpack.c.bf16 %v3606_v26, %v3603_v54 }
 0x43d   :  { %v3636_v34 = vsel %vm12635_vm1, %v8385_v59, %v8375_v5  ;;  %vm12636_vm1 = vmmov %vm12634_vm13 }
 0x43e   :  { %v7797_v28 = vpack.c.bf16 %v3636_v34, %v3635_v7  ;;  %7788 = vmatpush1.bf16.msk.msra.mxu0 %vm10889_vm4, %v7787_v39 }
 0x440   :  { %7798 = vmatprep.subr.msk.bf16.mxu1 %vm10902_vm10, %v7797_v28 }
 0x441   :  { %7801 = vmatpush1.bf16.msk.msra.mxu1 %vm10913_vm3, %v7800_v52  ;;  %7789 = vmatmul.mubr.msk.bf16.vlgmr.msra.gmra.mxu0 %vm12634_vm13, %v8693_v46 }
 0x442   :  { %4018 = vmatprep.mubr.bf16.mxu0 %v12394_v33 }
 0x444   :  { %7802 = vmatmul.mubr.msk.bf16.vlgmr.msra.gmra.mxu1 %vm12636_vm1, %v8693_v46 }
 0x445   :  { %4059 = vmatprep.mubr.bf16.mxu1 %v12394_v33 }
 0x496   :  { %v2327_v44 = vpop.f32.mrf.mxu0 }
 0x498   :  { %v2329_v57 = vpop.f32.mrf.mxu0 }
 0x49a   :  { %v2331_v32 = vpop.f32.mrf.mxu0 }
 0x49b   :  { %v2370_v41 = vpop.f32.mrf.mxu1 }
 0x49c   :  { %v2333_v17 = vpop.f32.mrf.mxu0 }
 0x49d   :  { %v10947_v61 = vpop.f32.mrf.mxu1 }
 0x49f   :  { %v10949_v59 = vpop.f32.mrf.mxu1 }
 0x4a1   :  { %v10951_v55 = vpop.f32.mrf.mxu1 }
 0x4a6   :  { %v2421_v5 = vpop.f32.mrf.mxu0 }
 0x4a7   :  { %v2422_v0 = vadd.f32 %v2421_v5, %v2327_v44 }
 0x4a8   :  { %v2423_v19 = vpop.f32.mrf.mxu0 }
 0x4a9   :  { %v2424_v2 = vadd.f32 %v2423_v19, %v2329_v57 }
 0x4aa   :  { %v2425_v53 = vpop.f32.mrf.mxu0 }
 0x4ab   :  { %v2464_v31 = vpop.f32.mrf.mxu1  ;;  %v2426_v49 = vadd.f32 %v2425_v53, %v2331_v32 }
 0x4ac   :  { %v2427_v54 = vpop.f32.mrf.mxu0  ;;  %v2465_v10 = vadd.f32 %v2464_v31, %v2370_v41 }
 0x4ad   :  { %v2466_v37 = vpop.f32.mrf.mxu1 }
 0x4ae   :  { %v2467_v44 = vadd.f32 %v2466_v37, %v10947_v61 }
 0x4af   :  { %v2468_v9 = vpop.f32.mrf.mxu1 }
 0x4b0   :  { %v2469_v5 = vadd.f32 %v2468_v9, %v10949_v59 }
 0x4b1   :  { %v2470_v26 = vpop.f32.mrf.mxu1 }
 0x4b2   :  { %v2471_v31 = vadd.f32 %v2470_v26, %v10951_v55 }
 0x4b8   :  { %v2610_v7 = vpop.f32.mrf.mxu0 }
 0x4b9   :  { %v2662_v16 = vadd.f32 %v2610_v7, %v2422_v0 }
 0x4ba   :  { %v2612_v39 = vpop.f32.mrf.mxu0 }
 0x4bb   :  { %v2663_v33 = vadd.f32 %v2612_v39, %v2424_v2 }
 0x4bc   :  { %v2614_v46 = vpop.f32.mrf.mxu0 }
 0x4bd   :  { %v2653_v34 = vpop.f32.mrf.mxu1 }
 0x4be   :  { %v2616_v21 = vpop.f32.mrf.mxu0  ;;  %v2664_v48 = vadd.f32 %v2653_v34, %v2465_v10 }
 0x4bf   :  { %v2655_v28 = vpop.f32.mrf.mxu1 }
 0x4c0   :  { %v2665_v10 = vadd.f32 %v2655_v28, %v2467_v44 }
 0x4c1   :  { %v2657_v52 = vpop.f32.mrf.mxu1 }
 0x4c2   :  { %v2668_v32 = vadd.f32 %v2657_v52, %v2469_v5 }
 0x4c3   :  { %v2659_v25 = vpop.f32.mrf.mxu1  ;;  %v2807_v30 = vpop.f32.mrf.mxu0 }
 0x4c4   :  { %v2859_v29 = vadd.f32 %v2807_v30, %v2662_v16 }
 0x4c5   :  { %v2809_v43 = vpop.f32.mrf.mxu0 }
 0x4c6   :  { %v2850_v45 = vpop.f32.mrf.mxu1 }
 0x4c7   :  { %v2811_v38 = vpop.f32.mrf.mxu0  ;;  %v2861_v57 = vadd.f32 %v2850_v45, %v2664_v48 }
 0x4c8   :  { %v2852_v15 = vpop.f32.mrf.mxu1 }
 0x4c9   :  { %v2813_v4 = vpop.f32.mrf.mxu0  ;;  %v2862_v59 = vadd.f32 %v2852_v15, %v2665_v10 }
 0x4ca   :  { %v2854_v62 = vpop.f32.mrf.mxu1 }
 0x4cc   :  { %v10953_v42 = vpop.f32.mrf.mxu1 }
 0x4cf   :  { %v2920_v36 = vpop.f32.mrf.mxu0 }
 0x4d1   :  { %v2922_v24 = vpop.f32.mrf.mxu0 }
 0x4d2   :  { %v2963_v12 = vpop.f32.mrf.mxu1 }
 0x4d3   :  { %v2924_v60 = vpop.f32.mrf.mxu0  ;;  %v2974_v53 = vadd.f32 %v2963_v12, %v2861_v57 }
 0x4d4   :  { %v10955_v56 = vpop.f32.mrf.mxu1 }
 0x4d5   :  { %v2926_v6 = vpop.f32.mrf.mxu0 }
 0x4d6   :  { %v2967_v18 = vpop.f32.mrf.mxu1 }
 0x4d8   :  { %v10957_v58 = vpop.f32.mrf.mxu1 }
 0x4d9   :  { %12637 = vst [vmem:[#allocation69_spill] sm:$0xff] %v10957_v58  ;;  %v2972_v58 = vadd.f32 %v2920_v36, %v2859_v29  ;;  %v2669_v29 = vadd.f32 %v2659_v25, %v2471_v31 }
 0x4dd   :  { %v3117_v63 = vpop.f32.mrf.mxu0 }
 0x4de   :  { %v3169_v30 = vadd.f32 %v3117_v63, %v2972_v58 }
 0x4df   :  { %v3160_v1 = vpop.f32.mrf.mxu1  ;;  %v3119_v14 = vpop.f32.mrf.mxu0 }
 0x4e0   :  { %v3171_v45 = vadd.f32 %v3160_v1, %v2974_v53 }
 0x4e1   :  { %v10959_v35 = vpop.f32.mrf.mxu1  ;;  %v3121_v3 = vpop.f32.mrf.mxu0 }
 0x4e2   :  { %12638 = vst [vmem:[#allocation70_spill] sm:$0xff] %v10959_v35  ;;  %v2860_v35 = vadd.f32 %v2809_v43, %v2663_v33 }
 0x4e3   :  { %v10961_v20 = vpop.f32.mrf.mxu1  ;;  %v3123_v23 = vpop.f32.mrf.mxu0 }
 0x4e4   :  { %12639 = vst [vmem:[#allocation71_spill] sm:$0xff] %v10961_v20  ;;  %v2973_v16 = vadd.f32 %v2922_v24, %v2860_v35 }
 0x4e5   :  { %v10963_v50 = vpop.f32.mrf.mxu1 }
 0x4e6   :  { %12640 = vst [vmem:[#allocation72_spill] sm:$0xff] %v10963_v50  ;;  %v2428_v50 = vadd.f32 %v2427_v54, %v2333_v17  ;;  %v3170_v36 = vadd.f32 %v3119_v14, %v2973_v16  ;;  %v12642_v14 = vld [vmem:[#allocation69_spill] sm:$0xff] }
 0x4e7   :  { %v3314_v40 = vpop.f32.mrf.mxu0 }
 0x4e8   :  { %v2667_v2 = vadd.f32 %v2616_v21, %v2428_v50  ;;  %v3366_v61 = vadd.f32 %v3314_v40, %v3169_v30  ;;  %v2866_v50 = vadd.f32 %v10953_v42, %v2669_v29 }
 0x4e9   :  { %v3316_v11 = vpop.f32.mrf.mxu0  ;;  %v12643_v1 = vld [vmem:[#allocation70_spill] sm:$0xff] }
 0x4ea   :  { %v2864_v43 = vadd.f32 %v2813_v4, %v2667_v2  ;;  %v3367_v63 = vadd.f32 %v3316_v11, %v3170_v36  ;;  %v2979_v40 = vadd.f32 %v12642_v14, %v2866_v50 }
 0x4eb   :  { %v3318_v22 = vpop.f32.mrf.mxu0  ;;  %v12644_v55 = vld [vmem:[#allocation71_spill] sm:$0xff] }
 0x4ec   :  { %v3357_v47 = vpop.f32.mrf.mxu1  ;;  %v2977_v35 = vadd.f32 %v2926_v6, %v2864_v43 }
 0x4ed   :  { %v3320_v27 = vpop.f32.mrf.mxu0  ;;  %v3368_v12 = vadd.f32 %v3357_v47, %v3171_v45 }
 0x4ee   :  { %v10965_v8 = vpop.f32.mrf.mxu1  ;;  %v3174_v15 = vadd.f32 %v3123_v23, %v2977_v35 }
 0x4ef   :  { %12641 = vst [vmem:[#allocation73_spill] sm:$0xff] %v10965_v8  ;;  %v2666_v8 = vadd.f32 %v2614_v46, %v2426_v49  ;;  %v2865_v49 = vadd.f32 %v2854_v62, %v2668_v32 }
 0x4f0   :  { %v3361_v51 = vpop.f32.mrf.mxu1 }
 0x4f1   :  { %v2863_v19 = vadd.f32 %v2811_v38, %v2666_v8  ;;  %v2975_v8 = vadd.f32 %v10955_v56, %v2862_v59  ;;  %v2978_v38 = vadd.f32 %v2967_v18, %v2865_v49  ;;  %v12645_v56 = vld [vmem:[#allocation72_spill] sm:$0xff] }
 0x4f2   :  { %v10967_v13 = vpop.f32.mrf.mxu1  ;;  %v3176_v18 = vadd.f32 %v12645_v56, %v2979_v40  ;;  %v3814_v56 = vld [vmem:[%s11822_s8] sm:$0xff] }
 0x4f3   :  { %v3511_v20 = vpop.f32.mrf.mxu0  ;;  %v2976_v48 = vadd.f32 %v2924_v60, %v2863_v19  ;;  %v3172_v21 = vadd.f32 %v12643_v1, %v2975_v8  ;;  %v3175_v42 = vadd.f32 %v12644_v55, %v2978_v38 }
 0x4f4   :  { %v3554_v0 = vpop.f32.mrf.mxu1  ;;  %v3563_v58 = vadd.f32 %v3511_v20, %v3366_v61  ;;  %v3373_v31 = vadd.f32 %v10967_v13, %v3176_v18  ;;  %v3807_v18 = vld [vmem:[%s11821_s7 + $0x8] sm:$0xff] }
 0x4f5   :  { %v3513_v41 = vpop.f32.mrf.mxu0  ;;  %v3173_v24 = vadd.f32 %v3121_v3, %v2976_v48  ;;  %v3565_v11 = vadd.f32 %v3554_v0, %v3368_v12  ;;  %v3371_v3 = vadd.f32 %v3320_v27, %v3174_v15  ;;  %v3372_v34 = vadd.f32 %v3361_v51, %v3175_v42 }
 0x4f6   :  { %v3556_v17 = vpop.f32.mrf.mxu1  ;;  %v3564_v62 = vadd.f32 %v3513_v41, %v3367_v63  ;;  %v12646_v26 = vld [vmem:[#allocation73_spill] sm:$0xff] }
 0x4f7   :  { %v3515_v33 = vpop.f32.mrf.mxu0  ;;  %v3370_v6 = vadd.f32 %v3318_v22, %v3173_v24  ;;  %v3369_v7 = vadd.f32 %v12646_v26, %v3172_v21 }
 0x4f8   :  { %v3558_v37 = vpop.f32.mrf.mxu1 }
 0x4f9   :  { %v3517_v9 = vpop.f32.mrf.mxu0  ;;  %v3567_v23 = vadd.f32 %v3515_v33, %v3370_v6  ;;  %v3566_v5 = vadd.f32 %v3556_v17, %v3369_v7  ;;  %v3569_v57 = vadd.f32 %v3558_v37, %v3372_v34 }
 0x4fa   :  { %v3560_v25 = vpop.f32.mrf.mxu1  ;;  %v3568_v52 = vadd.f32 %v3517_v9, %v3371_v3 }
 0x4fb   :  { %v3570_v17 = vadd.f32 %v3560_v25, %v3373_v31 }
 0x501   :  { %v3708_v4 = vpop.f32.mrf.mxu0 }
 0x502   :  { %v10975_v60 = vadd.f32 %v3708_v4, %v3563_v58 }
 0x503   :  { %v3710_v54 = vpop.f32.mrf.mxu0 }
 0x504   :  { %v3751_v20 = vpop.f32.mrf.mxu1  ;;  %v10980_v47 = vadd.f32 %v3710_v54, %v3564_v62  ;;  %v3778_v22 = vmul.f32 %v10975_v60, %v10975_v60 }
 0x505   :  { %v10983_v39 = vadd.f32 %v3751_v20, %v3565_v11  ;;  %v3712_v46 = vpop.f32.mrf.mxu0  ;;  %v3806_v11 = vld [vmem:[%s11821_s7] sm:$0xff] }
 0x506   :  { %v3753_v28 = vpop.f32.mrf.mxu1  ;;  %v3768_v44 = vadd.f32 %v10980_v47, %v10975_v60  ;;  %v3779_v27 = vmul.f32 %v10980_v47, %v10980_v47  ;;  %v10991_v0 = vadd.f32 %v3712_v46, %v3567_v23  ;;  %v3815_v23 = vld [vmem:[%s11822_s8 + $0x8] sm:$0xff] }
 0x507   :  { %v3714_v41 = vpop.f32.mrf.mxu0  ;;  %v3780_v30 = vmul.f32 %v10983_v39, %v10983_v39  ;;  %v3763_v10 = vadd.f32 %v3753_v28, %v3566_v5 }
 0x508   :  { %v3755_v51 = vpop.f32.mrf.mxu1  ;;  %v3786_v2 = vadd.f32 %v3779_v27, %v3778_v22  ;;  %v10994_v16 = vadd.f32 %v3714_v41, %v3568_v52  ;;  %v3769_v53 = vadd.f32 %v3768_v44, %v10983_v39  ;;  %v3782_v33 = vmul.f32 %v10991_v0, %v10991_v0 }
 0x509   :  { %v10998_v32 = vadd.f32 %v3755_v51, %v3569_v57  ;;  %v3781_v48 = vmul.f32 %v3763_v10, %v3763_v10 }
 0x50a   :  { %v3757_v19 = vpop.f32.mrf.mxu1  ;;  %v3773_v29 = vadd.f32 %v10994_v16, %v10991_v0  ;;  %v3783_v13 = vmul.f32 %v10994_v16, %v10994_v16  ;;  %v3770_v43 = vadd.f32 %v3769_v53, %v3763_v10  ;;  %v3787_v36 = vadd.f32 %v3786_v2, %v3780_v30 }
 0x50b   :  { %v11007_v59 = vadd.f32 %v3757_v19, %v3570_v17  ;;  %v3784_v45 = vmul.f32 %v10998_v32, %v10998_v32 }
 0x50c   :  { %v3791_v61 = vadd.f32 %v3783_v13, %v3782_v33  ;;  %v3774_v49 = vadd.f32 %v3773_v29, %v10998_v32  ;;  %3771 = vadd.xlane.f32.xlu0 %v3770_v43  ;;  %v3788_v9 = vadd.f32 %v3787_v36, %v3781_v48 }
 0x50d   :  { %v3785_v35 = vmul.f32 %v11007_v59, %v11007_v59 }
 0x50e   :  { %v3775_v37 = vadd.f32 %v3774_v49, %v11007_v59  ;;  %v3792_v50 = vadd.f32 %v3791_v61, %v3784_v45 }
 0x510   :  { %3776 = vadd.xlane.f32.xlu1 %v3775_v37  ;;  %3789 = vadd.xlane.f32.xlu0 %v3788_v9  ;;  %v3793_v63 = vadd.f32 %v3792_v50, %v3785_v35 }
 0x514   :  { %3794 = vadd.xlane.f32.xlu0 %v3793_v63 }
 0x595   :  { %v3772_v58 = vpop.xlane.xlu0 %3771 }
 0x596   :  { %v3796_v8 = vmul.f32 0.001953125, %v3772_v58 }
 0x598   :  { %v3800_v12 = vmul.f32 %v3796_v8, %v3796_v8 }
 0x599   :  { %v3777_v38 = vpop.xlane.xlu1 %3776  ;;  %v3790_v24 = vpop.xlane.xlu0 %3789 }
 0x59a   :  { %v3797_v25 = vmul.f32 0.001953125, %v3777_v38  ;;  %v3798_v4 = vmul.f32 0.001953125, %v3790_v24 }
 0x59c   :  { %v3802_v14 = vsub.f32 %v3798_v4, %v3800_v12  ;;  %v3801_v15 = vmul.f32 %v3797_v25, %v3797_v25 }
 0x59d   :  { %v3795_v40 = vpop.xlane.xlu0 %3794 }
 0x59e   :  { %v3804_v62 = vmax.f32 %v3802_v14, 0.0  ;;  %v3799_v1 = vmul.f32 0.001953125, %v3795_v40 }
 0x5a0   :  { %v3808_v21 = vadd.f32 1e-05, %v3804_v62  ;;  %v3803_v55 = vsub.f32 %v3799_v1, %v3801_v15 }
 0x5a2   :  { %8702 = vrsqrt.f32 %v3808_v21  ;;  %v3805_v42 = vmax.f32 %v3803_v55, 0.0 }
 0x5a4   :  { %v3809_v6 = vadd.f32 1e-05, %v3805_v42 }
 0x5a6   :  { %8704 = vrsqrt.f32 %v3809_v6 }
 0x5af   :  { %v8703_v20 = vpop.eup %8702 }
 0x5b0   :  { %v3812_v54 = vmul.f32 %v8703_v20, %v3806_v11 }
 0x5b2   :  { %3822 = vperm.xlu1 %8064, %v3812_v54   ;;  %v3816_v3 = vmul.f32 %v3812_v54, %v3796_v8 }
 0x5b3   :  { %v8705_v26 = vpop.eup %8704 }
 0x5b4   :  { %v3818_v7 = vsub.f32 %v3814_v56, %v3816_v3  ;;  %v3813_v34 = vmul.f32 %v8705_v26, %v3807_v18 }
 0x5b6   :  { %3840 = vperm.xlu1 %8064, %v3818_v7   ;;  %3827 = vperm.xlu0 %8065, %v3813_v34   ;;  %v3817_v28 = vmul.f32 %v3813_v34, %v3797_v25 }
 0x5b8   :  { %v3819_v46 = vsub.f32 %v3815_v23, %v3817_v28 }
 0x5ba   :  { %3845 = vperm.xlu1 %8064, %v3819_v46  }
 0x62d   :  { %v3823_v52 = vpop.permute.xlu1 %3822 }
 0x62e   :  { %v3830_v22 = vmul.f32 %v3823_v52, %v10975_v60  ;;  %v3831_v44 = vmul.f32 %v3823_v52, %v10980_v47  ;;  %v3833_v27 = vmul.f32 %v3823_v52, %v3763_v10  ;;  %v3832_v53 = vmul.f32 %v3823_v52, %v10983_v39 }
 0x631   :  { %v3841_v5 = vpop.permute.xlu1 %3840  ;;  %v3828_v57 = vpop.permute.xlu0 %3827 }
 0x632   :  { %v3848_v51 = vadd.f32 %v3841_v5, %v3830_v22  ;;  %v3849_v41 = vadd.f32 %v3841_v5, %v3831_v44  ;;  %v3851_v31 = vadd.f32 %v3841_v5, %v3833_v27  ;;  %v3834_v2 = vmul.f32 %v3828_v57, %v10991_v0 }
 0x633   :  { %v3835_v30 = vmul.f32 %v3828_v57, %v10994_v16  ;;  %v3836_v19 = vmul.f32 %v3828_v57, %v10998_v32  ;;  %v3837_v47 = vmul.f32 %v3828_v57, %v11007_v59  ;;  %v3850_v43 = vadd.f32 %v3841_v5, %v3832_v53 }
 0x634   :  { %vm3856_vm0 = vcmp.ge.f32.partialorder %v3848_v51, 0.0  ;;  %vm3857_vm14 = vcmp.ge.f32.partialorder %v3849_v41, 0.0  ;;  %v3864_v17 = vmul.f32 0.2, %v3848_v51  ;;  %v3865_v60 = vmul.f32 0.2, %v3849_v41 }
 0x635   :  { %v3846_v10 = vpop.permute.xlu1 %3845  ;;  %vm3859_vm15 = vcmp.ge.f32.partialorder %v3851_v31, 0.0  ;;  %v3867_v16 = vmul.f32 0.2, %v3851_v31  ;;  %v3866_v45 = vmul.f32 0.2, %v3850_v43 }
 0x636   :  { %v3852_v33 = vadd.f32 %v3846_v10, %v3834_v2  ;;  %v3853_v29 = vadd.f32 %v3846_v10, %v3835_v30  ;;  %v3854_v13 = vadd.f32 %v3846_v10, %v3836_v19  ;;  %v11034_v36 = vsel %vm3856_vm0, %v3848_v51, %v3864_v17  ;;  %v7803_v30 = vld [vmem:[%s11823_s9 + $0x4] sm:$0xf] }
 0x637   :  { %v11036_v0 = vsel %vm3857_vm14, %v3849_v41, %v3865_v60  ;;  %v3855_v61 = vadd.f32 %v3846_v10, %v3837_v47  ;;  %vm3858_vm0 = vcmp.ge.f32.partialorder %v3850_v43, 0.0  ;;  %v11046_v50 = vsel %vm3859_vm15, %v3851_v31, %v3867_v16  ;;  %v12662_v16 = vld [vmem:[#allocation50_spill] sm:$0xff] }
 0x638   :  { %vm3860_vm2 = vcmp.ge.f32.partialorder %v3852_v33, 0.0  ;;  %vm3861_vm12 = vcmp.ge.f32.partialorder %v3853_v29, 0.0  ;;  %v3868_v39 = vmul.f32 0.2, %v3852_v33  ;;  %v3869_v32 = vmul.f32 0.2, %v3853_v29 }
 0x639   :  { %vm3863_vm13 = vcmp.ge.f32.partialorder %v3855_v61, 0.0  ;;  %v8386_v59 = vpack.i.bf16 %v11036_v0, %v11034_v36  ;;  %vm3862_vm1 = vcmp.ge.f32.partialorder %v3854_v13, 0.0  ;;  %v3870_v49 = vmul.f32 0.2, %v3854_v13 }
 0x63a   :  { %v3871_v48 = vmul.f32 0.2, %v3855_v61  ;;  %v11040_v37 = vsel %vm3860_vm2, %v3852_v33, %v3868_v39  ;;  %v11042_v9 = vsel %vm3861_vm12, %v3853_v29, %v3869_v32  ;;  %v11057_v38 = vsel %vm3858_vm0, %v3850_v43, %v3866_v45 }
 0x63b   :  { %8387 = vrot.lane.b32.xlu0 %v8386_v59, %s8732_s2  ;;  %v8391_v63 = vpack.i.bf16 %v11042_v9, %v11040_v37  ;;  %v11052_v58 = vsel %vm3862_vm1, %v3854_v13, %v3870_v49  ;;  %v4430_v12 = vpack.c.bf16 %v11042_v9, %v11036_v0  ;;  %v4429_v25 = vpack.c.bf16 %v11040_v37, %v11034_v36  ;;  %v12658_v13 = vld [vmem:[#allocation49_spill] sm:$0xff] }
 0x63c   :  { %v11048_v35 = vsel %vm3863_vm13, %v3855_v61, %v3871_v48  ;;  %v8406_v24 = vpack.i.bf16 %v11052_v58, %v11057_v38  ;;  %v4431_v14 = vpack.c.bf16 %v11052_v58, %v11057_v38  ;;  %v8466_v40 = vpack.i.bf16 %v11057_v38, %v11036_v0 }
 0x63d   :  { %v8396_v8 = vpack.i.bf16 %v11048_v35, %v11046_v50  ;;  %8392 = vrot.lane.b32.xlu1 %v8391_v63, %s8732_s2  ;;  %v4432_v4 = vpack.c.bf16 %v11048_v35, %v11046_v50  ;;  %v8471_v15 = vpack.i.bf16 %v11052_v58, %v11042_v9  ;;  %v8476_v62 = vpack.i.bf16 %v11040_v37, %v11034_v36  ;;  %v7862_v35 = vld [vmem:[%s11823_s9 + $0x10] sm:$0xf]  ;;  %v12725_v58 = vld [vmem:[#allocation44_spill] sm:$0xff] }
 0x63e   :  { %vm12647_vm14 = vcmask 130048   ;;  %v12664_v39 = vmov 0  }
 0x63f   :  { %8397 = vrot.lane.b32.xlu0 %v8396_v8, %s8732_s2  ;;  %vm12648_vm15 = vmmov %vm12647_vm14 }
 0x640   :  { %vm12649_vm2 = vmmov %vm12647_vm14 }
 0x641   :  { %8407 = vrot.lane.b32.xlu1 %v8406_v24, %s8732_s2  ;;  %vm12650_vm12 = vmmov %vm12649_vm2 }
 0x642   :  { %vm12652_vm13 = vmmov %vm12649_vm2 }
 0x643   :  { %8402 = vrot.lane.b32.xlu0 %v8386_v59, %s8734_s18  ;;  %vm12653_vm1 = vmmov %vm12649_vm2 }
 0x644   :  { %vm12654_vm0 = vmmov %vm12653_vm1 }
 0x645   :  { %8412 = vrot.lane.b32.xlu1 %v8391_v63, %s8734_s18 }
 0x647   :  { %8417 = vrot.lane.b32.xlu0 %v8396_v8, %s8734_s18 }
 0x649   :  { %8427 = vrot.lane.b32.xlu1 %v8406_v24, %s8734_s18 }
 0x64b   :  { %8422 = vrot.lane.b32.xlu0 %v8386_v59, %s8735_s19 }
 0x64d   :  { %8432 = vrot.lane.b32.xlu1 %v8391_v63, %s8735_s19 }
 0x64f   :  { %8437 = vrot.lane.b32.xlu0 %v8396_v8, %s8735_s19 }
 0x651   :  { %8447 = vrot.lane.b32.xlu1 %v8406_v24, %s8735_s19 }
 0x653   :  { %8442 = vrot.lane.b32.xlu0 %v8386_v59, %s8736_s1 }
 0x655   :  { %8452 = vrot.lane.b32.xlu1 %v8391_v63, %s8736_s1 }
 0x657   :  { %8457 = vrot.lane.b32.xlu0 %v8396_v8, %s8736_s1 }
 0x659   :  { %8462 = vrot.lane.b32.xlu1 %v8406_v24, %s8736_s1 }
 0x65b   :  { %8467 = vrot.lane.b32.xlu0 %v8466_v40, %s8737_s20 }
 0x65d   :  { %8472 = vrot.lane.b32.xlu1 %v8471_v15, %s8737_s20 }
 0x65f   :  { %8477 = vrot.lane.b32.xlu0 %v8476_v62, %s8737_s20 }
 0x661   :  { %8487 = vrot.lane.b32.xlu1 %v8396_v8, %s8737_s20 }
 0x663   :  { %8482 = vrot.lane.b32.xlu0 %v8466_v40, %s8738_s21 }
 0x665   :  { %8492 = vrot.lane.b32.xlu1 %v8471_v15, %s8738_s21 }
 0x667   :  { %8497 = vrot.lane.b32.xlu0 %v8476_v62, %s8738_s21 }
 0x669   :  { %8507 = vrot.lane.b32.xlu1 %v8396_v8, %s8738_s21 }
 0x66b   :  { %8502 = vrot.lane.b32.xlu0 %v8466_v40, %s8739_s22 }
 0x66d   :  { %8512 = vrot.lane.b32.xlu1 %v8471_v15, %s8739_s22 }
 0x66f   :  { %8517 = vrot.lane.b32.xlu0 %v8476_v62, %s8739_s22 }
 0x671   :  { %8527 = vrot.lane.b32.xlu1 %v8396_v8, %s8739_s22 }
 0x673   :  { %8522 = vrot.lane.b32.xlu0 %v8466_v40, %s8740_s23 }
 0x675   :  { %8532 = vrot.lane.b32.xlu1 %v8471_v15, %s8740_s23 }
 0x677   :  { %8537 = vrot.lane.b32.xlu0 %v8476_v62, %s8740_s23  ;;  %v12667_v62 = vld [vmem:[#allocation51_spill] sm:$0xff] }
 0x679   :  { %8542 = vrot.lane.b32.xlu1 %v8396_v8, %s8740_s23 }
 0x6ad   :  { %v8388_v1 = vpop.permute.xlu0 %8387 }
 0x6ae   :  { %v8390_v21 = vunpack.i.h.bf16 %v8388_v1  ;;  %v8389_v55 = vunpack.i.l.bf16 %v8388_v1 }
 0x6af   :  { %v8393_v42 = vpop.permute.xlu1 %8392 }
 0x6b0   :  { %v8395_v11 = vunpack.i.h.bf16 %v8393_v42  ;;  %v8394_v20 = vunpack.i.l.bf16 %v8393_v42  ;;  %v3953_v18 = vsel %vm12647_vm14, %v8389_v55, %v8390_v21  ;;  %vm12655_vm14 = vmmov %vm12654_vm0 }
 0x6b1   :  { %v8398_v6 = vpop.permute.xlu0 %8397 }
 0x6b2   :  { %v8400_v54 = vunpack.i.h.bf16 %v8398_v6  ;;  %v8399_v56 = vunpack.i.l.bf16 %v8398_v6  ;;  %v3956_v3 = vsel %vm12648_vm15, %v8394_v20, %v8395_v11  ;;  %vm12659_vm15 = vnez %v12658_v13  ;;  %v12673_v6 = vld [vmem:[#allocation52_spill] sm:$0xff] }
 0x6b3   :  { %v7805_v34 = vpack.c.bf16 %v3956_v3, %v3953_v18  ;;  %v8408_v23 = vpop.permute.xlu1 %8407 }
 0x6b4   :  { %v3967_v26 = vsel %vm12649_vm2, %v8399_v56, %v8389_v55  ;;  %v3968_v7 = vsel %vm12650_vm12, %v8400_v54, %v8394_v20  ;;  %v8410_v52 = vunpack.i.h.bf16 %v8408_v23  ;;  %v8409_v22 = vunpack.i.l.bf16 %v8408_v23  ;;  %v12676_v23 = vld [vmem:[#allocation53_spill] sm:$0xff] }
 0x6b5   :  { %v7808_v28 = vpack.c.bf16 %v3968_v7, %v3967_v26  ;;  %v8403_v46 = vpop.permute.xlu0 %8402  ;;  %7806 = vmatprep.subr.msk.bf16.mxu0 %vm10051_vm5, %v7805_v34  ;;  %vm12657_vm5 = vmmov %vm12654_vm0  ;;  %vm12660_vm2 = vcmask 138240   ;;  %vm12663_vm12 = vnez %v12662_v16 }
 0x6b6   :  { %v8405_v44 = vunpack.i.h.bf16 %v8403_v46  ;;  %v8404_v27 = vunpack.i.l.bf16 %v8403_v46  ;;  %v3958_v57 = vsel %vm12652_vm13, %v8410_v52, %v8400_v54  ;;  %v3954_v51 = vsel %vm12653_vm1, %v8390_v21, %v8409_v22  ;;  %vm12665_vm13 = vmmov %vm12660_vm2 }
 0x6b7   :  { %v3955_v41 = vsel %vm12654_vm0, %v8409_v22, %v8399_v56  ;;  %v3957_v31 = vsel %vm12655_vm14, %v8395_v11, %v8410_v52  ;;  %7809 = vmatpush1.bf16.msk.msra.mxu0 %vm10132_vm11, %v7808_v28  ;;  %v8413_v17 = vpop.permute.xlu1 %8412  ;;  %vm12661_vm11 = vmmov %vm12660_vm2  ;;  %vm12668_vm14 = vnez %v12667_v62  ;;  %v3930_v11 = vld [vmem:[%s11823_s9] sm:$0xf] }
 0x6b8   :  { %v7812_v19 = vpack.c.bf16 %v3958_v57, %v3955_v41  ;;  %v7815_v53 = vpack.c.bf16 %v3957_v31, %v3954_v51  ;;  %v8415_v47 = vunpack.i.h.bf16 %v8413_v17  ;;  %v8414_v10 = vunpack.i.l.bf16 %v8413_v17  ;;  %vm12666_vm1 = vmmov %vm12660_vm2 }
 0x6b9   :  { %v8418_v60 = vpop.permute.xlu0 %8417  ;;  %v3906_v43 = vsel %vm12660_vm2, %v8404_v27, %v8405_v44  ;;  %vm12671_vm2 = vmmov %vm12666_vm1 }
 0x6ba   :  { %v8420_v33 = vunpack.i.h.bf16 %v8418_v60  ;;  %v8419_v29 = vunpack.i.l.bf16 %v8418_v60  ;;  %7810 = vmatmul.mubr.msk.bf16.vlgmr.msra.gmra.mxu0 %vm12657_vm5, %v7803_v30  ;;  %7813 = vmatprep.subr.msk.bf16.mxu1 %vm12659_vm15, %v7812_v19  ;;  %v3909_v61 = vsel %vm12661_vm11, %v8414_v10, %v8415_v47  ;;  %vm12669_vm5 = vmmov %vm12666_vm1  ;;  %v12684_v19 = vld [vmem:[#allocation61_spill] sm:$0xff] }
 0x6bb   :  { %7816 = vmatpush1.bf16.msk.msra.mxu1 %vm12663_vm12, %v7815_v53  ;;  %4103 = vmatprep.mubr.bf16.mxu0 %v12664_v39  ;;  %v7819_v49 = vpack.c.bf16 %v3909_v61, %v3906_v43  ;;  %v8428_v48 = vpop.permute.xlu1 %8427  ;;  %vm12670_vm15 = vmmov %vm12666_vm1  ;;  %vm12674_vm12 = vnez %v12673_v6 }
 0x6bc   :  { %v3920_v32 = vsel %vm12665_vm13, %v8419_v29, %v8404_v27  ;;  %v3921_v59 = vsel %vm12666_vm1, %v8420_v33, %v8414_v10  ;;  %v8430_v8 = vunpack.i.h.bf16 %v8428_v48  ;;  %v8429_v24 = vunpack.i.l.bf16 %v8428_v48  ;;  %vm12672_vm11 = vmmov %vm12666_vm1  ;;  %v12690_v10 = vld [vmem:[#allocation55_spill] sm:$0xff]  ;;  %v12693_v48 = vld [vmem:[#allocation57_spill] sm:$0xff] }
 0x6bd   :  { %v7822_v45 = vpack.c.bf16 %v3921_v59, %v3920_v32  ;;  %v8423_v63 = vpop.permute.xlu0 %8422  ;;  %7820 = vmatprep.subr.msk.bf16.mxu0 %vm12668_vm14, %v7819_v49  ;;  %vm12675_vm13 = vmmov %vm12654_vm0  ;;  %vm12677_vm1 = vnez %v12676_v23 }
 0x6be   :  { %v8425_v40 = vunpack.i.h.bf16 %v8423_v63  ;;  %v8424_v15 = vunpack.i.l.bf16 %v8423_v63  ;;  %7817 = vmatmul.mubr.msk.bf16.vlgmr.msra.gmra.mxu1 %vm12654_vm0, %v7803_v30  ;;  %v3911_v1 = vsel %vm12669_vm5, %v8430_v8, %v8420_v33  ;;  %v3907_v21 = vsel %vm12670_vm15, %v8405_v44, %v8429_v24  ;;  %v7832_v33 = vld [vmem:[%s11823_s9 + $0x8] sm:$0xf] }
 0x6bf   :  { %v3908_v55 = vsel %vm12671_vm2, %v8429_v24, %v8419_v29  ;;  %v3910_v42 = vsel %vm12672_vm11, %v8415_v47, %v8430_v8  ;;  %7823 = vmatpush1.bf16.msk.msra.mxu0 %vm12674_vm12, %v7822_v45  ;;  %v8433_v56 = vpop.permute.xlu1 %8432  ;;  %4144 = vmatprep.mubr.bf16.mxu1 %v12664_v39  ;;  %vm12678_vm0 = vcmask 121856   ;;  %vm12683_vm2 = vmmov %vm12675_vm13  ;;  %vm12685_vm11 = vnez %v12684_v19 }
 0x6c0   :  { %v7826_v20 = vpack.c.bf16 %v3911_v1, %v3908_v55  ;;  %v7829_v54 = vpack.c.bf16 %v3910_v42, %v3907_v21  ;;  %v8435_v3 = vunpack.i.h.bf16 %v8433_v56  ;;  %v8434_v26 = vunpack.i.l.bf16 %v8433_v56  ;;  %vm12679_vm14 = vmmov %vm12678_vm0 }
 0x6c1   :  { %v8438_v18 = vpop.permute.xlu0 %8437  ;;  %v4171_v28 = vsel %vm12678_vm0, %v8424_v15, %v8425_v40  ;;  %vm12681_vm5 = vmmov %vm12678_vm0 }
 0x6c2   :  { %v8440_v7 = vunpack.i.h.bf16 %v8438_v18  ;;  %v8439_v34 = vunpack.i.l.bf16 %v8438_v18  ;;  %7824 = vmatmul.mubr.msk.bf16.vlgmr.msra.gmra.mxu0 %vm12675_vm13, %v3930_v11  ;;  %7827 = vmatprep.subr.msk.bf16.mxu1 %vm12677_vm1, %v7826_v20  ;;  %v4174_v46 = vsel %vm12679_vm14, %v8434_v26, %v8435_v3  ;;  %vm12682_vm15 = vmmov %vm12678_vm0 }
 0x6c3   :  { %7830 = vmatpush1.bf16.msk.msra.mxu1 %vm10260_vm9, %v7829_v54  ;;  %4236 = vmatprep.mubr.bf16.mxu0 %v12664_v39  ;;  %v7834_v27 = vpack.c.bf16 %v4174_v46, %v4171_v28  ;;  %v8448_v5 = vpop.permute.xlu1 %8447  ;;  %vm12686_vm9 = vmmov %vm12678_vm0 }
 0x6c4   :  { %v4185_v22 = vsel %vm12681_vm5, %v8439_v34, %v8424_v15  ;;  %v4186_v44 = vsel %vm12682_vm15, %v8440_v7, %v8434_v26  ;;  %v8450_v41 = vunpack.i.h.bf16 %v8448_v5  ;;  %v8449_v31 = vunpack.i.l.bf16 %v8448_v5  ;;  %vm12687_vm12 = vmmov %vm12678_vm0  ;;  %v12706_v26 = vld [vmem:[#allocation56_spill] sm:$0xff] }
 0x6c5   :  { %v7837_v57 = vpack.c.bf16 %v4186_v44, %v4185_v22  ;;  %v8443_v51 = vpop.permute.xlu0 %8442  ;;  %7835 = vmatprep.subr.msk.bf16.mxu0 %vm12685_vm11, %v7834_v27  ;;  %vm12688_vm13 = vmmov %vm12678_vm0  ;;  %vm12694_vm5 = vnez %v12693_v48  ;;  %vm12695_vm15 = vcmask 7168   ;;  %v12709_v5 = vld [vmem:[#allocation60_spill] sm:$0xff] }
 0x6c6   :  { %v8445_v2 = vunpack.i.h.bf16 %v8443_v51  ;;  %v8444_v30 = vunpack.i.l.bf16 %v8443_v51  ;;  %7831 = vmatmul.mubr.msk.bf16.vlgmr.msra.gmra.mxu1 %vm12683_vm2, %v3930_v11  ;;  %v4176_v53 = vsel %vm12686_vm9, %v8450_v41, %v8440_v7  ;;  %v4172_v17 = vsel %vm12687_vm12, %v8425_v40, %v8449_v31  ;;  %vm12689_vm1 = vmmov %vm12678_vm0  ;;  %v7847_v7 = vld [vmem:[%s11823_s9 + $0xc] sm:$0xf] }
 0x6c7   :  { %v4173_v60 = vsel %vm12688_vm13, %v8449_v31, %v8439_v34  ;;  %v4175_v47 = vsel %vm12689_vm1, %v8435_v3, %v8450_v41  ;;  %vm12691_vm0 = vnez %v12690_v10  ;;  %v8453_v43 = vpop.permute.xlu1 %8452  ;;  %4277 = vmatprep.mubr.bf16.mxu1 %v12664_v39  ;;  %vm12692_vm14 = vmmov %vm12683_vm2  ;;  %v12713_v41 = vld [vmem:[#allocation62_spill] sm:$0xff] }
 0x6c8   :  { %7838 = vmatpush1.bf16.msk.msra.mxu0 %vm12691_vm0, %v7837_v57  ;;  %v7841_v29 = vpack.c.bf16 %v4176_v53, %v4173_v60  ;;  %v7844_v13 = vpack.c.bf16 %v4175_v47, %v4172_v17  ;;  %v8455_v16 = vunpack.i.h.bf16 %v8453_v43  ;;  %v8454_v32 = vunpack.i.l.bf16 %v8453_v43  ;;  %vm12696_vm2 = vmmov %vm12695_vm15  ;;  %v12718_v53 = vld [vmem:[#allocation40_spill] sm:$0xff] }
 0x6c9   :  { %v8458_v61 = vpop.permute.xlu0 %8457  ;;  %v4308_v45 = vsel %vm12695_vm15, %v8444_v30, %v8445_v2  ;;  %vm12698_vm11 = vmmov %vm12696_vm2  ;;  %vm12711_vm15 = vcmask 1039360  }
 0x6ca   :  { %v8460_v59 = vunpack.i.h.bf16 %v8458_v61  ;;  %v8459_v49 = vunpack.i.l.bf16 %v8458_v61  ;;  %7842 = vmatprep.subr.msk.bf16.mxu1 %vm12694_vm5, %v7841_v29  ;;  %v4311_v63 = vsel %vm12696_vm2, %v8454_v32, %v8455_v16  ;;  %vm12699_vm9 = vmmov %vm12696_vm2  ;;  %vm12710_vm5 = vnez %v12709_v5 }
 0x6cb   :  { %7839 = vmatmul.mubr.msk.bf16.vlgmr.msra.gmra.mxu0 %vm12692_vm14, %v7832_v33  ;;  %7845 = vmatpush1.bf16.msk.msra.mxu1 %vm10372_vm7, %v7844_v13  ;;  %v7849_v15 = vpack.c.bf16 %v4311_v63, %v4308_v45  ;;  %v8463_v62 = vpop.permute.xlu1 %8462  ;;  %vm12700_vm12 = vmmov %vm12692_vm14  ;;  %vm12707_vm14 = vnez %v12706_v26 }
 0x6cc   :  { %4373 = vmatprep.mubr.bf16.mxu0 %v12664_v39  ;;  %v4322_v24 = vsel %vm12698_vm11, %v8459_v49, %v8444_v30  ;;  %v4323_v40 = vsel %vm12699_vm9, %v8460_v59, %v8454_v32  ;;  %v8465_v55 = vunpack.i.h.bf16 %v8463_v62  ;;  %v8464_v42 = vunpack.i.l.bf16 %v8463_v62  ;;  %vm12702_vm7 = vmmov %vm12696_vm2 }
 0x6cd   :  { %v7852_v1 = vpack.c.bf16 %v4323_v40, %v4322_v24  ;;  %v8468_v21 = vpop.permute.xlu0 %8467  ;;  %7850 = vmatprep.subr.msk.bf16.mxu0 %vm10399_vm8, %v7849_v15  ;;  %vm12703_vm13 = vmmov %vm12696_vm2  ;;  %vm12714_vm11 = vnez %v12713_v41  ;;  %v12734_v40 = vld [vmem:[#allocation41_spill] sm:$0xff] }
 0x6ce   :  { %v8470_v6 = vunpack.i.h.bf16 %v8468_v21  ;;  %v8469_v11 = vunpack.i.l.bf16 %v8468_v21  ;;  %7846 = vmatmul.mubr.msk.bf16.vlgmr.msra.gmra.mxu1 %vm12700_vm12, %v7832_v33  ;;  %v4313_v54 = vsel %vm12702_vm7, %v8465_v55, %v8460_v59  ;;  %v4309_v56 = vsel %vm12703_vm13, %v8445_v2, %v8464_v42  ;;  %vm12704_vm1 = vmmov %vm12696_vm2 }
 0x6cf   :  { %v4310_v18 = vsel %vm12704_vm1, %v8464_v42, %v8459_v49  ;;  %vm12705_vm0 = vmmov %vm12704_vm1  ;;  %7853 = vmatpush1.bf16.msk.msra.mxu0 %vm12707_vm14, %v7852_v1  ;;  %v8473_v28 = vpop.permute.xlu1 %8472  ;;  %4414 = vmatprep.mubr.bf16.mxu1 %v12664_v39  ;;  %vm12719_vm13 = vnez %v12718_v53  ;;  %v7865_v42 = vld [vmem:[%s11823_s9 + $0x14] sm:$0xf]  ;;  %v7880_v53 = vld [vmem:[%s11823_s9 + $0x18] sm:$0xf] }
 0x6d0   :  { %v4312_v3 = vsel %vm12705_vm0, %v8455_v16, %v8465_v55  ;;  %v7856_v34 = vpack.c.bf16 %v4313_v54, %v4310_v18  ;;  %4450 = vmatprep.subr.bf16.mxu0 %v4430_v12  ;;  %v8475_v52 = vunpack.i.h.bf16 %v8473_v28  ;;  %v8474_v22 = vunpack.i.l.bf16 %v8473_v28  ;;  %vm12708_vm8 = vmmov %vm12700_vm12  ;;  %v12729_v16 = vld [vmem:[#allocation38_spill] sm:$0xff]  ;;  %v12738_v55 = vld [vmem:[#allocation45_spill] sm:$0xff] }
 0x6d1   :  { %v7859_v23 = vpack.c.bf16 %v4312_v3, %v4309_v56  ;;  %v8478_v46 = vpop.permute.xlu0 %8477  ;;  %v4539_v57 = vsel %vm12711_vm15, %v8469_v11, %v8470_v6  ;;  %vm12712_vm2 = vmmov %vm12711_vm15  ;;  %vm12726_vm15 = vnez %v12725_v58 }
 0x6d2   :  { %v8480_v44 = vunpack.i.h.bf16 %v8478_v46  ;;  %v8479_v27 = vunpack.i.l.bf16 %v8478_v46  ;;  %7857 = vmatprep.subr.msk.bf16.mxu1 %vm12710_vm5, %v7856_v34  ;;  %v4542_v51 = vsel %vm12712_vm2, %v8474_v22, %v8475_v52  ;;  %vm12715_vm9 = vmmov %vm12712_vm2 }
 0x6d3   :  { %7854 = vmatmul.mubr.msk.bf16.vlgmr.msra.gmra.mxu0 %vm12708_vm8, %v7847_v7  ;;  %7860 = vmatpush1.bf16.msk.msra.mxu1 %vm12714_vm11, %v7859_v23  ;;  %v7867_v0 = vpack.c.bf16 %v4542_v51, %v4539_v57  ;;  %v8488_v9 = vpop.permute.xlu1 %8487  ;;  %vm12716_vm12 = vmmov %vm12712_vm2  ;;  %v12743_v23 = vld [vmem:[#allocation39_spill] sm:$0xff] }
 0x6d4   :  { %4451 = vmatpush1.bf16.msra.mxu0 %v4429_v25  ;;  %4491 = vmatprep.subr.bf16.mxu1 %v4432_v4  ;;  %v8490_v31 = vunpack.i.h.bf16 %v8488_v9  ;;  %v8489_v2 = vunpack.i.l.bf16 %v8488_v9  ;;  %v4538_v30 = vsel %vm12715_vm9, %v8479_v27, %v8469_v11  ;;  %v4541_v19 = vsel %vm12716_vm12, %v8480_v44, %v8474_v22  ;;  %vm12717_vm7 = vmmov %vm12708_vm8  ;;  %v12752_v9 = vld [vmem:[#allocation43_spill] sm:$0xff] }
 0x6d5   :  { %4468 = vmatprep.mubr.bf16.mxu0 %v12664_v39  ;;  %v8483_v12 = vpop.permute.xlu0 %8482  ;;  %7868 = vmatprep.subr.msk.bf16.mxu0 %vm12719_vm13, %v7867_v0  ;;  %vm12720_vm1 = vmmov %vm12712_vm2  ;;  %v7870_v60 = vpack.c.bf16 %v4541_v19, %v4538_v30  ;;  %vm12727_vm2 = vcmask 924672   ;;  %vm12730_vm9 = vnez %v12729_v16  ;;  %v12756_v19 = vld [vmem:[#allocation37_spill] sm:$0xff] }
 0x6d6   :  { %7861 = vmatmul.mubr.msk.bf16.vlgmr.msra.gmra.mxu1 %vm12717_vm7, %v7847_v7  ;;  %v8485_v36 = vunpack.i.h.bf16 %v8483_v12  ;;  %v8484_v37 = vunpack.i.l.bf16 %v8483_v12  ;;  %v4555_v25 = vsel %vm12720_vm1, %v8490_v31, %v8480_v44  ;;  %vm12721_vm0 = vmmov %vm12720_vm1  ;;  %vm12735_vm1 = vnez %v12734_v40 }
 0x6d7   :  { %v4554_v50 = vsel %vm12721_vm0, %v8489_v2, %v8479_v27  ;;  %4492 = vmatpush1.bf16.msra.mxu1 %v4431_v14  ;;  %v8493_v17 = vpop.permute.xlu1 %8492  ;;  %4509 = vmatprep.mubr.bf16.mxu1 %v12664_v39  ;;  %vm12722_vm14 = vmmov %vm12721_vm0 }
 0x6d8   :  { %v7874_v4 = vpack.c.bf16 %v4555_v25, %v4554_v50  ;;  %v8495_v10 = vunpack.i.h.bf16 %v8493_v17  ;;  %v8494_v33 = vunpack.i.l.bf16 %v8493_v17  ;;  %v4540_v29 = vsel %vm12722_vm14, %v8470_v6, %v8489_v2  ;;  %vm12723_vm8 = vmmov %vm12721_vm0 }
 0x6d9   :  { %v8498_v47 = vpop.permute.xlu0 %8497  ;;  %v4543_v13 = vsel %vm12723_vm8, %v8475_v52, %v8490_v31  ;;  %vm12724_vm5 = vmmov %vm12717_vm7  ;;  %v4676_v38 = vsel %vm12727_vm2, %v8484_v37, %v8485_v36  ;;  %vm12739_vm8 = vnez %v12738_v55  ;;  %v12747_v52 = vld [vmem:[#allocation46_spill] sm:$0xff] }
 0x6da   :  { %v8500_v43 = vunpack.i.h.bf16 %v8498_v47  ;;  %v8499_v61 = vunpack.i.l.bf16 %v8498_v47  ;;  %7875 = vmatprep.subr.msk.bf16.mxu1 %vm12726_vm15, %v7874_v4  ;;  %vm12728_vm11 = vmmov %vm12727_vm2  ;;  %v7877_v49 = vpack.c.bf16 %v4543_v13, %v4540_v29 }
 0x6db   :  { %7863 = vmatmul.mubr.msk.bf16.vlgmr.msra.gmra.mxu0 %vm12724_vm5, %v7862_v35  ;;  %v4679_v14 = vsel %vm12728_vm11, %v8494_v33, %v8495_v10  ;;  %v8508_v59 = vpop.permute.xlu1 %8507  ;;  %vm12731_vm12 = vmmov %vm12727_vm2  ;;  %vm12744_vm11 = vnez %v12743_v23 }
 0x6dc   :  { %7871 = vmatpush1.bf16.msk.msra.mxu0 %vm12730_vm9, %v7870_v60  ;;  %4605 = vmatprep.mubr.bf16.mxu0 %v12664_v39  ;;  %v7882_v32 = vpack.c.bf16 %v4679_v14, %v4676_v38  ;;  %v8510_v45 = vunpack.i.h.bf16 %v8508_v59  ;;  %v8509_v63 = vunpack.i.l.bf16 %v8508_v59  ;;  %v4675_v8 = vsel %vm12731_vm12, %v8499_v61, %v8484_v37  ;;  %vm12732_vm7 = vmmov %vm12727_vm2 }
 0x6dd   :  { %v8503_v48 = vpop.permute.xlu0 %8502  ;;  %v4678_v24 = vsel %vm12732_vm7, %v8500_v43, %v8494_v33  ;;  %vm12733_vm13 = vmmov %vm12724_vm5  ;;  %vm12745_vm9 = vcmask 916480   ;;  %vm12748_vm7 = vnez %v12747_v52  ;;  %v12761_v33 = vld [vmem:[#allocation63_spill] sm:$0xff] }
 0x6de   :  { %7864 = vmatmul.mubr.msk.bf16.vlgmr.msra.gmra.mxu1 %vm12733_vm13, %v7862_v35  ;;  %7883 = vmatprep.subr.msk.bf16.mxu0 %vm12735_vm1, %v7882_v32  ;;  %v8505_v15 = vunpack.i.h.bf16 %v8503_v48  ;;  %v8504_v62 = vunpack.i.l.bf16 %v8503_v48  ;;  %vm12736_vm0 = vmmov %vm12727_vm2  ;;  %v7885_v20 = vpack.c.bf16 %v4678_v24, %v4675_v8  ;;  %v7895_v8 = vld [vmem:[%s11823_s9 + $0x1c] sm:$0xf] }
 0x6df   :  { %v4692_v1 = vsel %vm12736_vm0, %v8510_v45, %v8500_v43  ;;  %vm12737_vm14 = vmmov %vm12736_vm0  ;;  %7878 = vmatpush1.bf16.msk.msra.mxu1 %vm12739_vm8, %v7877_v49  ;;  %v8513_v11 = vpop.permute.xlu1 %8512  ;;  %4646 = vmatprep.mubr.bf16.mxu1 %v12664_v39  ;;  %v12765_v43 = vld [vmem:[#allocation42_spill] sm:$0xff] }
 0x6e0   :  { %v4691_v21 = vsel %vm12737_vm14, %v8509_v63, %v8499_v61  ;;  %v8515_v56 = vunpack.i.h.bf16 %v8513_v11  ;;  %v8514_v18 = vunpack.i.l.bf16 %v8513_v11  ;;  %vm12740_vm5 = vmmov %vm12736_vm0  ;;  %v4813_v28 = vsel %vm12745_vm9, %v8504_v62, %v8505_v15 }
 0x6e1   :  { %v7889_v6 = vpack.c.bf16 %v4692_v1, %v4691_v21  ;;  %v8518_v54 = vpop.permute.xlu0 %8517  ;;  %v4677_v3 = vsel %vm12740_vm5, %v8485_v36, %v8509_v63  ;;  %vm12741_vm15 = vmmov %vm12736_vm0  ;;  %vm12753_vm14 = vnez %v12752_v9  ;;  %v12773_v63 = vld [vmem:[#allocation64_spill] sm:$0xff] }
 0x6e2   :  { %v4680_v26 = vsel %vm12741_vm15, %v8495_v10, %v8510_v45  ;;  %v8520_v7 = vunpack.i.h.bf16 %v8518_v54  ;;  %v8519_v34 = vunpack.i.l.bf16 %v8518_v54  ;;  %vm12742_vm2 = vmmov %vm12733_vm13  ;;  %vm12757_vm15 = vnez %v12756_v19 }
 0x6e3   :  { %7872 = vmatmul.mubr.msk.bf16.vlgmr.msra.gmra.mxu0 %vm12742_vm2, %v7865_v42  ;;  %7890 = vmatprep.subr.msk.bf16.mxu1 %vm12744_vm11, %v7889_v6  ;;  %vm12746_vm12 = vmmov %vm12745_vm9  ;;  %v8528_v44 = vpop.permute.xlu1 %8527  ;;  %v7892_v27 = vpack.c.bf16 %v4680_v26, %v4677_v3  ;;  %v7910_v6 = vld [vmem:[%s11823_s9 + $0x20] sm:$0xf] }
 0x6e4   :  { %v4816_v46 = vsel %vm12746_vm12, %v8514_v18, %v8515_v56  ;;  %7886 = vmatpush1.bf16.msk.msra.mxu0 %vm12748_vm7, %v7885_v20  ;;  %4742 = vmatprep.mubr.bf16.mxu0 %v12664_v39  ;;  %v8530_v57 = vunpack.i.h.bf16 %v8528_v44  ;;  %v8529_v51 = vunpack.i.l.bf16 %v8528_v44  ;;  %vm12749_vm13 = vmmov %vm12745_vm9  ;;  %vm12762_vm12 = vnez %v12761_v33 }
 0x6e5   :  { %v7897_v22 = vpack.c.bf16 %v4816_v46, %v4813_v28  ;;  %v8523_v5 = vpop.permute.xlu0 %8522  ;;  %v4812_v41 = vsel %vm12749_vm13, %v8519_v34, %v8504_v62  ;;  %vm12750_vm1 = vmmov %vm12745_vm9  ;;  %vm12763_vm7 = vcmask 908288  }
 0x6e6   :  { %v4815_v0 = vsel %vm12750_vm1, %v8520_v7, %v8514_v18  ;;  %vm12751_vm0 = vmmov %vm12742_vm2  ;;  %v8525_v12 = vunpack.i.h.bf16 %v8523_v5  ;;  %v8524_v31 = vunpack.i.l.bf16 %v8523_v5 }
 0x6e7   :  { %7879 = vmatmul.mubr.msk.bf16.vlgmr.msra.gmra.mxu1 %vm12751_vm0, %v7865_v42  ;;  %7898 = vmatprep.subr.msk.bf16.mxu0 %vm12753_vm14, %v7897_v22  ;;  %vm12754_vm8 = vmmov %vm12750_vm1  ;;  %v8533_v37 = vpop.permute.xlu1 %8532  ;;  %v7900_v25 = vpack.c.bf16 %v4815_v0, %v4812_v41 }
 0x6e8   :  { %v4829_v2 = vsel %vm12754_vm8, %v8530_v57, %v8520_v7  ;;  %vm12755_vm5 = vmmov %vm12750_vm1  ;;  %7893 = vmatpush1.bf16.msk.msra.mxu1 %vm12757_vm15, %v7892_v27  ;;  %4783 = vmatprep.mubr.bf16.mxu1 %v12664_v39  ;;  %v8535_v35 = vunpack.i.h.bf16 %v8533_v37  ;;  %v8534_v4 = vunpack.i.l.bf16 %v8533_v37  ;;  %v4950_v29 = vsel %vm12763_vm7, %v8524_v31, %v8525_v12 }
 0x6e9   :  { %v4828_v30 = vsel %vm12755_vm5, %v8529_v51, %v8519_v34  ;;  %v8538_v50 = vpop.permute.xlu0 %8537  ;;  %vm12758_vm2 = vmmov %vm12750_vm1 }
 0x6ea   :  { %v7904_v36 = vpack.c.bf16 %v4829_v2, %v4828_v30  ;;  %v4814_v17 = vsel %vm12758_vm2, %v8505_v15, %v8529_v51  ;;  %vm12759_vm11 = vmmov %vm12750_vm1  ;;  %v8540_v47 = vunpack.i.h.bf16 %v8538_v50  ;;  %v8539_v10 = vunpack.i.l.bf16 %v8538_v50 }
 0x6eb   :  { %v4817_v60 = vsel %vm12759_vm11, %v8515_v56, %v8530_v57  ;;  %vm12760_vm9 = vmmov %vm12751_vm0  ;;  %vm12766_vm1 = vnez %v12765_v43  ;;  %v8543_v58 = vpop.permute.xlu1 %8542  ;;  %vm12774_vm2 = vnez %v12773_v63 }
 0x6ec   :  { %7887 = vmatmul.mubr.msk.bf16.vlgmr.msra.gmra.mxu0 %vm12760_vm9, %v7880_v53  ;;  %7905 = vmatprep.subr.msk.bf16.mxu1 %vm12762_vm12, %v7904_v36  ;;  %vm12764_vm13 = vmmov %vm12763_vm7  ;;  %v7907_v38 = vpack.c.bf16 %v4817_v60, %v4814_v17  ;;  %v8545_v14 = vunpack.i.h.bf16 %v8543_v58  ;;  %v8544_v16 = vunpack.i.l.bf16 %v8543_v58 }
 0x6ed   :  { %v4953_v13 = vsel %vm12764_vm13, %v8534_v4, %v8535_v35  ;;  %7901 = vmatpush1.bf16.msk.msra.mxu0 %vm12766_vm1, %v7900_v25  ;;  %4879 = vmatprep.mubr.bf16.mxu0 %v12664_v39  ;;  %vm12767_vm0 = vmmov %vm12763_vm7 }
 0x6ee   :  { %v7912_v61 = vpack.c.bf16 %v4953_v13, %v4950_v29  ;;  %v4949_v32 = vsel %vm12767_vm0, %v8539_v10, %v8524_v31  ;;  %vm12768_vm14 = vmmov %vm12767_vm0 }
 0x6ef   :  { %v4952_v59 = vsel %vm12768_vm14, %v8540_v47, %v8534_v4  ;;  %vm12769_vm8 = vmmov %vm12760_vm9 }
 0x6f0   :  { %7894 = vmatmul.mubr.msk.bf16.vlgmr.msra.gmra.mxu1 %vm12769_vm8, %v7880_v53  ;;  %7913 = vmatprep.subr.msk.bf16.mxu0 %vm10869_vm6, %v7912_v61  ;;  %vm12771_vm5 = vmmov %vm12767_vm0  ;;  %v7915_v40 = vpack.c.bf16 %v4952_v59, %v4949_v32 }
 0x6f1   :  { %v4966_v48 = vsel %vm12771_vm5, %v8545_v14, %v8540_v47  ;;  %vm12772_vm15 = vmmov %vm12767_vm0  ;;  %7908 = vmatpush1.bf16.msk.msra.mxu1 %vm12774_vm2, %v7907_v38  ;;  %4920 = vmatprep.mubr.bf16.mxu1 %v12664_v39  ;;  %vm12788_vm5 = vcmask 138240  }
 0x6f2   :  { %v4965_v45 = vsel %vm12772_vm15, %v8544_v16, %v8539_v10  ;;  %vm12775_vm11 = vmmov %vm12767_vm0  ;;  %vm12041_vm15 = vcmask 1043456  }
 0x6f3   :  { %v7919_v24 = vpack.c.bf16 %v4966_v48, %v4965_v45  ;;  %v4951_v15 = vsel %vm12775_vm11, %v8525_v12, %v8544_v16  ;;  %vm12776_vm9 = vmmov %vm12767_vm0 }
 0x6f4   :  { %v4954_v62 = vsel %vm12776_vm9, %v8535_v35, %v8545_v14  ;;  %vm12777_vm6 = vmmov %vm12769_vm8 }
 0x6f5   :  { %7902 = vmatmul.mubr.msk.bf16.vlgmr.msra.gmra.mxu0 %vm12777_vm6, %v7895_v8  ;;  %7920 = vmatprep.subr.msk.bf16.mxu1 %vm10902_vm10, %v7919_v24  ;;  %v7922_v55 = vpack.c.bf16 %v4954_v62, %v4951_v15  ;;  %vm12780_vm12 = vmmov %vm12777_vm6 }
 0x6f6   :  { %7916 = vmatpush1.bf16.msk.msra.mxu0 %vm10889_vm4, %v7915_v40  ;;  %5016 = vmatprep.mubr.bf16.mxu0 %v12664_v39  ;;  %vm12782_vm7 = vmmov %vm12777_vm6 }
 0x6f7   :  { %vm12783_vm10 = vmmov %vm12777_vm6 }
 0x6f8   :  { %7909 = vmatmul.mubr.msk.bf16.vlgmr.msra.gmra.mxu1 %vm12780_vm12, %v7895_v8  ;;  %vm12784_vm0 = vmmov %vm12777_vm6 }
 0x6f9   :  { %7923 = vmatpush1.bf16.msk.msra.mxu1 %vm10913_vm3, %v7922_v55  ;;  %5057 = vmatprep.mubr.bf16.mxu1 %v12664_v39  ;;  %vm12785_vm14 = vmmov %vm12784_vm0 }
 0x6fa   :  { %vm12791_vm11 = vmmov %vm12784_vm0 }
 0x6fb   :  { %vm12792_vm9 = vmmov %vm12784_vm0 }
 0x6fd   :  { %7917 = vmatmul.mubr.msk.bf16.vlgmr.msra.gmra.mxu0 %vm12782_vm7, %v7910_v6  ;;  %vm12797_vm7 = vmmov %vm12788_vm5 }
 0x6fe   :  { %5232 = vmatprep.mubr.bf16.mxu0 %v12664_v39 }
 0x700   :  { %7924 = vmatmul.mubr.msk.bf16.vlgmr.msra.gmra.mxu1 %vm12783_vm10, %v7910_v6 }
 0x701   :  { %5273 = vmatprep.mubr.bf16.mxu1 %v12664_v39 }
 0x77a   :  { %v4020_v11 = vpop.f32.mrf.mxu0 }
 0x77c   :  { %v4022_v20 = vpop.f32.mrf.mxu0 }
 0x77e   :  { %v4024_v54 = vpop.f32.mrf.mxu0  ;;  %v4061_v56 = vpop.f32.mrf.mxu1 }
 0x780   :  { %v4025_v18 = vpop.f32.mrf.mxu0  ;;  %v4063_v3 = vpop.f32.mrf.mxu1 }
 0x782   :  { %v4065_v26 = vpop.f32.mrf.mxu1  ;;  %v4105_v7 = vpop.f32.mrf.mxu0 }
 0x783   :  { %v4106_v48 = vadd.f32 %v4105_v7, %v4020_v11 }
 0x784   :  { %v4066_v34 = vpop.f32.mrf.mxu1  ;;  %v4107_v23 = vpop.f32.mrf.mxu0 }
 0x785   :  { %v4108_v8 = vadd.f32 %v4107_v23, %v4022_v20 }
 0x786   :  { %v4109_v28 = vpop.f32.mrf.mxu0  ;;  %v4146_v46 = vpop.f32.mrf.mxu1 }
 0x787   :  { %v4147_v62 = vadd.f32 %v4146_v46, %v4061_v56 }
 0x788   :  { %v4110_v52 = vpop.f32.mrf.mxu0  ;;  %v4148_v22 = vpop.f32.mrf.mxu1 }
 0x789   :  { %v4149_v55 = vadd.f32 %v4148_v22, %v4063_v3 }
 0x78a   :  { %v4150_v44 = vpop.f32.mrf.mxu1 }
 0x78b   :  { %v4238_v27 = vpop.f32.mrf.mxu0 }
 0x78c   :  { %v4151_v5 = vpop.f32.mrf.mxu1  ;;  %v4286_v24 = vadd.f32 %v4238_v27, %v4106_v48 }
 0x78d   :  { %v4240_v57 = vpop.f32.mrf.mxu0 }
 0x78e   :  { %v4279_v41 = vpop.f32.mrf.mxu1  ;;  %v4287_v1 = vadd.f32 %v4240_v57, %v4108_v8 }
 0x78f   :  { %v4242_v51 = vpop.f32.mrf.mxu0  ;;  %v4288_v54 = vadd.f32 %v4279_v41, %v4147_v62 }
 0x790   :  { %v4281_v9 = vpop.f32.mrf.mxu1 }
 0x791   :  { %v4243_v0 = vpop.f32.mrf.mxu0  ;;  %v4289_v34 = vadd.f32 %v4281_v9, %v4149_v55 }
 0x792   :  { %v4283_v12 = vpop.f32.mrf.mxu1 }
 0x793   :  { %v4375_v31 = vpop.f32.mrf.mxu0 }
 0x794   :  { %v4284_v2 = vpop.f32.mrf.mxu1  ;;  %v4423_v21 = vadd.f32 %v4375_v31, %v4286_v24 }
 0x795   :  { %v4377_v30 = vpop.f32.mrf.mxu0 }
 0x796   :  { %v4416_v53 = vpop.f32.mrf.mxu1  ;;  %v4424_v18 = vadd.f32 %v4377_v30, %v4287_v1 }
 0x797   :  { %v4379_v19 = vpop.f32.mrf.mxu0  ;;  %v4425_v44 = vadd.f32 %v4416_v53, %v4288_v54 }
 0x798   :  { %v4418_v37 = vpop.f32.mrf.mxu1 }
 0x799   :  { %v4380_v36 = vpop.f32.mrf.mxu0  ;;  %v4426_v5 = vadd.f32 %v4418_v37, %v4289_v34 }
 0x79a   :  { %v4420_v25 = vpop.f32.mrf.mxu1 }
 0x79b   :  { %v4470_v50 = vpop.f32.mrf.mxu0 }
 0x79c   :  { %v4421_v35 = vpop.f32.mrf.mxu1  ;;  %v4518_v26 = vadd.f32 %v4470_v50, %v4423_v21  ;;  %v5089_v21 = vld [vmem:[%s11824_s10] sm:$0xff] }
 0x79d   :  { %v4472_v4 = vpop.f32.mrf.mxu0 }
 0x79e   :  { %v4511_v60 = vpop.f32.mrf.mxu1  ;;  %v4519_v11 = vadd.f32 %v4472_v4, %v4424_v18 }
 0x79f   :  { %v4474_v17 = vpop.f32.mrf.mxu0  ;;  %v4520_v27 = vadd.f32 %v4511_v60, %v4425_v44 }
 0x7a0   :  { %v4513_v10 = vpop.f32.mrf.mxu1 }
 0x7a1   :  { %v4475_v47 = vpop.f32.mrf.mxu0  ;;  %v4521_v46 = vadd.f32 %v4513_v10, %v4426_v5 }
 0x7a2   :  { %v4515_v33 = vpop.f32.mrf.mxu1 }
 0x7a3   :  { %v4607_v29 = vpop.f32.mrf.mxu0 }
 0x7a4   :  { %v4516_v13 = vpop.f32.mrf.mxu1  ;;  %v4655_v7 = vadd.f32 %v4607_v29, %v4518_v26 }
 0x7a5   :  { %v4609_v43 = vpop.f32.mrf.mxu0 }
 0x7a6   :  { %v4656_v51 = vadd.f32 %v4609_v43, %v4519_v11 }
 0x7a7   :  { %v4611_v61 = vpop.f32.mrf.mxu0  ;;  %v4648_v58 = vpop.f32.mrf.mxu1 }
 0x7a8   :  { %v4657_v22 = vadd.f32 %v4648_v58, %v4520_v27 }
 0x7a9   :  { %v4612_v38 = vpop.f32.mrf.mxu0  ;;  %v4650_v14 = vpop.f32.mrf.mxu1 }
 0x7aa   :  { %v4658_v12 = vadd.f32 %v4650_v14, %v4521_v46 }
 0x7ab   :  { %v4652_v16 = vpop.f32.mrf.mxu1 }
 0x7ac   :  { %v4744_v32 = vpop.f32.mrf.mxu0 }
 0x7ad   :  { %v4653_v59 = vpop.f32.mrf.mxu1  ;;  %v4792_v56 = vadd.f32 %v4744_v32, %v4655_v7 }
 0x7ae   :  { %v4746_v49 = vpop.f32.mrf.mxu0 }
 0x7af   :  { %v4793_v0 = vadd.f32 %v4746_v49, %v4656_v51 }
 0x7b0   :  { %v4748_v45 = vpop.f32.mrf.mxu0  ;;  %v4785_v63 = vpop.f32.mrf.mxu1 }
 0x7b1   :  { %v4794_v2 = vadd.f32 %v4785_v63, %v4657_v22 }
 0x7b2   :  { %v4749_v40 = vpop.f32.mrf.mxu0  ;;  %v4787_v15 = vpop.f32.mrf.mxu1 }
 0x7b3   :  { %v4795_v53 = vadd.f32 %v4787_v15, %v4658_v12 }
 0x7b4   :  { %v4789_v42 = vpop.f32.mrf.mxu1 }
 0x7b5   :  { %v4881_v6 = vpop.f32.mrf.mxu0 }
 0x7b6   :  { %v4790_v28 = vpop.f32.mrf.mxu1  ;;  %v4929_v41 = vadd.f32 %v4881_v6, %v4792_v56  ;;  %v5093_v6 = vld [vmem:[%s11825_s11] sm:$0xff] }
 0x7b7   :  { %v4883_v52 = vpop.f32.mrf.mxu0 }
 0x7b8   :  { %v4922_v23 = vpop.f32.mrf.mxu1  ;;  %v4930_v30 = vadd.f32 %v4883_v52, %v4793_v0 }
 0x7b9   :  { %v4885_v20 = vpop.f32.mrf.mxu0  ;;  %v4931_v25 = vadd.f32 %v4922_v23, %v4794_v2 }
 0x7ba   :  { %v4924_v3 = vpop.f32.mrf.mxu1 }
 0x7bb   :  { %v4886_v57 = vpop.f32.mrf.mxu0  ;;  %v4932_v35 = vadd.f32 %v4924_v3, %v4795_v53 }
 0x7bc   :  { %v4926_v31 = vpop.f32.mrf.mxu1 }
 0x7bd   :  { %v5018_v9 = vpop.f32.mrf.mxu0 }
 0x7be   :  { %v5066_v19 = vadd.f32 %v5018_v9, %v4929_v41  ;;  %v4927_v36 = vpop.f32.mrf.mxu1 }
 0x7bf   :  { %v5020_v37 = vpop.f32.mrf.mxu0 }
 0x7c0   :  { %v5067_v50 = vadd.f32 %v5020_v37, %v4930_v30  ;;  %v5059_v17 = vpop.f32.mrf.mxu1  ;;  %v5075_v60 = vmul.f32 %v5066_v19, %v5066_v19 }
 0x7c1   :  { %v5022_v4 = vpop.f32.mrf.mxu0  ;;  %v5068_v33 = vadd.f32 %v5059_v17, %v4931_v25 }
 0x7c2   :  { %v5070_v47 = vadd.f32 %v5067_v50, %v5066_v19  ;;  %v5076_v10 = vmul.f32 %v5067_v50, %v5067_v50  ;;  %v5061_v13 = vpop.f32.mrf.mxu1 }
 0x7c3   :  { %v5023_v29 = vpop.f32.mrf.mxu0  ;;  %v5077_v58 = vmul.f32 %v5068_v33, %v5068_v33  ;;  %v5069_v38 = vadd.f32 %v5061_v13, %v4932_v35 }
 0x7c4   :  { %v5079_v43 = vadd.f32 %v5076_v10, %v5075_v60  ;;  %v5071_v61 = vadd.f32 %v5070_v47, %v5068_v33  ;;  %v5063_v14 = vpop.f32.mrf.mxu1  ;;  %v12789_v60 = vld [vmem:[#allocation7_spill] sm:$0xff] }
 0x7c5   :  { %v5078_v16 = vmul.f32 %v5069_v38, %v5069_v38  ;;  %vm12790_vm2 = vnez %v12789_v60 }
 0x7c6   :  { %v5072_v32 = vadd.f32 %v5071_v61, %v5069_v38  ;;  %v5080_v59 = vadd.f32 %v5079_v43, %v5077_v58  ;;  %v5064_v49 = vpop.f32.mrf.mxu1  ;;  %v12793_v61 = vld [vmem:[#allocation8_spill] sm:$0xff] }
 0x7c7   :  { %vm12794_vm6 = vnez %v12793_v61 }
 0x7c8   :  { %5073 = vadd.xlane.f32.xlu0 %v5072_v32  ;;  %v5081_v48 = vadd.f32 %v5080_v59, %v5078_v16  ;;  %v12798_v32 = vld [vmem:[#allocation9_spill] sm:$0xff] }
 0x7c9   :  { %vm12799_vm10 = vnez %v12798_v32 }
 0x7ca   :  { %5082 = vadd.xlane.f32.xlu1 %v5081_v48 }
 0x851   :  { %v5074_v45 = vpop.xlane.xlu0 %5073 }
 0x852   :  { %v5084_v63 = vmul.f32 0.001953125, %v5074_v45  ;;  %v12800_v45 = vld [vmem:[#allocation10_spill] sm:$0xff] }
 0x853   :  { %v5083_v8 = vpop.xlane.xlu1 %5082 }
 0x854   :  { %v5086_v24 = vmul.f32 %v5084_v63, %v5084_v63  ;;  %v5085_v40 = vmul.f32 0.001953125, %v5083_v8 }
 0x856   :  { %v5087_v15 = vsub.f32 %v5085_v40, %v5086_v24 }
 0x858   :  { %v5088_v62 = vmax.f32 %v5087_v15, 0.0  ;;  %v7925_v15 = vld [vmem:[%s11826_s12 + $0x4] sm:$0xf] }
 0x85a   :  { %v5090_v1 = vadd.f32 1e-05, %v5088_v62 }
 0x85c   :  { %8706 = vrsqrt.f32 %v5090_v1 }
 0x869   :  { %v8707_v55 = vpop.eup %8706 }
 0x86a   :  { %v5092_v42 = vmul.f32 %v8707_v55, %v5089_v21 }
 0x86c   :  { %5098 = vperm.xlu0 %8065, %v5092_v42   ;;  %v5094_v54 = vmul.f32 %v5092_v42, %v5084_v63 }
 0x86e   :  { %v5095_v18 = vsub.f32 %v5093_v6, %v5094_v54  ;;  %v12804_v6 = vld [vmem:[#allocation11_spill] sm:$0xff] }
 0x870   :  { %5107 = vperm.xlu1 %8064, %v5095_v18   ;;  %v12806_v18 = vld [vmem:[#allocation12_spill] sm:$0xff] }
 0x8e7   :  { %v5099_v26 = vpop.permute.xlu0 %5098 }
 0x8e8   :  { %v5101_v34 = vmul.f32 %v5099_v26, %v5066_v19  ;;  %v5102_v28 = vmul.f32 %v5099_v26, %v5067_v50  ;;  %v5104_v52 = vmul.f32 %v5099_v26, %v5069_v38  ;;  %v5103_v20 = vmul.f32 %v5099_v26, %v5068_v33  ;;  %v12786_v50 = vld [vmem:[#allocation6_spill] sm:$0xff]  ;;  %v12795_v38 = vld [vmem:[#allocation5_spill] sm:$0xff] }
 0x8e9   :  { %vm12787_vm8 = vnez %v12786_v50  ;;  %vm12796_vm12 = vnez %v12795_v38 }
 0x8eb   :  { %v5108_v44 = vpop.permute.xlu1 %5107 }
 0x8ec   :  { %v5110_v11 = vadd.f32 %v5108_v44, %v5101_v34  ;;  %v5111_v7 = vadd.f32 %v5108_v44, %v5102_v28  ;;  %v5113_v5 = vadd.f32 %v5108_v44, %v5104_v52  ;;  %v5112_v51 = vadd.f32 %v5108_v44, %v5103_v20 }
 0x8ee   :  { %vm5114_vm4 = vcmp.ge.f32.partialorder %v5110_v11, 0.0  ;;  %vm5115_vm3 = vcmp.ge.f32.partialorder %v5111_v7, 0.0  ;;  %vm5117_vm13 = vcmp.ge.f32.partialorder %v5113_v5, 0.0  ;;  %v5118_v23 = vmul.f32 0.2, %v5110_v11 }
 0x8ef   :  { %v5119_v27 = vmul.f32 0.2, %v5111_v7  ;;  %v5121_v56 = vmul.f32 0.2, %v5113_v5  ;;  %v5120_v0 = vmul.f32 0.2, %v5112_v51 }
 0x8f0   :  { %v11314_v46 = vsel %vm5114_vm4, %v5110_v11, %v5118_v23  ;;  %vm5116_vm1 = vcmp.ge.f32.partialorder %v5112_v51, 0.0  ;;  %vm12801_vm4 = vnez %v12800_v45 }
 0x8f1   :  { %v11316_v57 = vsel %vm5115_vm3, %v5111_v7, %v5119_v27  ;;  %v11318_v3 = vsel %vm5117_vm13, %v5113_v5, %v5121_v56  ;;  %v11326_v41 = vsel %vm5116_vm1, %v5112_v51, %v5120_v0  ;;  %vm12042_vm3 = vcmask 64512   ;;  %vm12802_vm13 = vmmov %vm12788_vm5 }
 0x8f2   :  { %5161 = vrot.lane.b32.xlu1 %v11316_v57, %s8732_s2  ;;  %v8546_v22 = vpack.i.bf16 %v11314_v46, %v11318_v3  ;;  %v8566_v12 = vpack.i.bf16 %v11316_v57, %v11314_v46  ;;  %vm12803_vm1 = vmmov %vm12788_vm5 }
 0x8f4   :  { %8547 = vrot.lane.b32.xlu0 %v8546_v22, %s8732_s2 }
 0x8f6   :  { %8552 = vrot.lane.b32.xlu1 %v8546_v22, %s8734_s18 }
 0x8f8   :  { %5163 = vrot.lane.b32.xlu0 %v11326_v41, %s8732_s2 }
 0x8fa   :  { %5137 = vrot.lane.b32.xlu1 %v11326_v41, %s8734_s18 }
 0x8fc   :  { %5135 = vrot.lane.b32.xlu0 %v11316_v57, %s8734_s18 }
 0x8fe   :  { %5384 = vrot.lane.b32.xlu1 %v11316_v57, %s8735_s19 }
 0x900   :  { %8557 = vrot.lane.b32.xlu0 %v8546_v22, %s8735_s19 }
 0x902   :  { %8562 = vrot.lane.b32.xlu1 %v8546_v22, %s8736_s1  ;;  %v12810_v22 = vld [vmem:[#allocation13_spill] sm:$0xff] }
 0x904   :  { %5386 = vrot.lane.b32.xlu0 %v11326_v41, %s8735_s19 }
 0x906   :  { %5514 = vrot.lane.b32.xlu1 %v11326_v41, %s8736_s1 }
 0x908   :  { %5512 = vrot.lane.b32.xlu0 %v11316_v57, %s8736_s1 }
 0x90a   :  { %5746 = vrot.lane.b32.xlu1 %v11326_v41, %s8737_s20 }
 0x90c   :  { %8567 = vrot.lane.b32.xlu0 %v8566_v12, %s8737_s20 }
 0x90e   :  { %8572 = vrot.lane.b32.xlu1 %v8566_v12, %s8738_s21 }
 0x910   :  { %5748 = vrot.lane.b32.xlu0 %v11318_v3, %s8737_s20 }
 0x912   :  { %5876 = vrot.lane.b32.xlu1 %v11318_v3, %s8738_s21 }
 0x914   :  { %5874 = vrot.lane.b32.xlu0 %v11326_v41, %s8738_s21 }
 0x916   :  { %6002 = vrot.lane.b32.xlu1 %v11326_v41, %s8739_s22 }
 0x918   :  { %8577 = vrot.lane.b32.xlu0 %v8566_v12, %s8739_s22 }
 0x91a   :  { %8582 = vrot.lane.b32.xlu1 %v8566_v12, %s8740_s23 }
 0x91c   :  { %6004 = vrot.lane.b32.xlu0 %v11318_v3, %s8739_s22 }
 0x91e   :  { %6132 = vrot.lane.b32.xlu1 %v11318_v3, %s8740_s23 }
 0x920   :  { %6130 = vrot.lane.b32.xlu0 %v11326_v41, %s8740_s23 }
 0x964   :  { %v5162_v31 = vpop.permute.xlu1 %5161 }
 0x966   :  { %v8548_v9 = vpop.permute.xlu0 %8547 }
 0x967   :  { %v8550_v2 = vunpack.i.h.bf16 %v8548_v9  ;;  %v8549_v30 = vunpack.i.l.bf16 %v8548_v9  ;;  %v5151_v9 = vld [vmem:[%s11826_s12] sm:$0xf] }
 0x968   :  { %v8553_v19 = vpop.permute.xlu1 %8552 }
 0x969   :  { %v8555_v53 = vunpack.i.h.bf16 %v8553_v19  ;;  %v8554_v36 = vunpack.i.l.bf16 %v8553_v19  ;;  %v5165_v37 = vsel %vm12784_vm0, %v8550_v2, %v5162_v31  ;;  %v5172_v25 = vsel %vm12785_vm14, %v8549_v30, %v8550_v2  ;;  %v12813_v2 = vld [vmem:[#allocation16_spill] sm:$0xff] }
 0x96a   :  { %v5174_v35 = vsel %vm12787_vm8, %v5165_v37, 0.0  ;;  %v5164_v17 = vpop.permute.xlu0 %5163  ;;  %v5173_v47 = vsel %vm12790_vm2, %v5172_v25, 0.0  ;;  %vm12805_vm0 = vnez %v12804_v6  ;;  %vm12807_vm14 = vnez %v12806_v18 }
 0x96b   :  { %v5146_v4 = vsel %vm12788_vm5, %v8554_v36, %v8555_v53  ;;  %v5166_v10 = vsel %vm12791_vm11, %v5162_v31, %v5164_v17  ;;  %v5167_v33 = vsel %vm12792_vm9, %v5164_v17, %v8549_v30  ;;  %v5180_v13 = vpack.c.bf16 %v5174_v35, %v5174_v35  ;;  %v12817_v35 = vld [vmem:[#allocation15_spill] sm:$0xff]  ;;  %v12819_v17 = vld [vmem:[#allocation14_spill] sm:$0xff] }
 0x96c   :  { %v5138_v29 = vpop.permute.xlu1 %5137  ;;  %v5179_v43 = vpack.c.bf16 %v5173_v47, %v5173_v47  ;;  %v5175_v58 = vsel %vm12794_vm6, %v5166_v10, 0.0  ;;  %v5176_v14 = vsel %vm12796_vm12, %v5167_v33, 0.0  ;;  %v5147_v59 = vsel %vm12799_vm10, %v5146_v4, 0.0 }
 0x96d   :  { %v5141_v16 = vsel %vm12797_vm7, %v5138_v29, %v8554_v36  ;;  %v5181_v49 = vpack.c.bf16 %v5175_v58, %v5175_v58  ;;  %v5182_v48 = vpack.c.bf16 %v5176_v14, %v5176_v14  ;;  %7926 = vmatprep.subr.msk.bf16.mxu0 %vm12041_vm15, %v5180_v13  ;;  %v5152_v42 = vpack.c.bf16 %v5147_v59, %v5147_v59  ;;  %v12822_v13 = vld [vmem:[#allocation17_spill] sm:$0xff]  ;;  %v12827_v59 = vld [vmem:[#allocation20_spill] sm:$0xff] }
 0x96e   :  { %v5150_v63 = vsel %vm12801_vm4, %v5141_v16, 0.0  ;;  %v5189_v8 = vsel %vm12041_vm15, %v5179_v43, 0  ;;  %v5136_v40 = vpop.permute.xlu0 %5135  ;;  %vm12808_vm5 = vcmask 121856   ;;  %vm12811_vm9 = vnez %v12810_v22 }
 0x96f   :  { %v5155_v24 = vpack.c.bf16 %v5150_v63, %v5150_v63  ;;  %5215 = vmatpush1.bf16.msra.mxu0 %v5189_v8  ;;  %v5139_v62 = vsel %vm12802_vm13, %v8555_v53, %v5136_v40  ;;  %v5140_v1 = vsel %vm12803_vm1, %v5136_v40, %v5138_v29  ;;  %7928 = vmatprep.subr.msk.bf16.mxu1 %vm12041_vm15, %v5182_v48  ;;  %v5195_v55 = vsel %vm12041_vm15, %v5181_v49, 0  ;;  %vm12809_vm11 = vmmov %vm12808_vm5 }
 0x970   :  { %v5385_v21 = vpop.permute.xlu1 %5384  ;;  %v5148_v54 = vsel %vm12805_vm0, %v5139_v62, 0.0  ;;  %v5149_v26 = vsel %vm12807_vm14, %v5140_v1, 0.0  ;;  %5256 = vmatpush1.bf16.msra.mxu1 %v5195_v55  ;;  %v5286_v5 = vsel %vm12041_vm15, %v5152_v42, 0  ;;  %vm12812_vm7 = vcmask 7168   ;;  %vm12815_vm1 = vmmov %vm12808_vm5 }
 0x971   :  { %v5153_v34 = vpack.c.bf16 %v5148_v54, %v5148_v54  ;;  %v5154_v28 = vpack.c.bf16 %v5149_v26, %v5149_v26  ;;  %7932 = vmatprep.subr.msk.bf16.mxu1 %vm12041_vm15, %v5155_v24  ;;  %vm12814_vm13 = vnez %v12813_v2  ;;  %v12833_v24 = vld [vmem:[#allocation18_spill] sm:$0xff] }
 0x972   :  { %7927 = vmatmul.mubr.msk.bf16.vlgmr.msra.gmra.mxu0 %vm12042_vm3, %v7925_v15  ;;  %v8558_v52 = vpop.permute.xlu0 %8557  ;;  %v7934_v54 = vld [vmem:[%s11826_s12 + $0x8] sm:$0xf] }
 0x973   :  { %5329 = vmatprep.mubr.bf16.mxu0 %v12664_v39  ;;  %v8560_v44 = vunpack.i.h.bf16 %v8558_v52  ;;  %v8559_v11 = vunpack.i.l.bf16 %v8558_v52  ;;  %7929 = vmatmul.mubr.msk.bf16.vlgmr.msra.gmra.mxu1 %vm12042_vm3, %v7925_v15  ;;  %v5292_v20 = vsel %vm12041_vm15, %v5154_v28, 0  ;;  %vm12823_vm3 = vnez %v12822_v13  ;;  %v12835_v15 = vld [vmem:[#allocation19_spill] sm:$0xff] }
 0x974   :  { %7930 = vmatprep.subr.msk.bf16.mxu0 %vm12041_vm15, %v5153_v34  ;;  %v8563_v7 = vpop.permute.xlu1 %8562  ;;  %5353 = vmatpush1.bf16.msra.mxu1 %v5292_v20  ;;  %vm12821_vm15 = vcmask 7168   ;;  %v5638_v52 = vpack.c.bf16 %v11316_v57, %v11316_v57 }
 0x975   :  { %v8565_v23 = vunpack.i.h.bf16 %v8563_v7  ;;  %v8564_v27 = vunpack.i.l.bf16 %v8563_v7  ;;  %5312 = vmatpush1.bf16.msra.mxu0 %v5286_v5  ;;  %v5388_v51 = vsel %vm12808_vm5, %v8560_v44, %v5385_v21  ;;  %v5395_v56 = vsel %vm12809_vm11, %v8559_v11, %v8560_v44  ;;  %5370 = vmatprep.mubr.bf16.mxu1 %v12664_v39  ;;  %vm12816_vm5 = vmmov %vm12815_vm1 }
 0x976   :  { %v5397_v0 = vsel %vm12811_vm9, %v5388_v51, 0.0  ;;  %v5387_v31 = vpop.permute.xlu0 %5386  ;;  %v5396_v30 = vsel %vm12814_vm13, %v5395_v56, 0.0  ;;  %vm12818_vm11 = vnez %v12817_v35  ;;  %vm12824_vm13 = vcmask 64512   ;;  %v12844_v51 = vld [vmem:[#allocation21_spill] sm:$0xff] }
 0x977   :  { %v5523_v12 = vsel %vm12812_vm7, %v8564_v27, %v8565_v23  ;;  %v5389_v19 = vsel %vm12815_vm1, %v5385_v21, %v5387_v31  ;;  %v5390_v53 = vsel %vm12816_vm5, %v5387_v31, %v8559_v11  ;;  %v5403_v37 = vpack.c.bf16 %v5397_v0, %v5397_v0  ;;  %vm12830_vm9 = vmmov %vm12824_vm13 }
 0x978   :  { %v5515_v36 = vpop.permute.xlu1 %5514  ;;  %v5402_v25 = vpack.c.bf16 %v5396_v30, %v5396_v30  ;;  %v5398_v4 = vsel %vm12818_vm11, %v5389_v19, 0.0  ;;  %vm12820_vm7 = vnez %v12819_v17  ;;  %vm12825_vm1 = vcmask 1043456  }
 0x979   :  { %v5399_v47 = vsel %vm12820_vm7, %v5390_v53, 0.0  ;;  %v5518_v10 = vsel %vm12821_vm15, %v5515_v36, %v8564_v27  ;;  %v5404_v33 = vpack.c.bf16 %v5398_v4, %v5398_v4  ;;  %7935 = vmatprep.subr.msk.bf16.mxu0 %vm12825_vm1, %v5403_v37  ;;  %vm12826_vm5 = vmmov %vm12825_vm1  ;;  %vm12828_vm11 = vnez %v12827_v59 }
 0x97a   :  { %v5405_v29 = vpack.c.bf16 %v5399_v47, %v5399_v47  ;;  %v5527_v43 = vsel %vm12823_vm3, %v5518_v10, 0.0  ;;  %7931 = vmatmul.mubr.msk.bf16.vlgmr.msra.gmra.mxu0 %vm12824_vm13, %v5151_v9  ;;  %v5410_v58 = vsel %vm12826_vm5, %v5402_v25, 0  ;;  %v5513_v16 = vpop.permute.xlu0 %5512  ;;  %v5524_v49 = vsel %vm12828_vm11, %v5523_v12, 0.0  ;;  %vm12829_vm7 = vmmov %vm12821_vm15  ;;  %v7939_v12 = vld [vmem:[%s11826_s12 + $0xc] sm:$0xf]  ;;  %v12851_v25 = vld [vmem:[#allocation24_spill] sm:$0xff] }
 0x97b   :  { %v5533_v14 = vpack.c.bf16 %v5527_v43, %v5527_v43  ;;  %5436 = vmatpush1.bf16.msra.mxu0 %v5410_v58  ;;  %5453 = vmatprep.mubr.bf16.mxu0 %v12664_v39  ;;  %v5516_v48 = vsel %vm12821_vm15, %v8565_v23, %v5513_v16  ;;  %v5517_v63 = vsel %vm12829_vm7, %v5513_v16, %v5515_v36  ;;  %vm12831_vm3 = vmmov %vm12825_vm1 }
 0x97c   :  { %7933 = vmatmul.mubr.msk.bf16.vlgmr.msra.gmra.mxu1 %vm12830_vm9, %v5151_v9  ;;  %7937 = vmatprep.subr.msk.bf16.mxu1 %vm12831_vm3, %v5405_v29  ;;  %vm12832_vm13 = vmmov %vm12825_vm1  ;;  %vm12834_vm1 = vnez %v12833_v24  ;;  %vm12836_vm5 = vnez %v12835_v15  ;;  %v5747_v1 = vpop.permute.xlu1 %5746  ;;  %v5530_v55 = vpack.c.bf16 %v5524_v49, %v5524_v49  ;;  %v5640_v23 = vpack.c.bf16 %v11318_v3, %v11318_v3  ;;  %v12847_v9 = vld [vmem:[#allocation22_spill] sm:$0xff]  ;;  %v12857_v29 = vld [vmem:[#allocation23_spill] sm:$0xff] }
 0x97d   :  { %v5416_v8 = vsel %vm12832_vm13, %v5404_v33, 0  ;;  %v5525_v40 = vsel %vm12834_vm1, %v5516_v48, 0.0  ;;  %v5526_v62 = vsel %vm12836_vm5, %v5517_v63, 0.0  ;;  %5494 = vmatprep.mubr.bf16.mxu1 %v12664_v39  ;;  %vm12837_vm15 = vmmov %vm12831_vm3  ;;  %vm12839_vm13 = vcmask 1039360   ;;  %v12861_v49 = vld [vmem:[#allocation26_spill] sm:$0xff] }
 0x97e   :  { %5477 = vmatpush1.bf16.msra.mxu1 %v5416_v8  ;;  %v5531_v21 = vpack.c.bf16 %v5525_v40, %v5525_v40  ;;  %v8568_v42 = vpop.permute.xlu0 %8567  ;;  %v5532_v26 = vpack.c.bf16 %v5526_v62, %v5526_v62  ;;  %vm12838_vm7 = vmmov %vm12831_vm3  ;;  %v5637_v27 = vpack.c.bf16 %v11314_v46, %v11314_v46  ;;  %v5639_v31 = vpack.c.bf16 %v11326_v41, %v11326_v41  ;;  %v7944_v8 = vld [vmem:[%s11826_s12 + $0x10] sm:$0xf] }
 0x97f   :  { %7942 = vmatprep.subr.msk.bf16.mxu1 %vm12837_vm15, %v5533_v14  ;;  %v8570_v34 = vunpack.i.h.bf16 %v8568_v42  ;;  %v5538_v28 = vsel %vm12838_vm7, %v5530_v55, 0  ;;  %v8569_v5 = vunpack.i.l.bf16 %v8568_v42  ;;  %vm12840_vm15 = vmmov %vm12831_vm3 }
 0x980   :  { %7940 = vmatprep.subr.msk.bf16.mxu0 %vm12831_vm3, %v5531_v21  ;;  %v8573_v44 = vpop.permute.xlu1 %8572  ;;  %vm12841_vm11 = vmmov %vm12830_vm9  ;;  %v5544_v20 = vsel %vm12831_vm3, %v5532_v26, 0  ;;  %v12864_v21 = vld [vmem:[#allocation25_spill] sm:$0xff] }
 0x981   :  { %v5751_v7 = vsel %vm12839_vm13, %v8570_v34, %v5747_v1  ;;  %vm12843_vm7 = vmmov %vm12831_vm3  ;;  %v8575_v53 = vunpack.i.h.bf16 %v8573_v44  ;;  %v8574_v47 = vunpack.i.l.bf16 %v8573_v44 }
 0x982   :  { %7936 = vmatmul.mubr.msk.bf16.vlgmr.msra.gmra.mxu0 %vm12830_vm9, %v7934_v54  ;;  %v5749_v11 = vpop.permute.xlu0 %5748  ;;  %vm12842_vm9 = vmmov %vm12839_vm13  ;;  %vm12845_vm13 = vnez %v12844_v51  ;;  %v5645_v36 = vsel %vm12843_vm7, %v5637_v27, 0 }
 0x983   :  { %5564 = vmatpush1.bf16.msra.mxu0 %v5538_v28  ;;  %5581 = vmatprep.mubr.bf16.mxu0 %v12664_v39  ;;  %v5758_v57 = vsel %vm12842_vm9, %v5749_v11, %v8569_v5  ;;  %v5760_v56 = vsel %vm12845_vm13, %v5751_v7, 0.0  ;;  %vm12849_vm3 = vmmov %vm12842_vm9  ;;  %vm12853_vm13 = vcmask 924672   ;;  %v12869_v28 = vld [vmem:[#allocation28_spill] sm:$0xff] }
 0x984   :  { %7945 = vmatprep.subr.msk.bf16.mxu0 %vm12840_vm15, %v5638_v52  ;;  %7938 = vmatmul.mubr.msk.bf16.vlgmr.msra.gmra.mxu1 %vm12841_vm11, %v7934_v54  ;;  %vm12846_vm11 = vmmov %vm12842_vm9  ;;  %vm12848_vm15 = vnez %v12847_v9  ;;  %v5877_v19 = vpop.permute.xlu1 %5876  ;;  %v5752_v46 = vsel %vm12849_vm3, %v5747_v1, %v5749_v11  ;;  %vm12850_vm9 = vcmask 64512   ;;  %v5766_v37 = vpack.c.bf16 %v5760_v56, %v5760_v56 }
 0x985   :  { %5605 = vmatpush1.bf16.msra.mxu1 %v5544_v20  ;;  %5622 = vmatprep.mubr.bf16.mxu1 %v12664_v39  ;;  %v5750_v3 = vsel %vm12846_vm11, %v8569_v5, %v8570_v34  ;;  %v5762_v30 = vsel %vm12848_vm15, %v5758_v57, 0.0  ;;  %vm12852_vm11 = vnez %v12851_v25  ;;  %vm12854_vm15 = vmmov %vm12843_vm7  ;;  %v12875_v20 = vld [vmem:[#allocation27_spill] sm:$0xff] }
 0x986   :  { %7947 = vmatprep.subr.msk.bf16.mxu1 %vm12843_vm7, %v5640_v23  ;;  %v5875_v0 = vpop.permute.xlu0 %5874  ;;  %v5759_v4 = vsel %vm12852_vm11, %v5750_v3, 0.0  ;;  %v5768_v41 = vpack.c.bf16 %v5762_v30, %v5762_v30  ;;  %vm12855_vm5 = vmmov %vm12850_vm9  ;;  %v7949_v3 = vld [vmem:[%s11826_s12 + $0x14] sm:$0xf] }
 0x987   :  { %v5879_v10 = vsel %vm12853_vm13, %v8575_v53, %v5875_v0  ;;  %vm12856_vm3 = vmmov %vm12843_vm7  ;;  %v5765_v16 = vpack.c.bf16 %v5759_v4, %v5759_v4 }
 0x988   :  { %v5651_v33 = vsel %vm12856_vm3, %v5639_v31, 0  ;;  %vm12859_vm7 = vmmov %vm12853_vm13  ;;  %vm12862_vm13 = vnez %v12861_v49  ;;  %v6003_v63 = vpop.permute.xlu1 %6002 }
 0x989   :  { %v5886_v14 = vsel %vm12859_vm7, %v5877_v19, %v8574_v47  ;;  %vm12860_vm11 = vmmov %vm12856_vm3  ;;  %v5888_v48 = vsel %vm12862_vm13, %v5879_v10, 0.0  ;;  %vm12870_vm13 = vnez %v12869_v28  ;;  %v12886_v10 = vld [vmem:[#allocation32_spill] sm:$0xff] }
 0x98a   :  { %7941 = vmatmul.mubr.msk.bf16.vlgmr.msra.gmra.mxu0 %vm12850_vm9, %v7939_v12  ;;  %vm12858_vm9 = vnez %v12857_v29  ;;  %v8578_v58 = vpop.permute.xlu0 %8577  ;;  %v5894_v54 = vpack.c.bf16 %v5888_v48, %v5888_v48  ;;  %v12892_v48 = vld [vmem:[#allocation31_spill] sm:$0xff] }
 0x98b   :  { %5671 = vmatpush1.bf16.msra.mxu0 %v5645_v36  ;;  %5688 = vmatprep.mubr.bf16.mxu0 %v12664_v39  ;;  %v5761_v43 = vsel %vm12858_vm9, %v5752_v46, 0.0  ;;  %v8580_v1 = vunpack.i.h.bf16 %v8578_v58  ;;  %v8579_v7 = vunpack.i.l.bf16 %v8578_v58 }
 0x98c   :  { %7950 = vmatprep.subr.msk.bf16.mxu0 %vm12854_vm15, %v5766_v37  ;;  %7943 = vmatmul.mubr.msk.bf16.vlgmr.msra.gmra.mxu1 %vm12855_vm5, %v7939_v12  ;;  %vm12863_vm5 = vmmov %vm12859_vm7  ;;  %v5767_v62 = vpack.c.bf16 %v5761_v43, %v5761_v43  ;;  %vm12865_vm15 = vnez %v12864_v21  ;;  %vm12868_vm7 = vcmask 1043456   ;;  %v8583_v57 = vpop.permute.xlu1 %8582 }
 0x98d   :  { %5712 = vmatpush1.bf16.msra.mxu1 %v5651_v33  ;;  %5729 = vmatprep.mubr.bf16.mxu1 %v12664_v39  ;;  %v5878_v40 = vsel %vm12863_vm5, %v8574_v47, %v8575_v53  ;;  %v5890_v55 = vsel %vm12865_vm15, %v5886_v14, 0.0  ;;  %vm12866_vm3 = vmmov %vm12863_vm5  ;;  %v5773_v26 = vsel %vm12868_vm7, %v5765_v16, 0  ;;  %vm12871_vm5 = vcmask 916480  }
 0x98e   :  { %7952 = vmatprep.subr.msk.bf16.mxu1 %vm12860_vm11, %v5768_v41  ;;  %v5880_v42 = vsel %vm12866_vm3, %v5875_v0, %v5877_v19  ;;  %vm12867_vm11 = vcmask 64512   ;;  %v6005_v34 = vpop.permute.xlu0 %6004  ;;  %v5887_v52 = vsel %vm12870_vm13, %v5878_v40, 0.0  ;;  %v5896_v44 = vpack.c.bf16 %v5890_v55, %v5890_v55  ;;  %vm12872_vm9 = vmmov %vm12868_vm7  ;;  %v12879_v0 = vld [vmem:[#allocation29_spill] sm:$0xff]  ;;  %v12882_v19 = vld [vmem:[#allocation30_spill] sm:$0xff] }
 0x98f   :  { %v6007_v11 = vsel %vm12871_vm5, %v8580_v1, %v6003_v63  ;;  %vm12873_vm15 = vmmov %vm12867_vm11  ;;  %v5893_v56 = vpack.c.bf16 %v5887_v52, %v5887_v52  ;;  %v8585_v36 = vunpack.i.h.bf16 %v8583_v57  ;;  %v8584_v43 = vunpack.i.l.bf16 %v8583_v57  ;;  %v7954_v55 = vld [vmem:[%s11826_s12 + $0x18] sm:$0xf] }
 0x990   :  { %vm12874_vm3 = vmmov %vm12868_vm7  ;;  %v6133_v41 = vpop.permute.xlu1 %6132 }
 0x991   :  { %v5779_v5 = vsel %vm12874_vm3, %v5767_v62, 0  ;;  %vm12877_vm7 = vmmov %vm12871_vm5  ;;  %vm12880_vm5 = vnez %v12879_v0  ;;  %v12896_v62 = vld [vmem:[#allocation34_spill] sm:$0xff] }
 0x992   :  { %7946 = vmatmul.mubr.msk.bf16.vlgmr.msra.gmra.mxu0 %vm12867_vm11, %v7944_v8  ;;  %vm12876_vm11 = vnez %v12875_v20  ;;  %v6014_v27 = vsel %vm12877_vm7, %v6005_v34, %v8579_v7  ;;  %vm12878_vm13 = vmmov %vm12874_vm3  ;;  %v6016_v12 = vsel %vm12880_vm5, %v6007_v11, 0.0  ;;  %v6131_v46 = vpop.permute.xlu0 %6130  ;;  %vm12887_vm5 = vnez %v12886_v10 }
 0x993   :  { %5799 = vmatpush1.bf16.msra.mxu0 %v5773_v26  ;;  %5816 = vmatprep.mubr.bf16.mxu0 %v12664_v39  ;;  %v5889_v23 = vsel %vm12876_vm11, %v5880_v42, 0.0  ;;  %vm12884_vm3 = vmmov %vm12877_vm7  ;;  %v5901_v4 = vsel %vm12878_vm13, %v5893_v56, 0  ;;  %v6022_v47 = vpack.c.bf16 %v6016_v12, %v6016_v12  ;;  %v12899_v26 = vld [vmem:[#allocation33_spill] sm:$0xff] }
 0x994   :  { %7955 = vmatprep.subr.msk.bf16.mxu0 %vm12872_vm9, %v5894_v54  ;;  %7948 = vmatmul.mubr.msk.bf16.vlgmr.msra.gmra.mxu1 %vm12873_vm15, %v7944_v8  ;;  %v5895_v31 = vpack.c.bf16 %v5889_v23, %v5889_v23  ;;  %vm12881_vm9 = vmmov %vm12877_vm7  ;;  %vm12883_vm15 = vnez %v12882_v19  ;;  %v6008_v37 = vsel %vm12884_vm3, %v6003_v63, %v6005_v34  ;;  %vm12885_vm7 = vcmask 64512  }
 0x995   :  { %5840 = vmatpush1.bf16.msra.mxu1 %v5779_v5  ;;  %5857 = vmatprep.mubr.bf16.mxu1 %v12664_v39  ;;  %v6006_v30 = vsel %vm12881_vm9, %v8579_v7, %v8580_v1  ;;  %v6018_v53 = vsel %vm12883_vm15, %v6014_v27, 0.0  ;;  %vm12888_vm9 = vcmask 908288   ;;  %vm12889_vm15 = vmmov %vm12878_vm13  ;;  %v12902_v7 = vld [vmem:[#allocation36_spill] sm:$0xff]  ;;  %v12907_v27 = vld [vmem:[#allocation35_spill] sm:$0xff] }
 0x996   :  { %7957 = vmatprep.subr.msk.bf16.mxu1 %vm12878_vm13, %v5896_v44  ;;  %v6015_v33 = vsel %vm12887_vm5, %v6006_v30, 0.0  ;;  %v6024_v58 = vpack.c.bf16 %v6018_v53, %v6018_v53  ;;  %v6135_v14 = vsel %vm12888_vm9, %v8585_v36, %v6131_v46  ;;  %vm12890_vm11 = vmmov %vm12885_vm7  ;;  %vm12897_vm5 = vnez %v12896_v62 }
 0x997   :  { %vm12891_vm3 = vmmov %vm12878_vm13  ;;  %v6021_v40 = vpack.c.bf16 %v6015_v33, %v6015_v33  ;;  %v6144_v1 = vsel %vm12897_vm5, %v6135_v14, 0.0  ;;  %v6136_v52 = vsel %vm12888_vm9, %v6131_v46, %v6133_v41  ;;  %v7964_v46 = vld [vmem:[%s11826_s12 + $0x20] sm:$0xf] }
 0x998   :  { %v5907_v16 = vsel %vm12891_vm3, %v5895_v31, 0  ;;  %vm12894_vm13 = vmmov %vm12888_vm9  ;;  %v6150_v44 = vpack.c.bf16 %v6144_v1, %v6144_v1 }
 0x999   :  { %v6142_v8 = vsel %vm12894_vm13, %v6133_v41, %v8584_v43  ;;  %vm12895_vm1 = vmmov %vm12891_vm3  ;;  %vm12901_vm3 = vcmask 64512   ;;  %vm12903_vm13 = vnez %v12902_v7 }
 0x99a   :  { %7951 = vmatmul.mubr.msk.bf16.vlgmr.msra.gmra.mxu0 %vm12885_vm7, %v7949_v3  ;;  %vm12893_vm7 = vnez %v12892_v48  ;;  %v6029_v11 = vsel %vm12895_vm1, %v6021_v40, 0  ;;  %vm12904_vm5 = vmmov %vm12895_vm1 }
 0x99b   :  { %5927 = vmatpush1.bf16.msra.mxu0 %v5901_v4  ;;  %5944 = vmatprep.mubr.bf16.mxu0 %v12664_v39  ;;  %v6017_v63 = vsel %vm12893_vm7, %v6008_v37, 0.0  ;;  %vm12906_vm7 = vmmov %vm12895_vm1 }
 0x99c   :  { %7960 = vmatprep.subr.msk.bf16.mxu0 %vm12889_vm15, %v6022_v47  ;;  %7953 = vmatmul.mubr.msk.bf16.vlgmr.msra.gmra.mxu1 %vm12890_vm11, %v7949_v3  ;;  %vm12898_vm11 = vmmov %vm12888_vm9  ;;  %v6023_v54 = vpack.c.bf16 %v6017_v63, %v6017_v63  ;;  %vm12900_vm15 = vnez %v12899_v26  ;;  %vm12908_vm9 = vnez %v12907_v27  ;;  %v7959_v3 = vld [vmem:[%s11826_s12 + $0x1c] sm:$0xf] }
 0x99d   :  { %5968 = vmatpush1.bf16.msra.mxu1 %v5907_v16  ;;  %5985 = vmatprep.mubr.bf16.mxu1 %v12664_v39  ;;  %v6134_v42 = vsel %vm12898_vm11, %v8584_v43, %v8585_v36  ;;  %v6146_v34 = vsel %vm12900_vm15, %v6142_v8, 0.0  ;;  %vm12905_vm11 = vmmov %vm12901_vm3  ;;  %v6145_v56 = vsel %vm12908_vm9, %v6136_v52, 0.0 }
 0x99e   :  { %7962 = vmatprep.subr.msk.bf16.mxu1 %vm12895_vm1, %v6024_v58  ;;  %v6143_v5 = vsel %vm12903_vm13, %v6134_v42, 0.0  ;;  %v6152_v23 = vpack.c.bf16 %v6146_v34, %v6146_v34  ;;  %v6035_v57 = vsel %vm12906_vm7, %v6023_v54, 0  ;;  %v6151_v31 = vpack.c.bf16 %v6145_v56, %v6145_v56 }
 0x99f   :  { %v6149_v12 = vpack.c.bf16 %v6143_v5, %v6143_v5 }
 0x9a2   :  { %7956 = vmatmul.mubr.msk.bf16.vlgmr.msra.gmra.mxu0 %vm12901_vm3, %v7954_v55  ;;  %vm12909_vm3 = vmmov %vm12895_vm1 }
 0x9a3   :  { %6055 = vmatpush1.bf16.msra.mxu0 %v6029_v11  ;;  %6072 = vmatprep.mubr.bf16.mxu0 %v12664_v39  ;;  %vm12910_vm1 = vmmov %vm12905_vm11 }
 0x9a4   :  { %7965 = vmatprep.subr.msk.bf16.mxu0 %vm12904_vm5, %v6150_v44  ;;  %7958 = vmatmul.mubr.msk.bf16.vlgmr.msra.gmra.mxu1 %vm12905_vm11, %v7954_v55  ;;  %vm12911_vm5 = vmmov %vm12909_vm3 }
 0x9a5   :  { %6096 = vmatpush1.bf16.msra.mxu1 %v6035_v57  ;;  %6113 = vmatprep.mubr.bf16.mxu1 %v12664_v39  ;;  %v6157_v30 = vsel %vm12911_vm5, %v6149_v12, 0  ;;  %vm12912_vm7 = vmmov %vm12910_vm1 }
 0x9a6   :  { %7967 = vmatprep.subr.msk.bf16.mxu1 %vm12909_vm3, %v6152_v23  ;;  %vm12913_vm11 = vmmov %vm12909_vm3 }
 0x9a7   :  { %v6163_v53 = vsel %vm12913_vm11, %v6151_v31, 0  ;;  %vm12914_vm3 = vmmov %vm12910_vm1 }
 0x9aa   :  { %7961 = vmatmul.mubr.msk.bf16.vlgmr.msra.gmra.mxu0 %vm12910_vm1, %v7959_v3 }
 0x9ab   :  { %6183 = vmatpush1.bf16.msra.mxu0 %v6157_v30  ;;  %6200 = vmatprep.mubr.bf16.mxu0 %v12664_v39 }
 0x9ac   :  { %7963 = vmatmul.mubr.msk.bf16.vlgmr.msra.gmra.mxu1 %vm12912_vm7, %v7959_v3 }
 0x9ad   :  { %6224 = vmatpush1.bf16.msra.mxu1 %v6163_v53  ;;  %6241 = vmatprep.mubr.bf16.mxu1 %v12664_v39 }
 0x9b2   :  { %7966 = vmatmul.mubr.msk.bf16.vlgmr.msra.gmra.mxu0 %vm12914_vm3, %v7964_v46 }
 0x9b3   :  { %6414 = vmatprep.mubr.bf16.mxu0 %v12664_v39 }
 0x9b4   :  { %7968 = vmatmul.mubr.msk.bf16.vlgmr.msra.gmra.mxu1 %vm12910_vm1, %v7964_v46  ;;  %vm12915_vm1 = vcmask 130048  }
 0x9b5   :  { %6455 = vmatprep.mubr.bf16.mxu1 %v12664_v39 }
 0xa32   :  { %v5234_v36 = vpop.f32.mrf.mxu0 }
 0xa33   :  { %v5275_v4 = vpop.f32.mrf.mxu1 }
 0xa34   :  { %v5236_v37 = vpop.f32.mrf.mxu0 }
 0xa35   :  { %v5277_v41 = vpop.f32.mrf.mxu1 }
 0xa36   :  { %v5238_v47 = vpop.f32.mrf.mxu0 }
 0xa37   :  { %v5279_v43 = vpop.f32.mrf.mxu1 }
 0xa38   :  { %v5239_v33 = vpop.f32.mrf.mxu0 }
 0xa39   :  { %v5280_v58 = vpop.f32.mrf.mxu1 }
 0xa3a   :  { %v5331_v14 = vpop.f32.mrf.mxu0 }
 0xa3c   :  { %v5333_v16 = vpop.f32.mrf.mxu0  ;;  %v5372_v63 = vpop.f32.mrf.mxu1 }
 0xa3d   :  { %v5334_v19 = vadd.f32 %v5333_v16, %v5236_v37 }
 0xa3e   :  { %v5335_v8 = vpop.f32.mrf.mxu0  ;;  %v5374_v40 = vpop.f32.mrf.mxu1 }
 0xa40   :  { %v5336_v1 = vpop.f32.mrf.mxu0  ;;  %v5376_v55 = vpop.f32.mrf.mxu1 }
 0xa42   :  { %v5377_v42 = vpop.f32.mrf.mxu1  ;;  %v5455_v54 = vpop.f32.mrf.mxu0 }
 0xa44   :  { %v5457_v34 = vpop.f32.mrf.mxu0  ;;  %v5496_v52 = vpop.f32.mrf.mxu1 }
 0xa45   :  { %v5504_v20 = vadd.f32 %v5457_v34, %v5334_v19 }
 0xa46   :  { %v5459_v44 = vpop.f32.mrf.mxu0  ;;  %v5498_v11 = vpop.f32.mrf.mxu1 }
 0xa48   :  { %v5460_v5 = vpop.f32.mrf.mxu0  ;;  %v5500_v23 = vpop.f32.mrf.mxu1 }
 0xa4a   :  { %v5501_v57 = vpop.f32.mrf.mxu1  ;;  %v5583_v56 = vpop.f32.mrf.mxu0 }
 0xa4c   :  { %v5585_v12 = vpop.f32.mrf.mxu0  ;;  %v5624_v3 = vpop.f32.mrf.mxu1 }
 0xa4e   :  { %v5587_v31 = vpop.f32.mrf.mxu0  ;;  %v5626_v30 = vpop.f32.mrf.mxu1 }
 0xa50   :  { %v5588_v53 = vpop.f32.mrf.mxu0  ;;  %v5628_v46 = vpop.f32.mrf.mxu1 }
 0xa52   :  { %v5629_v47 = vpop.f32.mrf.mxu1  ;;  %v5690_v33 = vpop.f32.mrf.mxu0 }
 0xa53   :  { %v5332_v47 = vadd.f32 %v5331_v14, %v5234_v36 }
 0xa54   :  { %v5692_v43 = vpop.f32.mrf.mxu0  ;;  %v5731_v58 = vpop.f32.mrf.mxu1 }
 0xa55   :  { %v5503_v28 = vadd.f32 %v5455_v54, %v5332_v47 }
 0xa56   :  { %v5694_v8 = vpop.f32.mrf.mxu0  ;;  %v5733_v1 = vpop.f32.mrf.mxu1 }
 0xa57   :  { %v5373_v8 = vadd.f32 %v5372_v63, %v5275_v4  ;;  %v5631_v21 = vadd.f32 %v5583_v56, %v5503_v28 }
 0xa58   :  { %v5695_v55 = vpop.f32.mrf.mxu0  ;;  %v5735_v42 = vpop.f32.mrf.mxu1 }
 0xa59   :  { %v5505_v49 = vadd.f32 %v5496_v52, %v5373_v8  ;;  %v5738_v29 = vadd.f32 %v5690_v33, %v5631_v21 }
 0xa5a   :  { %v5736_v44 = vpop.f32.mrf.mxu1  ;;  %v5818_v7 = vpop.f32.mrf.mxu0 }
 0xa5b   :  { %v5375_v44 = vadd.f32 %v5374_v40, %v5277_v41  ;;  %v5866_v37 = vadd.f32 %v5818_v7, %v5738_v29 }
 0xa5c   :  { %v5820_v5 = vpop.f32.mrf.mxu0  ;;  %v5859_v23 = vpop.f32.mrf.mxu1 }
 0xa5e   :  { %v5822_v57 = vpop.f32.mrf.mxu0  ;;  %v5861_v27 = vpop.f32.mrf.mxu1 }
 0xa60   :  { %v5823_v62 = vpop.f32.mrf.mxu0  ;;  %v5863_v26 = vpop.f32.mrf.mxu1 }
 0xa61   :  { %v5506_v62 = vadd.f32 %v5498_v11, %v5375_v44  ;;  %v5632_v26 = vadd.f32 %v5585_v12, %v5504_v20 }
 0xa62   :  { %v5864_v31 = vpop.f32.mrf.mxu1  ;;  %v5946_v10 = vpop.f32.mrf.mxu0 }
 0xa63   :  { %v5633_v31 = vadd.f32 %v5624_v3, %v5505_v49  ;;  %v5634_v36 = vadd.f32 %v5626_v30, %v5506_v62  ;;  %v5994_v19 = vadd.f32 %v5946_v10, %v5866_v37 }
 0xa64   :  { %v5948_v53 = vpop.f32.mrf.mxu0  ;;  %v5987_v46 = vpop.f32.mrf.mxu1 }
 0xa65   :  { %v5740_v14 = vadd.f32 %v5731_v58, %v5633_v31  ;;  %v5741_v63 = vadd.f32 %v5733_v1, %v5634_v36 }
 0xa66   :  { %v5950_v48 = vpop.f32.mrf.mxu0  ;;  %v5989_v0 = vpop.f32.mrf.mxu1 }
 0xa67   :  { %v5739_v48 = vadd.f32 %v5692_v43, %v5632_v26  ;;  %v5868_v41 = vadd.f32 %v5859_v23, %v5740_v14  ;;  %v5869_v34 = vadd.f32 %v5861_v27, %v5741_v63 }
 0xa68   :  { %v5951_v55 = vpop.f32.mrf.mxu0  ;;  %v5991_v42 = vpop.f32.mrf.mxu1 }
 0xa69   :  { %v5867_v54 = vadd.f32 %v5820_v5, %v5739_v48  ;;  %v5996_v11 = vadd.f32 %v5987_v46, %v5868_v41  ;;  %v5997_v56 = vadd.f32 %v5989_v0, %v5869_v34 }
 0xa6a   :  { %v5992_v57 = vpop.f32.mrf.mxu1  ;;  %v6074_v25 = vpop.f32.mrf.mxu0 }
 0xa6b   :  { %v5995_v52 = vadd.f32 %v5948_v53, %v5867_v54  ;;  %v6122_v20 = vadd.f32 %v6074_v25, %v5994_v19  ;;  %v6277_v54 = vld [vmem:[%s11828_s14] sm:$0xff] }
 0xa6c   :  { %v6076_v51 = vpop.f32.mrf.mxu0  ;;  %v6115_v9 = vpop.f32.mrf.mxu1 }
 0xa6d   :  { %v6123_v12 = vadd.f32 %v6076_v51, %v5995_v52  ;;  %v6124_v3 = vadd.f32 %v6115_v9, %v5996_v11 }
 0xa6e   :  { %v6078_v4 = vpop.f32.mrf.mxu0  ;;  %v6117_v16 = vpop.f32.mrf.mxu1 }
 0xa6f   :  { %v6125_v7 = vadd.f32 %v6117_v16, %v5997_v56  ;;  %v6273_v4 = vld [vmem:[%s11827_s13] sm:$0xff] }
 0xa70   :  { %v6079_v40 = vpop.f32.mrf.mxu0  ;;  %v6119_v28 = vpop.f32.mrf.mxu1 }
 0xa72   :  { %v6120_v49 = vpop.f32.mrf.mxu1  ;;  %v6202_v21 = vpop.f32.mrf.mxu0 }
 0xa73   :  { %v6250_v30 = vadd.f32 %v6202_v21, %v6122_v20 }
 0xa74   :  { %v6204_v33 = vpop.f32.mrf.mxu0  ;;  %v6243_v29 = vpop.f32.mrf.mxu1 }
 0xa75   :  { %v6251_v43 = vadd.f32 %v6204_v33, %v6123_v12  ;;  %v6252_v58 = vadd.f32 %v6243_v29, %v6124_v3  ;;  %v6259_v10 = vmul.f32 %v6250_v30, %v6250_v30 }
 0xa76   :  { %v6206_v1 = vpop.f32.mrf.mxu0  ;;  %v6245_v5 = vpop.f32.mrf.mxu1 }
 0xa77   :  { %v6254_v23 = vadd.f32 %v6251_v43, %v6250_v30  ;;  %v6260_v47 = vmul.f32 %v6251_v43, %v6251_v43  ;;  %v6253_v27 = vadd.f32 %v6245_v5, %v6125_v7  ;;  %v6261_v55 = vmul.f32 %v6252_v58, %v6252_v58 }
 0xa78   :  { %v6207_v53 = vpop.f32.mrf.mxu0  ;;  %v6247_v46 = vpop.f32.mrf.mxu1 }
 0xa79   :  { %v6263_v25 = vadd.f32 %v6260_v47, %v6259_v10  ;;  %v6255_v8 = vadd.f32 %v6254_v23, %v6252_v58  ;;  %v6262_v51 = vmul.f32 %v6253_v27, %v6253_v27 }
 0xa7a   :  { %v6248_v0 = vpop.f32.mrf.mxu1 }
 0xa7b   :  { %v6256_v9 = vadd.f32 %v6255_v8, %v6253_v27  ;;  %v6264_v42 = vadd.f32 %v6263_v25, %v6261_v55 }
 0xa7d   :  { %6257 = vadd.xlane.f32.xlu0 %v6256_v9  ;;  %v6265_v44 = vadd.f32 %v6264_v42, %v6262_v51 }
 0xa7f   :  { %6266 = vadd.xlane.f32.xlu1 %v6265_v44 }
 0xb06   :  { %v6258_v57 = vpop.xlane.xlu0 %6257 }
 0xb07   :  { %v6268_v62 = vmul.f32 0.001953125, %v6258_v57 }
 0xb08   :  { %v6267_v26 = vpop.xlane.xlu1 %6266 }
 0xb09   :  { %v6270_v31 = vmul.f32 %v6268_v62, %v6268_v62  ;;  %v6269_v36 = vmul.f32 0.001953125, %v6267_v26 }
 0xb0b   :  { %v6271_v48 = vsub.f32 %v6269_v36, %v6270_v31 }
 0xb0d   :  { %v6272_v14 = vmax.f32 %v6271_v48, 0.0 }
 0xb0f   :  { %v6274_v37 = vadd.f32 1e-05, %v6272_v14 }
 0xb11   :  { %8708 = vrsqrt.f32 %v6274_v37 }
 0xb1e   :  { %v8709_v16 = vpop.eup %8708 }
 0xb1f   :  { %v6276_v63 = vmul.f32 %v8709_v16, %v6273_v4 }
 0xb21   :  { %6282 = vperm.xlu0 %8065, %v6276_v63   ;;  %v6278_v41 = vmul.f32 %v6276_v63, %v6268_v62 }
 0xb23   :  { %v6279_v19 = vsub.f32 %v6277_v54, %v6278_v41 }
 0xb25   :  { %6291 = vperm.xlu1 %8064, %v6279_v19  }
 0xb9c   :  { %v6283_v40 = vpop.permute.xlu0 %6282 }
 0xb9d   :  { %v6285_v28 = vmul.f32 %v6283_v40, %v6250_v30  ;;  %v6286_v34 = vmul.f32 %v6283_v40, %v6251_v43  ;;  %v6287_v52 = vmul.f32 %v6283_v40, %v6252_v58  ;;  %v6288_v11 = vmul.f32 %v6283_v40, %v6253_v27  ;;  %v7436_v27 = vld [vmem:[%s11830_s16] sm:$0xff] }
 0xba0   :  { %v6292_v20 = vpop.permute.xlu1 %6291 }
 0xba1   :  { %v6294_v49 = vadd.f32 %v6292_v20, %v6285_v28  ;;  %v6295_v21 = vadd.f32 %v6292_v20, %v6286_v34  ;;  %v6296_v56 = vadd.f32 %v6292_v20, %v6287_v52  ;;  %v6297_v12 = vadd.f32 %v6292_v20, %v6288_v11 }
 0xba3   :  { %vm6298_vm5 = vcmp.ge.f32.partialorder %v6294_v49, 0.0  ;;  %vm6299_vm7 = vcmp.ge.f32.partialorder %v6295_v21, 0.0  ;;  %vm6300_vm11 = vcmp.ge.f32.partialorder %v6296_v56, 0.0  ;;  %vm6301_vm3 = vcmp.ge.f32.partialorder %v6297_v12, 0.0 }
 0xba4   :  { %v6302_v3 = vmul.f32 0.2, %v6294_v49  ;;  %v6303_v33 = vmul.f32 0.2, %v6295_v21  ;;  %v6304_v29 = vmul.f32 0.2, %v6296_v56 }
 0xba5   :  { %v6305_v7 = vmul.f32 0.2, %v6297_v12 }
 0xba6   :  { %v11575_v1 = vsel %vm6298_vm5, %v6294_v49, %v6302_v3  ;;  %v11577_v5 = vsel %vm6299_vm7, %v6295_v21, %v6303_v33  ;;  %v11579_v30 = vsel %vm6300_vm11, %v6296_v56, %v6304_v29  ;;  %vm12916_vm5 = vmmov %vm12915_vm1 }
 0xba7   :  { %v11581_v43 = vsel %vm6301_vm3, %v6297_v12, %v6305_v7  ;;  %v8591_v58 = vpack.i.bf16 %v11579_v30, %v11577_v5  ;;  %v8626_v47 = vpack.i.bf16 %v11577_v5, %v11575_v1  ;;  %vm12917_vm7 = vmmov %vm12915_vm1  ;;  %vm12919_vm3 = vcmask 138240   ;;  %v7969_v12 = vld [vmem:[%s11829_s15 + $0x4] sm:$0xf] }
 0xba8   :  { %v8586_v10 = vpack.i.bf16 %v11575_v1, %v11581_v43  ;;  %v8631_v23 = vpack.i.bf16 %v11581_v43, %v11579_v30  ;;  %vm12918_vm11 = vmmov %vm12915_vm1 }
 0xba9   :  { %8592 = vrot.lane.b32.xlu1 %v8591_v58, %s8732_s2 }
 0xbaa   :  { %8587 = vrot.lane.b32.xlu0 %v8586_v10, %s8732_s2 }
 0xbad   :  { %8602 = vrot.lane.b32.xlu1 %v8591_v58, %s8734_s18 }
 0xbae   :  { %8597 = vrot.lane.b32.xlu0 %v8586_v10, %s8734_s18 }
 0xbb1   :  { %8612 = vrot.lane.b32.xlu1 %v8591_v58, %s8735_s19 }
 0xbb2   :  { %8607 = vrot.lane.b32.xlu0 %v8586_v10, %s8735_s19 }
 0xbb5   :  { %8622 = vrot.lane.b32.xlu1 %v8591_v58, %s8736_s1 }
 0xbb6   :  { %8617 = vrot.lane.b32.xlu0 %v8586_v10, %s8736_s1 }
 0xbb9   :  { %8632 = vrot.lane.b32.xlu1 %v8631_v23, %s8737_s20 }
 0xbba   :  { %8627 = vrot.lane.b32.xlu0 %v8626_v47, %s8737_s20 }
 0xbbd   :  { %8642 = vrot.lane.b32.xlu1 %v8631_v23, %s8738_s21 }
 0xbbe   :  { %8637 = vrot.lane.b32.xlu0 %v8626_v47, %s8738_s21 }
 0xbc1   :  { %8652 = vrot.lane.b32.xlu1 %v8631_v23, %s8739_s22 }
 0xbc2   :  { %8647 = vrot.lane.b32.xlu0 %v8626_v47, %s8739_s22 }
 0xbc5   :  { %8662 = vrot.lane.b32.xlu1 %v8631_v23, %s8740_s23 }
 0xbc6   :  { %8657 = vrot.lane.b32.xlu0 %v8626_v47, %s8740_s23 }
 0xbca   :  { %7439 = vperm.xlu0 %8065, %v7436_v27  }
 0xc1b   :  { %v8593_v53 = vpop.permute.xlu1 %8592 }
 0xc1c   :  { %v8595_v46 = vunpack.i.h.bf16 %v8593_v53  ;;  %v8594_v25 = vunpack.i.l.bf16 %v8593_v53  ;;  %v8588_v8 = vpop.permute.xlu0 %8587 }
 0xc1d   :  { %v8590_v55 = vunpack.i.h.bf16 %v8588_v8  ;;  %v8589_v0 = vunpack.i.l.bf16 %v8588_v8 }
 0xc1e   :  { %v6350_v51 = vsel %vm12915_vm1, %v8594_v25, %v8595_v46  ;;  %vm12921_vm1 = vmmov %vm12919_vm3 }
 0xc1f   :  { %v6349_v9 = vsel %vm12916_vm5, %v8590_v55, %v8594_v25  ;;  %v6351_v42 = vsel %vm12917_vm7, %v8595_v46, %v8589_v0  ;;  %v6356_v44 = vsel %vm12918_vm11, %v8589_v0, %v8590_v55  ;;  %v8603_v57 = vpop.permute.xlu1 %8602  ;;  %v6359_v62 = vsel %vm12794_vm6, %v6350_v51, 0.0  ;;  %vm12920_vm6 = vmmov %vm12919_vm3 }
 0xc20   :  { %v6358_v26 = vsel %vm12787_vm8, %v6349_v9, 0.0  ;;  %v6360_v31 = vsel %vm12796_vm12, %v6351_v42, 0.0  ;;  %v8605_v36 = vunpack.i.h.bf16 %v8603_v57  ;;  %v8604_v48 = vunpack.i.l.bf16 %v8603_v57  ;;  %v8598_v14 = vpop.permute.xlu0 %8597  ;;  %vm12922_vm8 = vmmov %vm12921_vm1 }
 0xc21   :  { %v8600_v37 = vunpack.i.h.bf16 %v8598_v14  ;;  %v8599_v4 = vunpack.i.l.bf16 %v8598_v14  ;;  %v6364_v16 = vpack.c.bf16 %v6358_v26, %v6358_v26  ;;  %v6366_v63 = vpack.c.bf16 %v6360_v31, %v6360_v31  ;;  %v6335_v31 = vld [vmem:[%s11829_s15] sm:$0xf] }
 0xc22   :  { %v6324_v54 = vsel %vm12919_vm3, %v8604_v48, %v8605_v36  ;;  %v6357_v41 = vsel %vm12790_vm2, %v6356_v44, 0.0  ;;  %v6365_v61 = vpack.c.bf16 %v6359_v62, %v6359_v62  ;;  %vm12923_vm12 = vcmask 1043456  }
 0xc23   :  { %v6323_v19 = vsel %vm12920_vm6, %v8600_v37, %v8604_v48  ;;  %v6325_v50 = vsel %vm12921_vm1, %v8605_v36, %v8599_v4  ;;  %v6330_v38 = vsel %vm12922_vm8, %v8599_v4, %v8600_v37  ;;  %7970 = vmatprep.subr.msk.bf16.mxu0 %vm12923_vm12, %v6364_v16  ;;  %vm12924_vm5 = vmmov %vm12923_vm12  ;;  %v8613_v40 = vpop.permute.xlu1 %8612  ;;  %v6363_v21 = vpack.c.bf16 %v6357_v41, %v6357_v41 }
 0xc24   :  { %7972 = vmatprep.subr.msk.bf16.mxu1 %vm12924_vm5, %v6366_v63  ;;  %v6332_v28 = vsel %vm12805_vm0, %v6323_v19, 0.0  ;;  %v6334_v34 = vsel %vm12801_vm4, %v6325_v50, 0.0  ;;  %v8615_v60 = vunpack.i.h.bf16 %v8613_v40  ;;  %v8614_v52 = vunpack.i.l.bf16 %v8613_v40  ;;  %v8608_v11 = vpop.permute.xlu0 %8607  ;;  %vm12925_vm2 = vmmov %vm12924_vm5 }
 0xc25   :  { %v8610_v20 = vunpack.i.h.bf16 %v8608_v11  ;;  %v8609_v49 = vunpack.i.l.bf16 %v8608_v11  ;;  %v6377_v56 = vsel %vm12925_vm2, %v6365_v61, 0  ;;  %v6337_v3 = vpack.c.bf16 %v6332_v28, %v6332_v28  ;;  %vm12929_vm11 = vmmov %vm12925_vm2  ;;  %v7978_v61 = vld [vmem:[%s11829_s15 + $0x8] sm:$0xf] }
 0xc26   :  { %6438 = vmatpush1.bf16.msra.mxu1 %v6377_v56  ;;  %v6339_v33 = vpack.c.bf16 %v6334_v34, %v6334_v34  ;;  %v6331_v6 = vsel %vm12799_vm10, %v6330_v38, 0.0  ;;  %v6333_v45 = vsel %vm12807_vm14, %v6324_v54, 0.0  ;;  %vm12926_vm4 = vcmask 121856   ;;  %vm12932_vm10 = vmmov %vm12925_vm2  ;;  %v12963_v56 = vld [vmem:[#allocation22_spill] sm:$0xff] }
 0xc27   :  { %v6570_v29 = vsel %vm12926_vm4, %v8610_v20, %v8614_v52  ;;  %vm12927_vm0 = vmmov %vm12926_vm4  ;;  %v6371_v10 = vsel %vm12929_vm11, %v6363_v21, 0  ;;  %v8623_v23 = vpop.permute.xlu1 %8622  ;;  %vm12930_vm3 = vnez %v12810_v22  ;;  %vm12931_vm6 = vnez %v12819_v17 }
 0xc28   :  { %v6572_v7 = vsel %vm12927_vm0, %v8615_v60, %v8609_v49  ;;  %vm12928_vm7 = vmmov %vm12927_vm0  ;;  %v6579_v47 = vsel %vm12930_vm3, %v6570_v29, 0.0  ;;  %6397 = vmatpush1.bf16.msra.mxu0 %v6371_v10  ;;  %7976 = vmatprep.subr.msk.bf16.mxu1 %vm12932_vm10, %v6339_v33  ;;  %v8625_v32 = vunpack.i.h.bf16 %v8623_v23  ;;  %v8624_v18 = vunpack.i.l.bf16 %v8623_v23  ;;  %v8618_v53 = vpop.permute.xlu0 %8617 }
 0xc29   :  { %v6577_v58 = vsel %vm12928_vm7, %v8609_v49, %v8610_v20  ;;  %v6581_v27 = vsel %vm12931_vm6, %v6572_v7, 0.0  ;;  %vm12933_vm14 = vcmask 64512   ;;  %vm12934_vm1 = vmmov %vm12925_vm2  ;;  %v8620_v46 = vunpack.i.h.bf16 %v8618_v53 }
 0xc2a   :  { %7973 = vmatmul.mubr.msk.bf16.vlgmr.msra.gmra.mxu1 %vm12933_vm14, %v7969_v12  ;;  %7974 = vmatprep.subr.msk.bf16.mxu0 %vm12934_vm1, %v6337_v3  ;;  %v8619_v25 = vunpack.i.l.bf16 %v8618_v53  ;;  %v6336_v8 = vpack.c.bf16 %v6331_v6, %v6331_v6  ;;  %v6338_v55 = vpack.c.bf16 %v6333_v45, %v6333_v45  ;;  %v6585_v0 = vpack.c.bf16 %v6579_v47, %v6579_v47  ;;  %vm12935_vm8 = vmmov %vm12927_vm0  ;;  %v12966_v45 = vld [vmem:[#allocation21_spill] sm:$0xff] }
 0xc2b   :  { %v6587_v22 = vpack.c.bf16 %v6581_v27, %v6581_v27  ;;  %6552 = vmatprep.mubr.bf16.mxu1 %v12664_v39  ;;  %v6571_v17 = vsel %vm12935_vm8, %v8614_v52, %v8615_v60  ;;  %vm12936_vm12 = vmmov %vm12933_vm14  ;;  %vm12937_vm5 = vcmask 7168   ;;  %vm12941_vm7 = vnez %v12813_v2  ;;  %v8633_v63 = vpop.permute.xlu1 %8632  ;;  %v12971_v27 = vld [vmem:[#allocation23_spill] sm:$0xff] }
 0xc2c   :  { %7971 = vmatmul.mubr.msk.bf16.vlgmr.msra.gmra.mxu0 %vm12936_vm12, %v7969_v12  ;;  %v6698_v51 = vsel %vm12937_vm5, %v8620_v46, %v8624_v18  ;;  %vm12938_vm2 = vmmov %vm12937_vm5  ;;  %v6578_v57 = vsel %vm12941_vm7, %v6577_v58, 0.0  ;;  %vm12942_vm11 = vnez %v12822_v13  ;;  %vm12944_vm6 = vnez %v12833_v24  ;;  %v8628_v54 = vpop.permute.xlu0 %8627 }
 0xc2d   :  { %v6700_v9 = vsel %vm12938_vm2, %v8625_v32, %v8619_v25  ;;  %vm12939_vm4 = vmmov %vm12934_vm1  ;;  %6511 = vmatprep.mubr.bf16.mxu0 %v12664_v39  ;;  %v6707_v26 = vsel %vm12944_vm6, %v6698_v51, 0.0  ;;  %vm12946_vm14 = vnez %v12817_v35  ;;  %v6584_v2 = vpack.c.bf16 %v6578_v57, %v6578_v57 }
 0xc2e   :  { %v6468_v42 = vsel %vm12939_vm4, %v6336_v8, 0  ;;  %vm12940_vm0 = vmmov %vm12934_vm1  ;;  %v6709_v62 = vsel %vm12942_vm11, %v6700_v9, 0.0  ;;  %v6580_v36 = vsel %vm12946_vm14, %v6571_v17, 0.0  ;;  %v6713_v24 = vpack.c.bf16 %v6707_v26, %v6707_v26  ;;  %v12976_v8 = vld [vmem:[#allocation24_spill] sm:$0xff]  ;;  %v12980_v17 = vld [vmem:[#allocation25_spill] sm:$0xff] }
 0xc2f   :  { %6494 = vmatpush1.bf16.msra.mxu0 %v6468_v42  ;;  %v6474_v44 = vsel %vm12940_vm0, %v6338_v55, 0  ;;  %vm12943_vm3 = vmmov %vm12940_vm0  ;;  %v6586_v13 = vpack.c.bf16 %v6580_v36, %v6580_v36  ;;  %v6715_v14 = vpack.c.bf16 %v6709_v62, %v6709_v62  ;;  %vm12954_vm11 = vnez %v12827_v59  ;;  %v8643_v20 = vpop.permute.xlu1 %8642  ;;  %v7988_v9 = vld [vmem:[%s11829_s15 + $0x10] sm:$0xf]  ;;  %v12983_v26 = vld [vmem:[#allocation26_spill] sm:$0xff] }
 0xc30   :  { %6535 = vmatpush1.bf16.msra.mxu1 %v6474_v44  ;;  %7979 = vmatprep.subr.msk.bf16.mxu0 %vm12943_vm3, %v6585_v0  ;;  %vm12945_vm10 = vmmov %vm12940_vm0  ;;  %v8635_v50 = vunpack.i.h.bf16 %v8633_v63  ;;  %v8634_v40 = vunpack.i.l.bf16 %v8633_v63  ;;  %v8630_v28 = vunpack.i.h.bf16 %v8628_v54  ;;  %v6822_v59 = vpack.c.bf16 %v11581_v43, %v11581_v43  ;;  %v8638_v49 = vpop.permute.xlu0 %8637 }
 0xc31   :  { %7981 = vmatprep.subr.msk.bf16.mxu1 %vm12945_vm10, %v6587_v22  ;;  %vm12947_vm1 = vmmov %vm12938_vm2  ;;  %vm12957_vm14 = vcmask 1039360   ;;  %v6820_v11 = vpack.c.bf16 %v11577_v5, %v11577_v5  ;;  %v6821_v21 = vpack.c.bf16 %v11579_v30, %v11579_v30  ;;  %v7983_v5 = vld [vmem:[%s11829_s15 + $0xc] sm:$0xf]  ;;  %v8645_v33 = vunpack.i.h.bf16 %v8643_v20 }
 0xc32   :  { %v6699_v48 = vsel %vm12947_vm1, %v8624_v18, %v8625_v32  ;;  %vm12948_vm8 = vmmov %vm12947_vm1  ;;  %v8639_v6 = vunpack.i.l.bf16 %v8638_v49  ;;  %v6819_v30 = vpack.c.bf16 %v11575_v1, %v11575_v1  ;;  %v8644_v10 = vunpack.i.l.bf16 %v8643_v20 }
 0xc33   :  { %v6705_v37 = vsel %vm12948_vm8, %v8619_v25, %v8620_v46  ;;  %7977 = vmatmul.mubr.msk.bf16.vlgmr.msra.gmra.mxu1 %vm12936_vm12, %v6335_v31  ;;  %vm12949_vm5 = vmmov %vm12940_vm0  ;;  %v8640_v23 = vunpack.i.h.bf16 %v8638_v49  ;;  %v8653_v46 = vpop.permute.xlu1 %8652 }
 0xc34   :  { %v6598_v4 = vsel %vm12949_vm5, %v6586_v13, 0  ;;  %6676 = vmatprep.mubr.bf16.mxu1 %v12664_v39  ;;  %vm12950_vm2 = vmmov %vm12936_vm12  ;;  %v6706_v41 = vsel %vm12954_vm11, %v6705_v37, 0.0  ;;  %v8648_v25 = vpop.permute.xlu0 %8647  ;;  %v8655_v44 = vunpack.i.h.bf16 %v8653_v46  ;;  %v12988_v37 = vld [vmem:[#allocation27_spill] sm:$0xff] }
 0xc35   :  { %7975 = vmatmul.mubr.msk.bf16.vlgmr.msra.gmra.mxu0 %vm12950_vm2, %v6335_v31  ;;  %vm12951_vm4 = vmmov %vm12940_vm0  ;;  %6659 = vmatpush1.bf16.msra.mxu1 %v6598_v4  ;;  %vm12952_vm0 = vnez %v12835_v15  ;;  %v8629_v15 = vunpack.i.l.bf16 %v8628_v54  ;;  %v6712_v38 = vpack.c.bf16 %v6706_v41, %v6706_v41  ;;  %v8649_v57 = vunpack.i.l.bf16 %v8648_v25  ;;  %v12994_v41 = vld [vmem:[#allocation28_spill] sm:$0xff] }
 0xc36   :  { %v6592_v16 = vsel %vm12951_vm4, %v6584_v2, 0  ;;  %v6708_v35 = vsel %vm12952_vm0, %v6699_v48, 0.0  ;;  %vm12953_vm7 = vmmov %vm12943_vm3  ;;  %6635 = vmatprep.mubr.bf16.mxu0 %v12664_v39  ;;  %vm12964_vm4 = vnez %v12963_v56  ;;  %v8654_v2 = vunpack.i.l.bf16 %v8653_v46 }
 0xc37   :  { %6618 = vmatpush1.bf16.msra.mxu0 %v6592_v16  ;;  %7986 = vmatprep.subr.msk.bf16.mxu1 %vm12953_vm7, %v6715_v14  ;;  %v6714_v19 = vpack.c.bf16 %v6708_v35, %v6708_v35  ;;  %vm12955_vm6 = vmmov %vm12950_vm2  ;;  %v6940_v60 = vsel %vm12957_vm14, %v8635_v50, %v8629_v15  ;;  %vm12967_vm7 = vnez %v12966_v45  ;;  %v8650_v48 = vunpack.i.h.bf16 %v8648_v25  ;;  %v8663_v63 = vpop.permute.xlu1 %8662 }
 0xc38   :  { %7984 = vmatprep.subr.msk.bf16.mxu0 %vm12943_vm3, %v6713_v24  ;;  %vm12956_vm10 = vmmov %vm12943_vm3  ;;  %v6944_v12 = vsel %vm12964_vm4, %v6940_v60, 0.0  ;;  %v8658_v54 = vpop.permute.xlu0 %8657  ;;  %v8664_v49 = vunpack.i.l.bf16 %v8663_v63 }
 0xc39   :  { %v6726_v34 = vsel %vm12956_vm10, %v6714_v19, 0  ;;  %vm12958_vm1 = vmmov %vm12950_vm2  ;;  %v6950_v47 = vpack.c.bf16 %v6944_v12, %v6944_v12  ;;  %vm12972_vm10 = vnez %v12971_v27  ;;  %v13006_v12 = vld [vmem:[#allocation31_spill] sm:$0xff] }
 0xc3a   :  { %vm12959_vm8 = vmmov %vm12943_vm3 }
 0xc3b   :  { %7982 = vmatmul.mubr.msk.bf16.vlgmr.msra.gmra.mxu1 %vm12955_vm6, %v7978_v61  ;;  %v6720_v52 = vsel %vm12959_vm8, %v6712_v38, 0  ;;  %vm12960_vm12 = vmmov %vm12943_vm3 }
 0xc3c   :  { %6787 = vmatpush1.bf16.msra.mxu1 %v6726_v34  ;;  %6804 = vmatprep.mubr.bf16.mxu1 %v12664_v39  ;;  %vm12961_vm5 = vmmov %vm12957_vm14  ;;  %vm12973_vm14 = vcmask 924672   ;;  %v8665_v34 = vunpack.i.h.bf16 %v8663_v63 }
 0xc3d   :  { %7980 = vmatmul.mubr.msk.bf16.vlgmr.msra.gmra.mxu0 %vm12958_vm1, %v7978_v61  ;;  %7991 = vmatprep.subr.msk.bf16.mxu1 %vm12960_vm12, %v6822_v59  ;;  %v6933_v43 = vsel %vm12961_vm5, %v8630_v28, %v8634_v40  ;;  %vm12962_vm2 = vmmov %vm12943_vm3  ;;  %v7068_v1 = vsel %vm12973_vm14, %v8645_v33, %v8639_v6  ;;  %v8659_v59 = vunpack.i.l.bf16 %v8658_v54 }
 0xc3e   :  { %6746 = vmatpush1.bf16.msra.mxu0 %v6720_v52  ;;  %6763 = vmatprep.mubr.bf16.mxu0 %v12664_v39  ;;  %vm12965_vm0 = vmmov %vm12961_vm5  ;;  %v6942_v29 = vsel %vm12967_vm7, %v6933_v43, 0.0  ;;  %vm12977_vm5 = vnez %v12976_v8  ;;  %v13001_v52 = vld [vmem:[#allocation29_spill] sm:$0xff] }
 0xc3f   :  { %7989 = vmatprep.subr.msk.bf16.mxu0 %vm12962_vm2, %v6820_v11  ;;  %v6934_v3 = vsel %vm12965_vm0, %v8634_v40, %v8635_v50  ;;  %vm12968_vm11 = vmmov %vm12962_vm2  ;;  %v6948_v53 = vpack.c.bf16 %v6942_v29, %v6942_v29  ;;  %v7993_v40 = vld [vmem:[%s11829_s15 + $0x14] sm:$0xf] }
 0xc40   :  { %v6833_v7 = vsel %vm12968_vm11, %v6821_v21, 0  ;;  %vm12969_vm3 = vmmov %vm12965_vm0  ;;  %v6943_v32 = vsel %vm12972_vm10, %v6934_v3, 0.0  ;;  %vm12981_vm0 = vnez %v12980_v17  ;;  %vm12984_vm11 = vnez %v12983_v26 }
 0xc41   :  { %v6932_v58 = vsel %vm12969_vm3, %v8629_v15, %v8630_v28  ;;  %vm12970_vm6 = vmmov %vm12958_vm1  ;;  %v6949_v22 = vpack.c.bf16 %v6943_v32, %v6943_v32  ;;  %v7072_v51 = vsel %vm12981_vm0, %v7068_v1, 0.0  ;;  %v12998_v15 = vld [vmem:[#allocation30_spill] sm:$0xff]  ;;  %v8660_v21 = vunpack.i.h.bf16 %v8658_v54 }
 0xc42   :  { %vm12974_vm8 = vmmov %vm12962_vm2  ;;  %v6941_v55 = vsel %vm12977_vm5, %v6932_v58, 0.0  ;;  %v7078_v14 = vpack.c.bf16 %v7072_v51, %v7072_v51  ;;  %v13018_v32 = vld [vmem:[#allocation34_spill] sm:$0xff] }
 0xc43   :  { %7987 = vmatmul.mubr.msk.bf16.vlgmr.msra.gmra.mxu1 %vm12970_vm6, %v7983_v5  ;;  %v6827_v18 = vsel %vm12974_vm8, %v6819_v30, 0  ;;  %vm12975_vm12 = vmmov %vm12962_vm2  ;;  %v6947_v62 = vpack.c.bf16 %v6941_v55, %v6941_v55  ;;  %v13012_v30 = vld [vmem:[#allocation32_spill] sm:$0xff] }
 0xc44   :  { %6894 = vmatpush1.bf16.msra.mxu1 %v6833_v7  ;;  %6911 = vmatprep.mubr.bf16.mxu1 %v12664_v39  ;;  %vm12978_vm2 = vmmov %vm12973_vm14  ;;  %vm12989_vm14 = vnez %v12988_v37 }
 0xc45   :  { %7985 = vmatmul.mubr.msk.bf16.vlgmr.msra.gmra.mxu0 %vm12958_vm1, %v7983_v5  ;;  %7996 = vmatprep.subr.msk.bf16.mxu1 %vm12975_vm12, %v6950_v47  ;;  %v7061_v0 = vsel %vm12978_vm2, %v8640_v23, %v8644_v10  ;;  %vm12979_vm4 = vmmov %vm12974_vm8 }
 0xc46   :  { %6853 = vmatpush1.bf16.msra.mxu0 %v6827_v18  ;;  %6870 = vmatprep.mubr.bf16.mxu0 %v12664_v39  ;;  %vm12982_vm7 = vmmov %vm12978_vm2  ;;  %v7070_v31 = vsel %vm12984_vm11, %v7061_v0, 0.0 }
 0xc47   :  { %7994 = vmatprep.subr.msk.bf16.mxu0 %vm12979_vm4, %v6948_v53  ;;  %v7062_v42 = vsel %vm12982_vm7, %v8644_v10, %v8645_v33  ;;  %vm12985_vm3 = vmmov %vm12978_vm2  ;;  %v7076_v35 = vpack.c.bf16 %v7070_v31, %v7070_v31  ;;  %vm12995_vm2 = vnez %v12994_v41  ;;  %vm12999_vm7 = vnez %v12998_v15 }
 0xc48   :  { %v7060_v36 = vsel %vm12985_vm3, %v8639_v6, %v8640_v23  ;;  %vm12986_vm6 = vmmov %vm12958_vm1  ;;  %v7071_v24 = vsel %vm12989_vm14, %v7062_v42, 0.0  ;;  %vm12990_vm1 = vcmask 916480   ;;  %vm13002_vm3 = vnez %v13001_v52  ;;  %v7998_v23 = vld [vmem:[%s11829_s15 + $0x18] sm:$0xf] }
 0xc49   :  { %vm12987_vm10 = vmmov %vm12979_vm4  ;;  %v7196_v4 = vsel %vm12990_vm1, %v8655_v44, %v8649_v57  ;;  %v7069_v61 = vsel %vm12995_vm2, %v7060_v36, 0.0  ;;  %v7077_v50 = vpack.c.bf16 %v7071_v24, %v7071_v24 }
 0xc4a   :  { %v6961_v13 = vsel %vm12987_vm10, %v6949_v22, 0  ;;  %vm12991_vm8 = vmmov %vm12986_vm6  ;;  %v7200_v38 = vsel %vm12999_vm7, %v7196_v4, 0.0  ;;  %v7075_v60 = vpack.c.bf16 %v7069_v61, %v7069_v61 }
 0xc4b   :  { %7992 = vmatmul.mubr.msk.bf16.vlgmr.msra.gmra.mxu1 %vm12986_vm6, %v7988_v9  ;;  %vm12992_vm12 = vmmov %vm12979_vm4  ;;  %v7206_v56 = vpack.c.bf16 %v7200_v38, %v7200_v38 }
 0xc4c   :  { %7022 = vmatpush1.bf16.msra.mxu1 %v6961_v13  ;;  %7039 = vmatprep.mubr.bf16.mxu1 %v12664_v39  ;;  %v6955_v16 = vsel %vm12992_vm12, %v6947_v62, 0  ;;  %vm12993_vm5 = vmmov %vm12979_vm4  ;;  %v8008_v62 = vld [vmem:[%s11829_s15 + $0x20] sm:$0xf] }
 0xc4d   :  { %7990 = vmatmul.mubr.msk.bf16.vlgmr.msra.gmra.mxu0 %vm12991_vm8, %v7988_v9  ;;  %8001 = vmatprep.subr.msk.bf16.mxu1 %vm12993_vm5, %v7078_v14  ;;  %vm12996_vm4 = vmmov %vm12990_vm1  ;;  %v8003_v9 = vld [vmem:[%s11829_s15 + $0x1c] sm:$0xf]  ;;  %s8742_s15 = smov [#allocation2]  }
 0xc4e   :  { %6981 = vmatpush1.bf16.msra.mxu0 %v6955_v16  ;;  %6998 = vmatprep.mubr.bf16.mxu0 %v12664_v39  ;;  %v7189_v19 = vsel %vm12996_vm4, %v8650_v48, %v8654_v2  ;;  %vm12997_vm0 = vmmov %vm12993_vm5  ;;  %vm13013_vm4 = vnez %v13012_v30  ;;  %s7456_s9 = sshll.u32 %s8742_s15, 4  ;;  %s7457_s9 = int_to_ptr.vmem [resolvable:$true] %s7456_s9 }
 0xc4f   :  { %7999 = vmatprep.subr.msk.bf16.mxu0 %vm12997_vm0, %v7076_v35  ;;  %vm13000_vm11 = vmmov %vm12990_vm1  ;;  %v7198_v11 = vsel %vm13002_vm3, %v7189_v19, 0.0  ;;  %vm13019_vm3 = vnez %v13018_v32  ;;  %s8710_s28 = scalar_lea.vmem %s7457_s9, 512  ;;  %p8715_p1 = scmp.lt.s32.totalorder %s7457_s9, %s7457_s9 }
 0xc50   :  { %v7190_v28 = vsel %vm13000_vm11, %v8654_v2, %v8655_v44  ;;  %vm13003_vm6 = vmmov %vm12990_vm1  ;;  %vm13007_vm1 = vnez %v13006_v12  ;;  %v7204_v6 = vpack.c.bf16 %v7198_v11, %v7198_v11  ;;  %p8711_p0 = scmp.ne.s32.totalorder %s7457_s9, %s8710_s28  ;;  %p8716_p2 = scmp.lt.s32.totalorder %s8710_s28, %s8710_s28 }
 0xc51   :  { %v7188_v20 = vsel %vm13003_vm6, %v8649_v57, %v8650_v48  ;;  %vm13004_vm10 = vmmov %vm12991_vm8  ;;  %v7199_v5 = vsel %vm13007_vm1, %v7190_v28, 0.0  ;;  %vm13008_vm8 = vcmask 908288  }
 0xc52   :  { %vm13005_vm14 = vmmov %vm12997_vm0  ;;  %v7324_v3 = vsel %vm13008_vm8, %v8665_v34, %v8659_v59  ;;  %v7197_v45 = vsel %vm13013_vm4, %v7188_v20, 0.0  ;;  %v7205_v7 = vpack.c.bf16 %v7199_v5, %v7199_v5  ;;  %p8717_p3 = por %p8716_p2, %p8715_p1 }
 0xc53   :  { %7997 = vmatmul.mubr.msk.bf16.vlgmr.msra.gmra.mxu1 %vm13004_vm10, %v7993_v40  ;;  %v7089_v43 = vsel %vm13005_vm14, %v7077_v50, 0  ;;  %vm13009_vm12 = vmmov %vm13004_vm10  ;;  %v7328_v10 = vsel %vm12900_vm15, %v7324_v3, 0.0  ;;  %v7203_v27 = vpack.c.bf16 %v7197_v45, %v7197_v45 }
 0xc54   :  { %7150 = vmatpush1.bf16.msra.mxu1 %v7089_v43  ;;  %7167 = vmatprep.mubr.bf16.mxu1 %v12664_v39  ;;  %vm13010_vm5 = vmmov %vm12997_vm0  ;;  %v7334_v46 = vpack.c.bf16 %v7328_v10, %v7328_v10  ;;  %p8718_p4 = pnand %p8717_p3, %p8711_p0 }
 0xc55   :  { %7995 = vmatmul.mubr.msk.bf16.vlgmr.msra.gmra.mxu0 %vm13009_vm12, %v7993_v40  ;;  %v7083_v33 = vsel %vm13010_vm5, %v7075_v60, 0  ;;  %vm13011_vm2 = vmmov %vm12997_vm0 }
 0xc56   :  { %8006 = vmatprep.subr.msk.bf16.mxu1 %vm13011_vm2, %v7206_v56  ;;  %7109 = vmatpush1.bf16.msra.mxu0 %v7083_v33  ;;  %vm13014_vm0 = vmmov %vm13008_vm8 }
 0xc57   :  { %7126 = vmatprep.mubr.bf16.mxu0 %v12664_v39  ;;  %v7317_v29 = vsel %vm13014_vm0, %v8660_v21, %v8664_v49  ;;  %vm13015_vm7 = vmmov %vm13011_vm2 }
 0xc58   :  { %8004 = vmatprep.subr.msk.bf16.mxu0 %vm13015_vm7, %v7204_v6  ;;  %vm13017_vm11 = vmmov %vm13014_vm0  ;;  %v7326_v1 = vsel %vm13019_vm3, %v7317_v29, 0.0 }
 0xc59   :  { %v7318_v47 = vsel %vm13017_vm11, %v8664_v49, %v8665_v34  ;;  %vm13020_vm6 = vmmov %vm13014_vm0  ;;  %v7332_v0 = vpack.c.bf16 %v7326_v1, %v7326_v1 }
 0xc5a   :  { %v7316_v18 = vsel %vm13020_vm6, %v8659_v59, %v8660_v21  ;;  %vm13021_vm14 = vmmov %vm13011_vm2  ;;  %v7327_v8 = vsel %vm12908_vm9, %v7318_v47, 0.0 }
 0xc5b   :  { %8002 = vmatmul.mubr.msk.bf16.vlgmr.msra.gmra.mxu1 %vm13004_vm10, %v7998_v23  ;;  %v7217_v53 = vsel %vm13021_vm14, %v7205_v7, 0  ;;  %vm13023_vm15 = vmmov %vm13004_vm10  ;;  %v7325_v17 = vsel %vm12903_vm13, %v7316_v18, 0.0  ;;  %v7333_v51 = vpack.c.bf16 %v7327_v8, %v7327_v8 }
 0xc5c   :  { %7278 = vmatpush1.bf16.msra.mxu1 %v7217_v53  ;;  %7295 = vmatprep.mubr.bf16.mxu1 %v12664_v39  ;;  %vm13024_vm1 = vmmov %vm13011_vm2  ;;  %v7331_v42 = vpack.c.bf16 %v7325_v17, %v7325_v17 }
 0xc5d   :  { %8000 = vmatmul.mubr.msk.bf16.vlgmr.msra.gmra.mxu0 %vm13023_vm15, %v7998_v23  ;;  %v7211_v55 = vsel %vm13024_vm1, %v7203_v27, 0  ;;  %vm13025_vm8 = vmmov %vm13024_vm1 }
 0xc5e   :  { %8011 = vmatprep.subr.msk.bf16.mxu1 %vm13025_vm8, %v7334_v46  ;;  %7237 = vmatpush1.bf16.msra.mxu0 %v7211_v55  ;;  %vm13027_vm12 = vmmov %vm13024_vm1 }
 0xc5f   :  { %7254 = vmatprep.mubr.bf16.mxu0 %v12664_v39  ;;  %8009 = vmatprep.subr.msk.bf16.mxu0 %vm13027_vm12, %v7332_v0  ;;  %vm13028_vm9 = vmmov %vm13004_vm10 }
 0xc60   :  { %vm13029_vm5 = vmmov %vm13024_vm1 }
 0xc61   :  { %v7345_v44 = vsel %vm13029_vm5, %v7333_v51, 0  ;;  %vm13030_vm2 = vmmov %vm13028_vm9 }
 0xc62   :  { %vm13031_vm4 = vmmov %vm13024_vm1 }
 0xc63   :  { %8007 = vmatmul.mubr.msk.bf16.vlgmr.msra.gmra.mxu1 %vm13028_vm9, %v8003_v9  ;;  %v7339_v57 = vsel %vm13031_vm4, %v7331_v42, 0  ;;  %vm13032_vm13 = vmmov %vm13030_vm2 }
 0xc64   :  { %7406 = vmatpush1.bf16.msra.mxu1 %v7345_v44  ;;  %7423 = vmatprep.mubr.bf16.mxu1 %v12664_v39  ;;  %vm13033_vm0 = vmmov %vm13030_vm2 }
 0xc65   :  { %8005 = vmatmul.mubr.msk.bf16.vlgmr.msra.gmra.mxu0 %vm13030_vm2, %v8003_v9 }
 0xc66   :  { %7365 = vmatpush1.bf16.msra.mxu0 %v7339_v57  ;;  %7382 = vmatprep.mubr.bf16.mxu0 %v12664_v39 }
 0xc6b   :  { %8012 = vmatmul.mubr.msk.bf16.vlgmr.msra.gmra.mxu1 %vm13032_vm13, %v8008_v62 }
 0xc6d   :  { %8010 = vmatmul.mubr.msk.bf16.vlgmr.msra.gmra.mxu0 %vm13033_vm0, %v8008_v62 }
 0xcea   :  { %v6457_v26 = vpop.f32.mrf.mxu1 }
 0xcec   :  { %v6416_v31 = vpop.f32.mrf.mxu0  ;;  %v6459_v36 = vpop.f32.mrf.mxu1 }
 0xcee   :  { %v6418_v2 = vpop.f32.mrf.mxu0  ;;  %v6461_v48 = vpop.f32.mrf.mxu1 }
 0xcf0   :  { %v6420_v13 = vpop.f32.mrf.mxu0  ;;  %v6462_v14 = vpop.f32.mrf.mxu1 }
 0xcf2   :  { %v6421_v37 = vpop.f32.mrf.mxu0 }
 0xcf3   :  { %v6554_v24 = vpop.f32.mrf.mxu1 }
 0xcf4   :  { %v6555_v46 = vadd.f32 %v6554_v24, %v6457_v26 }
 0xcf5   :  { %v6513_v4 = vpop.f32.mrf.mxu0  ;;  %v6556_v16 = vpop.f32.mrf.mxu1 }
 0xcf6   :  { %v6514_v55 = vadd.f32 %v6513_v4, %v6416_v31  ;;  %v6557_v0 = vadd.f32 %v6556_v16, %v6459_v36 }
 0xcf7   :  { %v6515_v39 = vpop.f32.mrf.mxu0  ;;  %v6558_v35 = vpop.f32.mrf.mxu1 }
 0xcf8   :  { %v6516_v9 = vadd.f32 %v6515_v39, %v6418_v2 }
 0xcf9   :  { %v6517_v63 = vpop.f32.mrf.mxu0  ;;  %v6559_v54 = vpop.f32.mrf.mxu1 }
 0xcfb   :  { %v6518_v41 = vpop.f32.mrf.mxu0  ;;  %v6678_v61 = vpop.f32.mrf.mxu1 }
 0xcfc   :  { %v6687_v22 = vadd.f32 %v6678_v61, %v6555_v46 }
 0xcfd   :  { %v6637_v19 = vpop.f32.mrf.mxu0  ;;  %v6680_v50 = vpop.f32.mrf.mxu1 }
 0xcfe   :  { %v6685_v42 = vadd.f32 %v6637_v19, %v6514_v55  ;;  %v6688_v44 = vadd.f32 %v6680_v50, %v6557_v0 }
 0xcff   :  { %v6639_v15 = vpop.f32.mrf.mxu0  ;;  %v6682_v38 = vpop.f32.mrf.mxu1 }
 0xd00   :  { %v6686_v13 = vadd.f32 %v6639_v15, %v6516_v9 }
 0xd01   :  { %v6641_v40 = vpop.f32.mrf.mxu0  ;;  %v6683_v28 = vpop.f32.mrf.mxu1 }
 0xd03   :  { %v6642_v34 = vpop.f32.mrf.mxu0  ;;  %v6806_v59 = vpop.f32.mrf.mxu1 }
 0xd04   :  { %v6815_v57 = vadd.f32 %v6806_v59, %v6687_v22 }
 0xd05   :  { %v6765_v60 = vpop.f32.mrf.mxu0  ;;  %v6808_v52 = vpop.f32.mrf.mxu1 }
 0xd06   :  { %v6813_v14 = vadd.f32 %v6765_v60, %v6685_v42  ;;  %v6816_v37 = vadd.f32 %v6808_v52, %v6688_v44  ;;  %v7440_v60 = vpop.permute.xlu0 %7439 }
 0xd07   :  { %v6767_v11 = vpop.f32.mrf.mxu0  ;;  %v6810_v20 = vpop.f32.mrf.mxu1 }
 0xd08   :  { %v6814_v26 = vadd.f32 %v6767_v11, %v6686_v13 }
 0xd09   :  { %v6769_v49 = vpop.f32.mrf.mxu0  ;;  %v6811_v21 = vpop.f32.mrf.mxu1 }
 0xd0b   :  { %v6770_v43 = vpop.f32.mrf.mxu0  ;;  %v6913_v56 = vpop.f32.mrf.mxu1 }
 0xd0c   :  { %v6922_v35 = vadd.f32 %v6913_v56, %v6815_v57 }
 0xd0d   :  { %v6872_v12 = vpop.f32.mrf.mxu0  ;;  %v6915_v5 = vpop.f32.mrf.mxu1 }
 0xd0e   :  { %v6920_v24 = vadd.f32 %v6872_v12, %v6813_v14  ;;  %v6923_v41 = vadd.f32 %v6915_v5, %v6816_v37 }
 0xd0f   :  { %v6874_v3 = vpop.f32.mrf.mxu0  ;;  %v6917_v33 = vpop.f32.mrf.mxu1 }
 0xd10   :  { %v6921_v16 = vadd.f32 %v6874_v3, %v6814_v26 }
 0xd11   :  { %v6876_v6 = vpop.f32.mrf.mxu0  ;;  %v6918_v30 = vpop.f32.mrf.mxu1 }
 0xd13   :  { %v6877_v45 = vpop.f32.mrf.mxu0  ;;  %v7041_v29 = vpop.f32.mrf.mxu1 }
 0xd14   :  { %v7050_v31 = vadd.f32 %v7041_v29, %v6922_v35 }
 0xd15   :  { %v7000_v7 = vpop.f32.mrf.mxu0  ;;  %v7043_v58 = vpop.f32.mrf.mxu1 }
 0xd16   :  { %v7048_v61 = vadd.f32 %v7000_v7, %v6920_v24  ;;  %v7051_v2 = vadd.f32 %v7043_v58, %v6923_v41 }
 0xd17   :  { %v7002_v10 = vpop.f32.mrf.mxu0  ;;  %v7045_v23 = vpop.f32.mrf.mxu1 }
 0xd18   :  { %v7049_v38 = vadd.f32 %v7002_v10, %v6921_v16 }
 0xd19   :  { %v7004_v47 = vpop.f32.mrf.mxu0  ;;  %v7046_v27 = vpop.f32.mrf.mxu1 }
 0xd1b   :  { %v7005_v32 = vpop.f32.mrf.mxu0  ;;  %v7169_v1 = vpop.f32.mrf.mxu1 }
 0xd1c   :  { %v7178_v39 = vadd.f32 %v7169_v1, %v7050_v31 }
 0xd1d   :  { %v7128_v18 = vpop.f32.mrf.mxu0  ;;  %v7171_v53 = vpop.f32.mrf.mxu1 }
 0xd1e   :  { %v7176_v40 = vadd.f32 %v7128_v18, %v7048_v61  ;;  %v7179_v15 = vadd.f32 %v7171_v53, %v7051_v2 }
 0xd1f   :  { %v7130_v25 = vpop.f32.mrf.mxu0  ;;  %v7173_v8 = vpop.f32.mrf.mxu1 }
 0xd20   :  { %v7177_v52 = vadd.f32 %v7130_v25, %v7049_v38 }
 0xd21   :  { %v7132_v17 = vpop.f32.mrf.mxu0  ;;  %v7174_v51 = vpop.f32.mrf.mxu1 }
 0xd23   :  { %v7133_v62 = vpop.f32.mrf.mxu0  ;;  %v7297_v48 = vpop.f32.mrf.mxu1 }
 0xd24   :  { %v7306_v28 = vadd.f32 %v7297_v48, %v7178_v39 }
 0xd25   :  { %v7256_v63 = vpop.f32.mrf.mxu0  ;;  %v7299_v54 = vpop.f32.mrf.mxu1 }
 0xd26   :  { %v7304_v11 = vadd.f32 %v7256_v63, %v7176_v40  ;;  %v7307_v20 = vadd.f32 %v7299_v54, %v7179_v15 }
 0xd27   :  { %v7258_v36 = vpop.f32.mrf.mxu0  ;;  %v7301_v4 = vpop.f32.mrf.mxu1 }
 0xd28   :  { %v7305_v56 = vadd.f32 %v7258_v36, %v7177_v52 }
 0xd29   :  { %v7260_v19 = vpop.f32.mrf.mxu0  ;;  %v7302_v50 = vpop.f32.mrf.mxu1 }
 0xd2b   :  { %v7261_v34 = vpop.f32.mrf.mxu0  ;;  %v7425_v59 = vpop.f32.mrf.mxu1 }
 0xd2c   :  { %v7434_v49 = vadd.f32 %v7425_v59, %v7306_v28 }
 0xd2d   :  { %v7384_v21 = vpop.f32.mrf.mxu0  ;;  %v7427_v43 = vpop.f32.mrf.mxu1 }
 0xd2e   :  { %v7432_v12 = vadd.f32 %v7384_v21, %v7304_v11  ;;  %v7444_v5 = vadd.f32 %v7440_v60, %v7434_v49  ;;  %v7435_v3 = vadd.f32 %v7427_v43, %v7307_v20 }
 0xd2f   :  { %v7386_v33 = vpop.f32.mrf.mxu0  ;;  %v7429_v6 = vpop.f32.mrf.mxu1 }
 0xd30   :  { %v7442_v30 = vadd.f32 %v7440_v60, %v7432_v12  ;;  %7448 = vst [vmem:[#allocation2 + $0x10] sm:$0xff] %v7444_v5  ;;  %v7433_v45 = vadd.f32 %v7386_v33, %v7305_v56  ;;  %v7445_v29 = vadd.f32 %v7440_v60, %v7435_v3 }
 0xd31   :  { %v7388_v7 = vpop.f32.mrf.mxu0  ;;  %v7430_v58 = vpop.f32.mrf.mxu1 }
 0xd32   :  { %7446 = vst [vmem:[#allocation2] sm:$0xff] %v7442_v30  ;;  %v7443_v10 = vadd.f32 %v7440_v60, %v7433_v45  ;;  %7449 = vst [vmem:[#allocation2 + $0x18] sm:$0xff] %v7445_v29 }
 0xd33   :  { %v7389_v23 = vpop.f32.mrf.mxu0 }
 0xd34   :  { %7447 = vst [vmem:[#allocation2 + $0x8] sm:$0xff] %v7443_v10 }
 0xd35   :  { %8721 = shalt.err (!%p8718_p4)
}
 0xd36   :  { %7459 = dma.vmem_to_hbm [thread:$0]  %s7457_s9, 512, %s11831_s17, [#allocation3]  }
 0xd37   :  { %8730 = dma.done.wait [#allocation3], 512  }
 0xd38   :  { %8731 = vsyncadd [#allocation3], 4294966784 }
 0xd39   :  { %7463 = vsyncpa [#allocation3], 1 }

</bundles_post_ra>
